<compile_context>
chip_gen: v6e
topology: v6e:2x2x1
jax: 0.10.0
libtpu: 0.0.40
codegen_flags: <defaults>
</compile_context>

<pallas_src>
import functools

import jax
import jax.numpy as jnp
from jax import lax
from jax.experimental import pallas as pl
from jax.experimental.pallas import tpu as pltpu


# ----------------------------------------------------------------------------
# Pallas kernel: one (Cout, TM) lane-dense output tile of a 'same' conv
# ----------------------------------------------------------------------------
def _fake_quant(y, alpha, k_bits):
    """PAMS activation fake-quant.  At k_bits >= 16 rounding is an fp32 no-op."""
    y = jnp.clip(y, -alpha, alpha)
    if k_bits < 16:
        q = (2.0 ** (k_bits - 1)) - 1.0
        y = jnp.round(y * (q / alpha)) * (alpha / q)
    return y


def _conv_tap_kernel(xl_ref, xm_ref, xr_ref, w_ref, sh_ref, m_ref, *rest,
                     ksz, wp, tm, prelu_a, clamp_alpha, k_bits, resid_clamp,
                     has_resid):
    """Direct conv on the flat padded grid.

    refs: x left/centre/right halo tiles (Cin, TM) bf16, taps (K2, Cout, Cin)
    bf16 (per-channel scale folded in), shift (Cout, 1) f32, interior mask
    (1, TM) bf16, [residual (Cout, TM) bf16], out (Cout, TM) bf16.
    """
    if has_resid:
        r_ref, o_ref = rest
    else:
        (o_ref,) = rest
        r_ref = None

    # 3*TM halo window; the centre TM columns are this tile's output positions.
    win = jnp.concatenate([xl_ref[...], xm_ref[...], xr_ref[...]], axis=1)

    p = ksz // 2
    acc = None
    # TODO(synk): group taps of one kernel row into a single K=ksz*Cin GEMM if
    # MXU issue rate ever becomes the bottleneck (currently HBM-bound).
    for kh in range(ksz):
        for kw in range(ksz):
            s = (kh - p) * wp + (kw - p)                  # constant flat shift
            xs = win[:, tm + s:2 * tm + s]                # (Cin, TM), static slice
            d = jnp.dot(w_ref[kh * ksz + kw], xs,
                        preferred_element_type=jnp.float32)
            acc = d if acc is None else acc + d

    y = acc + sh_ref[...]                                 # folded bias / BN shift
    if prelu_a is not None:                               # nn.PReLU (scalar weight)
        y = jnp.where(y >= 0.0, y, prelu_a * y)
    if clamp_alpha is not None:                           # quant_act_pams on output
        y = _fake_quant(y, clamp_alpha, k_bits)
    if has_resid:
        r = r_ref[...].astype(jnp.float32)
        if resid_clamp is not None:                       # quant_act_pams on shortcut
            r = _fake_quant(r, resid_clamp, k_bits)
        y = y + r
    # Interior mask keeps the zero frame exact -> output is pre-padded for the
    # next conv (no JAX-level re-pad between layers).
    o_ref[...] = (y * m_ref[...].astype(jnp.float32)).astype(o_ref.dtype)


# ----------------------------------------------------------------------------
# Flat padded-grid layout helpers
# ----------------------------------------------------------------------------
def _round_up(x, m):
    return ((x + m - 1) // m) * m


def make_grid_geom(n, h, w, *, pad=4, target_tm=2048):
    """Shared layout for all activations at one resolution."""
    hp, wp = h + 2 * pad, w + 2 * pad
    mraw = n * hp * wp
    halo = pad * (wp + 1)                      # largest |flat shift| of any tap
    lo = max(128, _round_up(halo, 128))
    # Big lane-dense tiles, padded up to a TM multiple, but >= 2 "real" tiles
    # (plus 2 pad tiles) so the parallel grid feeds both v7x TensorCores.
    tm = max(lo, min(target_tm, _round_up(max(1, -(-mraw // 2)), 128)))
    mtot = tm + _round_up(mraw, tm) + tm       # front pad = TM, back pad >= TM
    idx = jnp.arange(mtot)
    lin = idx - tm
    in_img = (lin >= 0) & (lin < mraw)
    q = jnp.where(in_img, lin, 0) % (hp * wp)
    hh, ww = q // wp, q % wp
    interior = in_img & (hh >= pad) & (hh < pad + h) & (ww >= pad) & (ww < pad + w)
    mask = interior.astype(jnp.bfloat16).reshape(1, mtot)
    return {"n": n, "h": h, "w": w, "pad": pad, "hp": hp, "wp": wp,
            "mraw": mraw, "tm": tm, "mtot": mtot, "mask": mask}


def to_grid(x_cfirst, geom):
    """(C, N, H, W) -> (C, Mtot) bf16 on the shared padded-grid layout."""
    c = x_cfirst.shape[0]
    pad = geom["pad"]
    xp = jnp.pad(x_cfirst, ((0, 0), (0, 0), (pad, pad), (pad, pad)))
    flat = xp.reshape(c, geom["mraw"])
    flat = jnp.pad(flat, ((0, 0), (geom["tm"],
                                   geom["mtot"] - geom["tm"] - geom["mraw"])))
    return flat.astype(jnp.bfloat16)


def from_grid(a_flat, geom, dtype=jnp.float32):
    """(C, Mtot) -> (C, N, H, W)."""
    c = a_flat.shape[0]
    pad = geom["pad"]
    t = a_flat[:, geom["tm"]:geom["tm"] + geom["mraw"]]
    t = t.reshape(c, geom["n"], geom["hp"], geom["wp"])
    return t[:, :, pad:pad + geom["h"], pad:pad + geom["w"]].astype(dtype)


def pixel_shuffle_cfirst(x, r):
    """nn.PixelShuffle(r) on channel-first (C*r*r, N, H, W) maps."""
    cr2, n, h, w = x.shape
    c = cr2 // (r * r)
    x = x.reshape(c, r, r, n, h, w)
    x = jnp.transpose(x, (0, 3, 4, 1, 5, 2))   # (C, N, H, r, W, r)
    return x.reshape(c, n, h * r, w * r)


# ----------------------------------------------------------------------------
# Conv wrapper: one pallas_call per conv, fused epilogue
# ----------------------------------------------------------------------------
def conv2d_grid(x_flat, w_taps, shift, geom, *, ksz, prelu_a=None,
                clamp_alpha=None, k_bits=32, residual=None, resid_clamp=None):
    """'same' conv (stride 1) + fused epilogue on the shared padded grid."""
    cin, mtot = x_flat.shape
    k2, cout, cin_w = w_taps.shape
    assert cin_w == cin and k2 == ksz * ksz and mtot == geom["mtot"]
    tm, wp = geom["tm"], geom["wp"]
    nblk = mtot // tm
    halo = (ksz // 2) * (wp + 1)
    assert halo <= tm and nblk >= 3 and mtot % tm == 0

    in_specs = [
        pl.BlockSpec((cin, tm), lambda i: (0, jnp.maximum(i - 1, 0))),        # left halo
        pl.BlockSpec((cin, tm), lambda i: (0, i)),                            # centre
        pl.BlockSpec((cin, tm), lambda i: (0, jnp.minimum(i + 1, nblk - 1))), # right halo
        pl.BlockSpec((k2, cout, cin), lambda i: (0, 0, 0)),                   # weights (resident)
        pl.BlockSpec((cout, 1), lambda i: (0, 0)),                            # shift (resident)
        pl.BlockSpec((1, tm), lambda i: (0, i)),                              # interior mask
    ]
    args = [x_flat, x_flat, x_flat, w_taps, shift, geom["mask"]]
    has_resid = residual is not None
    if has_resid:
        in_specs.append(pl.BlockSpec((cout, tm), lambda i: (0, i)))
        args.append(residual)

    kernel = functools.partial(
        _conv_tap_kernel, ksz=ksz, wp=wp, tm=tm,
        prelu_a=None if prelu_a is None else float(prelu_a),
        clamp_alpha=None if clamp_alpha is None else float(clamp_alpha),
        k_bits=int(k_bits),
        resid_clamp=None if resid_clamp is None else float(resid_clamp),
        has_resid=has_resid)

    # Explicit VMEM budget (v5e defaults to ~16 MiB scoped): double-buffered
    # streaming tiles + resident weights + in-kernel window/accumulator temps.
    tile_bytes = tm * 2 * (3 * cin + cout + 1 + (cout if has_resid else 0))
    est = 2 * tile_bytes + k2 * 32 * 128 * 2 + 3 * cin * tm * 2 + cout * tm * 4
    vlim = int(min(max(est + (16 << 20), 32 << 20), 96 << 20))

    # TODO(synk): for very large images, tile spatially with manual halo DMA
    # (memory_space=pl.ANY + make_async_copy) instead of full-row flat tiles.
    return pl.pallas_call(
        kernel,
        out_shape=jax.ShapeDtypeStruct((cout, mtot), jnp.bfloat16),
        grid_spec=pltpu.PrefetchScalarGridSpec(
            num_scalar_prefetch=0,
            grid=(nblk,),
            in_specs=in_specs,
            out_specs=pl.BlockSpec((cout, tm), lambda i: (0, i)),
        ),
        compiler_params=pltpu.CompilerParams(
            dimension_semantics=("parallel",),
            vmem_limit_bytes=vlim),
    )(*args)


# ----------------------------------------------------------------------------
# Deterministic parameter init + one-time folding into kernel-friendly form
# ----------------------------------------------------------------------------
def init_params(key, *, n_colors=3, n_feats=8, n_resblocks=2):
    keys = iter(jax.random.split(key, 64))

    def conv_w(cout, cin, k):
        fan_in = cin * k * k
        return jax.random.normal(next(keys), (cout, cin, k, k), jnp.float32) / jnp.sqrt(fan_in)

    def bn(c):
        gamma = 1.0 + 0.1 * jax.random.normal(next(keys), (c,), jnp.float32)
        beta = 0.1 * jax.random.normal(next(keys), (c,), jnp.float32)
        mean = 0.1 * jax.random.normal(next(keys), (c,), jnp.float32)
        var = 1.0 + 0.1 * jax.random.uniform(next(keys), (c,), jnp.float32)
        s = gamma / jnp.sqrt(var + 1e-5)           # eval-mode BN folded to affine
        return s, beta - mean * s

    p = {"n_colors": n_colors, "n_feats": n_feats,
         "head_w": conv_w(n_feats, n_colors, 9),       # conv9x9, bias=False
         "blocks": [],
         "body_tail_w": conv_w(n_feats, n_feats, 3),   # conv3x3, bias=False
         "body_tail_bn": bn(n_feats),
         "up_w": conv_w(4 * n_feats, n_feats, 3),      # Upsampler conv3x3, bias=True
         "up_b": 0.01 * jax.random.normal(next(keys), (4 * n_feats,), jnp.float32),
         "tail_w": conv_w(n_colors, n_feats, 9),       # conv9x9, bias=False
         "prelu_shared": 0.25,                         # shared nn.PReLU (head + blocks)
         "prelu_tail": 0.25}                           # Upsampler_srresnet's nn.PReLU
    for _ in range(n_resblocks):
        p["blocks"].append({"w1": conv_w(n_feats, n_feats, 3),
                            "w2": conv_w(n_feats, n_feats, 3),
                            "bn1": bn(n_feats), "bn2": bn(n_feats),
                            "alpha1": 10.0, "alpha2": 10.0})   # PAMS default alphas
    return p


def _prep_conv(w_oihw, bn=None, bias=None, out_mul=1.0):
    """Fold conv bias / BN affine / res_scale; weights -> (K2, Cout, Cin) bf16."""
    cout, cin, kh, kw = w_oihw.shape
    if bn is None:
        s = jnp.ones((cout,), jnp.float32)
        t = jnp.zeros((cout,), jnp.float32)
    else:
        s, t = bn
    if bias is not None:
        t = t + s * bias                               # (acc + b)*s + t = acc*s + (s*b + t)
    s = s * float(out_mul)
    t = t * float(out_mul)
    w_taps = (w_oihw * s[:, None, None, None]).transpose(2, 3, 0, 1).reshape(kh * kw, cout, cin)
    return w_taps.astype(jnp.bfloat16), t.reshape(cout, 1).astype(jnp.float32)


def prepare_params(raw, *, res_scale=1.0):
    def pack(w, bn=None, bias=None, out_mul=1.0):
        wf, sh = _prep_conv(w, bn=bn, bias=bias, out_mul=out_mul)
        return {"w": wf, "shift": sh}

    p = {"head": pack(raw["head_w"]),
         "body_tail": pack(raw["body_tail_w"], bn=raw["body_tail_bn"]),
         "up": pack(raw["up_w"], bias=raw["up_b"]),
         "tail": pack(raw["tail_w"]),
         "blocks": [],
         "prelu_shared": float(raw["prelu_shared"]),
         "prelu_tail": float(raw["prelu_tail"])}
    for blk in raw["blocks"]:
        c1 = pack(blk["w1"], bn=blk["bn1"])
        c2 = pack(blk["w2"], bn=blk["bn2"], out_mul=res_scale)
        p["blocks"].append({"w1": c1["w"], "sh1": c1["shift"],
                            "w2": c2["w"], "sh2": c2["shift"],
                            "alpha1": float(blk["alpha1"]),
                            "alpha2": float(blk["alpha2"])})
    return p


# ----------------------------------------------------------------------------
# Forward pass (mirrors SRResNet_PAMS.forward with fully=False, loss_kdf=False)
# ----------------------------------------------------------------------------
def srresnet_pams_forward(x_nchw, params, *, k_bits=32, scale=2, target_tm=2048):
    n, _, h, w = x_nchw.shape
    a = params["prelu_shared"]
    g_lr = make_grid_geom(n, h, w, pad=4, target_tm=target_tm)
    g_hr = make_grid_geom(n, h * scale, w * scale, pad=4, target_tm=target_tm)

    x = to_grid(jnp.transpose(x_nchw, (1, 0, 2, 3)).astype(jnp.float32), g_lr)

    # head: conv9x9 -> PReLU (fused)
    x = conv2d_grid(x, params["head"]["w"], params["head"]["shift"], g_lr, ksz=9, prelu_a=a)
    head_out = x

    # body: ResBlock_PAMS x n_resblocks
    for blk in params["blocks"]:
        # conv1 -> bn1 -> PReLU -> quant_act2, fused
        r = conv2d_grid(x, blk["w1"], blk["sh1"], g_lr, ksz=3, prelu_a=a,
                        clamp_alpha=blk["alpha2"], k_bits=k_bits)
        # conv2 -> bn2 * res_scale -> + quant_act1(shortcut(x)), fused
        x = conv2d_grid(r, blk["w2"], blk["sh2"], g_lr, ksz=3,
                        residual=x, resid_clamp=blk["alpha1"], k_bits=k_bits)

    # body tail: conv3x3 -> BN, then `res += x` (skip from head), fused
    res = conv2d_grid(x, params["body_tail"]["w"], params["body_tail"]["shift"], g_lr,
                      ksz=3, residual=head_out)
    out_feat = from_grid(res, g_lr)

    # tail: Upsampler_srresnet (conv3x3+bias -> PixelShuffle(2) -> PReLU) -> conv9x9.
    # Scalar PReLU commutes with PixelShuffle, so it is fused into the up-conv.
    u = conv2d_grid(res, params["up"]["w"], params["up"]["shift"], g_lr, ksz=3,
                    prelu_a=params["prelu_tail"])
    # TODO(synk): fuse PixelShuffle into the up-conv output index_map (strided
    # scatter) to remove this bf16 re-layout round trip between pallas_calls.
    u_hr = pixel_shuffle_cfirst(from_grid(u, g_lr, dtype=jnp.bfloat16), scale)
    sr = conv2d_grid(to_grid(u_hr, g_hr), params["tail"]["w"], params["tail"]["shift"],
                     g_hr, ksz=9)
    sr = from_grid(sr, g_hr)

    sr = jnp.transpose(sr, (1, 0, 2, 3))
    out_feat = jnp.transpose(out_feat, (1, 0, 2, 3))
    return sr, out_feat, None          # loss_kdf=False -> f is None


# ----------------------------------------------------------------------------
# Pure-JAX fp32 reference (for validation only)
# ----------------------------------------------------------------------------
def reference_forward(x, raw, *, res_scale=1.0, scale=2):
    a, at = float(raw["prelu_shared"]), float(raw["prelu_tail"])
    prec = lax.Precision.HIGHEST

    def conv(v, wgt, b=None, pad=1):
        o = lax.conv_general_dilated(v, wgt, (1, 1), [(pad, pad), (pad, pad)],
                                     dimension_numbers=("NCHW", "OIHW", "NCHW"),
                                     precision=prec)
        return o if b is None else o + b[None, :, None, None]

    def bn(v, p):
        s, t = p
        return v * s[None, :, None, None] + t[None, :, None, None]

    def prelu(v, alpha):
        return jnp.where(v >= 0, v, alpha * v)

    def qa(v, alpha):                                   # k_bits=32 -> clamp only
        return jnp.clip(v, -alpha, alpha)

    h = prelu(conv(x, raw["head_w"], pad=4), a)
    cur = h
    for blk in raw["blocks"]:
        r = prelu(bn(conv(cur, blk["w1"], pad=1), blk["bn1"]), a)
        r = qa(r, blk["alpha2"])
        r = conv(r, blk["w2"], pad=1)
        r = bn(r, blk["bn2"]) * res_scale
        cur = r + qa(cur, blk["alpha1"])
    res = bn(conv(cur, raw["body_tail_w"], pad=1), raw["body_tail_bn"]) + h
    u = conv(res, raw["up_w"], raw["up_b"], pad=1)
    nn_, c4, hh, ww = u.shape
    c = c4 // (scale * scale)
    u = u.reshape(nn_, c, scale, scale, hh, ww).transpose(0, 1, 4, 2, 5, 3)
    u = u.reshape(nn_, c, hh * scale, ww * scale)
    u = prelu(u, at)
    sr = conv(u, raw["tail_w"], pad=4)
    return sr, res


# ----------------------------------------------------------------------------
if __name__ == "__main__":
    key = jax.random.PRNGKey(0)
    kp, kx = jax.random.split(key)

    N, C, H, W = 2, 3, 16, 16
    n_feats, n_resblocks, up_scale = 8, 2, 2

    raw = init_params(kp, n_colors=C, n_feats=n_feats, n_resblocks=n_resblocks)
    params = prepare_params(raw, res_scale=1.0)
    x = jax.random.normal(kx, (N, C, H, W), jnp.float32)

    sr, out_feat, f = srresnet_pams_forward(x, params, k_bits=32, scale=up_scale)
    sr = jax.block_until_ready(sr)
    out_feat = jax.block_until_ready(out_feat)

    assert sr.shape == (N, C, up_scale * H, up_scale * W), sr.shape
    assert out_feat.shape == (N, n_feats, H, W), out_feat.shape
    assert f is None
    assert bool(jnp.all(jnp.isfinite(sr))) and bool(jnp.all(jnp.isfinite(out_feat)))

    # Numerics check against the fp32 reference (tolerance covers bf16 operands).
    sr_ref, feat_ref = reference_forward(x, raw, res_scale=1.0, scale=up_scale)

    def _check(got, ref, name):
        err = float(jnp.max(jnp.abs(got - ref)))
        scl = float(jnp.max(jnp.abs(ref)))
        assert err <= 0.08 * scl + 0.05, f"{name}: max_err={err:.4f} ref_max={scl:.4f}"

    _check(sr, sr_ref, "sr")
    _check(out_feat, feat_ref, "out_feat")
    print("KERNEL_OK")
</pallas_src>

<mosaic_0001>
module attributes {stable_mosaic.version = 11 : i64} {
  func.func @_conv_tap_kernel(%arg0: i32, %arg1: memref<3x640xbf16, #tpu.memory_space<vmem>>, %arg2: memref<3x640xbf16, #tpu.memory_space<vmem>>, %arg3: memref<3x640xbf16, #tpu.memory_space<vmem>>, %arg4: memref<81x8x3xbf16, #tpu.memory_space<vmem>>, %arg5: memref<8x1xf32, #tpu.memory_space<vmem>>, %arg6: memref<1x640xbf16, #tpu.memory_space<vmem>>, %arg7: memref<8x640xbf16, #tpu.memory_space<vmem>>) attributes {dimension_semantics = [#tpu.dimension_semantics<parallel>], iteration_bounds = array<i64: 4>, scalar_prefetch = 0 : i64, scratch_operands = 0 : i64, tpu.core_type = #tpu.core_type<tc>, window_params = [{transform_indices = @transform_0, window_bounds = array<i64: 3, 640>}, {transform_indices = @transform_1, window_bounds = array<i64: 3, 640>}, {transform_indices = @transform_2, window_bounds = array<i64: 3, 640>}, {pipeline_mode = #tpu.pipeline_mode<synchronous>, transform_indices = @transform_3, window_bounds = array<i64: 81, 8, 3>}, {pipeline_mode = #tpu.pipeline_mode<synchronous>, transform_indices = @transform_4, window_bounds = array<i64: 8, 1>}, {transform_indices = @transform_5, window_bounds = array<i64: 1, 640>}, {transform_indices = @transform_6, window_bounds = array<i64: 8, 640>}]} {
    %c0 = arith.constant 0 : index
    %c0_0 = arith.constant 0 : index
    %0 = vector.load %arg1[%c0, %c0_0] : memref<3x640xbf16, #tpu.memory_space<vmem>>, vector<3x640xbf16>
    %c0_1 = arith.constant 0 : index
    %c0_2 = arith.constant 0 : index
    %1 = vector.load %arg2[%c0_1, %c0_2] : memref<3x640xbf16, #tpu.memory_space<vmem>>, vector<3x640xbf16>
    %c0_3 = arith.constant 0 : index
    %c0_4 = arith.constant 0 : index
    %2 = vector.load %arg3[%c0_3, %c0_4] : memref<3x640xbf16, #tpu.memory_space<vmem>>, vector<3x640xbf16>
    %3 = tpu.concatenate %0, %1, %2 in 1 : vector<3x640xbf16>, vector<3x640xbf16>, vector<3x640xbf16> -> vector<3x1920xbf16>
    %4 = vector.extract_strided_slice %3 {offsets = [0, 540], sizes = [3, 640], strides = [1, 1]} : vector<3x1920xbf16> to vector<3x640xbf16>
    %c0_5 = arith.constant 0 : index
    %c0_6 = arith.constant 0 : index
    %c0_7 = arith.constant 0 : index
    %5 = vector.load %arg4[%c0_5, %c0_6, %c0_7] : memref<81x8x3xbf16, #tpu.memory_space<vmem>>, vector<1x8x3xbf16>
    %6 = vector.shape_cast %5 : vector<1x8x3xbf16> to vector<8x3xbf16>
    %cst = arith.constant dense<0.000000e+00> : vector<8x640xf32>
    %7 = tpu.matmul %6, %4, %cst {dimension_numbers = #tpu.dot_dimension_numbers<[1], [0], [0], [1], [0, 0, 1, 1], [], []>} : vector<8x3xbf16>, vector<3x640xbf16>, vector<8x640xf32> -> vector<8x640xf32>
    %8 = vector.extract_strided_slice %3 {offsets = [0, 541], sizes = [3, 640], strides = [1, 1]} : vector<3x1920xbf16> to vector<3x640xbf16>
    %c1 = arith.constant 1 : index
    %c0_8 = arith.constant 0 : index
    %c0_9 = arith.constant 0 : index
    %9 = vector.load %arg4[%c1, %c0_8, %c0_9] : memref<81x8x3xbf16, #tpu.memory_space<vmem>>, vector<1x8x3xbf16>
    %10 = vector.shape_cast %9 : vector<1x8x3xbf16> to vector<8x3xbf16>
    %cst_10 = arith.constant dense<0.000000e+00> : vector<8x640xf32>
    %11 = tpu.matmul %10, %8, %cst_10 {dimension_numbers = #tpu.dot_dimension_numbers<[1], [0], [0], [1], [0, 0, 1, 1], [], []>} : vector<8x3xbf16>, vector<3x640xbf16>, vector<8x640xf32> -> vector<8x640xf32>
    %12 = arith.addf %7, %11 : vector<8x640xf32>
    %13 = vector.extract_strided_slice %3 {offsets = [0, 542], sizes = [3, 640], strides = [1, 1]} : vector<3x1920xbf16> to vector<3x640xbf16>
    %c2 = arith.constant 2 : index
    %c0_11 = arith.constant 0 : index
    %c0_12 = arith.constant 0 : index
    %14 = vector.load %arg4[%c2, %c0_11, %c0_12] : memref<81x8x3xbf16, #tpu.memory_space<vmem>>, vector<1x8x3xbf16>
    %15 = vector.shape_cast %14 : vector<1x8x3xbf16> to vector<8x3xbf16>
    %cst_13 = arith.constant dense<0.000000e+00> : vector<8x640xf32>
    %16 = tpu.matmul %15, %13, %cst_13 {dimension_numbers = #tpu.dot_dimension_numbers<[1], [0], [0], [1], [0, 0, 1, 1], [], []>} : vector<8x3xbf16>, vector<3x640xbf16>, vector<8x640xf32> -> vector<8x640xf32>
    %17 = arith.addf %12, %16 : vector<8x640xf32>
    %18 = vector.extract_strided_slice %3 {offsets = [0, 543], sizes = [3, 640], strides = [1, 1]} : vector<3x1920xbf16> to vector<3x640xbf16>
    %c3 = arith.constant 3 : index
    %c0_14 = arith.constant 0 : index
    %c0_15 = arith.constant 0 : index
    %19 = vector.load %arg4[%c3, %c0_14, %c0_15] : memref<81x8x3xbf16, #tpu.memory_space<vmem>>, vector<1x8x3xbf16>
    %20 = vector.shape_cast %19 : vector<1x8x3xbf16> to vector<8x3xbf16>
    %cst_16 = arith.constant dense<0.000000e+00> : vector<8x640xf32>
    %21 = tpu.matmul %20, %18, %cst_16 {dimension_numbers = #tpu.dot_dimension_numbers<[1], [0], [0], [1], [0, 0, 1, 1], [], []>} : vector<8x3xbf16>, vector<3x640xbf16>, vector<8x640xf32> -> vector<8x640xf32>
    %22 = arith.addf %17, %21 : vector<8x640xf32>
    %23 = vector.extract_strided_slice %3 {offsets = [0, 544], sizes = [3, 640], strides = [1, 1]} : vector<3x1920xbf16> to vector<3x640xbf16>
    %c4 = arith.constant 4 : index
    %c0_17 = arith.constant 0 : index
    %c0_18 = arith.constant 0 : index
    %24 = vector.load %arg4[%c4, %c0_17, %c0_18] : memref<81x8x3xbf16, #tpu.memory_space<vmem>>, vector<1x8x3xbf16>
    %25 = vector.shape_cast %24 : vector<1x8x3xbf16> to vector<8x3xbf16>
    %cst_19 = arith.constant dense<0.000000e+00> : vector<8x640xf32>
    %26 = tpu.matmul %25, %23, %cst_19 {dimension_numbers = #tpu.dot_dimension_numbers<[1], [0], [0], [1], [0, 0, 1, 1], [], []>} : vector<8x3xbf16>, vector<3x640xbf16>, vector<8x640xf32> -> vector<8x640xf32>
    %27 = arith.addf %22, %26 : vector<8x640xf32>
    %28 = vector.extract_strided_slice %3 {offsets = [0, 545], sizes = [3, 640], strides = [1, 1]} : vector<3x1920xbf16> to vector<3x640xbf16>
    %c5 = arith.constant 5 : index
    %c0_20 = arith.constant 0 : index
    %c0_21 = arith.constant 0 : index
    %29 = vector.load %arg4[%c5, %c0_20, %c0_21] : memref<81x8x3xbf16, #tpu.memory_space<vmem>>, vector<1x8x3xbf16>
    %30 = vector.shape_cast %29 : vector<1x8x3xbf16> to vector<8x3xbf16>
    %cst_22 = arith.constant dense<0.000000e+00> : vector<8x640xf32>
    %31 = tpu.matmul %30, %28, %cst_22 {dimension_numbers = #tpu.dot_dimension_numbers<[1], [0], [0], [1], [0, 0, 1, 1], [], []>} : vector<8x3xbf16>, vector<3x640xbf16>, vector<8x640xf32> -> vector<8x640xf32>
    %32 = arith.addf %27, %31 : vector<8x640xf32>
    %33 = vector.extract_strided_slice %3 {offsets = [0, 546], sizes = [3, 640], strides = [1, 1]} : vector<3x1920xbf16> to vector<3x640xbf16>
    %c6 = arith.constant 6 : index
    %c0_23 = arith.constant 0 : index
    %c0_24 = arith.constant 0 : index
    %34 = vector.load %arg4[%c6, %c0_23, %c0_24] : memref<81x8x3xbf16, #tpu.memory_space<vmem>>, vector<1x8x3xbf16>
    %35 = vector.shape_cast %34 : vector<1x8x3xbf16> to vector<8x3xbf16>
    %cst_25 = arith.constant dense<0.000000e+00> : vector<8x640xf32>
    %36 = tpu.matmul %35, %33, %cst_25 {dimension_numbers = #tpu.dot_dimension_numbers<[1], [0], [0], [1], [0, 0, 1, 1], [], []>} : vector<8x3xbf16>, vector<3x640xbf16>, vector<8x640xf32> -> vector<8x640xf32>
    %37 = arith.addf %32, %36 : vector<8x640xf32>
    %38 = vector.extract_strided_slice %3 {offsets = [0, 547], sizes = [3, 640], strides = [1, 1]} : vector<3x1920xbf16> to vector<3x640xbf16>
    %c7 = arith.constant 7 : index
    %c0_26 = arith.constant 0 : index
    %c0_27 = arith.constant 0 : index
    %39 = vector.load %arg4[%c7, %c0_26, %c0_27] : memref<81x8x3xbf16, #tpu.memory_space<vmem>>, vector<1x8x3xbf16>
    %40 = vector.shape_cast %39 : vector<1x8x3xbf16> to vector<8x3xbf16>
    %cst_28 = arith.constant dense<0.000000e+00> : vector<8x640xf32>
    %41 = tpu.matmul %40, %38, %cst_28 {dimension_numbers = #tpu.dot_dimension_numbers<[1], [0], [0], [1], [0, 0, 1, 1], [], []>} : vector<8x3xbf16>, vector<3x640xbf16>, vector<8x640xf32> -> vector<8x640xf32>
    %42 = arith.addf %37, %41 : vector<8x640xf32>
    %43 = vector.extract_strided_slice %3 {offsets = [0, 548], sizes = [3, 640], strides = [1, 1]} : vector<3x1920xbf16> to vector<3x640xbf16>
    %c8 = arith.constant 8 : index
    %c0_29 = arith.constant 0 : index
    %c0_30 = arith.constant 0 : index
    %44 = vector.load %arg4[%c8, %c0_29, %c0_30] : memref<81x8x3xbf16, #tpu.memory_space<vmem>>, vector<1x8x3xbf16>
    %45 = vector.shape_cast %44 : vector<1x8x3xbf16> to vector<8x3xbf16>
    %cst_31 = arith.constant dense<0.000000e+00> : vector<8x640xf32>
    %46 = tpu.matmul %45, %43, %cst_31 {dimension_numbers = #tpu.dot_dimension_numbers<[1], [0], [0], [1], [0, 0, 1, 1], [], []>} : vector<8x3xbf16>, vector<3x640xbf16>, vector<8x640xf32> -> vector<8x640xf32>
    %47 = arith.addf %42, %46 : vector<8x640xf32>
    %48 = vector.extract_strided_slice %3 {offsets = [0, 564], sizes = [3, 640], strides = [1, 1]} : vector<3x1920xbf16> to vector<3x640xbf16>
    %c9 = arith.constant 9 : index
    %c0_32 = arith.constant 0 : index
    %c0_33 = arith.constant 0 : index
    %49 = vector.load %arg4[%c9, %c0_32, %c0_33] : memref<81x8x3xbf16, #tpu.memory_space<vmem>>, vector<1x8x3xbf16>
    %50 = vector.shape_cast %49 : vector<1x8x3xbf16> to vector<8x3xbf16>
    %cst_34 = arith.constant dense<0.000000e+00> : vector<8x640xf32>
    %51 = tpu.matmul %50, %48, %cst_34 {dimension_numbers = #tpu.dot_dimension_numbers<[1], [0], [0], [1], [0, 0, 1, 1], [], []>} : vector<8x3xbf16>, vector<3x640xbf16>, vector<8x640xf32> -> vector<8x640xf32>
    %52 = arith.addf %47, %51 : vector<8x640xf32>
    %53 = vector.extract_strided_slice %3 {offsets = [0, 565], sizes = [3, 640], strides = [1, 1]} : vector<3x1920xbf16> to vector<3x640xbf16>
    %c10 = arith.constant 10 : index
    %c0_35 = arith.constant 0 : index
    %c0_36 = arith.constant 0 : index
    %54 = vector.load %arg4[%c10, %c0_35, %c0_36] : memref<81x8x3xbf16, #tpu.memory_space<vmem>>, vector<1x8x3xbf16>
    %55 = vector.shape_cast %54 : vector<1x8x3xbf16> to vector<8x3xbf16>
    %cst_37 = arith.constant dense<0.000000e+00> : vector<8x640xf32>
    %56 = tpu.matmul %55, %53, %cst_37 {dimension_numbers = #tpu.dot_dimension_numbers<[1], [0], [0], [1], [0, 0, 1, 1], [], []>} : vector<8x3xbf16>, vector<3x640xbf16>, vector<8x640xf32> -> vector<8x640xf32>
    %57 = arith.addf %52, %56 : vector<8x640xf32>
    %58 = vector.extract_strided_slice %3 {offsets = [0, 566], sizes = [3, 640], strides = [1, 1]} : vector<3x1920xbf16> to vector<3x640xbf16>
    %c11 = arith.constant 11 : index
    %c0_38 = arith.constant 0 : index
    %c0_39 = arith.constant 0 : index
    %59 = vector.load %arg4[%c11, %c0_38, %c0_39] : memref<81x8x3xbf16, #tpu.memory_space<vmem>>, vector<1x8x3xbf16>
    %60 = vector.shape_cast %59 : vector<1x8x3xbf16> to vector<8x3xbf16>
    %cst_40 = arith.constant dense<0.000000e+00> : vector<8x640xf32>
    %61 = tpu.matmul %60, %58, %cst_40 {dimension_numbers = #tpu.dot_dimension_numbers<[1], [0], [0], [1], [0, 0, 1, 1], [], []>} : vector<8x3xbf16>, vector<3x640xbf16>, vector<8x640xf32> -> vector<8x640xf32>
    %62 = arith.addf %57, %61 : vector<8x640xf32>
    %63 = vector.extract_strided_slice %3 {offsets = [0, 567], sizes = [3, 640], strides = [1, 1]} : vector<3x1920xbf16> to vector<3x640xbf16>
    %c12 = arith.constant 12 : index
    %c0_41 = arith.constant 0 : index
    %c0_42 = arith.constant 0 : index
    %64 = vector.load %arg4[%c12, %c0_41, %c0_42] : memref<81x8x3xbf16, #tpu.memory_space<vmem>>, vector<1x8x3xbf16>
    %65 = vector.shape_cast %64 : vector<1x8x3xbf16> to vector<8x3xbf16>
    %cst_43 = arith.constant dense<0.000000e+00> : vector<8x640xf32>
    %66 = tpu.matmul %65, %63, %cst_43 {dimension_numbers = #tpu.dot_dimension_numbers<[1], [0], [0], [1], [0, 0, 1, 1], [], []>} : vector<8x3xbf16>, vector<3x640xbf16>, vector<8x640xf32> -> vector<8x640xf32>
    %67 = arith.addf %62, %66 : vector<8x640xf32>
    %68 = vector.extract_strided_slice %3 {offsets = [0, 568], sizes = [3, 640], strides = [1, 1]} : vector<3x1920xbf16> to vector<3x640xbf16>
    %c13 = arith.constant 13 : index
    %c0_44 = arith.constant 0 : index
    %c0_45 = arith.constant 0 : index
    %69 = vector.load %arg4[%c13, %c0_44, %c0_45] : memref<81x8x3xbf16, #tpu.memory_space<vmem>>, vector<1x8x3xbf16>
    %70 = vector.shape_cast %69 : vector<1x8x3xbf16> to vector<8x3xbf16>
    %cst_46 = arith.constant dense<0.000000e+00> : vector<8x640xf32>
    %71 = tpu.matmul %70, %68, %cst_46 {dimension_numbers = #tpu.dot_dimension_numbers<[1], [0], [0], [1], [0, 0, 1, 1], [], []>} : vector<8x3xbf16>, vector<3x640xbf16>, vector<8x640xf32> -> vector<8x640xf32>
    %72 = arith.addf %67, %71 : vector<8x640xf32>
    %73 = vector.extract_strided_slice %3 {offsets = [0, 569], sizes = [3, 640], strides = [1, 1]} : vector<3x1920xbf16> to vector<3x640xbf16>
    %c14 = arith.constant 14 : index
    %c0_47 = arith.constant 0 : index
    %c0_48 = arith.constant 0 : index
    %74 = vector.load %arg4[%c14, %c0_47, %c0_48] : memref<81x8x3xbf16, #tpu.memory_space<vmem>>, vector<1x8x3xbf16>
    %75 = vector.shape_cast %74 : vector<1x8x3xbf16> to vector<8x3xbf16>
    %cst_49 = arith.constant dense<0.000000e+00> : vector<8x640xf32>
    %76 = tpu.matmul %75, %73, %cst_49 {dimension_numbers = #tpu.dot_dimension_numbers<[1], [0], [0], [1], [0, 0, 1, 1], [], []>} : vector<8x3xbf16>, vector<3x640xbf16>, vector<8x640xf32> -> vector<8x640xf32>
    %77 = arith.addf %72, %76 : vector<8x640xf32>
    %78 = vector.extract_strided_slice %3 {offsets = [0, 570], sizes = [3, 640], strides = [1, 1]} : vector<3x1920xbf16> to vector<3x640xbf16>
    %c15 = arith.constant 15 : index
    %c0_50 = arith.constant 0 : index
    %c0_51 = arith.constant 0 : index
    %79 = vector.load %arg4[%c15, %c0_50, %c0_51] : memref<81x8x3xbf16, #tpu.memory_space<vmem>>, vector<1x8x3xbf16>
    %80 = vector.shape_cast %79 : vector<1x8x3xbf16> to vector<8x3xbf16>
    %cst_52 = arith.constant dense<0.000000e+00> : vector<8x640xf32>
    %81 = tpu.matmul %80, %78, %cst_52 {dimension_numbers = #tpu.dot_dimension_numbers<[1], [0], [0], [1], [0, 0, 1, 1], [], []>} : vector<8x3xbf16>, vector<3x640xbf16>, vector<8x640xf32> -> vector<8x640xf32>
    %82 = arith.addf %77, %81 : vector<8x640xf32>
    %83 = vector.extract_strided_slice %3 {offsets = [0, 571], sizes = [3, 640], strides = [1, 1]} : vector<3x1920xbf16> to vector<3x640xbf16>
    %c16 = arith.constant 16 : index
    %c0_53 = arith.constant 0 : index
    %c0_54 = arith.constant 0 : index
    %84 = vector.load %arg4[%c16, %c0_53, %c0_54] : memref<81x8x3xbf16, #tpu.memory_space<vmem>>, vector<1x8x3xbf16>
    %85 = vector.shape_cast %84 : vector<1x8x3xbf16> to vector<8x3xbf16>
    %cst_55 = arith.constant dense<0.000000e+00> : vector<8x640xf32>
    %86 = tpu.matmul %85, %83, %cst_55 {dimension_numbers = #tpu.dot_dimension_numbers<[1], [0], [0], [1], [0, 0, 1, 1], [], []>} : vector<8x3xbf16>, vector<3x640xbf16>, vector<8x640xf32> -> vector<8x640xf32>
    %87 = arith.addf %82, %86 : vector<8x640xf32>
    %88 = vector.extract_strided_slice %3 {offsets = [0, 572], sizes = [3, 640], strides = [1, 1]} : vector<3x1920xbf16> to vector<3x640xbf16>
    %c17 = arith.constant 17 : index
    %c0_56 = arith.constant 0 : index
    %c0_57 = arith.constant 0 : index
    %89 = vector.load %arg4[%c17, %c0_56, %c0_57] : memref<81x8x3xbf16, #tpu.memory_space<vmem>>, vector<1x8x3xbf16>
    %90 = vector.shape_cast %89 : vector<1x8x3xbf16> to vector<8x3xbf16>
    %cst_58 = arith.constant dense<0.000000e+00> : vector<8x640xf32>
    %91 = tpu.matmul %90, %88, %cst_58 {dimension_numbers = #tpu.dot_dimension_numbers<[1], [0], [0], [1], [0, 0, 1, 1], [], []>} : vector<8x3xbf16>, vector<3x640xbf16>, vector<8x640xf32> -> vector<8x640xf32>
    %92 = arith.addf %87, %91 : vector<8x640xf32>
    %93 = vector.extract_strided_slice %3 {offsets = [0, 588], sizes = [3, 640], strides = [1, 1]} : vector<3x1920xbf16> to vector<3x640xbf16>
    %c18 = arith.constant 18 : index
    %c0_59 = arith.constant 0 : index
    %c0_60 = arith.constant 0 : index
    %94 = vector.load %arg4[%c18, %c0_59, %c0_60] : memref<81x8x3xbf16, #tpu.memory_space<vmem>>, vector<1x8x3xbf16>
    %95 = vector.shape_cast %94 : vector<1x8x3xbf16> to vector<8x3xbf16>
    %cst_61 = arith.constant dense<0.000000e+00> : vector<8x640xf32>
    %96 = tpu.matmul %95, %93, %cst_61 {dimension_numbers = #tpu.dot_dimension_numbers<[1], [0], [0], [1], [0, 0, 1, 1], [], []>} : vector<8x3xbf16>, vector<3x640xbf16>, vector<8x640xf32> -> vector<8x640xf32>
    %97 = arith.addf %92, %96 : vector<8x640xf32>
    %98 = vector.extract_strided_slice %3 {offsets = [0, 589], sizes = [3, 640], strides = [1, 1]} : vector<3x1920xbf16> to vector<3x640xbf16>
    %c19 = arith.constant 19 : index
    %c0_62 = arith.constant 0 : index
    %c0_63 = arith.constant 0 : index
    %99 = vector.load %arg4[%c19, %c0_62, %c0_63] : memref<81x8x3xbf16, #tpu.memory_space<vmem>>, vector<1x8x3xbf16>
    %100 = vector.shape_cast %99 : vector<1x8x3xbf16> to vector<8x3xbf16>
    %cst_64 = arith.constant dense<0.000000e+00> : vector<8x640xf32>
    %101 = tpu.matmul %100, %98, %cst_64 {dimension_numbers = #tpu.dot_dimension_numbers<[1], [0], [0], [1], [0, 0, 1, 1], [], []>} : vector<8x3xbf16>, vector<3x640xbf16>, vector<8x640xf32> -> vector<8x640xf32>
    %102 = arith.addf %97, %101 : vector<8x640xf32>
    %103 = vector.extract_strided_slice %3 {offsets = [0, 590], sizes = [3, 640], strides = [1, 1]} : vector<3x1920xbf16> to vector<3x640xbf16>
    %c20 = arith.constant 20 : index
    %c0_65 = arith.constant 0 : index
    %c0_66 = arith.constant 0 : index
    %104 = vector.load %arg4[%c20, %c0_65, %c0_66] : memref<81x8x3xbf16, #tpu.memory_space<vmem>>, vector<1x8x3xbf16>
    %105 = vector.shape_cast %104 : vector<1x8x3xbf16> to vector<8x3xbf16>
    %cst_67 = arith.constant dense<0.000000e+00> : vector<8x640xf32>
    %106 = tpu.matmul %105, %103, %cst_67 {dimension_numbers = #tpu.dot_dimension_numbers<[1], [0], [0], [1], [0, 0, 1, 1], [], []>} : vector<8x3xbf16>, vector<3x640xbf16>, vector<8x640xf32> -> vector<8x640xf32>
    %107 = arith.addf %102, %106 : vector<8x640xf32>
    %108 = vector.extract_strided_slice %3 {offsets = [0, 591], sizes = [3, 640], strides = [1, 1]} : vector<3x1920xbf16> to vector<3x640xbf16>
    %c21 = arith.constant 21 : index
    %c0_68 = arith.constant 0 : index
    %c0_69 = arith.constant 0 : index
    %109 = vector.load %arg4[%c21, %c0_68, %c0_69] : memref<81x8x3xbf16, #tpu.memory_space<vmem>>, vector<1x8x3xbf16>
    %110 = vector.shape_cast %109 : vector<1x8x3xbf16> to vector<8x3xbf16>
    %cst_70 = arith.constant dense<0.000000e+00> : vector<8x640xf32>
    %111 = tpu.matmul %110, %108, %cst_70 {dimension_numbers = #tpu.dot_dimension_numbers<[1], [0], [0], [1], [0, 0, 1, 1], [], []>} : vector<8x3xbf16>, vector<3x640xbf16>, vector<8x640xf32> -> vector<8x640xf32>
    %112 = arith.addf %107, %111 : vector<8x640xf32>
    %113 = vector.extract_strided_slice %3 {offsets = [0, 592], sizes = [3, 640], strides = [1, 1]} : vector<3x1920xbf16> to vector<3x640xbf16>
    %c22 = arith.constant 22 : index
    %c0_71 = arith.constant 0 : index
    %c0_72 = arith.constant 0 : index
    %114 = vector.load %arg4[%c22, %c0_71, %c0_72] : memref<81x8x3xbf16, #tpu.memory_space<vmem>>, vector<1x8x3xbf16>
    %115 = vector.shape_cast %114 : vector<1x8x3xbf16> to vector<8x3xbf16>
    %cst_73 = arith.constant dense<0.000000e+00> : vector<8x640xf32>
    %116 = tpu.matmul %115, %113, %cst_73 {dimension_numbers = #tpu.dot_dimension_numbers<[1], [0], [0], [1], [0, 0, 1, 1], [], []>} : vector<8x3xbf16>, vector<3x640xbf16>, vector<8x640xf32> -> vector<8x640xf32>
    %117 = arith.addf %112, %116 : vector<8x640xf32>
    %118 = vector.extract_strided_slice %3 {offsets = [0, 593], sizes = [3, 640], strides = [1, 1]} : vector<3x1920xbf16> to vector<3x640xbf16>
    %c23 = arith.constant 23 : index
    %c0_74 = arith.constant 0 : index
    %c0_75 = arith.constant 0 : index
    %119 = vector.load %arg4[%c23, %c0_74, %c0_75] : memref<81x8x3xbf16, #tpu.memory_space<vmem>>, vector<1x8x3xbf16>
    %120 = vector.shape_cast %119 : vector<1x8x3xbf16> to vector<8x3xbf16>
    %cst_76 = arith.constant dense<0.000000e+00> : vector<8x640xf32>
    %121 = tpu.matmul %120, %118, %cst_76 {dimension_numbers = #tpu.dot_dimension_numbers<[1], [0], [0], [1], [0, 0, 1, 1], [], []>} : vector<8x3xbf16>, vector<3x640xbf16>, vector<8x640xf32> -> vector<8x640xf32>
    %122 = arith.addf %117, %121 : vector<8x640xf32>
    %123 = vector.extract_strided_slice %3 {offsets = [0, 594], sizes = [3, 640], strides = [1, 1]} : vector<3x1920xbf16> to vector<3x640xbf16>
    %c24 = arith.constant 24 : index
    %c0_77 = arith.constant 0 : index
    %c0_78 = arith.constant 0 : index
    %124 = vector.load %arg4[%c24, %c0_77, %c0_78] : memref<81x8x3xbf16, #tpu.memory_space<vmem>>, vector<1x8x3xbf16>
    %125 = vector.shape_cast %124 : vector<1x8x3xbf16> to vector<8x3xbf16>
    %cst_79 = arith.constant dense<0.000000e+00> : vector<8x640xf32>
    %126 = tpu.matmul %125, %123, %cst_79 {dimension_numbers = #tpu.dot_dimension_numbers<[1], [0], [0], [1], [0, 0, 1, 1], [], []>} : vector<8x3xbf16>, vector<3x640xbf16>, vector<8x640xf32> -> vector<8x640xf32>
    %127 = arith.addf %122, %126 : vector<8x640xf32>
    %128 = vector.extract_strided_slice %3 {offsets = [0, 595], sizes = [3, 640], strides = [1, 1]} : vector<3x1920xbf16> to vector<3x640xbf16>
    %c25 = arith.constant 25 : index
    %c0_80 = arith.constant 0 : index
    %c0_81 = arith.constant 0 : index
    %129 = vector.load %arg4[%c25, %c0_80, %c0_81] : memref<81x8x3xbf16, #tpu.memory_space<vmem>>, vector<1x8x3xbf16>
    %130 = vector.shape_cast %129 : vector<1x8x3xbf16> to vector<8x3xbf16>
    %cst_82 = arith.constant dense<0.000000e+00> : vector<8x640xf32>
    %131 = tpu.matmul %130, %128, %cst_82 {dimension_numbers = #tpu.dot_dimension_numbers<[1], [0], [0], [1], [0, 0, 1, 1], [], []>} : vector<8x3xbf16>, vector<3x640xbf16>, vector<8x640xf32> -> vector<8x640xf32>
    %132 = arith.addf %127, %131 : vector<8x640xf32>
    %133 = vector.extract_strided_slice %3 {offsets = [0, 596], sizes = [3, 640], strides = [1, 1]} : vector<3x1920xbf16> to vector<3x640xbf16>
    %c26 = arith.constant 26 : index
    %c0_83 = arith.constant 0 : index
    %c0_84 = arith.constant 0 : index
    %134 = vector.load %arg4[%c26, %c0_83, %c0_84] : memref<81x8x3xbf16, #tpu.memory_space<vmem>>, vector<1x8x3xbf16>
    %135 = vector.shape_cast %134 : vector<1x8x3xbf16> to vector<8x3xbf16>
    %cst_85 = arith.constant dense<0.000000e+00> : vector<8x640xf32>
    %136 = tpu.matmul %135, %133, %cst_85 {dimension_numbers = #tpu.dot_dimension_numbers<[1], [0], [0], [1], [0, 0, 1, 1], [], []>} : vector<8x3xbf16>, vector<3x640xbf16>, vector<8x640xf32> -> vector<8x640xf32>
    %137 = arith.addf %132, %136 : vector<8x640xf32>
    %138 = vector.extract_strided_slice %3 {offsets = [0, 612], sizes = [3, 640], strides = [1, 1]} : vector<3x1920xbf16> to vector<3x640xbf16>
    %c27 = arith.constant 27 : index
    %c0_86 = arith.constant 0 : index
    %c0_87 = arith.constant 0 : index
    %139 = vector.load %arg4[%c27, %c0_86, %c0_87] : memref<81x8x3xbf16, #tpu.memory_space<vmem>>, vector<1x8x3xbf16>
    %140 = vector.shape_cast %139 : vector<1x8x3xbf16> to vector<8x3xbf16>
    %cst_88 = arith.constant dense<0.000000e+00> : vector<8x640xf32>
    %141 = tpu.matmul %140, %138, %cst_88 {dimension_numbers = #tpu.dot_dimension_numbers<[1], [0], [0], [1], [0, 0, 1, 1], [], []>} : vector<8x3xbf16>, vector<3x640xbf16>, vector<8x640xf32> -> vector<8x640xf32>
    %142 = arith.addf %137, %141 : vector<8x640xf32>
    %143 = vector.extract_strided_slice %3 {offsets = [0, 613], sizes = [3, 640], strides = [1, 1]} : vector<3x1920xbf16> to vector<3x640xbf16>
    %c28 = arith.constant 28 : index
    %c0_89 = arith.constant 0 : index
    %c0_90 = arith.constant 0 : index
    %144 = vector.load %arg4[%c28, %c0_89, %c0_90] : memref<81x8x3xbf16, #tpu.memory_space<vmem>>, vector<1x8x3xbf16>
    %145 = vector.shape_cast %144 : vector<1x8x3xbf16> to vector<8x3xbf16>
    %cst_91 = arith.constant dense<0.000000e+00> : vector<8x640xf32>
    %146 = tpu.matmul %145, %143, %cst_91 {dimension_numbers = #tpu.dot_dimension_numbers<[1], [0], [0], [1], [0, 0, 1, 1], [], []>} : vector<8x3xbf16>, vector<3x640xbf16>, vector<8x640xf32> -> vector<8x640xf32>
    %147 = arith.addf %142, %146 : vector<8x640xf32>
    %148 = vector.extract_strided_slice %3 {offsets = [0, 614], sizes = [3, 640], strides = [1, 1]} : vector<3x1920xbf16> to vector<3x640xbf16>
    %c29 = arith.constant 29 : index
    %c0_92 = arith.constant 0 : index
    %c0_93 = arith.constant 0 : index
    %149 = vector.load %arg4[%c29, %c0_92, %c0_93] : memref<81x8x3xbf16, #tpu.memory_space<vmem>>, vector<1x8x3xbf16>
    %150 = vector.shape_cast %149 : vector<1x8x3xbf16> to vector<8x3xbf16>
    %cst_94 = arith.constant dense<0.000000e+00> : vector<8x640xf32>
    %151 = tpu.matmul %150, %148, %cst_94 {dimension_numbers = #tpu.dot_dimension_numbers<[1], [0], [0], [1], [0, 0, 1, 1], [], []>} : vector<8x3xbf16>, vector<3x640xbf16>, vector<8x640xf32> -> vector<8x640xf32>
    %152 = arith.addf %147, %151 : vector<8x640xf32>
    %153 = vector.extract_strided_slice %3 {offsets = [0, 615], sizes = [3, 640], strides = [1, 1]} : vector<3x1920xbf16> to vector<3x640xbf16>
    %c30 = arith.constant 30 : index
    %c0_95 = arith.constant 0 : index
    %c0_96 = arith.constant 0 : index
    %154 = vector.load %arg4[%c30, %c0_95, %c0_96] : memref<81x8x3xbf16, #tpu.memory_space<vmem>>, vector<1x8x3xbf16>
    %155 = vector.shape_cast %154 : vector<1x8x3xbf16> to vector<8x3xbf16>
    %cst_97 = arith.constant dense<0.000000e+00> : vector<8x640xf32>
    %156 = tpu.matmul %155, %153, %cst_97 {dimension_numbers = #tpu.dot_dimension_numbers<[1], [0], [0], [1], [0, 0, 1, 1], [], []>} : vector<8x3xbf16>, vector<3x640xbf16>, vector<8x640xf32> -> vector<8x640xf32>
    %157 = arith.addf %152, %156 : vector<8x640xf32>
    %158 = vector.extract_strided_slice %3 {offsets = [0, 616], sizes = [3, 640], strides = [1, 1]} : vector<3x1920xbf16> to vector<3x640xbf16>
    %c31 = arith.constant 31 : index
    %c0_98 = arith.constant 0 : index
    %c0_99 = arith.constant 0 : index
    %159 = vector.load %arg4[%c31, %c0_98, %c0_99] : memref<81x8x3xbf16, #tpu.memory_space<vmem>>, vector<1x8x3xbf16>
    %160 = vector.shape_cast %159 : vector<1x8x3xbf16> to vector<8x3xbf16>
    %cst_100 = arith.constant dense<0.000000e+00> : vector<8x640xf32>
    %161 = tpu.matmul %160, %158, %cst_100 {dimension_numbers = #tpu.dot_dimension_numbers<[1], [0], [0], [1], [0, 0, 1, 1], [], []>} : vector<8x3xbf16>, vector<3x640xbf16>, vector<8x640xf32> -> vector<8x640xf32>
    %162 = arith.addf %157, %161 : vector<8x640xf32>
    %163 = vector.extract_strided_slice %3 {offsets = [0, 617], sizes = [3, 640], strides = [1, 1]} : vector<3x1920xbf16> to vector<3x640xbf16>
    %c32 = arith.constant 32 : index
    %c0_101 = arith.constant 0 : index
    %c0_102 = arith.constant 0 : index
    %164 = vector.load %arg4[%c32, %c0_101, %c0_102] : memref<81x8x3xbf16, #tpu.memory_space<vmem>>, vector<1x8x3xbf16>
    %165 = vector.shape_cast %164 : vector<1x8x3xbf16> to vector<8x3xbf16>
    %cst_103 = arith.constant dense<0.000000e+00> : vector<8x640xf32>
    %166 = tpu.matmul %165, %163, %cst_103 {dimension_numbers = #tpu.dot_dimension_numbers<[1], [0], [0], [1], [0, 0, 1, 1], [], []>} : vector<8x3xbf16>, vector<3x640xbf16>, vector<8x640xf32> -> vector<8x640xf32>
    %167 = arith.addf %162, %166 : vector<8x640xf32>
    %168 = vector.extract_strided_slice %3 {offsets = [0, 618], sizes = [3, 640], strides = [1, 1]} : vector<3x1920xbf16> to vector<3x640xbf16>
    %c33 = arith.constant 33 : index
    %c0_104 = arith.constant 0 : index
    %c0_105 = arith.constant 0 : index
    %169 = vector.load %arg4[%c33, %c0_104, %c0_105] : memref<81x8x3xbf16, #tpu.memory_space<vmem>>, vector<1x8x3xbf16>
    %170 = vector.shape_cast %169 : vector<1x8x3xbf16> to vector<8x3xbf16>
    %cst_106 = arith.constant dense<0.000000e+00> : vector<8x640xf32>
    %171 = tpu.matmul %170, %168, %cst_106 {dimension_numbers = #tpu.dot_dimension_numbers<[1], [0], [0], [1], [0, 0, 1, 1], [], []>} : vector<8x3xbf16>, vector<3x640xbf16>, vector<8x640xf32> -> vector<8x640xf32>
    %172 = arith.addf %167, %171 : vector<8x640xf32>
    %173 = vector.extract_strided_slice %3 {offsets = [0, 619], sizes = [3, 640], strides = [1, 1]} : vector<3x1920xbf16> to vector<3x640xbf16>
    %c34 = arith.constant 34 : index
    %c0_107 = arith.constant 0 : index
    %c0_108 = arith.constant 0 : index
    %174 = vector.load %arg4[%c34, %c0_107, %c0_108] : memref<81x8x3xbf16, #tpu.memory_space<vmem>>, vector<1x8x3xbf16>
    %175 = vector.shape_cast %174 : vector<1x8x3xbf16> to vector<8x3xbf16>
    %cst_109 = arith.constant dense<0.000000e+00> : vector<8x640xf32>
    %176 = tpu.matmul %175, %173, %cst_109 {dimension_numbers = #tpu.dot_dimension_numbers<[1], [0], [0], [1], [0, 0, 1, 1], [], []>} : vector<8x3xbf16>, vector<3x640xbf16>, vector<8x640xf32> -> vector<8x640xf32>
    %177 = arith.addf %172, %176 : vector<8x640xf32>
    %178 = vector.extract_strided_slice %3 {offsets = [0, 620], sizes = [3, 640], strides = [1, 1]} : vector<3x1920xbf16> to vector<3x640xbf16>
    %c35 = arith.constant 35 : index
    %c0_110 = arith.constant 0 : index
    %c0_111 = arith.constant 0 : index
    %179 = vector.load %arg4[%c35, %c0_110, %c0_111] : memref<81x8x3xbf16, #tpu.memory_space<vmem>>, vector<1x8x3xbf16>
    %180 = vector.shape_cast %179 : vector<1x8x3xbf16> to vector<8x3xbf16>
    %cst_112 = arith.constant dense<0.000000e+00> : vector<8x640xf32>
    %181 = tpu.matmul %180, %178, %cst_112 {dimension_numbers = #tpu.dot_dimension_numbers<[1], [0], [0], [1], [0, 0, 1, 1], [], []>} : vector<8x3xbf16>, vector<3x640xbf16>, vector<8x640xf32> -> vector<8x640xf32>
    %182 = arith.addf %177, %181 : vector<8x640xf32>
    %183 = vector.extract_strided_slice %3 {offsets = [0, 636], sizes = [3, 640], strides = [1, 1]} : vector<3x1920xbf16> to vector<3x640xbf16>
    %c36 = arith.constant 36 : index
    %c0_113 = arith.constant 0 : index
    %c0_114 = arith.constant 0 : index
    %184 = vector.load %arg4[%c36, %c0_113, %c0_114] : memref<81x8x3xbf16, #tpu.memory_space<vmem>>, vector<1x8x3xbf16>
    %185 = vector.shape_cast %184 : vector<1x8x3xbf16> to vector<8x3xbf16>
    %cst_115 = arith.constant dense<0.000000e+00> : vector<8x640xf32>
    %186 = tpu.matmul %185, %183, %cst_115 {dimension_numbers = #tpu.dot_dimension_numbers<[1], [0], [0], [1], [0, 0, 1, 1], [], []>} : vector<8x3xbf16>, vector<3x640xbf16>, vector<8x640xf32> -> vector<8x640xf32>
    %187 = arith.addf %182, %186 : vector<8x640xf32>
    %188 = vector.extract_strided_slice %3 {offsets = [0, 637], sizes = [3, 640], strides = [1, 1]} : vector<3x1920xbf16> to vector<3x640xbf16>
    %c37 = arith.constant 37 : index
    %c0_116 = arith.constant 0 : index
    %c0_117 = arith.constant 0 : index
    %189 = vector.load %arg4[%c37, %c0_116, %c0_117] : memref<81x8x3xbf16, #tpu.memory_space<vmem>>, vector<1x8x3xbf16>
    %190 = vector.shape_cast %189 : vector<1x8x3xbf16> to vector<8x3xbf16>
    %cst_118 = arith.constant dense<0.000000e+00> : vector<8x640xf32>
    %191 = tpu.matmul %190, %188, %cst_118 {dimension_numbers = #tpu.dot_dimension_numbers<[1], [0], [0], [1], [0, 0, 1, 1], [], []>} : vector<8x3xbf16>, vector<3x640xbf16>, vector<8x640xf32> -> vector<8x640xf32>
    %192 = arith.addf %187, %191 : vector<8x640xf32>
    %193 = vector.extract_strided_slice %3 {offsets = [0, 638], sizes = [3, 640], strides = [1, 1]} : vector<3x1920xbf16> to vector<3x640xbf16>
    %c38 = arith.constant 38 : index
    %c0_119 = arith.constant 0 : index
    %c0_120 = arith.constant 0 : index
    %194 = vector.load %arg4[%c38, %c0_119, %c0_120] : memref<81x8x3xbf16, #tpu.memory_space<vmem>>, vector<1x8x3xbf16>
    %195 = vector.shape_cast %194 : vector<1x8x3xbf16> to vector<8x3xbf16>
    %cst_121 = arith.constant dense<0.000000e+00> : vector<8x640xf32>
    %196 = tpu.matmul %195, %193, %cst_121 {dimension_numbers = #tpu.dot_dimension_numbers<[1], [0], [0], [1], [0, 0, 1, 1], [], []>} : vector<8x3xbf16>, vector<3x640xbf16>, vector<8x640xf32> -> vector<8x640xf32>
    %197 = arith.addf %192, %196 : vector<8x640xf32>
    %198 = vector.extract_strided_slice %3 {offsets = [0, 639], sizes = [3, 640], strides = [1, 1]} : vector<3x1920xbf16> to vector<3x640xbf16>
    %c39 = arith.constant 39 : index
    %c0_122 = arith.constant 0 : index
    %c0_123 = arith.constant 0 : index
    %199 = vector.load %arg4[%c39, %c0_122, %c0_123] : memref<81x8x3xbf16, #tpu.memory_space<vmem>>, vector<1x8x3xbf16>
    %200 = vector.shape_cast %199 : vector<1x8x3xbf16> to vector<8x3xbf16>
    %cst_124 = arith.constant dense<0.000000e+00> : vector<8x640xf32>
    %201 = tpu.matmul %200, %198, %cst_124 {dimension_numbers = #tpu.dot_dimension_numbers<[1], [0], [0], [1], [0, 0, 1, 1], [], []>} : vector<8x3xbf16>, vector<3x640xbf16>, vector<8x640xf32> -> vector<8x640xf32>
    %202 = arith.addf %197, %201 : vector<8x640xf32>
    %203 = vector.extract_strided_slice %3 {offsets = [0, 640], sizes = [3, 640], strides = [1, 1]} : vector<3x1920xbf16> to vector<3x640xbf16>
    %c40 = arith.constant 40 : index
    %c0_125 = arith.constant 0 : index
    %c0_126 = arith.constant 0 : index
    %204 = vector.load %arg4[%c40, %c0_125, %c0_126] : memref<81x8x3xbf16, #tpu.memory_space<vmem>>, vector<1x8x3xbf16>
    %205 = vector.shape_cast %204 : vector<1x8x3xbf16> to vector<8x3xbf16>
    %cst_127 = arith.constant dense<0.000000e+00> : vector<8x640xf32>
    %206 = tpu.matmul %205, %203, %cst_127 {dimension_numbers = #tpu.dot_dimension_numbers<[1], [0], [0], [1], [0, 0, 1, 1], [], []>} : vector<8x3xbf16>, vector<3x640xbf16>, vector<8x640xf32> -> vector<8x640xf32>
    %207 = arith.addf %202, %206 : vector<8x640xf32>
    %208 = vector.extract_strided_slice %3 {offsets = [0, 641], sizes = [3, 640], strides = [1, 1]} : vector<3x1920xbf16> to vector<3x640xbf16>
    %c41 = arith.constant 41 : index
    %c0_128 = arith.constant 0 : index
    %c0_129 = arith.constant 0 : index
    %209 = vector.load %arg4[%c41, %c0_128, %c0_129] : memref<81x8x3xbf16, #tpu.memory_space<vmem>>, vector<1x8x3xbf16>
    %210 = vector.shape_cast %209 : vector<1x8x3xbf16> to vector<8x3xbf16>
    %cst_130 = arith.constant dense<0.000000e+00> : vector<8x640xf32>
    %211 = tpu.matmul %210, %208, %cst_130 {dimension_numbers = #tpu.dot_dimension_numbers<[1], [0], [0], [1], [0, 0, 1, 1], [], []>} : vector<8x3xbf16>, vector<3x640xbf16>, vector<8x640xf32> -> vector<8x640xf32>
    %212 = arith.addf %207, %211 : vector<8x640xf32>
    %213 = vector.extract_strided_slice %3 {offsets = [0, 642], sizes = [3, 640], strides = [1, 1]} : vector<3x1920xbf16> to vector<3x640xbf16>
    %c42 = arith.constant 42 : index
    %c0_131 = arith.constant 0 : index
    %c0_132 = arith.constant 0 : index
    %214 = vector.load %arg4[%c42, %c0_131, %c0_132] : memref<81x8x3xbf16, #tpu.memory_space<vmem>>, vector<1x8x3xbf16>
    %215 = vector.shape_cast %214 : vector<1x8x3xbf16> to vector<8x3xbf16>
    %cst_133 = arith.constant dense<0.000000e+00> : vector<8x640xf32>
    %216 = tpu.matmul %215, %213, %cst_133 {dimension_numbers = #tpu.dot_dimension_numbers<[1], [0], [0], [1], [0, 0, 1, 1], [], []>} : vector<8x3xbf16>, vector<3x640xbf16>, vector<8x640xf32> -> vector<8x640xf32>
    %217 = arith.addf %212, %216 : vector<8x640xf32>
    %218 = vector.extract_strided_slice %3 {offsets = [0, 643], sizes = [3, 640], strides = [1, 1]} : vector<3x1920xbf16> to vector<3x640xbf16>
    %c43 = arith.constant 43 : index
    %c0_134 = arith.constant 0 : index
    %c0_135 = arith.constant 0 : index
    %219 = vector.load %arg4[%c43, %c0_134, %c0_135] : memref<81x8x3xbf16, #tpu.memory_space<vmem>>, vector<1x8x3xbf16>
    %220 = vector.shape_cast %219 : vector<1x8x3xbf16> to vector<8x3xbf16>
    %cst_136 = arith.constant dense<0.000000e+00> : vector<8x640xf32>
    %221 = tpu.matmul %220, %218, %cst_136 {dimension_numbers = #tpu.dot_dimension_numbers<[1], [0], [0], [1], [0, 0, 1, 1], [], []>} : vector<8x3xbf16>, vector<3x640xbf16>, vector<8x640xf32> -> vector<8x640xf32>
    %222 = arith.addf %217, %221 : vector<8x640xf32>
    %223 = vector.extract_strided_slice %3 {offsets = [0, 644], sizes = [3, 640], strides = [1, 1]} : vector<3x1920xbf16> to vector<3x640xbf16>
    %c44 = arith.constant 44 : index
    %c0_137 = arith.constant 0 : index
    %c0_138 = arith.constant 0 : index
    %224 = vector.load %arg4[%c44, %c0_137, %c0_138] : memref<81x8x3xbf16, #tpu.memory_space<vmem>>, vector<1x8x3xbf16>
    %225 = vector.shape_cast %224 : vector<1x8x3xbf16> to vector<8x3xbf16>
    %cst_139 = arith.constant dense<0.000000e+00> : vector<8x640xf32>
    %226 = tpu.matmul %225, %223, %cst_139 {dimension_numbers = #tpu.dot_dimension_numbers<[1], [0], [0], [1], [0, 0, 1, 1], [], []>} : vector<8x3xbf16>, vector<3x640xbf16>, vector<8x640xf32> -> vector<8x640xf32>
    %227 = arith.addf %222, %226 : vector<8x640xf32>
    %228 = vector.extract_strided_slice %3 {offsets = [0, 660], sizes = [3, 640], strides = [1, 1]} : vector<3x1920xbf16> to vector<3x640xbf16>
    %c45 = arith.constant 45 : index
    %c0_140 = arith.constant 0 : index
    %c0_141 = arith.constant 0 : index
    %229 = vector.load %arg4[%c45, %c0_140, %c0_141] : memref<81x8x3xbf16, #tpu.memory_space<vmem>>, vector<1x8x3xbf16>
    %230 = vector.shape_cast %229 : vector<1x8x3xbf16> to vector<8x3xbf16>
    %cst_142 = arith.constant dense<0.000000e+00> : vector<8x640xf32>
    %231 = tpu.matmul %230, %228, %cst_142 {dimension_numbers = #tpu.dot_dimension_numbers<[1], [0], [0], [1], [0, 0, 1, 1], [], []>} : vector<8x3xbf16>, vector<3x640xbf16>, vector<8x640xf32> -> vector<8x640xf32>
    %232 = arith.addf %227, %231 : vector<8x640xf32>
    %233 = vector.extract_strided_slice %3 {offsets = [0, 661], sizes = [3, 640], strides = [1, 1]} : vector<3x1920xbf16> to vector<3x640xbf16>
    %c46 = arith.constant 46 : index
    %c0_143 = arith.constant 0 : index
    %c0_144 = arith.constant 0 : index
    %234 = vector.load %arg4[%c46, %c0_143, %c0_144] : memref<81x8x3xbf16, #tpu.memory_space<vmem>>, vector<1x8x3xbf16>
    %235 = vector.shape_cast %234 : vector<1x8x3xbf16> to vector<8x3xbf16>
    %cst_145 = arith.constant dense<0.000000e+00> : vector<8x640xf32>
    %236 = tpu.matmul %235, %233, %cst_145 {dimension_numbers = #tpu.dot_dimension_numbers<[1], [0], [0], [1], [0, 0, 1, 1], [], []>} : vector<8x3xbf16>, vector<3x640xbf16>, vector<8x640xf32> -> vector<8x640xf32>
    %237 = arith.addf %232, %236 : vector<8x640xf32>
    %238 = vector.extract_strided_slice %3 {offsets = [0, 662], sizes = [3, 640], strides = [1, 1]} : vector<3x1920xbf16> to vector<3x640xbf16>
    %c47 = arith.constant 47 : index
    %c0_146 = arith.constant 0 : index
    %c0_147 = arith.constant 0 : index
    %239 = vector.load %arg4[%c47, %c0_146, %c0_147] : memref<81x8x3xbf16, #tpu.memory_space<vmem>>, vector<1x8x3xbf16>
    %240 = vector.shape_cast %239 : vector<1x8x3xbf16> to vector<8x3xbf16>
    %cst_148 = arith.constant dense<0.000000e+00> : vector<8x640xf32>
    %241 = tpu.matmul %240, %238, %cst_148 {dimension_numbers = #tpu.dot_dimension_numbers<[1], [0], [0], [1], [0, 0, 1, 1], [], []>} : vector<8x3xbf16>, vector<3x640xbf16>, vector<8x640xf32> -> vector<8x640xf32>
    %242 = arith.addf %237, %241 : vector<8x640xf32>
    %243 = vector.extract_strided_slice %3 {offsets = [0, 663], sizes = [3, 640], strides = [1, 1]} : vector<3x1920xbf16> to vector<3x640xbf16>
    %c48 = arith.constant 48 : index
    %c0_149 = arith.constant 0 : index
    %c0_150 = arith.constant 0 : index
    %244 = vector.load %arg4[%c48, %c0_149, %c0_150] : memref<81x8x3xbf16, #tpu.memory_space<vmem>>, vector<1x8x3xbf16>
    %245 = vector.shape_cast %244 : vector<1x8x3xbf16> to vector<8x3xbf16>
    %cst_151 = arith.constant dense<0.000000e+00> : vector<8x640xf32>
    %246 = tpu.matmul %245, %243, %cst_151 {dimension_numbers = #tpu.dot_dimension_numbers<[1], [0], [0], [1], [0, 0, 1, 1], [], []>} : vector<8x3xbf16>, vector<3x640xbf16>, vector<8x640xf32> -> vector<8x640xf32>
    %247 = arith.addf %242, %246 : vector<8x640xf32>
    %248 = vector.extract_strided_slice %3 {offsets = [0, 664], sizes = [3, 640], strides = [1, 1]} : vector<3x1920xbf16> to vector<3x640xbf16>
    %c49 = arith.constant 49 : index
    %c0_152 = arith.constant 0 : index
    %c0_153 = arith.constant 0 : index
    %249 = vector.load %arg4[%c49, %c0_152, %c0_153] : memref<81x8x3xbf16, #tpu.memory_space<vmem>>, vector<1x8x3xbf16>
    %250 = vector.shape_cast %249 : vector<1x8x3xbf16> to vector<8x3xbf16>
    %cst_154 = arith.constant dense<0.000000e+00> : vector<8x640xf32>
    %251 = tpu.matmul %250, %248, %cst_154 {dimension_numbers = #tpu.dot_dimension_numbers<[1], [0], [0], [1], [0, 0, 1, 1], [], []>} : vector<8x3xbf16>, vector<3x640xbf16>, vector<8x640xf32> -> vector<8x640xf32>
    %252 = arith.addf %247, %251 : vector<8x640xf32>
    %253 = vector.extract_strided_slice %3 {offsets = [0, 665], sizes = [3, 640], strides = [1, 1]} : vector<3x1920xbf16> to vector<3x640xbf16>
    %c50 = arith.constant 50 : index
    %c0_155 = arith.constant 0 : index
    %c0_156 = arith.constant 0 : index
    %254 = vector.load %arg4[%c50, %c0_155, %c0_156] : memref<81x8x3xbf16, #tpu.memory_space<vmem>>, vector<1x8x3xbf16>
    %255 = vector.shape_cast %254 : vector<1x8x3xbf16> to vector<8x3xbf16>
    %cst_157 = arith.constant dense<0.000000e+00> : vector<8x640xf32>
    %256 = tpu.matmul %255, %253, %cst_157 {dimension_numbers = #tpu.dot_dimension_numbers<[1], [0], [0], [1], [0, 0, 1, 1], [], []>} : vector<8x3xbf16>, vector<3x640xbf16>, vector<8x640xf32> -> vector<8x640xf32>
    %257 = arith.addf %252, %256 : vector<8x640xf32>
    %258 = vector.extract_strided_slice %3 {offsets = [0, 666], sizes = [3, 640], strides = [1, 1]} : vector<3x1920xbf16> to vector<3x640xbf16>
    %c51 = arith.constant 51 : index
    %c0_158 = arith.constant 0 : index
    %c0_159 = arith.constant 0 : index
    %259 = vector.load %arg4[%c51, %c0_158, %c0_159] : memref<81x8x3xbf16, #tpu.memory_space<vmem>>, vector<1x8x3xbf16>
    %260 = vector.shape_cast %259 : vector<1x8x3xbf16> to vector<8x3xbf16>
    %cst_160 = arith.constant dense<0.000000e+00> : vector<8x640xf32>
    %261 = tpu.matmul %260, %258, %cst_160 {dimension_numbers = #tpu.dot_dimension_numbers<[1], [0], [0], [1], [0, 0, 1, 1], [], []>} : vector<8x3xbf16>, vector<3x640xbf16>, vector<8x640xf32> -> vector<8x640xf32>
    %262 = arith.addf %257, %261 : vector<8x640xf32>
    %263 = vector.extract_strided_slice %3 {offsets = [0, 667], sizes = [3, 640], strides = [1, 1]} : vector<3x1920xbf16> to vector<3x640xbf16>
    %c52 = arith.constant 52 : index
    %c0_161 = arith.constant 0 : index
    %c0_162 = arith.constant 0 : index
    %264 = vector.load %arg4[%c52, %c0_161, %c0_162] : memref<81x8x3xbf16, #tpu.memory_space<vmem>>, vector<1x8x3xbf16>
    %265 = vector.shape_cast %264 : vector<1x8x3xbf16> to vector<8x3xbf16>
    %cst_163 = arith.constant dense<0.000000e+00> : vector<8x640xf32>
    %266 = tpu.matmul %265, %263, %cst_163 {dimension_numbers = #tpu.dot_dimension_numbers<[1], [0], [0], [1], [0, 0, 1, 1], [], []>} : vector<8x3xbf16>, vector<3x640xbf16>, vector<8x640xf32> -> vector<8x640xf32>
    %267 = arith.addf %262, %266 : vector<8x640xf32>
    %268 = vector.extract_strided_slice %3 {offsets = [0, 668], sizes = [3, 640], strides = [1, 1]} : vector<3x1920xbf16> to vector<3x640xbf16>
    %c53 = arith.constant 53 : index
    %c0_164 = arith.constant 0 : index
    %c0_165 = arith.constant 0 : index
    %269 = vector.load %arg4[%c53, %c0_164, %c0_165] : memref<81x8x3xbf16, #tpu.memory_space<vmem>>, vector<1x8x3xbf16>
    %270 = vector.shape_cast %269 : vector<1x8x3xbf16> to vector<8x3xbf16>
    %cst_166 = arith.constant dense<0.000000e+00> : vector<8x640xf32>
    %271 = tpu.matmul %270, %268, %cst_166 {dimension_numbers = #tpu.dot_dimension_numbers<[1], [0], [0], [1], [0, 0, 1, 1], [], []>} : vector<8x3xbf16>, vector<3x640xbf16>, vector<8x640xf32> -> vector<8x640xf32>
    %272 = arith.addf %267, %271 : vector<8x640xf32>
    %273 = vector.extract_strided_slice %3 {offsets = [0, 684], sizes = [3, 640], strides = [1, 1]} : vector<3x1920xbf16> to vector<3x640xbf16>
    %c54 = arith.constant 54 : index
    %c0_167 = arith.constant 0 : index
    %c0_168 = arith.constant 0 : index
    %274 = vector.load %arg4[%c54, %c0_167, %c0_168] : memref<81x8x3xbf16, #tpu.memory_space<vmem>>, vector<1x8x3xbf16>
    %275 = vector.shape_cast %274 : vector<1x8x3xbf16> to vector<8x3xbf16>
    %cst_169 = arith.constant dense<0.000000e+00> : vector<8x640xf32>
    %276 = tpu.matmul %275, %273, %cst_169 {dimension_numbers = #tpu.dot_dimension_numbers<[1], [0], [0], [1], [0, 0, 1, 1], [], []>} : vector<8x3xbf16>, vector<3x640xbf16>, vector<8x640xf32> -> vector<8x640xf32>
    %277 = arith.addf %272, %276 : vector<8x640xf32>
    %278 = vector.extract_strided_slice %3 {offsets = [0, 685], sizes = [3, 640], strides = [1, 1]} : vector<3x1920xbf16> to vector<3x640xbf16>
    %c55 = arith.constant 55 : index
    %c0_170 = arith.constant 0 : index
    %c0_171 = arith.constant 0 : index
    %279 = vector.load %arg4[%c55, %c0_170, %c0_171] : memref<81x8x3xbf16, #tpu.memory_space<vmem>>, vector<1x8x3xbf16>
    %280 = vector.shape_cast %279 : vector<1x8x3xbf16> to vector<8x3xbf16>
    %cst_172 = arith.constant dense<0.000000e+00> : vector<8x640xf32>
    %281 = tpu.matmul %280, %278, %cst_172 {dimension_numbers = #tpu.dot_dimension_numbers<[1], [0], [0], [1], [0, 0, 1, 1], [], []>} : vector<8x3xbf16>, vector<3x640xbf16>, vector<8x640xf32> -> vector<8x640xf32>
    %282 = arith.addf %277, %281 : vector<8x640xf32>
    %283 = vector.extract_strided_slice %3 {offsets = [0, 686], sizes = [3, 640], strides = [1, 1]} : vector<3x1920xbf16> to vector<3x640xbf16>
    %c56 = arith.constant 56 : index
    %c0_173 = arith.constant 0 : index
    %c0_174 = arith.constant 0 : index
    %284 = vector.load %arg4[%c56, %c0_173, %c0_174] : memref<81x8x3xbf16, #tpu.memory_space<vmem>>, vector<1x8x3xbf16>
    %285 = vector.shape_cast %284 : vector<1x8x3xbf16> to vector<8x3xbf16>
    %cst_175 = arith.constant dense<0.000000e+00> : vector<8x640xf32>
    %286 = tpu.matmul %285, %283, %cst_175 {dimension_numbers = #tpu.dot_dimension_numbers<[1], [0], [0], [1], [0, 0, 1, 1], [], []>} : vector<8x3xbf16>, vector<3x640xbf16>, vector<8x640xf32> -> vector<8x640xf32>
    %287 = arith.addf %282, %286 : vector<8x640xf32>
    %288 = vector.extract_strided_slice %3 {offsets = [0, 687], sizes = [3, 640], strides = [1, 1]} : vector<3x1920xbf16> to vector<3x640xbf16>
    %c57 = arith.constant 57 : index
    %c0_176 = arith.constant 0 : index
    %c0_177 = arith.constant 0 : index
    %289 = vector.load %arg4[%c57, %c0_176, %c0_177] : memref<81x8x3xbf16, #tpu.memory_space<vmem>>, vector<1x8x3xbf16>
    %290 = vector.shape_cast %289 : vector<1x8x3xbf16> to vector<8x3xbf16>
    %cst_178 = arith.constant dense<0.000000e+00> : vector<8x640xf32>
    %291 = tpu.matmul %290, %288, %cst_178 {dimension_numbers = #tpu.dot_dimension_numbers<[1], [0], [0], [1], [0, 0, 1, 1], [], []>} : vector<8x3xbf16>, vector<3x640xbf16>, vector<8x640xf32> -> vector<8x640xf32>
    %292 = arith.addf %287, %291 : vector<8x640xf32>
    %293 = vector.extract_strided_slice %3 {offsets = [0, 688], sizes = [3, 640], strides = [1, 1]} : vector<3x1920xbf16> to vector<3x640xbf16>
    %c58 = arith.constant 58 : index
    %c0_179 = arith.constant 0 : index
    %c0_180 = arith.constant 0 : index
    %294 = vector.load %arg4[%c58, %c0_179, %c0_180] : memref<81x8x3xbf16, #tpu.memory_space<vmem>>, vector<1x8x3xbf16>
    %295 = vector.shape_cast %294 : vector<1x8x3xbf16> to vector<8x3xbf16>
    %cst_181 = arith.constant dense<0.000000e+00> : vector<8x640xf32>
    %296 = tpu.matmul %295, %293, %cst_181 {dimension_numbers = #tpu.dot_dimension_numbers<[1], [0], [0], [1], [0, 0, 1, 1], [], []>} : vector<8x3xbf16>, vector<3x640xbf16>, vector<8x640xf32> -> vector<8x640xf32>
    %297 = arith.addf %292, %296 : vector<8x640xf32>
    %298 = vector.extract_strided_slice %3 {offsets = [0, 689], sizes = [3, 640], strides = [1, 1]} : vector<3x1920xbf16> to vector<3x640xbf16>
    %c59 = arith.constant 59 : index
    %c0_182 = arith.constant 0 : index
    %c0_183 = arith.constant 0 : index
    %299 = vector.load %arg4[%c59, %c0_182, %c0_183] : memref<81x8x3xbf16, #tpu.memory_space<vmem>>, vector<1x8x3xbf16>
    %300 = vector.shape_cast %299 : vector<1x8x3xbf16> to vector<8x3xbf16>
    %cst_184 = arith.constant dense<0.000000e+00> : vector<8x640xf32>
    %301 = tpu.matmul %300, %298, %cst_184 {dimension_numbers = #tpu.dot_dimension_numbers<[1], [0], [0], [1], [0, 0, 1, 1], [], []>} : vector<8x3xbf16>, vector<3x640xbf16>, vector<8x640xf32> -> vector<8x640xf32>
    %302 = arith.addf %297, %301 : vector<8x640xf32>
    %303 = vector.extract_strided_slice %3 {offsets = [0, 690], sizes = [3, 640], strides = [1, 1]} : vector<3x1920xbf16> to vector<3x640xbf16>
    %c60 = arith.constant 60 : index
    %c0_185 = arith.constant 0 : index
    %c0_186 = arith.constant 0 : index
    %304 = vector.load %arg4[%c60, %c0_185, %c0_186] : memref<81x8x3xbf16, #tpu.memory_space<vmem>>, vector<1x8x3xbf16>
    %305 = vector.shape_cast %304 : vector<1x8x3xbf16> to vector<8x3xbf16>
    %cst_187 = arith.constant dense<0.000000e+00> : vector<8x640xf32>
    %306 = tpu.matmul %305, %303, %cst_187 {dimension_numbers = #tpu.dot_dimension_numbers<[1], [0], [0], [1], [0, 0, 1, 1], [], []>} : vector<8x3xbf16>, vector<3x640xbf16>, vector<8x640xf32> -> vector<8x640xf32>
    %307 = arith.addf %302, %306 : vector<8x640xf32>
    %308 = vector.extract_strided_slice %3 {offsets = [0, 691], sizes = [3, 640], strides = [1, 1]} : vector<3x1920xbf16> to vector<3x640xbf16>
    %c61 = arith.constant 61 : index
    %c0_188 = arith.constant 0 : index
    %c0_189 = arith.constant 0 : index
    %309 = vector.load %arg4[%c61, %c0_188, %c0_189] : memref<81x8x3xbf16, #tpu.memory_space<vmem>>, vector<1x8x3xbf16>
    %310 = vector.shape_cast %309 : vector<1x8x3xbf16> to vector<8x3xbf16>
    %cst_190 = arith.constant dense<0.000000e+00> : vector<8x640xf32>
    %311 = tpu.matmul %310, %308, %cst_190 {dimension_numbers = #tpu.dot_dimension_numbers<[1], [0], [0], [1], [0, 0, 1, 1], [], []>} : vector<8x3xbf16>, vector<3x640xbf16>, vector<8x640xf32> -> vector<8x640xf32>
    %312 = arith.addf %307, %311 : vector<8x640xf32>
    %313 = vector.extract_strided_slice %3 {offsets = [0, 692], sizes = [3, 640], strides = [1, 1]} : vector<3x1920xbf16> to vector<3x640xbf16>
    %c62 = arith.constant 62 : index
    %c0_191 = arith.constant 0 : index
    %c0_192 = arith.constant 0 : index
    %314 = vector.load %arg4[%c62, %c0_191, %c0_192] : memref<81x8x3xbf16, #tpu.memory_space<vmem>>, vector<1x8x3xbf16>
    %315 = vector.shape_cast %314 : vector<1x8x3xbf16> to vector<8x3xbf16>
    %cst_193 = arith.constant dense<0.000000e+00> : vector<8x640xf32>
    %316 = tpu.matmul %315, %313, %cst_193 {dimension_numbers = #tpu.dot_dimension_numbers<[1], [0], [0], [1], [0, 0, 1, 1], [], []>} : vector<8x3xbf16>, vector<3x640xbf16>, vector<8x640xf32> -> vector<8x640xf32>
    %317 = arith.addf %312, %316 : vector<8x640xf32>
    %318 = vector.extract_strided_slice %3 {offsets = [0, 708], sizes = [3, 640], strides = [1, 1]} : vector<3x1920xbf16> to vector<3x640xbf16>
    %c63 = arith.constant 63 : index
    %c0_194 = arith.constant 0 : index
    %c0_195 = arith.constant 0 : index
    %319 = vector.load %arg4[%c63, %c0_194, %c0_195] : memref<81x8x3xbf16, #tpu.memory_space<vmem>>, vector<1x8x3xbf16>
    %320 = vector.shape_cast %319 : vector<1x8x3xbf16> to vector<8x3xbf16>
    %cst_196 = arith.constant dense<0.000000e+00> : vector<8x640xf32>
    %321 = tpu.matmul %320, %318, %cst_196 {dimension_numbers = #tpu.dot_dimension_numbers<[1], [0], [0], [1], [0, 0, 1, 1], [], []>} : vector<8x3xbf16>, vector<3x640xbf16>, vector<8x640xf32> -> vector<8x640xf32>
    %322 = arith.addf %317, %321 : vector<8x640xf32>
    %323 = vector.extract_strided_slice %3 {offsets = [0, 709], sizes = [3, 640], strides = [1, 1]} : vector<3x1920xbf16> to vector<3x640xbf16>
    %c64 = arith.constant 64 : index
    %c0_197 = arith.constant 0 : index
    %c0_198 = arith.constant 0 : index
    %324 = vector.load %arg4[%c64, %c0_197, %c0_198] : memref<81x8x3xbf16, #tpu.memory_space<vmem>>, vector<1x8x3xbf16>
    %325 = vector.shape_cast %324 : vector<1x8x3xbf16> to vector<8x3xbf16>
    %cst_199 = arith.constant dense<0.000000e+00> : vector<8x640xf32>
    %326 = tpu.matmul %325, %323, %cst_199 {dimension_numbers = #tpu.dot_dimension_numbers<[1], [0], [0], [1], [0, 0, 1, 1], [], []>} : vector<8x3xbf16>, vector<3x640xbf16>, vector<8x640xf32> -> vector<8x640xf32>
    %327 = arith.addf %322, %326 : vector<8x640xf32>
    %328 = vector.extract_strided_slice %3 {offsets = [0, 710], sizes = [3, 640], strides = [1, 1]} : vector<3x1920xbf16> to vector<3x640xbf16>
    %c65 = arith.constant 65 : index
    %c0_200 = arith.constant 0 : index
    %c0_201 = arith.constant 0 : index
    %329 = vector.load %arg4[%c65, %c0_200, %c0_201] : memref<81x8x3xbf16, #tpu.memory_space<vmem>>, vector<1x8x3xbf16>
    %330 = vector.shape_cast %329 : vector<1x8x3xbf16> to vector<8x3xbf16>
    %cst_202 = arith.constant dense<0.000000e+00> : vector<8x640xf32>
    %331 = tpu.matmul %330, %328, %cst_202 {dimension_numbers = #tpu.dot_dimension_numbers<[1], [0], [0], [1], [0, 0, 1, 1], [], []>} : vector<8x3xbf16>, vector<3x640xbf16>, vector<8x640xf32> -> vector<8x640xf32>
    %332 = arith.addf %327, %331 : vector<8x640xf32>
    %333 = vector.extract_strided_slice %3 {offsets = [0, 711], sizes = [3, 640], strides = [1, 1]} : vector<3x1920xbf16> to vector<3x640xbf16>
    %c66 = arith.constant 66 : index
    %c0_203 = arith.constant 0 : index
    %c0_204 = arith.constant 0 : index
    %334 = vector.load %arg4[%c66, %c0_203, %c0_204] : memref<81x8x3xbf16, #tpu.memory_space<vmem>>, vector<1x8x3xbf16>
    %335 = vector.shape_cast %334 : vector<1x8x3xbf16> to vector<8x3xbf16>
    %cst_205 = arith.constant dense<0.000000e+00> : vector<8x640xf32>
    %336 = tpu.matmul %335, %333, %cst_205 {dimension_numbers = #tpu.dot_dimension_numbers<[1], [0], [0], [1], [0, 0, 1, 1], [], []>} : vector<8x3xbf16>, vector<3x640xbf16>, vector<8x640xf32> -> vector<8x640xf32>
    %337 = arith.addf %332, %336 : vector<8x640xf32>
    %338 = vector.extract_strided_slice %3 {offsets = [0, 712], sizes = [3, 640], strides = [1, 1]} : vector<3x1920xbf16> to vector<3x640xbf16>
    %c67 = arith.constant 67 : index
    %c0_206 = arith.constant 0 : index
    %c0_207 = arith.constant 0 : index
    %339 = vector.load %arg4[%c67, %c0_206, %c0_207] : memref<81x8x3xbf16, #tpu.memory_space<vmem>>, vector<1x8x3xbf16>
    %340 = vector.shape_cast %339 : vector<1x8x3xbf16> to vector<8x3xbf16>
    %cst_208 = arith.constant dense<0.000000e+00> : vector<8x640xf32>
    %341 = tpu.matmul %340, %338, %cst_208 {dimension_numbers = #tpu.dot_dimension_numbers<[1], [0], [0], [1], [0, 0, 1, 1], [], []>} : vector<8x3xbf16>, vector<3x640xbf16>, vector<8x640xf32> -> vector<8x640xf32>
    %342 = arith.addf %337, %341 : vector<8x640xf32>
    %343 = vector.extract_strided_slice %3 {offsets = [0, 713], sizes = [3, 640], strides = [1, 1]} : vector<3x1920xbf16> to vector<3x640xbf16>
    %c68 = arith.constant 68 : index
    %c0_209 = arith.constant 0 : index
    %c0_210 = arith.constant 0 : index
    %344 = vector.load %arg4[%c68, %c0_209, %c0_210] : memref<81x8x3xbf16, #tpu.memory_space<vmem>>, vector<1x8x3xbf16>
    %345 = vector.shape_cast %344 : vector<1x8x3xbf16> to vector<8x3xbf16>
    %cst_211 = arith.constant dense<0.000000e+00> : vector<8x640xf32>
    %346 = tpu.matmul %345, %343, %cst_211 {dimension_numbers = #tpu.dot_dimension_numbers<[1], [0], [0], [1], [0, 0, 1, 1], [], []>} : vector<8x3xbf16>, vector<3x640xbf16>, vector<8x640xf32> -> vector<8x640xf32>
    %347 = arith.addf %342, %346 : vector<8x640xf32>
    %348 = vector.extract_strided_slice %3 {offsets = [0, 714], sizes = [3, 640], strides = [1, 1]} : vector<3x1920xbf16> to vector<3x640xbf16>
    %c69 = arith.constant 69 : index
    %c0_212 = arith.constant 0 : index
    %c0_213 = arith.constant 0 : index
    %349 = vector.load %arg4[%c69, %c0_212, %c0_213] : memref<81x8x3xbf16, #tpu.memory_space<vmem>>, vector<1x8x3xbf16>
    %350 = vector.shape_cast %349 : vector<1x8x3xbf16> to vector<8x3xbf16>
    %cst_214 = arith.constant dense<0.000000e+00> : vector<8x640xf32>
    %351 = tpu.matmul %350, %348, %cst_214 {dimension_numbers = #tpu.dot_dimension_numbers<[1], [0], [0], [1], [0, 0, 1, 1], [], []>} : vector<8x3xbf16>, vector<3x640xbf16>, vector<8x640xf32> -> vector<8x640xf32>
    %352 = arith.addf %347, %351 : vector<8x640xf32>
    %353 = vector.extract_strided_slice %3 {offsets = [0, 715], sizes = [3, 640], strides = [1, 1]} : vector<3x1920xbf16> to vector<3x640xbf16>
    %c70 = arith.constant 70 : index
    %c0_215 = arith.constant 0 : index
    %c0_216 = arith.constant 0 : index
    %354 = vector.load %arg4[%c70, %c0_215, %c0_216] : memref<81x8x3xbf16, #tpu.memory_space<vmem>>, vector<1x8x3xbf16>
    %355 = vector.shape_cast %354 : vector<1x8x3xbf16> to vector<8x3xbf16>
    %cst_217 = arith.constant dense<0.000000e+00> : vector<8x640xf32>
    %356 = tpu.matmul %355, %353, %cst_217 {dimension_numbers = #tpu.dot_dimension_numbers<[1], [0], [0], [1], [0, 0, 1, 1], [], []>} : vector<8x3xbf16>, vector<3x640xbf16>, vector<8x640xf32> -> vector<8x640xf32>
    %357 = arith.addf %352, %356 : vector<8x640xf32>
    %358 = vector.extract_strided_slice %3 {offsets = [0, 716], sizes = [3, 640], strides = [1, 1]} : vector<3x1920xbf16> to vector<3x640xbf16>
    %c71 = arith.constant 71 : index
    %c0_218 = arith.constant 0 : index
    %c0_219 = arith.constant 0 : index
    %359 = vector.load %arg4[%c71, %c0_218, %c0_219] : memref<81x8x3xbf16, #tpu.memory_space<vmem>>, vector<1x8x3xbf16>
    %360 = vector.shape_cast %359 : vector<1x8x3xbf16> to vector<8x3xbf16>
    %cst_220 = arith.constant dense<0.000000e+00> : vector<8x640xf32>
    %361 = tpu.matmul %360, %358, %cst_220 {dimension_numbers = #tpu.dot_dimension_numbers<[1], [0], [0], [1], [0, 0, 1, 1], [], []>} : vector<8x3xbf16>, vector<3x640xbf16>, vector<8x640xf32> -> vector<8x640xf32>
    %362 = arith.addf %357, %361 : vector<8x640xf32>
    %363 = vector.extract_strided_slice %3 {offsets = [0, 732], sizes = [3, 640], strides = [1, 1]} : vector<3x1920xbf16> to vector<3x640xbf16>
    %c72 = arith.constant 72 : index
    %c0_221 = arith.constant 0 : index
    %c0_222 = arith.constant 0 : index
    %364 = vector.load %arg4[%c72, %c0_221, %c0_222] : memref<81x8x3xbf16, #tpu.memory_space<vmem>>, vector<1x8x3xbf16>
    %365 = vector.shape_cast %364 : vector<1x8x3xbf16> to vector<8x3xbf16>
    %cst_223 = arith.constant dense<0.000000e+00> : vector<8x640xf32>
    %366 = tpu.matmul %365, %363, %cst_223 {dimension_numbers = #tpu.dot_dimension_numbers<[1], [0], [0], [1], [0, 0, 1, 1], [], []>} : vector<8x3xbf16>, vector<3x640xbf16>, vector<8x640xf32> -> vector<8x640xf32>
    %367 = arith.addf %362, %366 : vector<8x640xf32>
    %368 = vector.extract_strided_slice %3 {offsets = [0, 733], sizes = [3, 640], strides = [1, 1]} : vector<3x1920xbf16> to vector<3x640xbf16>
    %c73 = arith.constant 73 : index
    %c0_224 = arith.constant 0 : index
    %c0_225 = arith.constant 0 : index
    %369 = vector.load %arg4[%c73, %c0_224, %c0_225] : memref<81x8x3xbf16, #tpu.memory_space<vmem>>, vector<1x8x3xbf16>
    %370 = vector.shape_cast %369 : vector<1x8x3xbf16> to vector<8x3xbf16>
    %cst_226 = arith.constant dense<0.000000e+00> : vector<8x640xf32>
    %371 = tpu.matmul %370, %368, %cst_226 {dimension_numbers = #tpu.dot_dimension_numbers<[1], [0], [0], [1], [0, 0, 1, 1], [], []>} : vector<8x3xbf16>, vector<3x640xbf16>, vector<8x640xf32> -> vector<8x640xf32>
    %372 = arith.addf %367, %371 : vector<8x640xf32>
    %373 = vector.extract_strided_slice %3 {offsets = [0, 734], sizes = [3, 640], strides = [1, 1]} : vector<3x1920xbf16> to vector<3x640xbf16>
    %c74 = arith.constant 74 : index
    %c0_227 = arith.constant 0 : index
    %c0_228 = arith.constant 0 : index
    %374 = vector.load %arg4[%c74, %c0_227, %c0_228] : memref<81x8x3xbf16, #tpu.memory_space<vmem>>, vector<1x8x3xbf16>
    %375 = vector.shape_cast %374 : vector<1x8x3xbf16> to vector<8x3xbf16>
    %cst_229 = arith.constant dense<0.000000e+00> : vector<8x640xf32>
    %376 = tpu.matmul %375, %373, %cst_229 {dimension_numbers = #tpu.dot_dimension_numbers<[1], [0], [0], [1], [0, 0, 1, 1], [], []>} : vector<8x3xbf16>, vector<3x640xbf16>, vector<8x640xf32> -> vector<8x640xf32>
    %377 = arith.addf %372, %376 : vector<8x640xf32>
    %378 = vector.extract_strided_slice %3 {offsets = [0, 735], sizes = [3, 640], strides = [1, 1]} : vector<3x1920xbf16> to vector<3x640xbf16>
    %c75 = arith.constant 75 : index
    %c0_230 = arith.constant 0 : index
    %c0_231 = arith.constant 0 : index
    %379 = vector.load %arg4[%c75, %c0_230, %c0_231] : memref<81x8x3xbf16, #tpu.memory_space<vmem>>, vector<1x8x3xbf16>
    %380 = vector.shape_cast %379 : vector<1x8x3xbf16> to vector<8x3xbf16>
    %cst_232 = arith.constant dense<0.000000e+00> : vector<8x640xf32>
    %381 = tpu.matmul %380, %378, %cst_232 {dimension_numbers = #tpu.dot_dimension_numbers<[1], [0], [0], [1], [0, 0, 1, 1], [], []>} : vector<8x3xbf16>, vector<3x640xbf16>, vector<8x640xf32> -> vector<8x640xf32>
    %382 = arith.addf %377, %381 : vector<8x640xf32>
    %383 = vector.extract_strided_slice %3 {offsets = [0, 736], sizes = [3, 640], strides = [1, 1]} : vector<3x1920xbf16> to vector<3x640xbf16>
    %c76 = arith.constant 76 : index
    %c0_233 = arith.constant 0 : index
    %c0_234 = arith.constant 0 : index
    %384 = vector.load %arg4[%c76, %c0_233, %c0_234] : memref<81x8x3xbf16, #tpu.memory_space<vmem>>, vector<1x8x3xbf16>
    %385 = vector.shape_cast %384 : vector<1x8x3xbf16> to vector<8x3xbf16>
    %cst_235 = arith.constant dense<0.000000e+00> : vector<8x640xf32>
    %386 = tpu.matmul %385, %383, %cst_235 {dimension_numbers = #tpu.dot_dimension_numbers<[1], [0], [0], [1], [0, 0, 1, 1], [], []>} : vector<8x3xbf16>, vector<3x640xbf16>, vector<8x640xf32> -> vector<8x640xf32>
    %387 = arith.addf %382, %386 : vector<8x640xf32>
    %388 = vector.extract_strided_slice %3 {offsets = [0, 737], sizes = [3, 640], strides = [1, 1]} : vector<3x1920xbf16> to vector<3x640xbf16>
    %c77 = arith.constant 77 : index
    %c0_236 = arith.constant 0 : index
    %c0_237 = arith.constant 0 : index
    %389 = vector.load %arg4[%c77, %c0_236, %c0_237] : memref<81x8x3xbf16, #tpu.memory_space<vmem>>, vector<1x8x3xbf16>
    %390 = vector.shape_cast %389 : vector<1x8x3xbf16> to vector<8x3xbf16>
    %cst_238 = arith.constant dense<0.000000e+00> : vector<8x640xf32>
    %391 = tpu.matmul %390, %388, %cst_238 {dimension_numbers = #tpu.dot_dimension_numbers<[1], [0], [0], [1], [0, 0, 1, 1], [], []>} : vector<8x3xbf16>, vector<3x640xbf16>, vector<8x640xf32> -> vector<8x640xf32>
    %392 = arith.addf %387, %391 : vector<8x640xf32>
    %393 = vector.extract_strided_slice %3 {offsets = [0, 738], sizes = [3, 640], strides = [1, 1]} : vector<3x1920xbf16> to vector<3x640xbf16>
    %c78 = arith.constant 78 : index
    %c0_239 = arith.constant 0 : index
    %c0_240 = arith.constant 0 : index
    %394 = vector.load %arg4[%c78, %c0_239, %c0_240] : memref<81x8x3xbf16, #tpu.memory_space<vmem>>, vector<1x8x3xbf16>
    %395 = vector.shape_cast %394 : vector<1x8x3xbf16> to vector<8x3xbf16>
    %cst_241 = arith.constant dense<0.000000e+00> : vector<8x640xf32>
    %396 = tpu.matmul %395, %393, %cst_241 {dimension_numbers = #tpu.dot_dimension_numbers<[1], [0], [0], [1], [0, 0, 1, 1], [], []>} : vector<8x3xbf16>, vector<3x640xbf16>, vector<8x640xf32> -> vector<8x640xf32>
    %397 = arith.addf %392, %396 : vector<8x640xf32>
    %398 = vector.extract_strided_slice %3 {offsets = [0, 739], sizes = [3, 640], strides = [1, 1]} : vector<3x1920xbf16> to vector<3x640xbf16>
    %c79 = arith.constant 79 : index
    %c0_242 = arith.constant 0 : index
    %c0_243 = arith.constant 0 : index
    %399 = vector.load %arg4[%c79, %c0_242, %c0_243] : memref<81x8x3xbf16, #tpu.memory_space<vmem>>, vector<1x8x3xbf16>
    %400 = vector.shape_cast %399 : vector<1x8x3xbf16> to vector<8x3xbf16>
    %cst_244 = arith.constant dense<0.000000e+00> : vector<8x640xf32>
    %401 = tpu.matmul %400, %398, %cst_244 {dimension_numbers = #tpu.dot_dimension_numbers<[1], [0], [0], [1], [0, 0, 1, 1], [], []>} : vector<8x3xbf16>, vector<3x640xbf16>, vector<8x640xf32> -> vector<8x640xf32>
    %402 = arith.addf %397, %401 : vector<8x640xf32>
    %403 = vector.extract_strided_slice %3 {offsets = [0, 740], sizes = [3, 640], strides = [1, 1]} : vector<3x1920xbf16> to vector<3x640xbf16>
    %c80 = arith.constant 80 : index
    %c0_245 = arith.constant 0 : index
    %c0_246 = arith.constant 0 : index
    %404 = vector.load %arg4[%c80, %c0_245, %c0_246] : memref<81x8x3xbf16, #tpu.memory_space<vmem>>, vector<1x8x3xbf16>
    %405 = vector.shape_cast %404 : vector<1x8x3xbf16> to vector<8x3xbf16>
    %cst_247 = arith.constant dense<0.000000e+00> : vector<8x640xf32>
    %406 = tpu.matmul %405, %403, %cst_247 {dimension_numbers = #tpu.dot_dimension_numbers<[1], [0], [0], [1], [0, 0, 1, 1], [], []>} : vector<8x3xbf16>, vector<3x640xbf16>, vector<8x640xf32> -> vector<8x640xf32>
    %407 = arith.addf %402, %406 : vector<8x640xf32>
    %c0_248 = arith.constant 0 : index
    %c0_249 = arith.constant 0 : index
    %408 = vector.load %arg5[%c0_248, %c0_249] : memref<8x1xf32, #tpu.memory_space<vmem>>, vector<8x1xf32>
    %409 = vector.broadcast %408 : vector<8x1xf32> to vector<8x640xf32>
    %410 = arith.addf %407, %409 : vector<8x640xf32>
    %cst_250 = arith.constant 0.000000e+00 : f32
    %411 = vector.broadcast %cst_250 : f32 to vector<8x640xf32>
    %412 = arith.cmpf oge, %410, %411 : vector<8x640xf32>
    %cst_251 = arith.constant 2.500000e-01 : f32
    %413 = vector.broadcast %cst_251 : f32 to vector<8x640xf32>
    %414 = arith.mulf %413, %410 : vector<8x640xf32>
    %415 = arith.select %412, %410, %414 : vector<8x640xi1>, vector<8x640xf32>
    %c0_252 = arith.constant 0 : index
    %c0_253 = arith.constant 0 : index
    %416 = vector.load %arg6[%c0_252, %c0_253] : memref<1x640xbf16, #tpu.memory_space<vmem>>, vector<1x640xbf16>
    %417 = arith.extf %416 : vector<1x640xbf16> to vector<1x640xf32>
    %418 = vector.broadcast %417 : vector<1x640xf32> to vector<8x640xf32>
    %419 = arith.mulf %415, %418 : vector<8x640xf32>
    %420 = arith.truncf %419 : vector<8x640xf32> to vector<8x640xbf16>
    %c0_254 = arith.constant 0 : index
    %c0_255 = arith.constant 0 : index
    %421 = vector.load %arg7[%c0_254, %c0_255] : memref<8x640xbf16, #tpu.memory_space<vmem>>, vector<8x640xbf16>
    tpu.vector_store %arg7[%c0_254, %c0_255], %420 {strides = array<i32>} : memref<8x640xbf16, #tpu.memory_space<vmem>>, vector<8x640xbf16>,
    return
  }
  func.func @transform_0(%arg0: i32) -> (i32, i32) {
    %c1_i32 = arith.constant 1 : i32
    %0 = arith.subi %arg0, %c1_i32 : i32
    %c0_i32 = arith.constant 0 : i32
    %1 = arith.maxsi %0, %c0_i32 : i32
    %c0_i32_0 = arith.constant 0 : i32
    %c0_i32_1 = arith.constant 0 : i32
    return %c0_i32_0, %1 : i32, i32
  }
  func.func @transform_1(%arg0: i32) -> (i32, i32) {
    %c0_i32 = arith.constant 0 : i32
    %c0_i32_0 = arith.constant 0 : i32
    return %c0_i32, %arg0 : i32, i32
  }
  func.func @transform_2(%arg0: i32) -> (i32, i32) {
    %c1_i32 = arith.constant 1 : i32
    %0 = arith.addi %arg0, %c1_i32 : i32
    %c3_i32 = arith.constant 3 : i32
    %1 = arith.minsi %0, %c3_i32 : i32
    %c0_i32 = arith.constant 0 : i32
    %c0_i32_0 = arith.constant 0 : i32
    return %c0_i32, %1 : i32, i32
  }
  func.func @transform_3(%arg0: i32) -> (i32, i32, i32) {
    %c0_i32 = arith.constant 0 : i32
    %c0_i32_0 = arith.constant 0 : i32
    %c0_i32_1 = arith.constant 0 : i32
    %c0_i32_2 = arith.constant 0 : i32
    return %c0_i32, %c0_i32_0, %c0_i32_1 : i32, i32, i32
  }
  func.func @transform_4(%arg0: i32) -> (i32, i32) {
    %c0_i32 = arith.constant 0 : i32
    %c0_i32_0 = arith.constant 0 : i32
    %c0_i32_1 = arith.constant 0 : i32
    return %c0_i32, %c0_i32_0 : i32, i32
  }
  func.func @transform_5(%arg0: i32) -> (i32, i32) {
    %c0_i32 = arith.constant 0 : i32
    %c0_i32_0 = arith.constant 0 : i32
    return %c0_i32, %arg0 : i32, i32
  }
  func.func @transform_6(%arg0: i32) -> (i32, i32) {
    %c0_i32 = arith.constant 0 : i32
    %c0_i32_0 = arith.constant 0 : i32
    return %c0_i32, %arg0 : i32, i32
  }
}

</mosaic_0001>

<bundles_post_ra>
// kernel: tpu_custom_call.1
= control target key start
LH: loop header
LB: loop body
LE: loop exit
PB: predicated region body
PF: predicated region fallthrough
CT: control target
= control target key end

     0   :  { %11 = vsyncpa [#allocation3], 0  ;;  %s18540_s0 = inlined_call_operand.vmem [shape: bf16[3,2560], index: 0, kind: input, shape index: {}]   ;;  %s18541_s1 = inlined_call_operand.vmem [shape: bf16[3,2560], index: 1, kind: input, shape index: {}]   ;;  %s18542_s2 = inlined_call_operand.vmem [shape: bf16[3,2560], index: 2, kind: input, shape index: {}]   ;;  %s18543_s3 = inlined_call_operand.vmem [shape: bf16[81,8,3], index: 3, kind: input, shape index: {}]   ;;  %s18544_s4 = inlined_call_operand.vmem [shape: f32[8,1], index: 4, kind: input, shape index: {}]   ;;  %s18545_s5 = inlined_call_operand.vmem [shape: bf16[1,2560], index: 5, kind: input, shape index: {}]   ;;  %s18546_s6 = inlined_call_operand.hbm [shape: bf16[8,2560], index: 6, kind: output, shape index: {}]  }
   0x1   :  { %13 = vsyncpa [#allocation3 + $0x1], 0  ;;  %s15157_s21 = smov 0   ;;  %s15159_s22 = smov 0  }
   0x2   :  { %s15161_s23 = smov 0   ;;  %s15163_s24 = smov 0  }
   0x3 LB: > { %s15178_s25 = sadd.s32 4294967295, %s15038_s24   ;;  %s13850_s26 = sadd.s32 4294967294, %s15038_s24   ;;  %s15038_s24 = sphi %s15163_s24, %s18554_s24   ;;  %s15034_s23 = sphi %s15161_s23, %s18553_s23   ;;  %s15030_s22 = sphi %s15159_s22, %s18552_s22   ;;  %s15026_s21 = sphi %s15157_s21, %s18551_s21  }
   0x4   : > { %s15182_s27 = sadd.s32 1, %s15038_s24   ;;  %s184_s28 = sadd.s32 1, %s15034_s23 }
   0x5   : > { %s181_s29 = ssub.s32 %s15038_s24, %s15182_s27  ;;  %p194_p0 = scmp.ne.s32.totalorder %s15034_s23, %s15030_s22 }
   0x6   : > { %p182_p1 = scmp.eq.s32.totalorder %s181_s29, 0  ;;  %p195_p2 = scmp.eq.s32.totalorder %s15178_s25, 3 }
   0x7   : > { %p200_p3 = scmp.ne.s32.totalorder %s15030_s22, %s15026_s21  ;;  %p201_p4 = scmp.eq.s32.totalorder %s13850_s26, 3 }
   0x8   : > { %s15193_s30 = scalar_select %p182_p1, %s15034_s23, %s184_s28  }
   0x9   : > { %p15195_p5 = por %p195_p2, %p194_p0  ;;  %p15199_p6 = por %p201_p4, %p200_p3 }
   0xa   : > { %p13855_p7 = scmp.ge.s32.totalorder %s15038_s24, 1  ;;  %p272_p8 = scmp.lt.s32.totalorder %s15038_s24, 5 }
   0xc   : > { %p273_p9 = pnand %p13855_p7, %p272_p8 }
   0xd   : > { %s334_s9 = smul.u32 (!%p273_p9), 5, %s15178_s25  ;;  %s13856_s10 = sadd.s32 (!%p273_p9), 4294967295, %s15178_s25 }
   0xe   : > { %276 = sbr.rel (%p273_p9) target bundleno = 1339 (0x53b), region = 44  ;;  %p323_p11 = scmp.gt.s32.totalorder (!%p273_p9), %s13856_s10, 0 }
   0xf   : > { %p335_p10 = scmp.lt.s32.totalorder (!%p273_p9), %s334_s9, 19  ;;  %s15042_s16 = smov (!%p273_p9), 99  }
  0x10   : > { %s15043_s26 = smov (!%p273_p9), 100   ;;  %s15044_s28 = smov (!%p273_p9), 98  }
  0x11   : > { %s15045_s29 = smov (!%p273_p9), 97   ;;  %s15048_s12 = smov (!%p273_p9), 94  }
  0x12   : > { %s15049_s13 = smov (!%p273_p9), 93   ;;  %s15059_s19 = smov (!%p273_p9), 71  }
  0x13   : > { %v377_v0 = vlaneseq  ;;  %v15040_v1 = vmov 1983009808   ;;  %s18556_s9 = smov (!%p335_p10, %s334_s9), 19  ;;  %s18558_s10 = smov (!%p323_p11, %s13856_s10), 0  ;;  %v15041_v9 = vmov 0   ;;  %vm430_vm0 = vcmask 1040384  }
  0x14   : > { %v375_v2 = vunpack.c.l.s4 %v15040_v1  ;;  %s13858_s11 = sshll.u32 %s18556_s9, 1  ;;  %s325_s15 = smul.u32 5, %s18558_s10  ;;  %481 = vmatprep.mubr.bf16.mxu0 %v15041_v9  ;;  %522 = vmatprep.mubr.bf16.mxu1 %v15041_v9  ;;  %vm431_vm1 = vcmask 1041408   ;;  %v15052_v16 = vmov 65535   ;;  %vm420_vm2 = vcmask 809984  }
  0x15   : > { %v15207_v3 = vshrl.u32 %v377_v0, 7  ;;  %s15216_s14 = scalar_lea.vmem %s18541_s1, %s13858_s11  ;;  %14965 = vset.pattern.permute.xlu0 %v15041_v9  ;;  %s15046_s10 = smov 96   ;;  %v432_v17 = vsel %vm430_vm0, 4294967295, %v15052_v16  ;;  %v13863_v27 = vld [vmem:[%s18543_s3 + $0x4] sm:$0xf]  ;;  %vm426_vm3 = vcmask 23552  }
  0x16   : > { %v376_v4 = vunpack.c.0.s8 %v375_v2  ;;  %v360_v6 = vld [vmem:[%s15216_s14] sm:$0xff]  ;;  %p326_p12 = scmp.lt.s32.totalorder %s325_s15, 19  ;;  %v15248_v14 = vld.sshfl [vmem:[%s15216_s14 + $0x8] sm:$0x3 pattern:$0x76325410] }
  0x17   : > { %v373_v8 = vcombine.high %v360_v6, %v360_v6  ;;  %s15047_s11 = smov 95   ;;  %v15315_v18 = vsel %vm431_vm1, %v432_v17, 0  ;;  %v15054_v30 = vmov 0.0   ;;  %vm15055_vm4 = vmmov 0   ;;  %v405_v47 = vld [vmem:[%s18543_s3] sm:$0xf] }
  0x18   : > { %v379_v5 = vsub.s32 %v376_v4, %v15207_v3  ;;  %s18560_s15 = smov (!%p326_p12, %s325_s15), 19  ;;  %vm583_vm5 = vcmask 818176   ;;  %vm743_vm6 = vcmask 801792   ;;  %v13870_v0 = vld [vmem:[%s18543_s3 + $0x8] sm:$0xf]  ;;  %vm908_vm7 = vcmask 793600  }
  0x19   : > { %s13857_s17 = sshll.u32 %s18560_s15, 1  ;;  %s15050_s15 = smov 92   ;;  %vm1073_vm8 = vcmask 785408   ;;  %vm1238_vm9 = vcmask 777216   ;;  %vm1403_vm10 = vcmask 769024   ;;  %vm1568_vm11 = vcmask 760832  }
  0x1a   : > { %v15219_v7 = vrot.slane %v360_v6, %v379_v5  ;;  %v15228_v11 = vrot.slane %v373_v8, %v379_v5  ;;  %s15234_s20 = scalar_lea.vmem %s18540_s0, %s13857_s17  ;;  %s15053_s17 = smov 75   ;;  %vm1733_vm12 = vcmask 752640   ;;  %vm1898_vm13 = vcmask 621568  }
  0x1b   : > { %v15237_v12 = vld.sshfl [vmem:[%s15234_s20 + $0x8] sm:$0x3 pattern:$0x76325410]  ;;  %s15062_s18 = smov 68   ;;  %vm2063_vm14 = vcmask 613376  }
  0x1c   : > { %410 = vrot.lane.b32.xlu0 %v15219_v7, %s15042_s16  ;;  %v15226_v10 = vcombine.high %v15219_v7, %v15219_v7  ;;  %v15242_v13 = vcombine.high %v15228_v11, %v15228_v11  ;;  %408 = vrot.lane.b32.xlu1 %v15237_v12, %s15042_s16  ;;  %vm2228_vm15 = vcmask 605184   ;;  %vm2393_vm0 = vcmask 596992  }
  0x1d   : > { %vm2558_vm1 = vcmask 588800  }
  0x20   : > { %412 = vrot.lane.b32.xlu0 %v15226_v10, %s15042_s16  ;;  %414 = vrot.lane.b32.xlu1 %v15228_v11, %s15042_s16 }
  0x24   : > { %416 = vrot.lane.b32.xlu0 %v15242_v13, %s15042_s16  ;;  %418 = vrot.lane.b32.xlu1 %v15248_v14, %s15042_s16  ;;  %s15051_s16 = smov 76  }
  0x28   : > { %573 = vrot.lane.b32.xlu0 %v15219_v7, %s15043_s26  ;;  %575 = vrot.lane.b32.xlu1 %v15226_v10, %s15043_s26 }
  0x2c   : > { %571 = vrot.lane.b32.xlu0 %v15237_v12, %s15043_s26  ;;  %577 = vrot.lane.b32.xlu1 %v15228_v11, %s15043_s26 }
  0x30   : > { %579 = vrot.lane.b32.xlu0 %v15242_v13, %s15043_s26  ;;  %581 = vrot.lane.b32.xlu1 %v15248_v14, %s15043_s26 }
  0x34   : > { %733 = vrot.lane.b32.xlu0 %v15219_v7, %s15044_s28  ;;  %735 = vrot.lane.b32.xlu1 %v15226_v10, %s15044_s28 }
  0x38   : > { %731 = vrot.lane.b32.xlu0 %v15237_v12, %s15044_s28  ;;  %737 = vrot.lane.b32.xlu1 %v15228_v11, %s15044_s28 }
  0x3c   : > { %739 = vrot.lane.b32.xlu0 %v15242_v13, %s15044_s28  ;;  %741 = vrot.lane.b32.xlu1 %v15248_v14, %s15044_s28  ;;  %s15056_s28 = smov 74  }
  0x40   : > { %898 = vrot.lane.b32.xlu0 %v15219_v7, %s15045_s29  ;;  %900 = vrot.lane.b32.xlu1 %v15226_v10, %s15045_s29 }
  0x44   : > { %896 = vrot.lane.b32.xlu0 %v15237_v12, %s15045_s29  ;;  %902 = vrot.lane.b32.xlu1 %v15228_v11, %s15045_s29 }
  0x48   : > { %904 = vrot.lane.b32.xlu0 %v15242_v13, %s15045_s29  ;;  %906 = vrot.lane.b32.xlu1 %v15248_v14, %s15045_s29  ;;  %s15063_s29 = smov 52  }
  0x4c   : > { %1063 = vrot.lane.b32.xlu0 %v15219_v7, %s15046_s10  ;;  %1065 = vrot.lane.b32.xlu1 %v15226_v10, %s15046_s10 }
  0x50   : > { %1061 = vrot.lane.b32.xlu0 %v15237_v12, %s15046_s10  ;;  %1067 = vrot.lane.b32.xlu1 %v15228_v11, %s15046_s10 }
  0x54   : > { %1069 = vrot.lane.b32.xlu0 %v15242_v13, %s15046_s10  ;;  %1071 = vrot.lane.b32.xlu1 %v15248_v14, %s15046_s10  ;;  %s15060_s10 = smov 70  }
  0x58   : > { %1228 = vrot.lane.b32.xlu0 %v15219_v7, %s15047_s11  ;;  %1230 = vrot.lane.b32.xlu1 %v15226_v10, %s15047_s11 }
  0x5c   : > { %1226 = vrot.lane.b32.xlu0 %v15237_v12, %s15047_s11  ;;  %1232 = vrot.lane.b32.xlu1 %v15228_v11, %s15047_s11 }
  0x60   : > { %1234 = vrot.lane.b32.xlu0 %v15242_v13, %s15047_s11  ;;  %1236 = vrot.lane.b32.xlu1 %v15248_v14, %s15047_s11  ;;  %s15057_s11 = smov 73  }
  0x64   : > { %1393 = vrot.lane.b32.xlu0 %v15219_v7, %s15048_s12  ;;  %1395 = vrot.lane.b32.xlu1 %v15226_v10, %s15048_s12 }
  0x68   : > { %1391 = vrot.lane.b32.xlu0 %v15237_v12, %s15048_s12  ;;  %1397 = vrot.lane.b32.xlu1 %v15228_v11, %s15048_s12 }
  0x6c   : > { %1399 = vrot.lane.b32.xlu0 %v15242_v13, %s15048_s12  ;;  %1401 = vrot.lane.b32.xlu1 %v15248_v14, %s15048_s12  ;;  %s15064_s12 = smov 51  }
  0x70   : > { %1558 = vrot.lane.b32.xlu0 %v15219_v7, %s15049_s13  ;;  %1560 = vrot.lane.b32.xlu1 %v15226_v10, %s15049_s13 }
  0x74   : > { %1556 = vrot.lane.b32.xlu0 %v15237_v12, %s15049_s13  ;;  %1562 = vrot.lane.b32.xlu1 %v15228_v11, %s15049_s13 }
  0x78   : > { %1564 = vrot.lane.b32.xlu0 %v15242_v13, %s15049_s13  ;;  %1566 = vrot.lane.b32.xlu1 %v15248_v14, %s15049_s13  ;;  %s15061_s13 = smov 69  }
  0x7c   : > { %1723 = vrot.lane.b32.xlu0 %v15219_v7, %s15050_s15  ;;  %1725 = vrot.lane.b32.xlu1 %v15226_v10, %s15050_s15 }
  0x80   : > { %1721 = vrot.lane.b32.xlu0 %v15237_v12, %s15050_s15  ;;  %1727 = vrot.lane.b32.xlu1 %v15228_v11, %s15050_s15 }
  0x84   : > { %1729 = vrot.lane.b32.xlu0 %v15242_v13, %s15050_s15  ;;  %1731 = vrot.lane.b32.xlu1 %v15248_v14, %s15050_s15  ;;  %s15058_s15 = smov 72  }
  0x88   : > { %1888 = vrot.lane.b32.xlu0 %v15219_v7, %s15051_s16  ;;  %1890 = vrot.lane.b32.xlu1 %v15226_v10, %s15051_s16 }
  0x8c   : > { %1886 = vrot.lane.b32.xlu0 %v15237_v12, %s15051_s16  ;;  %1892 = vrot.lane.b32.xlu1 %v15228_v11, %s15051_s16 }
  0x8e   : > { %v411_v15 = vpop.permute.xlu0 %410  ;;  %v409_v20 = vpop.permute.xlu1 %408 }
  0x8f   : > { %v421_v22 = vsel %vm420_vm2, %v409_v20, %v411_v15 }
  0x90   : > { %1894 = vrot.lane.b32.xlu0 %v15242_v13, %s15051_s16  ;;  %1896 = vrot.lane.b32.xlu1 %v15248_v14, %s15051_s16  ;;  %v435_v24 = vand.u32 %v15315_v18, %v421_v22 }
  0x92   : > { %v413_v19 = vpop.permute.xlu0 %412  ;;  %v415_v26 = vpop.permute.xlu1 %414 }
  0x93   : > { %v422_v21 = vsel %vm420_vm2, %v411_v15, %v413_v19  ;;  %v423_v29 = vsel %vm420_vm2, %v413_v19, %v415_v26 }
  0x94   : > { %2053 = vrot.lane.b32.xlu0 %v15219_v7, %s15053_s17  ;;  %v438_v23 = vand.u32 %v15315_v18, %v422_v21  ;;  %2055 = vrot.lane.b32.xlu1 %v15226_v10, %s15053_s17  ;;  %v441_v33 = vand.u32 %v15315_v18, %v423_v29 }
  0x96   : > { %463 = vmatprep.subr.bf16.mxu0 %v438_v23  ;;  %v417_v25 = vpop.permute.xlu0 %416  ;;  %v419_v34 = vpop.permute.xlu1 %418 }
  0x97   : > { %464 = vmatpush1.bf16.msra.mxu0 %v435_v24  ;;  %v424_v28 = vsel %vm420_vm2, %v415_v26, %v417_v25  ;;  %v425_v35 = vsel %vm420_vm2, %v417_v25, %v419_v34  ;;  %v13874_v26 = vld [vmem:[%s18543_s3 + $0xc] sm:$0xf]  ;;  %vm2723_vm2 = vcmask 580608  }
  0x98   : > { %2051 = vrot.lane.b32.xlu0 %v15237_v12, %s15053_s17  ;;  %14358 = vmatprep.subr.bf16.mxu0 %v15054_v30  ;;  %v444_v31 = vand.u32 %v15315_v18, %v424_v28  ;;  %v447_v36 = vand.u32 %v15315_v18, %v425_v35 }
  0x99   : > { %2057 = vrot.lane.b32.xlu1 %v15228_v11, %s15053_s17 }
  0x9a   : > { %v574_v32 = vpop.permute.xlu0 %573  ;;  %13864 = vmatmul.mubr.msk.bf16.vlgmr.msra.gmra.mxu0 %vm426_vm3, %v13863_v27  ;;  %504 = vmatprep.subr.bf16.mxu1 %v444_v31  ;;  %v576_v38 = vpop.permute.xlu1 %575 }
  0x9b   : > { %14360 = vmatprep.mubr.msk.bf16.mxu0 %vm15055_vm4, %v15054_v30  ;;  %505 = vmatpush1.bf16.msra.mxu1 %v441_v33  ;;  %v585_v40 = vsel %vm583_vm5, %v574_v32, %v576_v38 }
  0x9c   : > { %2059 = vrot.lane.b32.xlu0 %v15242_v13, %s15053_s17  ;;  %14359 = vmatpush3.bf16.msra.mxu0 %v447_v36  ;;  %v15356_v42 = vand.u32 %v585_v40, %v15315_v18 }
  0x9d   : > { %2061 = vrot.lane.b32.xlu1 %v15248_v14, %s15053_s17  ;;  %s15065_s17 = smov 50  }
  0x9e   : > { %v572_v37 = vpop.permute.xlu0 %571  ;;  %13865 = vmatmul.mubr.msk.bf16.vlgmr.msra.gmra.mxu1 %vm426_vm3, %v13863_v27  ;;  %621 = vmatprep.subr.bf16.mxu1 %v15356_v42  ;;  %v578_v44 = vpop.permute.xlu1 %577 }
  0x9f   : > { %v584_v39 = vsel %vm583_vm5, %v572_v37, %v574_v32  ;;  %639 = vmatprep.mubr.bf16.mxu1 %v15041_v9  ;;  %v586_v45 = vsel %vm583_vm5, %v576_v38, %v578_v44 }
  0xa0   : > { %v593_v41 = vand.u32 %v584_v39, %v15315_v18  ;;  %2218 = vrot.lane.b32.xlu0 %v15219_v7, %s15056_s28  ;;  %v15375_v49 = vand.u32 %v586_v45, %v15315_v18  ;;  %v13878_v45 = vld [vmem:[%s18543_s3 + $0x10] sm:$0xf] }
  0xa1   : > { %2220 = vrot.lane.b32.xlu1 %v15226_v10, %s15056_s28 }
  0xa2   : > { %v580_v43 = vpop.permute.xlu0 %579  ;;  %14361 = vmatmul.mubr.msk.bf16.vlgmr.msra.gmra.mxu0 %vm426_vm3, %v13863_v27  ;;  %622 = vmatpush1.bf16.msra.mxu1 %v593_v41  ;;  %v15377_v51 = vpop.permute.xlu1 %581 }
  0xa3   : > { %680 = vmatprep.mubr.bf16.mxu0 %v15041_v9  ;;  %v587_v46 = vsel %vm583_vm5, %v578_v44, %v580_v43  ;;  %14364 = vmatprep.subr.bf16.mxu1 %v15054_v30  ;;  %v588_v52 = vsel %vm583_vm5, %v580_v43, %v15377_v51 }
  0xa4   : > { %2216 = vrot.lane.b32.xlu0 %v15237_v12, %s15056_s28  ;;  %v15371_v48 = vand.u32 %v587_v46, %v15315_v18  ;;  %v15387_v53 = vand.u32 %v588_v52, %v15315_v18 }
  0xa5   : > { %2222 = vrot.lane.b32.xlu1 %v15228_v11, %s15056_s28 }
  0xa6   : > { %v734_v50 = vpop.permute.xlu0 %733  ;;  %13867 = vmatmul.mubr.msk.bf16.vlgmr.msra.gmra.mxu1 %vm426_vm3, %v405_v47  ;;  %662 = vmatprep.subr.bf16.mxu0 %v15371_v48  ;;  %v736_v55 = vpop.permute.xlu1 %735 }
  0xa7   : > { %663 = vmatpush1.bf16.msra.mxu0 %v15375_v49  ;;  %14366 = vmatprep.mubr.msk.bf16.mxu1 %vm15055_vm4, %v15054_v30  ;;  %v745_v57 = vsel %vm743_vm6, %v734_v50, %v736_v55 }
  0xa8   : > { %2224 = vrot.lane.b32.xlu0 %v15242_v13, %s15056_s28  ;;  %14365 = vmatpush3.bf16.msra.mxu1 %v15387_v53  ;;  %v756_v59 = vand.u32 %v745_v57, %v15315_v18 }
  0xa9   : > { %2226 = vrot.lane.b32.xlu1 %v15248_v14, %s15056_s28  ;;  %s15066_s28 = smov 49  }
  0xaa   : > { %v732_v54 = vpop.permute.xlu0 %731  ;;  %13868 = vmatmul.mubr.msk.bf16.vlgmr.msra.gmra.mxu0 %vm426_vm3, %v405_v47  ;;  %781 = vmatprep.subr.bf16.mxu0 %v756_v59  ;;  %v738_v61 = vpop.permute.xlu1 %737 }
  0xab   : > { %v744_v56 = vsel %vm743_vm6, %v732_v54, %v734_v50  ;;  %799 = vmatprep.mubr.bf16.mxu0 %v15041_v9  ;;  %v746_v62 = vsel %vm743_vm6, %v736_v55, %v738_v61 }
  0xac   : > { %v753_v58 = vand.u32 %v744_v56, %v15315_v18  ;;  %2383 = vrot.lane.b32.xlu0 %v15219_v7, %s15057_s11  ;;  %v759_v2 = vand.u32 %v746_v62, %v15315_v18 }
  0xad   : > { %2385 = vrot.lane.b32.xlu1 %v15226_v10, %s15057_s11 }
  0xae   : > { %v740_v60 = vpop.permute.xlu0 %739  ;;  %14367 = vmatmul.mubr.msk.bf16.vlgmr.msra.gmra.mxu1 %vm426_vm3, %v405_v47  ;;  %782 = vmatpush1.bf16.msra.mxu0 %v753_v58  ;;  %v742_v5 = vpop.permute.xlu1 %741 }
  0xaf   : > { %v747_v63 = vsel %vm743_vm6, %v738_v61, %v740_v60  ;;  %14370 = vmatprep.subr.bf16.mxu0 %v15054_v30  ;;  %840 = vmatprep.mubr.bf16.mxu1 %v15041_v9  ;;  %v748_v6 = vsel %vm743_vm6, %v740_v60, %v742_v5  ;;  %vm2888_vm6 = vcmask 572416  }
  0xb0   : > { %2381 = vrot.lane.b32.xlu0 %v15237_v12, %s15057_s11  ;;  %v762_v1 = vand.u32 %v747_v63, %v15315_v18  ;;  %v765_v8 = vand.u32 %v748_v6, %v15315_v18 }
  0xb1   : > { %2387 = vrot.lane.b32.xlu1 %v15228_v11, %s15057_s11 }
  0xb2   : > { %v899_v4 = vpop.permute.xlu0 %898  ;;  %13871 = vmatmul.mubr.msk.bf16.vlgmr.msra.gmra.mxu0 %vm426_vm3, %v13870_v0  ;;  %822 = vmatprep.subr.bf16.mxu1 %v762_v1  ;;  %v901_v16 = vpop.permute.xlu1 %900 }
  0xb3   : > { %823 = vmatpush1.bf16.msra.mxu1 %v759_v2  ;;  %14372 = vmatprep.mubr.msk.bf16.mxu0 %vm15055_vm4, %v15054_v30  ;;  %v910_v19 = vsel %vm908_vm7, %v899_v4, %v901_v16  ;;  %v13882_v2 = vld [vmem:[%s18543_s3 + $0x14] sm:$0xf] }
  0xb4   : > { %2389 = vrot.lane.b32.xlu0 %v15242_v13, %s15057_s11  ;;  %14371 = vmatpush3.bf16.msra.mxu0 %v765_v8  ;;  %v921_v21 = vand.u32 %v910_v19, %v15315_v18 }
  0xb5   : > { %2391 = vrot.lane.b32.xlu1 %v15248_v14, %s15057_s11  ;;  %s15078_s11 = smov 22  }
  0xb6   : > { %v897_v15 = vpop.permute.xlu0 %896  ;;  %13872 = vmatmul.mubr.msk.bf16.vlgmr.msra.gmra.mxu1 %vm426_vm3, %v13870_v0  ;;  %946 = vmatprep.subr.bf16.mxu1 %v921_v21  ;;  %v903_v23 = vpop.permute.xlu1 %902 }
  0xb7   : > { %v909_v17 = vsel %vm908_vm7, %v897_v15, %v899_v4  ;;  %964 = vmatprep.mubr.bf16.mxu1 %v15041_v9  ;;  %v911_v24 = vsel %vm908_vm7, %v901_v16, %v903_v23 }
  0xb8   : > { %v918_v20 = vand.u32 %v909_v17, %v15315_v18  ;;  %2548 = vrot.lane.b32.xlu0 %v15219_v7, %s15058_s15  ;;  %v924_v28 = vand.u32 %v911_v24, %v15315_v18 }
  0xb9   : > { %2550 = vrot.lane.b32.xlu1 %v15226_v10, %s15058_s15 }
  0xba   : > { %v905_v22 = vpop.permute.xlu0 %904  ;;  %14373 = vmatmul.mubr.msk.bf16.vlgmr.msra.gmra.mxu0 %vm426_vm3, %v13870_v0  ;;  %947 = vmatpush1.bf16.msra.mxu1 %v918_v20  ;;  %v907_v31 = vpop.permute.xlu1 %906 }
  0xbb   : > { %v912_v25 = vsel %vm908_vm7, %v903_v23, %v905_v22  ;;  %14376 = vmatprep.subr.bf16.mxu1 %v15054_v30  ;;  %1005 = vmatprep.mubr.bf16.mxu0 %v15041_v9  ;;  %v913_v32 = vsel %vm908_vm7, %v905_v22, %v907_v31  ;;  %vm3053_vm7 = vcmask 564224  }
  0xbc   : > { %2546 = vrot.lane.b32.xlu0 %v15237_v12, %s15058_s15  ;;  %v927_v27 = vand.u32 %v912_v25, %v15315_v18  ;;  %v930_v33 = vand.u32 %v913_v32, %v15315_v18 }
  0xbd   : > { %2552 = vrot.lane.b32.xlu1 %v15228_v11, %s15058_s15 }
  0xbe   : > { %v1064_v29 = vpop.permute.xlu0 %1063  ;;  %13875 = vmatmul.mubr.msk.bf16.vlgmr.msra.gmra.mxu1 %vm426_vm3, %v13874_v26  ;;  %987 = vmatprep.subr.bf16.mxu0 %v927_v27  ;;  %v1066_v35 = vpop.permute.xlu1 %1065 }
  0xbf   : > { %988 = vmatpush1.bf16.msra.mxu0 %v924_v28  ;;  %14378 = vmatprep.mubr.msk.bf16.mxu1 %vm15055_vm4, %v15054_v30  ;;  %v1075_v37 = vsel %vm1073_vm8, %v1064_v29, %v1066_v35  ;;  %v13886_v28 = vld [vmem:[%s18543_s3 + $0x18] sm:$0xf] }
  0xc0   : > { %2554 = vrot.lane.b32.xlu0 %v15242_v13, %s15058_s15  ;;  %14377 = vmatpush3.bf16.msra.mxu1 %v930_v33  ;;  %v1086_v39 = vand.u32 %v1075_v37, %v15315_v18 }
  0xc1   : > { %2556 = vrot.lane.b32.xlu1 %v15248_v14, %s15058_s15 }
  0xc2   : > { %v1062_v34 = vpop.permute.xlu0 %1061  ;;  %13876 = vmatmul.mubr.msk.bf16.vlgmr.msra.gmra.mxu0 %vm426_vm3, %v13874_v26  ;;  %1111 = vmatprep.subr.bf16.mxu0 %v1086_v39  ;;  %v1068_v41 = vpop.permute.xlu1 %1067 }
  0xc3   : > { %v1074_v36 = vsel %vm1073_vm8, %v1062_v34, %v1064_v29  ;;  %1129 = vmatprep.mubr.bf16.mxu0 %v15041_v9  ;;  %v1076_v43 = vsel %vm1073_vm8, %v1066_v35, %v1068_v41 }
  0xc4   : > { %v1083_v38 = vand.u32 %v1074_v36, %v15315_v18  ;;  %2713 = vrot.lane.b32.xlu0 %v15219_v7, %s15059_s19  ;;  %v1089_v47 = vand.u32 %v1076_v43, %v15315_v18 }
  0xc5   : > { %2715 = vrot.lane.b32.xlu1 %v15226_v10, %s15059_s19 }
  0xc6   : > { %v1070_v40 = vpop.permute.xlu0 %1069  ;;  %14379 = vmatmul.mubr.msk.bf16.vlgmr.msra.gmra.mxu1 %vm426_vm3, %v13874_v26  ;;  %1112 = vmatpush1.bf16.msra.mxu0 %v1083_v38  ;;  %v1072_v52 = vpop.permute.xlu1 %1071 }
  0xc7   : > { %v1077_v44 = vsel %vm1073_vm8, %v1068_v41, %v1070_v40  ;;  %14382 = vmatprep.subr.bf16.mxu0 %v15054_v30  ;;  %1170 = vmatprep.mubr.bf16.mxu1 %v15041_v9  ;;  %v1078_v54 = vsel %vm1073_vm8, %v1070_v40, %v1072_v52  ;;  %vm3218_vm8 = vcmask 556032  }
  0xc8   : > { %2711 = vrot.lane.b32.xlu0 %v15237_v12, %s15059_s19  ;;  %v1092_v46 = vand.u32 %v1077_v44, %v15315_v18  ;;  %v1095_v55 = vand.u32 %v1078_v54, %v15315_v18 }
  0xc9   : > { %2717 = vrot.lane.b32.xlu1 %v15228_v11, %s15059_s19 }
  0xca   : > { %v1229_v50 = vpop.permute.xlu0 %1228  ;;  %13879 = vmatmul.mubr.msk.bf16.vlgmr.msra.gmra.mxu0 %vm426_vm3, %v13878_v45  ;;  %1152 = vmatprep.subr.bf16.mxu1 %v1092_v46  ;;  %v1231_v57 = vpop.permute.xlu1 %1230 }
  0xcb   : > { %1153 = vmatpush1.bf16.msra.mxu1 %v1089_v47  ;;  %14384 = vmatprep.mubr.msk.bf16.mxu0 %vm15055_vm4, %v15054_v30  ;;  %v1240_v59 = vsel %vm1238_vm9, %v1229_v50, %v1231_v57  ;;  %v13890_v47 = vld [vmem:[%s18543_s3 + $0x1c] sm:$0xf] }
  0xcc   : > { %2719 = vrot.lane.b32.xlu0 %v15242_v13, %s15059_s19  ;;  %14383 = vmatpush3.bf16.msra.mxu0 %v1095_v55  ;;  %v1251_v61 = vand.u32 %v1240_v59, %v15315_v18 }
  0xcd   : > { %2721 = vrot.lane.b32.xlu1 %v15248_v14, %s15059_s19  ;;  %s15085_s19 = smov 127  }
  0xce   : > { %v1227_v56 = vpop.permute.xlu0 %1226  ;;  %13880 = vmatmul.mubr.msk.bf16.vlgmr.msra.gmra.mxu1 %vm426_vm3, %v13878_v45  ;;  %1276 = vmatprep.subr.bf16.mxu1 %v1251_v61  ;;  %v1233_v63 = vpop.permute.xlu1 %1232 }
  0xcf   : > { %v1239_v58 = vsel %vm1238_vm9, %v1227_v56, %v1229_v50  ;;  %1294 = vmatprep.mubr.bf16.mxu1 %v15041_v9  ;;  %v1241_v0 = vsel %vm1238_vm9, %v1231_v57, %v1233_v63 }
  0xd0   : > { %v1248_v60 = vand.u32 %v1239_v58, %v15315_v18  ;;  %2878 = vrot.lane.b32.xlu0 %v15219_v7, %s15060_s10  ;;  %v1254_v5 = vand.u32 %v1241_v0, %v15315_v18 }
  0xd1   : > { %2880 = vrot.lane.b32.xlu1 %v15226_v10, %s15060_s10 }
  0xd2   : > { %v1235_v62 = vpop.permute.xlu0 %1234  ;;  %14385 = vmatmul.mubr.msk.bf16.vlgmr.msra.gmra.mxu0 %vm426_vm3, %v13878_v45  ;;  %1277 = vmatpush1.bf16.msra.mxu1 %v1248_v60  ;;  %v1237_v8 = vpop.permute.xlu1 %1236 }
  0xd3   : > { %v1242_v1 = vsel %vm1238_vm9, %v1233_v63, %v1235_v62  ;;  %14388 = vmatprep.subr.bf16.mxu1 %v15054_v30  ;;  %1335 = vmatprep.mubr.bf16.mxu0 %v15041_v9  ;;  %v1243_v15 = vsel %vm1238_vm9, %v1235_v62, %v1237_v8  ;;  %vm3383_vm9 = vcmask 424960  }
  0xd4   : > { %2876 = vrot.lane.b32.xlu0 %v15237_v12, %s15060_s10  ;;  %v1257_v4 = vand.u32 %v1242_v1, %v15315_v18  ;;  %v1260_v16 = vand.u32 %v1243_v15, %v15315_v18 }
  0xd5   : > { %2882 = vrot.lane.b32.xlu1 %v15228_v11, %s15060_s10 }
  0xd6   : > { %v1394_v6 = vpop.permute.xlu0 %1393  ;;  %13883 = vmatmul.mubr.msk.bf16.vlgmr.msra.gmra.mxu1 %vm426_vm3, %v13882_v2  ;;  %1317 = vmatprep.subr.bf16.mxu0 %v1257_v4  ;;  %v1396_v19 = vpop.permute.xlu1 %1395 }
  0xd7   : > { %1318 = vmatpush1.bf16.msra.mxu0 %v1254_v5  ;;  %14390 = vmatprep.mubr.msk.bf16.mxu1 %vm15055_vm4, %v15054_v30  ;;  %v1405_v21 = vsel %vm1403_vm10, %v1394_v6, %v1396_v19  ;;  %v13894_v5 = vld [vmem:[%s18543_s3 + $0x20] sm:$0xf] }
  0xd8   : > { %2884 = vrot.lane.b32.xlu0 %v15242_v13, %s15060_s10  ;;  %14389 = vmatpush3.bf16.msra.mxu1 %v1260_v16  ;;  %v1416_v23 = vand.u32 %v1405_v21, %v15315_v18 }
  0xd9   : > { %2886 = vrot.lane.b32.xlu1 %v15248_v14, %s15060_s10  ;;  %s15075_s10 = smov 25  }
  0xda   : > { %v1392_v17 = vpop.permute.xlu0 %1391  ;;  %13884 = vmatmul.mubr.msk.bf16.vlgmr.msra.gmra.mxu0 %vm426_vm3, %v13882_v2  ;;  %1441 = vmatprep.subr.bf16.mxu0 %v1416_v23  ;;  %v1398_v25 = vpop.permute.xlu1 %1397 }
  0xdb   : > { %v1404_v20 = vsel %vm1403_vm10, %v1392_v17, %v1394_v6  ;;  %1459 = vmatprep.mubr.bf16.mxu0 %v15041_v9  ;;  %v1406_v26 = vsel %vm1403_vm10, %v1396_v19, %v1398_v25 }
  0xdc   : > { %v1413_v22 = vand.u32 %v1404_v20, %v15315_v18  ;;  %3043 = vrot.lane.b32.xlu0 %v15219_v7, %s15061_s13  ;;  %v1419_v31 = vand.u32 %v1406_v26, %v15315_v18 }
  0xdd   : > { %3045 = vrot.lane.b32.xlu1 %v15226_v10, %s15061_s13 }
  0xde   : > { %v1400_v24 = vpop.permute.xlu0 %1399  ;;  %14391 = vmatmul.mubr.msk.bf16.vlgmr.msra.gmra.mxu1 %vm426_vm3, %v13882_v2  ;;  %1442 = vmatpush1.bf16.msra.mxu0 %v1413_v22  ;;  %v1402_v33 = vpop.permute.xlu1 %1401 }
  0xdf   : > { %v1407_v27 = vsel %vm1403_vm10, %v1398_v25, %v1400_v24  ;;  %14394 = vmatprep.subr.bf16.mxu0 %v15054_v30  ;;  %1500 = vmatprep.mubr.bf16.mxu1 %v15041_v9  ;;  %v1408_v34 = vsel %vm1403_vm10, %v1400_v24, %v1402_v33  ;;  %vm3548_vm10 = vcmask 416768  }
  0xe0   : > { %3041 = vrot.lane.b32.xlu0 %v15237_v12, %s15061_s13  ;;  %v1422_v29 = vand.u32 %v1407_v27, %v15315_v18  ;;  %v1425_v35 = vand.u32 %v1408_v34, %v15315_v18 }
  0xe1   : > { %3047 = vrot.lane.b32.xlu1 %v15228_v11, %s15061_s13 }
  0xe2   : > { %v1559_v32 = vpop.permute.xlu0 %1558  ;;  %13887 = vmatmul.mubr.msk.bf16.vlgmr.msra.gmra.mxu0 %vm426_vm3, %v13886_v28  ;;  %1482 = vmatprep.subr.bf16.mxu1 %v1422_v29  ;;  %v1561_v37 = vpop.permute.xlu1 %1560 }
  0xe3   : > { %1483 = vmatpush1.bf16.msra.mxu1 %v1419_v31  ;;  %14396 = vmatprep.mubr.msk.bf16.mxu0 %vm15055_vm4, %v15054_v30  ;;  %v1570_v39 = vsel %vm1568_vm11, %v1559_v32, %v1561_v37  ;;  %v13898_v31 = vld [vmem:[%s18543_s3 + $0x24] sm:$0xf] }
  0xe4   : > { %3049 = vrot.lane.b32.xlu0 %v15242_v13, %s15061_s13  ;;  %14395 = vmatpush3.bf16.msra.mxu0 %v1425_v35  ;;  %v1581_v41 = vand.u32 %v1570_v39, %v15315_v18 }
  0xe5   : > { %3051 = vrot.lane.b32.xlu1 %v15248_v14, %s15061_s13  ;;  %s15076_s13 = smov 24  }
  0xe6   : > { %v1557_v36 = vpop.permute.xlu0 %1556  ;;  %13888 = vmatmul.mubr.msk.bf16.vlgmr.msra.gmra.mxu1 %vm426_vm3, %v13886_v28  ;;  %1606 = vmatprep.subr.bf16.mxu1 %v1581_v41  ;;  %v1563_v44 = vpop.permute.xlu1 %1562 }
  0xe7   : > { %v1569_v38 = vsel %vm1568_vm11, %v1557_v36, %v1559_v32  ;;  %1624 = vmatprep.mubr.bf16.mxu1 %v15041_v9  ;;  %v1571_v45 = vsel %vm1568_vm11, %v1561_v37, %v1563_v44 }
  0xe8   : > { %v1578_v40 = vand.u32 %v1569_v38, %v15315_v18  ;;  %3208 = vrot.lane.b32.xlu0 %v15219_v7, %s15062_s18  ;;  %v1584_v52 = vand.u32 %v1571_v45, %v15315_v18 }
  0xe9   : > { %3210 = vrot.lane.b32.xlu1 %v15226_v10, %s15062_s18 }
  0xea   : > { %v1565_v43 = vpop.permute.xlu0 %1564  ;;  %14397 = vmatmul.mubr.msk.bf16.vlgmr.msra.gmra.mxu0 %vm426_vm3, %v13886_v28  ;;  %1607 = vmatpush1.bf16.msra.mxu1 %v1578_v40  ;;  %v1567_v55 = vpop.permute.xlu1 %1566 }
  0xeb   : > { %v1572_v46 = vsel %vm1568_vm11, %v1563_v44, %v1565_v43  ;;  %14400 = vmatprep.subr.bf16.mxu1 %v15054_v30  ;;  %1665 = vmatprep.mubr.bf16.mxu0 %v15041_v9  ;;  %v1573_v56 = vsel %vm1568_vm11, %v1565_v43, %v1567_v55  ;;  %vm3713_vm11 = vcmask 408576  }
  0xec   : > { %3206 = vrot.lane.b32.xlu0 %v15237_v12, %s15062_s18  ;;  %v1587_v50 = vand.u32 %v1572_v46, %v15315_v18  ;;  %v1590_v57 = vand.u32 %v1573_v56, %v15315_v18 }
  0xed   : > { %3212 = vrot.lane.b32.xlu1 %v15228_v11, %s15062_s18 }
  0xee   : > { %v1724_v54 = vpop.permute.xlu0 %1723  ;;  %13891 = vmatmul.mubr.msk.bf16.vlgmr.msra.gmra.mxu1 %vm426_vm3, %v13890_v47  ;;  %1647 = vmatprep.subr.bf16.mxu0 %v1587_v50  ;;  %v1726_v59 = vpop.permute.xlu1 %1725 }
  0xef   : > { %1648 = vmatpush1.bf16.msra.mxu0 %v1584_v52  ;;  %14402 = vmatprep.mubr.msk.bf16.mxu1 %vm15055_vm4, %v15054_v30  ;;  %v1735_v61 = vsel %vm1733_vm12, %v1724_v54, %v1726_v59  ;;  %v13902_v52 = vld [vmem:[%s18543_s3 + $0x28] sm:$0xf] }
  0xf0   : > { %3214 = vrot.lane.b32.xlu0 %v15242_v13, %s15062_s18  ;;  %14401 = vmatpush3.bf16.msra.mxu1 %v1590_v57  ;;  %v1746_v63 = vand.u32 %v1735_v61, %v15315_v18 }
  0xf1   : > { %3216 = vrot.lane.b32.xlu1 %v15248_v14, %s15062_s18  ;;  %s15077_s18 = smov 23  }
  0xf2   : > { %v1722_v58 = vpop.permute.xlu0 %1721  ;;  %13892 = vmatmul.mubr.msk.bf16.vlgmr.msra.gmra.mxu0 %vm426_vm3, %v13890_v47  ;;  %1771 = vmatprep.subr.bf16.mxu0 %v1746_v63  ;;  %v1728_v1 = vpop.permute.xlu1 %1727 }
  0xf3   : > { %v1734_v60 = vsel %vm1733_vm12, %v1722_v58, %v1724_v54  ;;  %1789 = vmatprep.mubr.bf16.mxu0 %v15041_v9  ;;  %v1736_v2 = vsel %vm1733_vm12, %v1726_v59, %v1728_v1 }
  0xf4   : > { %v1743_v62 = vand.u32 %v1734_v60, %v15315_v18  ;;  %3373 = vrot.lane.b32.xlu0 %v15219_v7, %s15063_s29  ;;  %v1749_v8 = vand.u32 %v1736_v2, %v15315_v18 }
  0xf5   : > { %3375 = vrot.lane.b32.xlu1 %v15226_v10, %s15063_s29 }
  0xf6   : > { %v1730_v0 = vpop.permute.xlu0 %1729  ;;  %14403 = vmatmul.mubr.msk.bf16.vlgmr.msra.gmra.mxu1 %vm426_vm3, %v13890_v47  ;;  %1772 = vmatpush1.bf16.msra.mxu0 %v1743_v62  ;;  %v1732_v16 = vpop.permute.xlu1 %1731 }
  0xf7   : > { %v1737_v4 = vsel %vm1733_vm12, %v1728_v1, %v1730_v0  ;;  %14406 = vmatprep.subr.bf16.mxu0 %v15054_v30  ;;  %1830 = vmatprep.mubr.bf16.mxu1 %v15041_v9  ;;  %v1738_v17 = vsel %vm1733_vm12, %v1730_v0, %v1732_v16  ;;  %vm3878_vm12 = vcmask 400384  }
  0xf8   : > { %3371 = vrot.lane.b32.xlu0 %v15237_v12, %s15063_s29  ;;  %v1752_v6 = vand.u32 %v1737_v4, %v15315_v18  ;;  %v1755_v19 = vand.u32 %v1738_v17, %v15315_v18 }
  0xf9   : > { %3377 = vrot.lane.b32.xlu1 %v15228_v11, %s15063_s29 }
  0xfa   : > { %v1889_v15 = vpop.permute.xlu0 %1888  ;;  %13895 = vmatmul.mubr.msk.bf16.vlgmr.msra.gmra.mxu0 %vm426_vm3, %v13894_v5  ;;  %1812 = vmatprep.subr.bf16.mxu1 %v1752_v6  ;;  %v1891_v21 = vpop.permute.xlu1 %1890 }
  0xfb   : > { %1813 = vmatpush1.bf16.msra.mxu1 %v1749_v8  ;;  %14408 = vmatprep.mubr.msk.bf16.mxu0 %vm15055_vm4, %v15054_v30  ;;  %v1900_v23 = vsel %vm1898_vm13, %v1889_v15, %v1891_v21  ;;  %v13906_v8 = vld [vmem:[%s18543_s3 + $0x2c] sm:$0xf] }
  0xfc   : > { %3379 = vrot.lane.b32.xlu0 %v15242_v13, %s15063_s29  ;;  %14407 = vmatpush3.bf16.msra.mxu0 %v1755_v19  ;;  %v15635_v25 = vand.u32 %v1900_v23, %v15315_v18 }
  0xfd   : > { %3381 = vrot.lane.b32.xlu1 %v15248_v14, %s15063_s29 }
  0xfe   : > { %v1887_v20 = vpop.permute.xlu0 %1886  ;;  %13896 = vmatmul.mubr.msk.bf16.vlgmr.msra.gmra.mxu1 %vm426_vm3, %v13894_v5  ;;  %1936 = vmatprep.subr.bf16.mxu1 %v15635_v25  ;;  %v1893_v27 = vpop.permute.xlu1 %1892 }
  0xff   : > { %v1899_v22 = vsel %vm1898_vm13, %v1887_v20, %v1889_v15  ;;  %1954 = vmatprep.mubr.bf16.mxu1 %v15041_v9  ;;  %v1901_v28 = vsel %vm1898_vm13, %v1891_v21, %v1893_v27 }
 0x100   : > { %v1908_v24 = vand.u32 %v1899_v22, %v15315_v18  ;;  %3538 = vrot.lane.b32.xlu0 %v15219_v7, %s15064_s12  ;;  %v15653_v33 = vand.u32 %v1901_v28, %v15315_v18 }
 0x101   : > { %3540 = vrot.lane.b32.xlu1 %v15226_v10, %s15064_s12 }
 0x102   : > { %v1895_v26 = vpop.permute.xlu0 %1894  ;;  %14409 = vmatmul.mubr.msk.bf16.vlgmr.msra.gmra.mxu0 %vm426_vm3, %v13894_v5  ;;  %1937 = vmatpush1.bf16.msra.mxu1 %v1908_v24  ;;  %v15656_v35 = vpop.permute.xlu1 %1896 }
 0x103   : > { %v1902_v29 = vsel %vm1898_vm13, %v1893_v27, %v1895_v26  ;;  %14412 = vmatprep.subr.bf16.mxu1 %v15054_v30  ;;  %1995 = vmatprep.mubr.bf16.mxu0 %v15041_v9  ;;  %v1903_v36 = vsel %vm1898_vm13, %v1895_v26, %v15656_v35  ;;  %v15747_v26 = vld.sshfl [vmem:[%s15216_s14 + $0x8] sm:$0x3 pattern:$0x76325410] }
 0x104   : > { %3536 = vrot.lane.b32.xlu0 %v15237_v12, %s15064_s12  ;;  %v15649_v32 = vand.u32 %v1902_v29, %v15315_v18  ;;  %v15666_v37 = vand.u32 %v1903_v36, %v15315_v18  ;;  %v15756_v36 = vld.sshfl [vmem:[%s15234_s20 + $0x8] sm:$0x3 pattern:$0x76325410] }
 0x105   : > { %3542 = vrot.lane.b32.xlu1 %v15228_v11, %s15064_s12 }
 0x106   : > { %v2054_v34 = vpop.permute.xlu0 %2053  ;;  %13899 = vmatmul.mubr.msk.bf16.vlgmr.msra.gmra.mxu1 %vm426_vm3, %v13898_v31  ;;  %1977 = vmatprep.subr.bf16.mxu0 %v15649_v32  ;;  %v2056_v39 = vpop.permute.xlu1 %2055 }
 0x107   : > { %1978 = vmatpush1.bf16.msra.mxu0 %v15653_v33  ;;  %14414 = vmatprep.mubr.msk.bf16.mxu1 %vm15055_vm4, %v15054_v30  ;;  %v2065_v41 = vsel %vm2063_vm14, %v2054_v34, %v2056_v39 }
 0x108   : > { %3544 = vrot.lane.b32.xlu0 %v15242_v13, %s15064_s12  ;;  %14413 = vmatpush3.bf16.msra.mxu1 %v15666_v37  ;;  %v2076_v44 = vand.u32 %v2065_v41, %v15315_v18 }
 0x109   : > { %3546 = vrot.lane.b32.xlu1 %v15248_v14, %s15064_s12  ;;  %s15067_s12 = smov 48  }
 0x10a   : > { %v2052_v38 = vpop.permute.xlu0 %2051  ;;  %13900 = vmatmul.mubr.msk.bf16.vlgmr.msra.gmra.mxu0 %vm426_vm3, %v13898_v31  ;;  %2101 = vmatprep.subr.bf16.mxu0 %v2076_v44 }
 0x10b   : > { %v2064_v40 = vsel %vm2063_vm14, %v2052_v38, %v2054_v34  ;;  %2119 = vmatprep.mubr.bf16.mxu0 %v15041_v9  ;;  %v2058_v46 = vpop.permute.xlu1 %2057  ;;  %v13910_v38 = vld [vmem:[%s18543_s3 + $0x30] sm:$0xf] }
 0x10c   : > { %v2073_v43 = vand.u32 %v2064_v40, %v15315_v18  ;;  %3703 = vrot.lane.b32.xlu0 %v15219_v7, %s15065_s17  ;;  %v2066_v47 = vsel %vm2063_vm14, %v2056_v39, %v2058_v46 }
 0x10d   : > { %3705 = vrot.lane.b32.xlu1 %v15226_v10, %s15065_s17  ;;  %v2079_v55 = vand.u32 %v2066_v47, %v15315_v18 }
 0x10e   : > { %v2060_v45 = vpop.permute.xlu0 %2059  ;;  %14415 = vmatmul.mubr.msk.bf16.vlgmr.msra.gmra.mxu1 %vm426_vm3, %v13898_v31  ;;  %2102 = vmatpush1.bf16.msra.mxu0 %v2073_v43 }
 0x10f   : > { %v2067_v50 = vsel %vm2063_vm14, %v2058_v46, %v2060_v45  ;;  %14418 = vmatprep.subr.bf16.mxu0 %v15054_v30  ;;  %2160 = vmatprep.mubr.bf16.mxu1 %v15041_v9  ;;  %v2062_v57 = vpop.permute.xlu1 %2061 }
 0x110   : > { %3701 = vrot.lane.b32.xlu0 %v15237_v12, %s15065_s17  ;;  %v2082_v54 = vand.u32 %v2067_v50, %v15315_v18  ;;  %v2068_v58 = vsel %vm2063_vm14, %v2060_v45, %v2062_v57  ;;  %vm4043_vm14 = vcmask 392192  }
 0x111   : > { %v2085_v59 = vand.u32 %v2068_v58, %v15315_v18  ;;  %3707 = vrot.lane.b32.xlu1 %v15228_v11, %s15065_s17 }
 0x112   : > { %v2219_v56 = vpop.permute.xlu0 %2218  ;;  %13903 = vmatmul.mubr.msk.bf16.vlgmr.msra.gmra.mxu0 %vm426_vm3, %v13902_v52  ;;  %2142 = vmatprep.subr.bf16.mxu1 %v2082_v54 }
 0x113   : > { %2143 = vmatpush1.bf16.msra.mxu1 %v2079_v55  ;;  %14420 = vmatprep.mubr.msk.bf16.mxu0 %vm15055_vm4, %v15054_v30  ;;  %v2221_v61 = vpop.permute.xlu1 %2220 }
 0x114   : > { %3709 = vrot.lane.b32.xlu0 %v15242_v13, %s15065_s17  ;;  %14419 = vmatpush3.bf16.msra.mxu0 %v2085_v59  ;;  %v2230_v63 = vsel %vm2228_vm15, %v2219_v56, %v2221_v61 }
 0x115   : > { %3711 = vrot.lane.b32.xlu1 %v15248_v14, %s15065_s17  ;;  %v2241_v1 = vand.u32 %v2230_v63, %v15315_v18  ;;  %s15068_s17 = smov 47  }
 0x116   : > { %v2217_v60 = vpop.permute.xlu0 %2216  ;;  %13904 = vmatmul.mubr.msk.bf16.vlgmr.msra.gmra.mxu1 %vm426_vm3, %v13902_v52 }
 0x117   : > { %v2229_v62 = vsel %vm2228_vm15, %v2217_v60, %v2219_v56  ;;  %2284 = vmatprep.mubr.bf16.mxu1 %v15041_v9  ;;  %2266 = vmatprep.subr.bf16.mxu1 %v2241_v1  ;;  %v2223_v4 = vpop.permute.xlu1 %2222  ;;  %v13914_v60 = vld [vmem:[%s18543_s3 + $0x34] sm:$0xf] }
 0x118   : > { %v2238_v0 = vand.u32 %v2229_v62, %v15315_v18  ;;  %3868 = vrot.lane.b32.xlu0 %v15219_v7, %s15066_s28  ;;  %v2231_v5 = vsel %vm2228_vm15, %v2221_v61, %v2223_v4 }
 0x119   : > { %3870 = vrot.lane.b32.xlu1 %v15226_v10, %s15066_s28  ;;  %v2244_v15 = vand.u32 %v2231_v5, %v15315_v18 }
 0x11a   : > { %v2225_v2 = vpop.permute.xlu0 %2224  ;;  %14421 = vmatmul.mubr.msk.bf16.vlgmr.msra.gmra.mxu0 %vm426_vm3, %v13902_v52  ;;  %2267 = vmatpush1.bf16.msra.mxu1 %v2238_v0 }
 0x11b   : > { %v2232_v6 = vsel %vm2228_vm15, %v2223_v4, %v2225_v2  ;;  %14424 = vmatprep.subr.bf16.mxu1 %v15054_v30  ;;  %2325 = vmatprep.mubr.bf16.mxu0 %v15041_v9  ;;  %v2227_v17 = vpop.permute.xlu1 %2226 }
 0x11c   : > { %3866 = vrot.lane.b32.xlu0 %v15237_v12, %s15066_s28  ;;  %v2247_v14 = vand.u32 %v2232_v6, %v15315_v18  ;;  %v2233_v12 = vsel %vm2228_vm15, %v2225_v2, %v2227_v17  ;;  %vm4208_vm15 = vcmask 384000  }
 0x11d   : > { %v2250_v19 = vand.u32 %v2233_v12, %v15315_v18  ;;  %3872 = vrot.lane.b32.xlu1 %v15228_v11, %s15066_s28 }
 0x11e   : > { %v2384_v16 = vpop.permute.xlu0 %2383  ;;  %13907 = vmatmul.mubr.msk.bf16.vlgmr.msra.gmra.mxu1 %vm426_vm3, %v13906_v8  ;;  %2307 = vmatprep.subr.bf16.mxu0 %v2247_v14 }
 0x11f   : > { %2308 = vmatpush1.bf16.msra.mxu0 %v2244_v15  ;;  %14426 = vmatprep.mubr.msk.bf16.mxu1 %vm15055_vm4, %v15054_v30  ;;  %v2386_v21 = vpop.permute.xlu1 %2385 }
 0x120   : > { %3874 = vrot.lane.b32.xlu0 %v15242_v13, %s15066_s28  ;;  %14425 = vmatpush3.bf16.msra.mxu1 %v2250_v19  ;;  %v2395_v23 = vsel %vm2393_vm0, %v2384_v16, %v2386_v21 }
 0x121   : > { %3876 = vrot.lane.b32.xlu1 %v15747_v26, %s15066_s28  ;;  %v2406_v27 = vand.u32 %v2395_v23, %v15315_v18  ;;  %s15069_s28 = smov 46  }
 0x122   : > { %v2382_v20 = vpop.permute.xlu0 %2381  ;;  %13908 = vmatmul.mubr.msk.bf16.vlgmr.msra.gmra.mxu0 %vm426_vm3, %v13906_v8 }
 0x123   : > { %v2394_v22 = vsel %vm2393_vm0, %v2382_v20, %v2384_v16  ;;  %2449 = vmatprep.mubr.bf16.mxu0 %v15041_v9  ;;  %2431 = vmatprep.subr.bf16.mxu0 %v2406_v27  ;;  %v2388_v29 = vpop.permute.xlu1 %2387  ;;  %v13918_v20 = vld [vmem:[%s18543_s3 + $0x38] sm:$0xf] }
 0x124   : > { %v2403_v24 = vand.u32 %v2394_v22, %v15315_v18  ;;  %4033 = vrot.lane.b32.xlu0 %v15219_v7, %s15067_s12  ;;  %v2396_v31 = vsel %vm2393_vm0, %v2386_v21, %v2388_v29 }
 0x125   : > { %4035 = vrot.lane.b32.xlu1 %v15226_v10, %s15067_s12  ;;  %v2409_v40 = vand.u32 %v2396_v31, %v15315_v18 }
 0x126   : > { %v2390_v28 = vpop.permute.xlu0 %2389  ;;  %14427 = vmatmul.mubr.msk.bf16.vlgmr.msra.gmra.mxu1 %vm426_vm3, %v13906_v8  ;;  %2432 = vmatpush1.bf16.msra.mxu0 %v2403_v24 }
 0x127   : > { %v2397_v34 = vsel %vm2393_vm0, %v2388_v29, %v2390_v28  ;;  %14430 = vmatprep.subr.bf16.mxu0 %v15054_v30  ;;  %2490 = vmatprep.mubr.bf16.mxu1 %v15041_v9  ;;  %v2392_v43 = vpop.permute.xlu1 %2391 }
 0x128   : > { %4031 = vrot.lane.b32.xlu0 %v15756_v36, %s15067_s12  ;;  %v2412_v39 = vand.u32 %v2397_v34, %v15315_v18  ;;  %v2398_v44 = vsel %vm2393_vm0, %v2390_v28, %v2392_v43  ;;  %vm4373_vm0 = vcmask 375808  }
 0x129   : > { %v2415_v45 = vand.u32 %v2398_v44, %v15315_v18  ;;  %4037 = vrot.lane.b32.xlu1 %v15228_v11, %s15067_s12 }
 0x12a   : > { %v2549_v41 = vpop.permute.xlu0 %2548  ;;  %13911 = vmatmul.mubr.msk.bf16.vlgmr.msra.gmra.mxu0 %vm426_vm3, %v13910_v38  ;;  %2472 = vmatprep.subr.bf16.mxu1 %v2412_v39 }
 0x12b   : > { %2473 = vmatpush1.bf16.msra.mxu1 %v2409_v40  ;;  %14432 = vmatprep.mubr.msk.bf16.mxu0 %vm15055_vm4, %v15054_v30  ;;  %v2551_v47 = vpop.permute.xlu1 %2550 }
 0x12c   : > { %4039 = vrot.lane.b32.xlu0 %v15242_v13, %s15067_s12  ;;  %14431 = vmatpush3.bf16.msra.mxu0 %v2415_v45  ;;  %v2560_v52 = vsel %vm2558_vm1, %v2549_v41, %v2551_v47 }
 0x12d   : > { %4041 = vrot.lane.b32.xlu1 %v15747_v26, %s15067_s12  ;;  %v2571_v55 = vand.u32 %v2560_v52, %v15315_v18  ;;  %s15070_s12 = smov 45  }
 0x12e   : > { %v2547_v46 = vpop.permute.xlu0 %2546  ;;  %13912 = vmatmul.mubr.msk.bf16.vlgmr.msra.gmra.mxu1 %vm426_vm3, %v13910_v38 }
 0x12f   : > { %v2559_v50 = vsel %vm2558_vm1, %v2547_v46, %v2549_v41  ;;  %2614 = vmatprep.mubr.bf16.mxu1 %v15041_v9  ;;  %2596 = vmatprep.subr.bf16.mxu1 %v2571_v55  ;;  %v2553_v57 = vpop.permute.xlu1 %2552  ;;  %v13922_v46 = vld [vmem:[%s18543_s3 + $0x3c] sm:$0xf] }
 0x130   : > { %v2568_v54 = vand.u32 %v2559_v50, %v15315_v18  ;;  %4198 = vrot.lane.b32.xlu0 %v15219_v7, %s15068_s17  ;;  %v2561_v58 = vsel %vm2558_vm1, %v2551_v47, %v2553_v57 }
 0x131   : > { %4200 = vrot.lane.b32.xlu1 %v15226_v10, %s15068_s17  ;;  %v2574_v62 = vand.u32 %v2561_v58, %v15315_v18 }
 0x132   : > { %v2555_v56 = vpop.permute.xlu0 %2554  ;;  %14433 = vmatmul.mubr.msk.bf16.vlgmr.msra.gmra.mxu0 %vm426_vm3, %v13910_v38  ;;  %2597 = vmatpush1.bf16.msra.mxu1 %v2568_v54 }
 0x133   : > { %v2562_v59 = vsel %vm2558_vm1, %v2553_v57, %v2555_v56  ;;  %14436 = vmatprep.subr.bf16.mxu1 %v15054_v30  ;;  %2655 = vmatprep.mubr.bf16.mxu0 %v15041_v9  ;;  %v2557_v0 = vpop.permute.xlu1 %2556 }
 0x134   : > { %4196 = vrot.lane.b32.xlu0 %v15756_v36, %s15068_s17  ;;  %v2577_v61 = vand.u32 %v2562_v59, %v15315_v18  ;;  %v2563_v1 = vsel %vm2558_vm1, %v2555_v56, %v2557_v0  ;;  %vm4538_vm1 = vcmask 367616  }
 0x135   : > { %v2580_v2 = vand.u32 %v2563_v1, %v15315_v18  ;;  %4202 = vrot.lane.b32.xlu1 %v15228_v11, %s15068_s17 }
 0x136   : > { %v2714_v63 = vpop.permute.xlu0 %2713  ;;  %13915 = vmatmul.mubr.msk.bf16.vlgmr.msra.gmra.mxu1 %vm426_vm3, %v13914_v60  ;;  %2637 = vmatprep.subr.bf16.mxu0 %v2577_v61 }
 0x137   : > { %2638 = vmatpush1.bf16.msra.mxu0 %v2574_v62  ;;  %14438 = vmatprep.mubr.msk.bf16.mxu1 %vm15055_vm4, %v15054_v30  ;;  %v2716_v5 = vpop.permute.xlu1 %2715 }
 0x138   : > { %4204 = vrot.lane.b32.xlu0 %v15242_v13, %s15068_s17  ;;  %14437 = vmatpush3.bf16.msra.mxu1 %v2580_v2  ;;  %v2725_v8 = vsel %vm2723_vm2, %v2714_v63, %v2716_v5 }
 0x139   : > { %4206 = vrot.lane.b32.xlu1 %v15747_v26, %s15068_s17  ;;  %v2736_v15 = vand.u32 %v2725_v8, %v15315_v18  ;;  %s15071_s17 = smov 44  }
 0x13a   : > { %v2712_v4 = vpop.permute.xlu0 %2711  ;;  %13916 = vmatmul.mubr.msk.bf16.vlgmr.msra.gmra.mxu0 %vm426_vm3, %v13914_v60 }
 0x13b   : > { %v2724_v6 = vsel %vm2723_vm2, %v2712_v4, %v2714_v63  ;;  %2779 = vmatprep.mubr.bf16.mxu0 %v15041_v9  ;;  %2761 = vmatprep.subr.bf16.mxu0 %v2736_v15  ;;  %v2718_v17 = vpop.permute.xlu1 %2717  ;;  %v13926_v4 = vld [vmem:[%s18543_s3 + $0x40] sm:$0xf] }
 0x13c   : > { %v2733_v14 = vand.u32 %v2724_v6, %v15315_v18  ;;  %4363 = vrot.lane.b32.xlu0 %v15219_v7, %s15069_s28  ;;  %v2726_v12 = vsel %vm2723_vm2, %v2716_v5, %v2718_v17 }
 0x13d   : > { %4365 = vrot.lane.b32.xlu1 %v15226_v10, %s15069_s28  ;;  %v2739_v22 = vand.u32 %v2726_v12, %v15315_v18 }
 0x13e   : > { %v2720_v16 = vpop.permute.xlu0 %2719  ;;  %14439 = vmatmul.mubr.msk.bf16.vlgmr.msra.gmra.mxu1 %vm426_vm3, %v13914_v60  ;;  %2762 = vmatpush1.bf16.msra.mxu0 %v2733_v14 }
 0x13f   : > { %v2727_v19 = vsel %vm2723_vm2, %v2718_v17, %v2720_v16  ;;  %14442 = vmatprep.subr.bf16.mxu0 %v15054_v30  ;;  %2820 = vmatprep.mubr.bf16.mxu1 %v15041_v9  ;;  %v2722_v24 = vpop.permute.xlu1 %2721 }
 0x140   : > { %4361 = vrot.lane.b32.xlu0 %v15756_v36, %s15069_s28  ;;  %v2742_v21 = vand.u32 %v2727_v19, %v15315_v18  ;;  %v2728_v27 = vsel %vm2723_vm2, %v2720_v16, %v2722_v24  ;;  %vm4703_vm2 = vcmask 359424  }
 0x141   : > { %v2745_v28 = vand.u32 %v2728_v27, %v15315_v18  ;;  %4367 = vrot.lane.b32.xlu1 %v15228_v11, %s15069_s28 }
 0x142   : > { %v2879_v23 = vpop.permute.xlu0 %2878  ;;  %13919 = vmatmul.mubr.msk.bf16.vlgmr.msra.gmra.mxu0 %vm426_vm3, %v13918_v20  ;;  %2802 = vmatprep.subr.bf16.mxu1 %v2742_v21 }
 0x143   : > { %2803 = vmatpush1.bf16.msra.mxu1 %v2739_v22  ;;  %14444 = vmatprep.mubr.msk.bf16.mxu0 %vm15055_vm4, %v15054_v30  ;;  %v2881_v31 = vpop.permute.xlu1 %2880 }
 0x144   : > { %4369 = vrot.lane.b32.xlu0 %v15242_v13, %s15069_s28  ;;  %14443 = vmatpush3.bf16.msra.mxu0 %v2745_v28  ;;  %v2890_v38 = vsel %vm2888_vm6, %v2879_v23, %v2881_v31 }
 0x145   : > { %4371 = vrot.lane.b32.xlu1 %v15747_v26, %s15069_s28  ;;  %v2901_v40 = vand.u32 %v2890_v38, %v15315_v18  ;;  %s15072_s28 = smov 28  }
 0x146   : > { %v2877_v29 = vpop.permute.xlu0 %2876  ;;  %13920 = vmatmul.mubr.msk.bf16.vlgmr.msra.gmra.mxu1 %vm426_vm3, %v13918_v20 }
 0x147   : > { %v2889_v34 = vsel %vm2888_vm6, %v2877_v29, %v2879_v23  ;;  %2944 = vmatprep.mubr.bf16.mxu1 %v15041_v9  ;;  %2926 = vmatprep.subr.bf16.mxu1 %v2901_v40  ;;  %v2883_v43 = vpop.permute.xlu1 %2882 }
 0x148   : > { %v2898_v39 = vand.u32 %v2889_v34, %v15315_v18  ;;  %4528 = vrot.lane.b32.xlu0 %v15219_v7, %s15070_s12  ;;  %v2891_v44 = vsel %vm2888_vm6, %v2881_v31, %v2883_v43 }
 0x149   : > { %4530 = vrot.lane.b32.xlu1 %v15226_v10, %s15070_s12  ;;  %v2904_v50 = vand.u32 %v2891_v44, %v15315_v18 }
 0x14a   : > { %v2885_v41 = vpop.permute.xlu0 %2884  ;;  %14445 = vmatmul.mubr.msk.bf16.vlgmr.msra.gmra.mxu0 %vm426_vm3, %v13918_v20  ;;  %2927 = vmatpush1.bf16.msra.mxu1 %v2898_v39 }
 0x14b   : > { %v2892_v45 = vsel %vm2888_vm6, %v2883_v43, %v2885_v41  ;;  %14448 = vmatprep.subr.bf16.mxu1 %v15054_v30  ;;  %2985 = vmatprep.mubr.bf16.mxu0 %v15041_v9  ;;  %v2887_v54 = vpop.permute.xlu1 %2886 }
 0x14c   : > { %4526 = vrot.lane.b32.xlu0 %v15756_v36, %s15070_s12  ;;  %v2907_v47 = vand.u32 %v2892_v45, %v15315_v18  ;;  %v2893_v55 = vsel %vm2888_vm6, %v2885_v41, %v2887_v54  ;;  %v13930_v45 = vld [vmem:[%s18543_s3 + $0x44] sm:$0xf]  ;;  %vm4868_vm6 = vcmask 228352  }
 0x14d   : > { %v2910_v56 = vand.u32 %v2893_v55, %v15315_v18  ;;  %4532 = vrot.lane.b32.xlu1 %v15228_v11, %s15070_s12 }
 0x14e   : > { %v3044_v52 = vpop.permute.xlu0 %3043  ;;  %13923 = vmatmul.mubr.msk.bf16.vlgmr.msra.gmra.mxu1 %vm426_vm3, %v13922_v46  ;;  %2967 = vmatprep.subr.bf16.mxu0 %v2907_v47 }
 0x14f   : > { %2968 = vmatpush1.bf16.msra.mxu0 %v2904_v50  ;;  %14450 = vmatprep.mubr.msk.bf16.mxu1 %vm15055_vm4, %v15054_v30  ;;  %v3046_v58 = vpop.permute.xlu1 %3045 }
 0x150   : > { %4534 = vrot.lane.b32.xlu0 %v15242_v13, %s15070_s12  ;;  %14449 = vmatpush3.bf16.msra.mxu1 %v2910_v56  ;;  %v3055_v60 = vsel %vm3053_vm7, %v3044_v52, %v3046_v58 }
 0x151   : > { %4536 = vrot.lane.b32.xlu1 %v15747_v26, %s15070_s12  ;;  %v3066_v62 = vand.u32 %v3055_v60, %v15315_v18  ;;  %s15073_s12 = smov 27  }
 0x152   : > { %v3042_v57 = vpop.permute.xlu0 %3041  ;;  %13924 = vmatmul.mubr.msk.bf16.vlgmr.msra.gmra.mxu0 %vm426_vm3, %v13922_v46 }
 0x153   : > { %v3054_v59 = vsel %vm3053_vm7, %v3042_v57, %v3044_v52  ;;  %3109 = vmatprep.mubr.bf16.mxu0 %v15041_v9  ;;  %3091 = vmatprep.subr.bf16.mxu0 %v3066_v62  ;;  %v3048_v0 = vpop.permute.xlu1 %3047 }
 0x154   : > { %v3063_v61 = vand.u32 %v3054_v59, %v15315_v18  ;;  %4693 = vrot.lane.b32.xlu0 %v15219_v7, %s15071_s17  ;;  %v3056_v1 = vsel %vm3053_vm7, %v3046_v58, %v3048_v0 }
 0x155   : > { %4695 = vrot.lane.b32.xlu1 %v15226_v10, %s15071_s17  ;;  %v3069_v6 = vand.u32 %v3056_v1, %v15315_v18 }
 0x156   : > { %v3050_v63 = vpop.permute.xlu0 %3049  ;;  %14451 = vmatmul.mubr.msk.bf16.vlgmr.msra.gmra.mxu1 %vm426_vm3, %v13922_v46  ;;  %3092 = vmatpush1.bf16.msra.mxu0 %v3063_v61 }
 0x157   : > { %v3057_v2 = vsel %vm3053_vm7, %v3048_v0, %v3050_v63  ;;  %14454 = vmatprep.subr.bf16.mxu0 %v15054_v30  ;;  %3150 = vmatprep.mubr.bf16.mxu1 %v15041_v9  ;;  %v3052_v15 = vpop.permute.xlu1 %3051 }
 0x158   : > { %4691 = vrot.lane.b32.xlu0 %v15756_v36, %s15071_s17  ;;  %v3072_v5 = vand.u32 %v3057_v2, %v15315_v18  ;;  %v3058_v16 = vsel %vm3053_vm7, %v3050_v63, %v3052_v15  ;;  %vm5033_vm7 = vcmask 220160  }
 0x159   : > { %v3075_v12 = vand.u32 %v3058_v16, %v15315_v18  ;;  %4697 = vrot.lane.b32.xlu1 %v15228_v11, %s15071_s17 }
 0x15a   : > { %v3209_v8 = vpop.permute.xlu0 %3208  ;;  %v483_v14 = vpop.f32.mrf.mxu0  ;;  %13927 = vmatmul.mubr.msk.bf16.vlgmr.msra.gmra.mxu0 %vm426_vm3, %v13926_v4  ;;  %3132 = vmatprep.subr.bf16.mxu1 %v3072_v5 }
 0x15b   : > { %3133 = vmatpush1.bf16.msra.mxu1 %v3069_v6  ;;  %14456 = vmatprep.mubr.msk.bf16.mxu0 %vm15055_vm4, %v15054_v30  ;;  %v3211_v21 = vpop.permute.xlu1 %3210 }
 0x15c   : > { %4699 = vrot.lane.b32.xlu0 %v15242_v13, %s15071_s17  ;;  %v485_v17 = vpop.f32.mrf.mxu0  ;;  %14455 = vmatpush3.bf16.msra.mxu0 %v3075_v12  ;;  %v3220_v24 = vsel %vm3218_vm8, %v3209_v8, %v3211_v21 }
 0x15d   : > { %4701 = vrot.lane.b32.xlu1 %v15747_v26, %s15071_s17  ;;  %v3231_v31 = vand.u32 %v3220_v24, %v15315_v18  ;;  %s15074_s17 = smov 26  }
 0x15e   : > { %v3207_v19 = vpop.permute.xlu0 %3206  ;;  %v487_v20 = vpop.f32.mrf.mxu0  ;;  %13928 = vmatmul.mubr.msk.bf16.vlgmr.msra.gmra.mxu1 %vm426_vm3, %v13926_v4 }
 0x15f   : > { %v3219_v22 = vsel %vm3218_vm8, %v3207_v19, %v3209_v8  ;;  %v524_v23 = vpop.f32.mrf.mxu1  ;;  %3274 = vmatprep.mubr.bf16.mxu1 %v15041_v9  ;;  %3256 = vmatprep.subr.bf16.mxu1 %v3231_v31  ;;  %v3213_v39 = vpop.permute.xlu1 %3212 }
 0x160   : > { %v3228_v27 = vand.u32 %v3219_v22, %v15315_v18  ;;  %4858 = vrot.lane.b32.xlu0 %v15219_v7, %s15072_s28  ;;  %v488_v28 = vpop.f32.mrf.mxu0  ;;  %v3221_v41 = vsel %vm3218_vm8, %v3211_v21, %v3213_v39 }
 0x161   : > { %v526_v29 = vpop.f32.mrf.mxu1  ;;  %4860 = vrot.lane.b32.xlu1 %v15226_v10, %s15072_s28  ;;  %v3234_v50 = vand.u32 %v3221_v41, %v15315_v18 }
 0x162   : > { %v3215_v34 = vpop.permute.xlu0 %3214  ;;  %v565_v38 = vpop.f32.mrf.mxu0  ;;  %14457 = vmatmul.mubr.msk.bf16.vlgmr.msra.gmra.mxu0 %vm426_vm3, %v13926_v4  ;;  %3257 = vmatpush1.bf16.msra.mxu1 %v3228_v27  ;;  %v13934_v27 = vld [vmem:[%s18543_s3 + $0x48] sm:$0xf] }
 0x163   : > { %v528_v40 = vpop.f32.mrf.mxu1  ;;  %v3222_v43 = vsel %vm3218_vm8, %v3213_v39, %v3215_v34  ;;  %14460 = vmatprep.subr.bf16.mxu1 %v15054_v30  ;;  %3315 = vmatprep.mubr.bf16.mxu0 %v15041_v9  ;;  %v3217_v55 = vpop.permute.xlu1 %3216 }
 0x164   : > { %4856 = vrot.lane.b32.xlu0 %v15756_v36, %s15072_s28  ;;  %v14362_v44 = vpop.f32.mrf.mxu0  ;;  %v3237_v47 = vand.u32 %v3222_v43, %v15315_v18  ;;  %v3223_v57 = vsel %vm3218_vm8, %v3215_v34, %v3217_v55  ;;  %vm5198_vm8 = vcmask 211968  }
 0x165   : > { %v529_v46 = vpop.f32.mrf.mxu1  ;;  %v3240_v60 = vand.u32 %v3223_v57, %v15315_v18  ;;  %4862 = vrot.lane.b32.xlu1 %v15228_v11, %s15072_s28 }
 0x166   : > { %v3374_v52 = vpop.permute.xlu0 %3373  ;;  %v568_v54 = vpop.f32.mrf.mxu0  ;;  %13931 = vmatmul.mubr.msk.bf16.vlgmr.msra.gmra.mxu1 %vm426_vm3, %v13930_v45  ;;  %3297 = vmatprep.subr.bf16.mxu0 %v3237_v47 }
 0x167   : > { %v641_v56 = vpop.f32.mrf.mxu1  ;;  %3298 = vmatpush1.bf16.msra.mxu0 %v3234_v50  ;;  %14462 = vmatprep.mubr.msk.bf16.mxu1 %vm15055_vm4, %v15054_v30  ;;  %v3376_v0 = vpop.permute.xlu1 %3375 }
 0x168   : > { %v642_v58 = vadd.f32 %v641_v56, %v483_v14  ;;  %4864 = vrot.lane.b32.xlu0 %v15242_v13, %s15072_s28  ;;  %v14363_v59 = vpop.f32.mrf.mxu0  ;;  %14461 = vmatpush3.bf16.msra.mxu1 %v3240_v60  ;;  %v3385_v4 = vsel %vm3383_vm9, %v3374_v52, %v3376_v0 }
 0x169   : > { %v643_v61 = vpop.f32.mrf.mxu1  ;;  %4866 = vrot.lane.b32.xlu1 %v15747_v26, %s15072_s28  ;;  %v15953_v15 = vand.u32 %v3385_v4, %v15315_v18 }
 0x16a   : > { %v644_v62 = vadd.f32 %v643_v61, %v485_v17  ;;  %v3372_v63 = vpop.permute.xlu0 %3371  ;;  %13932 = vmatmul.mubr.msk.bf16.vlgmr.msra.gmra.mxu0 %vm426_vm3, %v13930_v45  ;;  %v682_v6 = vpop.f32.mrf.mxu0 }
 0x16b   : > { %v3384_v1 = vsel %vm3383_vm9, %v3372_v63, %v3374_v52  ;;  %v645_v2 = vpop.f32.mrf.mxu1  ;;  %3439 = vmatprep.mubr.bf16.mxu0 %v15041_v9  ;;  %v683_v8 = vadd.f32 %v682_v6, %v524_v23  ;;  %3421 = vmatprep.subr.bf16.mxu0 %v15953_v15  ;;  %v3378_v19 = vpop.permute.xlu1 %3377 }
 0x16c   : > { %v3393_v5 = vand.u32 %v3384_v1, %v15315_v18  ;;  %5023 = vrot.lane.b32.xlu0 %v15219_v7, %s15073_s12  ;;  %v684_v16 = vpop.f32.mrf.mxu0  ;;  %v3386_v21 = vsel %vm3383_vm9, %v3376_v0, %v3378_v19 }
 0x16d   : > { %v646_v14 = vpop.f32.mrf.mxu1  ;;  %v685_v12 = vadd.f32 %v684_v16, %v526_v29  ;;  %5025 = vrot.lane.b32.xlu1 %v15226_v10, %s15073_s12  ;;  %v15971_v31 = vand.u32 %v3386_v21, %v15315_v18 }
 0x16e   : > { %v3380_v17 = vpop.permute.xlu0 %3379  ;;  %14463 = vmatmul.mubr.msk.bf16.vlgmr.msra.gmra.mxu1 %vm426_vm3, %v13930_v45  ;;  %v686_v23 = vpop.f32.mrf.mxu0  ;;  %3422 = vmatpush1.bf16.msra.mxu0 %v3393_v5  ;;  %v13938_v14 = vld [vmem:[%s18543_s3 + $0x4c] sm:$0xf] }
 0x16f   : > { %v723_v20 = vpop.f32.mrf.mxu1  ;;  %v3387_v22 = vsel %vm3383_vm9, %v3378_v19, %v3380_v17  ;;  %14466 = vmatprep.subr.bf16.mxu0 %v15054_v30  ;;  %3480 = vmatprep.mubr.bf16.mxu1 %v15041_v9  ;;  %v15974_v39 = vpop.permute.xlu1 %3381 }
 0x170   : > { %v724_v24 = vadd.f32 %v723_v20, %v565_v38  ;;  %5021 = vrot.lane.b32.xlu0 %v15756_v36, %s15073_s12  ;;  %v15967_v29 = vand.u32 %v3387_v22, %v15315_v18  ;;  %v687_v34 = vpop.f32.mrf.mxu0  ;;  %v3388_v41 = vsel %vm3383_vm9, %v3380_v17, %v15974_v39 }
 0x171   : > { %v14368_v28 = vpop.f32.mrf.mxu1  ;;  %v15984_v44 = vand.u32 %v3388_v41, %v15315_v18  ;;  %5027 = vrot.lane.b32.xlu1 %v15228_v11, %s15073_s12 }
 0x172   : > { %v3539_v38 = vpop.permute.xlu0 %3538  ;;  %13935 = vmatmul.mubr.msk.bf16.vlgmr.msra.gmra.mxu0 %vm426_vm3, %v13934_v27  ;;  %3462 = vmatprep.subr.bf16.mxu1 %v15967_v29  ;;  %v801_v43 = vpop.f32.mrf.mxu0 }
 0x173   : > { %v726_v40 = vpop.f32.mrf.mxu1  ;;  %3463 = vmatpush1.bf16.msra.mxu1 %v15971_v31  ;;  %v889_v45 = vadd.f32 %v801_v43, %v642_v58  ;;  %14468 = vmatprep.mubr.msk.bf16.mxu0 %vm15055_vm4, %v15054_v30  ;;  %v3541_v54 = vpop.permute.xlu1 %3540 }
 0x174   : > { %5029 = vrot.lane.b32.xlu0 %v15242_v13, %s15073_s12  ;;  %v803_v47 = vpop.f32.mrf.mxu0  ;;  %14467 = vmatpush3.bf16.msra.mxu0 %v15984_v44  ;;  %v3550_v57 = vsel %vm3548_vm10, %v3539_v38, %v3541_v54 }
 0x175   : > { %v14369_v46 = vpop.f32.mrf.mxu1  ;;  %v890_v52 = vadd.f32 %v803_v47, %v644_v62  ;;  %5031 = vrot.lane.b32.xlu1 %v15747_v26, %s15073_s12  ;;  %v3561_v62 = vand.u32 %v3550_v57, %v15315_v18 }
 0x176   : > { %v3537_v50 = vpop.permute.xlu0 %3536  ;;  %13936 = vmatmul.mubr.msk.bf16.vlgmr.msra.gmra.mxu1 %vm426_vm3, %v13934_v27  ;;  %v805_v59 = vpop.f32.mrf.mxu0 }
 0x177   : > { %v3549_v55 = vsel %vm3548_vm10, %v3537_v50, %v3539_v38  ;;  %v842_v56 = vpop.f32.mrf.mxu1  ;;  %3604 = vmatprep.mubr.bf16.mxu1 %v15041_v9  ;;  %3586 = vmatprep.subr.bf16.mxu1 %v3561_v62  ;;  %v3543_v2 = vpop.permute.xlu1 %3542 }
 0x178   : > { %v3558_v58 = vand.u32 %v3549_v55, %v15315_v18  ;;  %v891_v60 = vadd.f32 %v842_v56, %v683_v8  ;;  %5188 = vrot.lane.b32.xlu0 %v15219_v7, %s15074_s17  ;;  %v806_v63 = vpop.f32.mrf.mxu0  ;;  %v3551_v5 = vsel %vm3548_vm10, %v3541_v54, %v3543_v2 }
 0x179   : > { %v844_v61 = vpop.f32.mrf.mxu1  ;;  %5190 = vrot.lane.b32.xlu1 %v15226_v10, %s15074_s17  ;;  %v3564_v19 = vand.u32 %v3551_v5, %v15315_v18  ;;  %v13942_v5 = vld [vmem:[%s18543_s3 + $0x50] sm:$0xf] }
 0x17a   : > { %v892_v0 = vadd.f32 %v844_v61, %v685_v12  ;;  %v3545_v1 = vpop.permute.xlu0 %3544  ;;  %14469 = vmatmul.mubr.msk.bf16.vlgmr.msra.gmra.mxu0 %vm426_vm3, %v13934_v27  ;;  %v883_v8 = vpop.f32.mrf.mxu0  ;;  %3587 = vmatpush1.bf16.msra.mxu1 %v3558_v58 }
 0x17b   : > { %v846_v4 = vpop.f32.mrf.mxu1  ;;  %v3552_v6 = vsel %vm3548_vm10, %v3543_v2, %v3545_v1  ;;  %v893_v16 = vadd.f32 %v883_v8, %v724_v24  ;;  %14472 = vmatprep.subr.bf16.mxu1 %v15054_v30  ;;  %3645 = vmatprep.mubr.bf16.mxu0 %v15041_v9  ;;  %v3547_v22 = vpop.permute.xlu1 %3546 }
 0x17c   : > { %5186 = vrot.lane.b32.xlu0 %v15756_v36, %s15074_s17  ;;  %v3567_v12 = vand.u32 %v3552_v6, %v15315_v18  ;;  %v14374_v20 = vpop.f32.mrf.mxu0  ;;  %v3553_v24 = vsel %vm3548_vm10, %v3545_v1, %v3547_v22  ;;  %vm5363_vm10 = vcmask 203776  }
 0x17d   : > { %v847_v17 = vpop.f32.mrf.mxu1  ;;  %v3570_v34 = vand.u32 %v3553_v24, %v15315_v18  ;;  %5192 = vrot.lane.b32.xlu1 %v15228_v11, %s15074_s17 }
 0x17e   : > { %v3704_v21 = vpop.permute.xlu0 %3703  ;;  %13939 = vmatmul.mubr.msk.bf16.vlgmr.msra.gmra.mxu1 %vm426_vm3, %v13938_v14  ;;  %3627 = vmatprep.subr.bf16.mxu0 %v3567_v12  ;;  %v886_v27 = vpop.f32.mrf.mxu0 }
 0x17f   : > { %v966_v23 = vpop.f32.mrf.mxu1  ;;  %3628 = vmatpush1.bf16.msra.mxu0 %v3564_v19  ;;  %14474 = vmatprep.mubr.msk.bf16.mxu1 %vm15055_vm4, %v15054_v30  ;;  %v3706_v46 = vpop.permute.xlu1 %3705 }
 0x180   : > { %v1054_v28 = vadd.f32 %v966_v23, %v889_v45  ;;  %5194 = vrot.lane.b32.xlu0 %v15242_v13, %s15074_s17  ;;  %v14375_v40 = vpop.f32.mrf.mxu0  ;;  %14473 = vmatpush3.bf16.msra.mxu1 %v3570_v34  ;;  %v3715_v50 = vsel %vm3713_vm11, %v3704_v21, %v3706_v46 }
 0x181   : > { %v968_v38 = vpop.f32.mrf.mxu1  ;;  %5196 = vrot.lane.b32.xlu1 %v15747_v26, %s15074_s17  ;;  %v3726_v57 = vand.u32 %v3715_v50, %v15315_v18 }
 0x182   : > { %v1055_v41 = vadd.f32 %v968_v38, %v890_v52  ;;  %v3702_v43 = vpop.permute.xlu0 %3701  ;;  %13940 = vmatmul.mubr.msk.bf16.vlgmr.msra.gmra.mxu0 %vm426_vm3, %v13938_v14  ;;  %v1007_v55 = vpop.f32.mrf.mxu0 }
 0x183   : > { %v3714_v45 = vsel %vm3713_vm11, %v3702_v43, %v3704_v21  ;;  %v970_v47 = vpop.f32.mrf.mxu1  ;;  %3769 = vmatprep.mubr.bf16.mxu0 %v15041_v9  ;;  %v1056_v52 = vadd.f32 %v1007_v55, %v891_v60  ;;  %3751 = vmatprep.subr.bf16.mxu0 %v3726_v57  ;;  %v3708_v62 = vpop.permute.xlu1 %3707 }
 0x184   : > { %v3723_v54 = vand.u32 %v3714_v45, %v15315_v18  ;;  %5353 = vrot.lane.b32.xlu0 %v15219_v7, %s15075_s10  ;;  %v1009_v58 = vpop.f32.mrf.mxu0  ;;  %v3716_v1 = vsel %vm3713_vm11, %v3706_v46, %v3708_v62 }
 0x185   : > { %v971_v56 = vpop.f32.mrf.mxu1  ;;  %v1057_v61 = vadd.f32 %v1009_v58, %v892_v0  ;;  %5355 = vrot.lane.b32.xlu1 %v15226_v10, %s15075_s10  ;;  %v3729_v8 = vand.u32 %v3716_v1, %v15315_v18 }
 0x186   : > { %v3710_v59 = vpop.permute.xlu0 %3709  ;;  %14475 = vmatmul.mubr.msk.bf16.vlgmr.msra.gmra.mxu1 %vm426_vm3, %v13938_v14  ;;  %v1011_v4 = vpop.f32.mrf.mxu0  ;;  %3752 = vmatpush1.bf16.msra.mxu0 %v3723_v54 }
 0x187   : > { %v1048_v63 = vpop.f32.mrf.mxu1  ;;  %v3717_v2 = vsel %vm3713_vm11, %v3708_v62, %v3710_v59  ;;  %14478 = vmatprep.subr.bf16.mxu0 %v15054_v30  ;;  %3810 = vmatprep.mubr.bf16.mxu1 %v15041_v9  ;;  %v3712_v17 = vpop.permute.xlu1 %3711 }
 0x188   : > { %v1058_v60 = vadd.f32 %v1048_v63, %v893_v16  ;;  %5351 = vrot.lane.b32.xlu0 %v15756_v36, %s15075_s10  ;;  %v3732_v6 = vand.u32 %v3717_v2, %v15315_v18  ;;  %v1012_v14 = vpop.f32.mrf.mxu0  ;;  %v3718_v19 = vsel %vm3713_vm11, %v3710_v59, %v3712_v17  ;;  %v13946_v63 = vld [vmem:[%s18543_s3 + $0x54] sm:$0xf]  ;;  %vm5528_vm11 = vcmask 195584  }
 0x189   : > { %v14380_v0 = vpop.f32.mrf.mxu1  ;;  %v3735_v21 = vand.u32 %v3718_v19, %v15315_v18  ;;  %5357 = vrot.lane.b32.xlu1 %v15228_v11, %s15075_s10 }
 0x18a   : > { %v3869_v16 = vpop.permute.xlu0 %3868  ;;  %13943 = vmatmul.mubr.msk.bf16.vlgmr.msra.gmra.mxu0 %vm426_vm3, %v13942_v5  ;;  %3792 = vmatprep.subr.bf16.mxu1 %v3732_v6  ;;  %v1131_v20 = vpop.f32.mrf.mxu0 }
 0x18b   : > { %v1051_v12 = vpop.f32.mrf.mxu1  ;;  %3793 = vmatpush1.bf16.msra.mxu1 %v3729_v8  ;;  %v1219_v22 = vadd.f32 %v1131_v20, %v1054_v28  ;;  %14480 = vmatprep.mubr.msk.bf16.mxu0 %vm15055_vm4, %v15054_v30  ;;  %v3871_v38 = vpop.permute.xlu1 %3870 }
 0x18c   : > { %5359 = vrot.lane.b32.xlu0 %v15242_v13, %s15075_s10  ;;  %v1133_v24 = vpop.f32.mrf.mxu0  ;;  %14479 = vmatpush3.bf16.msra.mxu0 %v3735_v21  ;;  %v3880_v46 = vsel %vm3878_vm12, %v3869_v16, %v3871_v38 }
 0x18d   : > { %v14381_v23 = vpop.f32.mrf.mxu1  ;;  %v1220_v34 = vadd.f32 %v1133_v24, %v1055_v41  ;;  %5361 = vrot.lane.b32.xlu1 %v15747_v26, %s15075_s10  ;;  %v3891_v50 = vand.u32 %v3880_v46, %v15315_v18  ;;  %s15087_s10 = smov 125  }
 0x18e   : > { %v3867_v27 = vpop.permute.xlu0 %3866  ;;  %13944 = vmatmul.mubr.msk.bf16.vlgmr.msra.gmra.mxu1 %vm426_vm3, %v13942_v5  ;;  %v1135_v45 = vpop.f32.mrf.mxu0 }
 0x18f   : > { %v3879_v40 = vsel %vm3878_vm12, %v3867_v27, %v3869_v16  ;;  %v1172_v43 = vpop.f32.mrf.mxu1  ;;  %3934 = vmatprep.mubr.bf16.mxu1 %v15041_v9  ;;  %3916 = vmatprep.subr.bf16.mxu1 %v3891_v50  ;;  %v3873_v57 = vpop.permute.xlu1 %3872 }
 0x190   : > { %v3888_v28 = vand.u32 %v3879_v40, %v15315_v18  ;;  %v1221_v47 = vadd.f32 %v1172_v43, %v1056_v52  ;;  %5518 = vrot.lane.b32.xlu0 %v15219_v7, %s15076_s13  ;;  %v1136_v54 = vpop.f32.mrf.mxu0  ;;  %v3881_v52 = vsel %vm3878_vm12, %v3871_v38, %v3873_v57 }
 0x191   : > { %v1174_v41 = vpop.f32.mrf.mxu1  ;;  %5520 = vrot.lane.b32.xlu1 %v15226_v10, %s15076_s13  ;;  %v3894_v4 = vand.u32 %v3881_v52, %v15315_v18  ;;  %v13950_v52 = vld [vmem:[%s18543_s3 + $0x58] sm:$0xf] }
 0x192   : > { %v1222_v55 = vadd.f32 %v1174_v41, %v1057_v61  ;;  %v3875_v56 = vpop.permute.xlu0 %3874  ;;  %14481 = vmatmul.mubr.msk.bf16.vlgmr.msra.gmra.mxu0 %vm426_vm3, %v13942_v5  ;;  %v1213_v62 = vpop.f32.mrf.mxu0  ;;  %3917 = vmatpush1.bf16.msra.mxu1 %v3888_v28 }
 0x193   : > { %v1176_v58 = vpop.f32.mrf.mxu1  ;;  %v3882_v59 = vsel %vm3878_vm12, %v3873_v57, %v3875_v56  ;;  %v1223_v61 = vadd.f32 %v1213_v62, %v1058_v60  ;;  %14484 = vmatprep.subr.bf16.mxu1 %v15054_v30  ;;  %3975 = vmatprep.mubr.bf16.mxu0 %v15041_v9  ;;  %v3877_v6 = vpop.permute.xlu1 %3876 }
 0x194   : > { %5516 = vrot.lane.b32.xlu0 %v15756_v36, %s15076_s13  ;;  %v3897_v2 = vand.u32 %v3882_v59, %v15315_v18  ;;  %v14386_v5 = vpop.f32.mrf.mxu0  ;;  %v3883_v60 = vsel %vm3878_vm12, %v3875_v56, %v3877_v6  ;;  %vm5693_vm12 = vcmask 187392  }
 0x195   : > { %v1177_v1 = vpop.f32.mrf.mxu1  ;;  %v3900_v17 = vand.u32 %v3883_v60, %v15315_v18  ;;  %5522 = vrot.lane.b32.xlu1 %v15228_v11, %s15076_s13 }
 0x196   : > { %v4034_v0 = vpop.permute.xlu0 %4033  ;;  %13947 = vmatmul.mubr.msk.bf16.vlgmr.msra.gmra.mxu1 %vm426_vm3, %v13946_v63  ;;  %3957 = vmatprep.subr.bf16.mxu0 %v3897_v2  ;;  %v1216_v14 = vpop.f32.mrf.mxu0 }
 0x197   : > { %v1296_v8 = vpop.f32.mrf.mxu1  ;;  %3958 = vmatpush1.bf16.msra.mxu0 %v3894_v4  ;;  %14486 = vmatprep.mubr.msk.bf16.mxu1 %vm15055_vm4, %v15054_v30  ;;  %v4036_v23 = vpop.permute.xlu1 %4035 }
 0x198   : > { %v1384_v16 = vadd.f32 %v1296_v8, %v1219_v22  ;;  %5524 = vrot.lane.b32.xlu0 %v15242_v13, %s15076_s13  ;;  %v14387_v19 = vpop.f32.mrf.mxu0  ;;  %14485 = vmatpush3.bf16.msra.mxu1 %v3900_v17  ;;  %v4045_v27 = vsel %vm4043_vm14, %v4034_v0, %v4036_v23 }
 0x199   : > { %v1298_v12 = vpop.f32.mrf.mxu1  ;;  %5526 = vrot.lane.b32.xlu1 %v15747_v26, %s15076_s13  ;;  %v4056_v46 = vand.u32 %v4045_v27, %v15315_v18  ;;  %s15084_s13 = smov 1  }
 0x19a   : > { %v1385_v20 = vadd.f32 %v1298_v12, %v1220_v34  ;;  %v4032_v21 = vpop.permute.xlu0 %4031  ;;  %13948 = vmatmul.mubr.msk.bf16.vlgmr.msra.gmra.mxu0 %vm426_vm3, %v13946_v63  ;;  %v1337_v40 = vpop.f32.mrf.mxu0 }
 0x19b   : > { %v4044_v22 = vsel %vm4043_vm14, %v4032_v21, %v4034_v0  ;;  %v1300_v24 = vpop.f32.mrf.mxu1  ;;  %4099 = vmatprep.mubr.bf16.mxu0 %v15041_v9  ;;  %v1386_v34 = vadd.f32 %v1337_v40, %v1221_v47  ;;  %4081 = vmatprep.subr.bf16.mxu0 %v4056_v46  ;;  %v4038_v50 = vpop.permute.xlu1 %4037 }
 0x19c   : > { %v4053_v38 = vand.u32 %v4044_v22, %v15315_v18  ;;  %5683 = vrot.lane.b32.xlu0 %v15219_v7, %s15077_s18  ;;  %v1339_v28 = vpop.f32.mrf.mxu0  ;;  %v4046_v56 = vsel %vm4043_vm14, %v4036_v23, %v4038_v50 }
 0x19d   : > { %v1301_v43 = vpop.f32.mrf.mxu1  ;;  %v1387_v41 = vadd.f32 %v1339_v28, %v1222_v55  ;;  %5685 = vrot.lane.b32.xlu1 %v15226_v10, %s15077_s18  ;;  %v4059_v62 = vand.u32 %v4046_v56, %v15315_v18 }
 0x19e   : > { %v4040_v45 = vpop.permute.xlu0 %4039  ;;  %14487 = vmatmul.mubr.msk.bf16.vlgmr.msra.gmra.mxu1 %vm426_vm3, %v13946_v63  ;;  %v1341_v58 = vpop.f32.mrf.mxu0  ;;  %4082 = vmatpush1.bf16.msra.mxu0 %v4053_v38 }
 0x19f   : > { %v1378_v54 = vpop.f32.mrf.mxu1  ;;  %v4047_v57 = vsel %vm4043_vm14, %v4038_v50, %v4040_v45  ;;  %14490 = vmatprep.subr.bf16.mxu0 %v15054_v30  ;;  %4140 = vmatprep.mubr.bf16.mxu1 %v15041_v9  ;;  %v4042_v1 = vpop.permute.xlu1 %4041  ;;  %v16137_v50 = vld.sshfl [vmem:[%s15234_s20 + $0x8] sm:$0x3 pattern:$0x76325410]  ;;  %s15079_s20 = smov 21  }
 0x1a0   : > { %v1388_v47 = vadd.f32 %v1378_v54, %v1223_v61  ;;  %5681 = vrot.lane.b32.xlu0 %v15756_v36, %s15077_s18  ;;  %v4062_v59 = vand.u32 %v4047_v57, %v15315_v18  ;;  %v1342_v63 = vpop.f32.mrf.mxu0  ;;  %v4048_v2 = vsel %vm4043_vm14, %v4040_v45, %v4042_v1  ;;  %vm5858_vm14 = vcmask 179200  }
 0x1a1   : > { %v14392_v55 = vpop.f32.mrf.mxu1  ;;  %v4065_v5 = vand.u32 %v4048_v2, %v15315_v18  ;;  %5687 = vrot.lane.b32.xlu1 %v15228_v11, %s15077_s18 }
 0x1a2   : > { %v4199_v61 = vpop.permute.xlu0 %4198  ;;  %13951 = vmatmul.mubr.msk.bf16.vlgmr.msra.gmra.mxu0 %vm426_vm3, %v13950_v52  ;;  %4122 = vmatprep.subr.bf16.mxu1 %v4062_v59  ;;  %v1461_v4 = vpop.f32.mrf.mxu0 }
 0x1a3   : > { %v1381_v36 = vpop.f32.mrf.mxu1  ;;  %4123 = vmatpush1.bf16.msra.mxu1 %v4059_v62  ;;  %v1549_v0 = vadd.f32 %v1461_v4, %v1384_v16  ;;  %14492 = vmatprep.mubr.msk.bf16.mxu0 %vm15055_vm4, %v15054_v30  ;;  %v4201_v17 = vpop.permute.xlu1 %4200 }
 0x1a4   : > { %5689 = vrot.lane.b32.xlu0 %v15242_v13, %s15077_s18  ;;  %v1463_v8 = vpop.f32.mrf.mxu0  ;;  %14491 = vmatpush3.bf16.msra.mxu0 %v4065_v5  ;;  %v4210_v21 = vsel %vm4208_vm15, %v4199_v61, %v4201_v17 }
 0x1a5   : > { %v14393_v6 = vpop.f32.mrf.mxu1  ;;  %v1550_v14 = vadd.f32 %v1463_v8, %v1385_v20  ;;  %5691 = vrot.lane.b32.xlu1 %v15747_v26, %s15077_s18  ;;  %v4221_v24 = vand.u32 %v4210_v21, %v15315_v18  ;;  %v13954_v26 = vld [vmem:[%s18543_s3 + $0x5c] sm:$0xf]  ;;  %s15080_s18 = smov 20  }
 0x1a6   : > { %v4197_v60 = vpop.permute.xlu0 %4196  ;;  %13952 = vmatmul.mubr.msk.bf16.vlgmr.msra.gmra.mxu1 %vm426_vm3, %v13950_v52  ;;  %v1465_v23 = vpop.f32.mrf.mxu0 }
 0x1a7   : > { %v4209_v12 = vsel %vm4208_vm15, %v4197_v60, %v4199_v61  ;;  %v1502_v19 = vpop.f32.mrf.mxu1  ;;  %4264 = vmatprep.mubr.bf16.mxu1 %v15041_v9  ;;  %4246 = vmatprep.subr.bf16.mxu1 %v4221_v24  ;;  %v4203_v43 = vpop.permute.xlu1 %4202 }
 0x1a8   : > { %v4218_v16 = vand.u32 %v4209_v12, %v15315_v18  ;;  %v1551_v22 = vadd.f32 %v1502_v19, %v1386_v34  ;;  %5848 = vrot.lane.b32.xlu0 %v15219_v7, %s15078_s11  ;;  %v1466_v27 = vpop.f32.mrf.mxu0  ;;  %v4211_v34 = vsel %vm4208_vm15, %v4201_v17, %v4203_v43  ;;  %v16167_v12 = vld.sshfl [vmem:[%s15216_s14 + $0x8] sm:$0x3 pattern:$0x76325410] }
 0x1a9   : > { %v1504_v20 = vpop.f32.mrf.mxu1  ;;  %5850 = vrot.lane.b32.xlu1 %v15226_v10, %s15078_s11  ;;  %v4224_v57 = vand.u32 %v4211_v34, %v15315_v18  ;;  %v13958_v34 = vld [vmem:[%s18543_s3 + $0x60] sm:$0xf] }
 0x1aa   : > { %v1552_v38 = vadd.f32 %v1504_v20, %v1387_v41  ;;  %v4205_v40 = vpop.permute.xlu0 %4204  ;;  %14493 = vmatmul.mubr.msk.bf16.vlgmr.msra.gmra.mxu0 %vm426_vm3, %v13950_v52  ;;  %v1543_v45 = vpop.f32.mrf.mxu0  ;;  %4247 = vmatpush1.bf16.msra.mxu1 %v4218_v16 }
 0x1ab   : > { %v1506_v46 = vpop.f32.mrf.mxu1  ;;  %v4212_v28 = vsel %vm4208_vm15, %v4203_v43, %v4205_v40  ;;  %v1553_v41 = vadd.f32 %v1543_v45, %v1388_v47  ;;  %14496 = vmatprep.subr.bf16.mxu1 %v15054_v30  ;;  %4305 = vmatprep.mubr.bf16.mxu0 %v15041_v9  ;;  %v4207_v55 = vpop.permute.xlu1 %4206 }
 0x1ac   : > { %5846 = vrot.lane.b32.xlu0 %v16137_v50, %s15078_s11  ;;  %v4227_v56 = vand.u32 %v4212_v28, %v15315_v18  ;;  %v14398_v58 = vpop.f32.mrf.mxu0  ;;  %v4213_v47 = vsel %vm4208_vm15, %v4205_v40, %v4207_v55  ;;  %vm6023_vm15 = vcmask 171008  }
 0x1ad   : > { %v1507_v54 = vpop.f32.mrf.mxu1  ;;  %v4230_v61 = vand.u32 %v4213_v47, %v15315_v18  ;;  %5852 = vrot.lane.b32.xlu1 %v15228_v11, %s15078_s11 }
 0x1ae   : > { %v4364_v52 = vpop.permute.xlu0 %4363  ;;  %13955 = vmatmul.mubr.msk.bf16.vlgmr.msra.gmra.mxu1 %vm426_vm3, %v13954_v26  ;;  %4287 = vmatprep.subr.bf16.mxu0 %v4227_v56  ;;  %v1546_v62 = vpop.f32.mrf.mxu0 }
 0x1af   : > { %v1626_v59 = vpop.f32.mrf.mxu1  ;;  %4288 = vmatpush1.bf16.msra.mxu0 %v4224_v57  ;;  %14498 = vmatprep.mubr.msk.bf16.mxu1 %vm15055_vm4, %v15054_v30  ;;  %v4366_v5 = vpop.permute.xlu1 %4365 }
 0x1b0   : > { %v1714_v63 = vadd.f32 %v1626_v59, %v1549_v0  ;;  %5854 = vrot.lane.b32.xlu0 %v15242_v13, %s15078_s11  ;;  %v14399_v36 = vpop.f32.mrf.mxu0  ;;  %14497 = vmatpush3.bf16.msra.mxu1 %v4230_v61  ;;  %v4375_v8 = vsel %vm4373_vm0, %v4364_v52, %v4366_v5 }
 0x1b1   : > { %v1628_v1 = vpop.f32.mrf.mxu1  ;;  %5856 = vrot.lane.b32.xlu1 %v16167_v12, %s15078_s11  ;;  %v4386_v21 = vand.u32 %v4375_v8, %v15315_v18  ;;  %s15081_s11 = smov 4  }
 0x1b2   : > { %v1715_v2 = vadd.f32 %v1628_v1, %v1550_v14  ;;  %v4362_v4 = vpop.permute.xlu0 %4361  ;;  %13956 = vmatmul.mubr.msk.bf16.vlgmr.msra.gmra.mxu0 %vm426_vm3, %v13954_v26  ;;  %v1667_v17 = vpop.f32.mrf.mxu0 }
 0x1b3   : > { %v4374_v0 = vsel %vm4373_vm0, %v4362_v4, %v4364_v52  ;;  %v1630_v6 = vpop.f32.mrf.mxu1  ;;  %4429 = vmatprep.mubr.bf16.mxu0 %v15041_v9  ;;  %v1716_v14 = vadd.f32 %v1667_v17, %v1551_v22  ;;  %4411 = vmatprep.subr.bf16.mxu0 %v4386_v21  ;;  %v4368_v24 = vpop.permute.xlu1 %4367 }
 0x1b4   : > { %v4383_v60 = vand.u32 %v4374_v0, %v15315_v18  ;;  %6013 = vrot.lane.b32.xlu0 %v15219_v7, %s15079_s20  ;;  %v1669_v16 = vpop.f32.mrf.mxu0  ;;  %v4376_v40 = vsel %vm4373_vm0, %v4366_v5, %v4368_v24 }
 0x1b5   : > { %v1631_v19 = vpop.f32.mrf.mxu1  ;;  %v1717_v20 = vadd.f32 %v1669_v16, %v1552_v38  ;;  %6015 = vrot.lane.b32.xlu1 %v15226_v10, %s15079_s20  ;;  %v4389_v45 = vand.u32 %v4376_v40, %v15315_v18 }
 0x1b6   : > { %v4370_v23 = vpop.permute.xlu0 %4369  ;;  %14499 = vmatmul.mubr.msk.bf16.vlgmr.msra.gmra.mxu1 %vm426_vm3, %v13954_v26  ;;  %v1671_v43 = vpop.f32.mrf.mxu0  ;;  %4412 = vmatpush1.bf16.msra.mxu0 %v4383_v60 }
 0x1b7   : > { %v1708_v27 = vpop.f32.mrf.mxu1  ;;  %v4377_v22 = vsel %vm4373_vm0, %v4368_v24, %v4370_v23  ;;  %14502 = vmatprep.subr.bf16.mxu0 %v15054_v30  ;;  %4470 = vmatprep.mubr.bf16.mxu1 %v15041_v9  ;;  %v4372_v54 = vpop.permute.xlu1 %4371 }
 0x1b8   : > { %v1718_v46 = vadd.f32 %v1708_v27, %v1553_v41  ;;  %6011 = vrot.lane.b32.xlu0 %v16137_v50, %s15079_s20  ;;  %v4392_v28 = vand.u32 %v4377_v22, %v15315_v18  ;;  %v1672_v26 = vpop.f32.mrf.mxu0  ;;  %v4378_v57 = vsel %vm4373_vm0, %v4370_v23, %v4372_v54  ;;  %v13962_v27 = vld [vmem:[%s18543_s3 + $0x64] sm:$0xf]  ;;  %vm6188_vm0 = vcmask 162816  }
 0x1b9   : > { %v14404_v38 = vpop.f32.mrf.mxu1  ;;  %v4395_v52 = vand.u32 %v4378_v57, %v15315_v18  ;;  %6017 = vrot.lane.b32.xlu1 %v15228_v11, %s15079_s20 }
 0x1ba   : > { %v4529_v41 = vpop.permute.xlu0 %4528  ;;  %13959 = vmatmul.mubr.msk.bf16.vlgmr.msra.gmra.mxu0 %vm426_vm3, %v13958_v34  ;;  %4452 = vmatprep.subr.bf16.mxu1 %v4392_v28  ;;  %v1791_v58 = vpop.f32.mrf.mxu0 }
 0x1bb   : > { %v1711_v56 = vpop.f32.mrf.mxu1  ;;  %4453 = vmatpush1.bf16.msra.mxu1 %v4389_v45  ;;  %v1879_v55 = vadd.f32 %v1791_v58, %v1714_v63  ;;  %14504 = vmatprep.mubr.msk.bf16.mxu0 %vm15055_vm4, %v15054_v30  ;;  %v4531_v1 = vpop.permute.xlu1 %4530 }
 0x1bc   : > { %6019 = vrot.lane.b32.xlu0 %v15242_v13, %s15079_s20  ;;  %v1793_v47 = vpop.f32.mrf.mxu0  ;;  %14503 = vmatpush3.bf16.msra.mxu0 %v4395_v52  ;;  %v4540_v5 = vsel %vm4538_vm1, %v4529_v41, %v4531_v1 }
 0x1bd   : > { %v14405_v59 = vpop.f32.mrf.mxu1  ;;  %v1880_v61 = vadd.f32 %v1793_v47, %v1715_v2  ;;  %6021 = vrot.lane.b32.xlu1 %v16167_v12, %s15079_s20  ;;  %v4551_v8 = vand.u32 %v4540_v5, %v15315_v18  ;;  %s15082_s20 = smov 3  }
 0x1be   : > { %v4527_v62 = vpop.permute.xlu0 %4526  ;;  %13960 = vmatmul.mubr.msk.bf16.vlgmr.msra.gmra.mxu1 %vm426_vm3, %v13958_v34  ;;  %v1795_v0 = vpop.f32.mrf.mxu0 }
 0x1bf   : > { %v4539_v36 = vsel %vm4538_vm1, %v4527_v62, %v4529_v41  ;;  %v1832_v4 = vpop.f32.mrf.mxu1  ;;  %4594 = vmatprep.mubr.bf16.mxu1 %v15041_v9  ;;  %4576 = vmatprep.subr.bf16.mxu1 %v4551_v8  ;;  %v4533_v21 = vpop.permute.xlu1 %4532 }
 0x1c0   : > { %v4548_v63 = vand.u32 %v4539_v36, %v15315_v18  ;;  %v1881_v6 = vadd.f32 %v1832_v4, %v1716_v14  ;;  %6178 = vrot.lane.b32.xlu0 %v15219_v7, %s15080_s18  ;;  %v1796_v60 = vpop.f32.mrf.mxu0  ;;  %v4541_v14 = vsel %vm4538_vm1, %v4531_v1, %v4533_v21 }
 0x1c1   : > { %v1834_v2 = vpop.f32.mrf.mxu1  ;;  %6180 = vrot.lane.b32.xlu1 %v15226_v10, %s15080_s18  ;;  %v4554_v43 = vand.u32 %v4541_v14, %v15315_v18  ;;  %v13966_v14 = vld [vmem:[%s18543_s3 + $0x68] sm:$0xf] }
 0x1c2   : > { %v1882_v17 = vadd.f32 %v1834_v2, %v1717_v20  ;;  %v4535_v19 = vpop.permute.xlu0 %4534  ;;  %14505 = vmatmul.mubr.msk.bf16.vlgmr.msra.gmra.mxu0 %vm426_vm3, %v13958_v34  ;;  %v1873_v24 = vpop.f32.mrf.mxu0  ;;  %4577 = vmatpush1.bf16.msra.mxu1 %v4548_v63 }
 0x1c3   : > { %v1836_v16 = vpop.f32.mrf.mxu1  ;;  %v4542_v23 = vsel %vm4538_vm1, %v4533_v21, %v4535_v19  ;;  %v1883_v20 = vadd.f32 %v1873_v24, %v1718_v46  ;;  %14508 = vmatprep.subr.bf16.mxu1 %v15054_v30  ;;  %4635 = vmatprep.mubr.bf16.mxu0 %v15041_v9  ;;  %v4537_v28 = vpop.permute.xlu1 %4536 }
 0x1c4   : > { %6176 = vrot.lane.b32.xlu0 %v16137_v50, %s15080_s18  ;;  %v4557_v22 = vand.u32 %v4542_v23, %v15315_v18  ;;  %v14410_v34 = vpop.f32.mrf.mxu0  ;;  %v4543_v46 = vsel %vm4538_vm1, %v4535_v19, %v4537_v28  ;;  %vm6353_vm1 = vcmask 31744  }
 0x1c5   : > { %v1837_v40 = vpop.f32.mrf.mxu1  ;;  %v4560_v54 = vand.u32 %v4543_v46, %v15315_v18  ;;  %6182 = vrot.lane.b32.xlu1 %v15228_v11, %s15080_s18 }
 0x1c6   : > { %v4694_v38 = vpop.permute.xlu0 %4693  ;;  %13963 = vmatmul.mubr.msk.bf16.vlgmr.msra.gmra.mxu1 %vm426_vm3, %v13962_v27  ;;  %4617 = vmatprep.subr.bf16.mxu0 %v4557_v22  ;;  %v1876_v26 = vpop.f32.mrf.mxu0 }
 0x1c7   : > { %v1956_v45 = vpop.f32.mrf.mxu1  ;;  %4618 = vmatpush1.bf16.msra.mxu0 %v4554_v43  ;;  %14510 = vmatprep.mubr.msk.bf16.mxu1 %vm15055_vm4, %v15054_v30  ;;  %v4696_v59 = vpop.permute.xlu1 %4695 }
 0x1c8   : > { %v2044_v41 = vadd.f32 %v1956_v45, %v1879_v55  ;;  %6184 = vrot.lane.b32.xlu0 %v15242_v13, %s15080_s18  ;;  %v14411_v57 = vpop.f32.mrf.mxu0  ;;  %14509 = vmatpush3.bf16.msra.mxu1 %v4560_v54  ;;  %v4705_v62 = vsel %vm4703_vm2, %v4694_v38, %v4696_v59 }
 0x1c9   : > { %v1958_v56 = vpop.f32.mrf.mxu1  ;;  %6186 = vrot.lane.b32.xlu1 %v16167_v12, %s15080_s18  ;;  %v4716_v5 = vand.u32 %v4705_v62, %v15315_v18  ;;  %s15083_s18 = smov 2  }
 0x1ca   : > { %v2045_v58 = vadd.f32 %v1958_v56, %v1880_v61  ;;  %v4692_v52 = vpop.permute.xlu0 %4691  ;;  %13964 = vmatmul.mubr.msk.bf16.vlgmr.msra.gmra.mxu0 %vm426_vm3, %v13962_v27  ;;  %v1997_v36 = vpop.f32.mrf.mxu0 }
 0x1cb   : > { %v4704_v55 = vsel %vm4703_vm2, %v4692_v52, %v4694_v38  ;;  %v1960_v47 = vpop.f32.mrf.mxu1  ;;  %4759 = vmatprep.mubr.bf16.mxu0 %v15041_v9  ;;  %v2046_v61 = vadd.f32 %v1997_v36, %v1881_v6  ;;  %4741 = vmatprep.subr.bf16.mxu0 %v4716_v5  ;;  %v4698_v8 = vpop.permute.xlu1 %4697 }
 0x1cc   : > { %v4713_v1 = vand.u32 %v4704_v55, %v15315_v18  ;;  %6343 = vrot.lane.b32.xlu0 %v15219_v7, %s15081_s11  ;;  %v1999_v63 = vpop.f32.mrf.mxu0  ;;  %v4706_v19 = vsel %vm4703_vm2, %v4696_v59, %v4698_v8 }
 0x1cd   : > { %v1961_v4 = vpop.f32.mrf.mxu1  ;;  %v2047_v2 = vadd.f32 %v1999_v63, %v1882_v17  ;;  %6345 = vrot.lane.b32.xlu1 %v15226_v10, %s15081_s11  ;;  %v4719_v24 = vand.u32 %v4706_v19, %v15315_v18 }
 0x1ce   : > { %v4700_v0 = vpop.permute.xlu0 %4699  ;;  %14511 = vmatmul.mubr.msk.bf16.vlgmr.msra.gmra.mxu1 %vm426_vm3, %v13962_v27  ;;  %v2001_v16 = vpop.f32.mrf.mxu0  ;;  %4742 = vmatpush1.bf16.msra.mxu0 %v4713_v1 }
 0x1cf   : > { %v2038_v60 = vpop.f32.mrf.mxu1  ;;  %v4707_v21 = vsel %vm4703_vm2, %v4698_v8, %v4700_v0  ;;  %14514 = vmatprep.subr.bf16.mxu0 %v15054_v30  ;;  %4800 = vmatprep.mubr.bf16.mxu1 %v15041_v9  ;;  %v4702_v40 = vpop.permute.xlu1 %4701 }
 0x1d0   : > { %v2048_v6 = vadd.f32 %v2038_v60, %v1883_v20  ;;  %6341 = vrot.lane.b32.xlu0 %v16137_v50, %s15081_s11  ;;  %v4722_v23 = vand.u32 %v4707_v21, %v15315_v18  ;;  %v2002_v27 = vpop.f32.mrf.mxu0  ;;  %v4708_v43 = vsel %vm4703_vm2, %v4700_v0, %v4702_v40  ;;  %vm6683_vm2 = vcmask 15360  }
 0x1d1   : > { %v14416_v17 = vpop.f32.mrf.mxu1  ;;  %v4725_v38 = vand.u32 %v4708_v43, %v15315_v18  ;;  %6347 = vrot.lane.b32.xlu1 %v15228_v11, %s15081_s11 }
 0x1d2   : > { %v4859_v20 = vpop.permute.xlu0 %4858  ;;  %13967 = vmatmul.mubr.msk.bf16.vlgmr.msra.gmra.mxu0 %vm426_vm3, %v13966_v14  ;;  %4782 = vmatprep.subr.bf16.mxu1 %v4722_v23  ;;  %v2121_v34 = vpop.f32.mrf.mxu0 }
 0x1d3   : > { %v2041_v22 = vpop.f32.mrf.mxu1  ;;  %4783 = vmatpush1.bf16.msra.mxu1 %v4719_v24  ;;  %v2209_v28 = vadd.f32 %v2121_v34, %v2044_v41  ;;  %14516 = vmatprep.mubr.msk.bf16.mxu0 %vm15055_vm4, %v15054_v30  ;;  %v4861_v56 = vpop.permute.xlu1 %4860 }
 0x1d4   : > { %6349 = vrot.lane.b32.xlu0 %v15242_v13, %s15081_s11  ;;  %v2123_v46 = vpop.f32.mrf.mxu0  ;;  %14515 = vmatpush3.bf16.msra.mxu0 %v4725_v38  ;;  %v4870_v59 = vsel %vm4868_vm6, %v4859_v20, %v4861_v56 }
 0x1d5   : > { %v14417_v45 = vpop.f32.mrf.mxu1  ;;  %v2210_v54 = vadd.f32 %v2123_v46, %v2045_v58  ;;  %6351 = vrot.lane.b32.xlu1 %v16167_v12, %s15081_s11  ;;  %v16271_v62 = vand.u32 %v4870_v59, %v15315_v18  ;;  %s340_s11 = sadd.s32 1, %s15178_s25 }
 0x1d6   : > { %v4857_v26 = vpop.permute.xlu0 %4856  ;;  %13968 = vmatmul.mubr.msk.bf16.vlgmr.msra.gmra.mxu1 %vm426_vm3, %v13966_v14  ;;  %v2125_v55 = vpop.f32.mrf.mxu0  ;;  %p16340_p13 = scmp.lt.s32.totalorder %s340_s11, 3 }
 0x1d7   : > { %v4869_v57 = vsel %vm4868_vm6, %v4857_v26, %v4859_v20  ;;  %v2162_v52 = vpop.f32.mrf.mxu1  ;;  %4924 = vmatprep.mubr.bf16.mxu1 %v15041_v9  ;;  %4906 = vmatprep.subr.bf16.mxu1 %v16271_v62  ;;  %v4863_v5 = vpop.permute.xlu1 %4862 }
 0x1d8   : > { %v4878_v41 = vand.u32 %v4869_v57, %v15315_v18  ;;  %v2211_v47 = vadd.f32 %v2162_v52, %v2046_v61  ;;  %6508 = vrot.lane.b32.xlu0 %v15219_v7, %s15082_s20  ;;  %v2126_v1 = vpop.f32.mrf.mxu0  ;;  %v4871_v63 = vsel %vm4868_vm6, %v4861_v56, %v4863_v5  ;;  %s18562_s11 = smov (!%p16340_p13, %s340_s11), 3 }
 0x1d9   : > { %v2164_v58 = vpop.f32.mrf.mxu1  ;;  %6510 = vrot.lane.b32.xlu1 %v15226_v10, %s15082_s20  ;;  %v16289_v16 = vand.u32 %v4871_v63, %v15315_v18  ;;  %s343_s17 = smul.u32 5, %s18562_s11  ;;  %s15090_s11 = smov 107  }
 0x1da   : > { %v2212_v36 = vadd.f32 %v2164_v58, %v2047_v2  ;;  %v4865_v4 = vpop.permute.xlu0 %4864  ;;  %14517 = vmatmul.mubr.msk.bf16.vlgmr.msra.gmra.mxu0 %vm426_vm3, %v13966_v14  ;;  %v2203_v8 = vpop.f32.mrf.mxu0  ;;  %4907 = vmatpush1.bf16.msra.mxu1 %v4878_v41  ;;  %v13970_v2 = vld [vmem:[%s18543_s3 + $0x6c] sm:$0xf] }
 0x1db   : > { %v2166_v61 = vpop.f32.mrf.mxu1  ;;  %v4872_v0 = vsel %vm4868_vm6, %v4863_v5, %v4865_v4  ;;  %v2213_v60 = vadd.f32 %v2203_v8, %v2048_v6  ;;  %14520 = vmatprep.subr.bf16.mxu1 %v15054_v30  ;;  %4965 = vmatprep.mubr.bf16.mxu0 %v15041_v9  ;;  %v16292_v23 = vpop.permute.xlu1 %4866  ;;  %p16386_p0 = scmp.lt.s32.totalorder %s343_s17, 19 }
 0x1dc   : > { %6506 = vrot.lane.b32.xlu0 %v16137_v50, %s15082_s20  ;;  %v16285_v21 = vand.u32 %v4872_v0, %v15315_v18  ;;  %v14422_v14 = vpop.f32.mrf.mxu0  ;;  %v4873_v6 = vsel %vm4868_vm6, %v4865_v4, %v16292_v23 }
 0x1dd   : > { %v2167_v19 = vpop.f32.mrf.mxu1  ;;  %v16302_v40 = vand.u32 %v4873_v6, %v15315_v18  ;;  %6512 = vrot.lane.b32.xlu1 %v15228_v11, %s15082_s20  ;;  %s18564_s17 = smov (!%p16386_p0, %s343_s17), 19 }
 0x1de   : > { %v5024_v17 = vpop.permute.xlu0 %5023  ;;  %13971 = vmatmul.mubr.msk.bf16.vlgmr.msra.gmra.mxu1 %vm426_vm3, %v13970_v2  ;;  %4947 = vmatprep.subr.bf16.mxu0 %v16285_v21  ;;  %v2206_v27 = vpop.f32.mrf.mxu0  ;;  %s13859_s12 = sshll.u32 %s18564_s17, 1  ;;  %s15086_s17 = smov 126  }
 0x1df   : > { %v2286_v24 = vpop.f32.mrf.mxu1  ;;  %4948 = vmatpush1.bf16.msra.mxu0 %v16289_v16  ;;  %14522 = vmatprep.mubr.msk.bf16.mxu1 %vm15055_vm4, %v15054_v30  ;;  %s16430_s15 = scalar_lea.vmem %s18542_s2, %s13859_s12  ;;  %s15093_s12 = smov 104  }
 0x1e0   : > { %v2374_v20 = vadd.f32 %v2286_v24, %v2209_v28  ;;  %6514 = vrot.lane.b32.xlu0 %v15242_v13, %s15082_s20  ;;  %v14423_v43 = vpop.f32.mrf.mxu0  ;;  %14521 = vmatpush3.bf16.msra.mxu1 %v16302_v40  ;;  %v5026_v28 = vpop.permute.xlu1 %5025 }
 0x1e1   : > { %v2288_v22 = vpop.f32.mrf.mxu1  ;;  %v5035_v26 = vsel %vm5033_vm7, %v5024_v17, %v5026_v28  ;;  %6516 = vrot.lane.b32.xlu1 %v16167_v12, %s15082_s20  ;;  %s15091_s20 = smov 106  }
 0x1e2   : > { %v2375_v34 = vadd.f32 %v2288_v22, %v2210_v54  ;;  %v5022_v38 = vpop.permute.xlu0 %5021  ;;  %13972 = vmatmul.mubr.msk.bf16.vlgmr.msra.gmra.mxu0 %vm426_vm3, %v13970_v2  ;;  %v2327_v57 = vpop.f32.mrf.mxu0  ;;  %v5046_v59 = vand.u32 %v5035_v26, %v15315_v18 }
 0x1e3   : > { %v5034_v45 = vsel %vm5033_vm7, %v5022_v38, %v5024_v17  ;;  %v2290_v46 = vpop.f32.mrf.mxu1  ;;  %5089 = vmatprep.mubr.bf16.mxu0 %v15041_v9  ;;  %v2376_v54 = vadd.f32 %v2327_v57, %v2211_v47 }
 0x1e4   : > { %v5043_v56 = vand.u32 %v5034_v45, %v15315_v18  ;;  %6673 = vrot.lane.b32.xlu0 %v15219_v7, %s15083_s18  ;;  %v2329_v41 = vpop.f32.mrf.mxu0  ;;  %5071 = vmatprep.subr.bf16.mxu0 %v5046_v59  ;;  %v5028_v1 = vpop.permute.xlu1 %5027 }
 0x1e5   : > { %v2291_v52 = vpop.f32.mrf.mxu1  ;;  %v2377_v58 = vadd.f32 %v2329_v41, %v2212_v36  ;;  %v5036_v5 = vsel %vm5033_vm7, %v5026_v28, %v5028_v1  ;;  %v13974_v36 = vld [vmem:[%s18543_s3 + $0x70] sm:$0xf]  ;;  %6675 = vrot.lane.b32.xlu1 %v15226_v10, %s15083_s18 }
 0x1e6   : > { %v5030_v55 = vpop.permute.xlu0 %5029  ;;  %14523 = vmatmul.mubr.msk.bf16.vlgmr.msra.gmra.mxu1 %vm426_vm3, %v13970_v2  ;;  %v2331_v47 = vpop.f32.mrf.mxu0  ;;  %5072 = vmatpush1.bf16.msra.mxu0 %v5043_v56  ;;  %v5049_v2 = vand.u32 %v5036_v5, %v15315_v18 }
 0x1e7   : > { %v2368_v4 = vpop.f32.mrf.mxu1  ;;  %v5037_v61 = vsel %vm5033_vm7, %v5028_v1, %v5030_v55  ;;  %14526 = vmatprep.subr.bf16.mxu0 %v15054_v30  ;;  %5130 = vmatprep.mubr.bf16.mxu1 %v15041_v9 }
 0x1e8   : > { %v2378_v63 = vadd.f32 %v2368_v4, %v2213_v60  ;;  %6671 = vrot.lane.b32.xlu0 %v16137_v50, %s15083_s18  ;;  %v5052_v8 = vand.u32 %v5037_v61, %v15315_v18  ;;  %v2332_v60 = vpop.f32.mrf.mxu0  ;;  %v5032_v14 = vpop.permute.xlu1 %5031 }
 0x1e9   : > { %v14428_v0 = vpop.f32.mrf.mxu1  ;;  %v5038_v24 = vsel %vm5033_vm7, %v5030_v55, %v5032_v14  ;;  %6677 = vrot.lane.b32.xlu1 %v15228_v11, %s15083_s18  ;;  %vm6848_vm7 = vcmask 7168  }
 0x1ea   : > { %v5189_v19 = vpop.permute.xlu0 %5188  ;;  %13975 = vmatmul.mubr.msk.bf16.vlgmr.msra.gmra.mxu0 %vm426_vm3, %v13974_v36  ;;  %5112 = vmatprep.subr.bf16.mxu1 %v5052_v8  ;;  %v2451_v6 = vpop.f32.mrf.mxu0  ;;  %v5055_v27 = vand.u32 %v5038_v24, %v15315_v18  ;;  %v13978_v8 = vld [vmem:[%s18543_s3 + $0x74] sm:$0xf] }
 0x1eb   : > { %v2371_v17 = vpop.f32.mrf.mxu1  ;;  %5113 = vmatpush1.bf16.msra.mxu1 %v5049_v2  ;;  %v2539_v22 = vadd.f32 %v2451_v6, %v2374_v20  ;;  %14528 = vmatprep.mubr.msk.bf16.mxu0 %vm15055_vm4, %v15054_v30 }
 0x1ec   : > { %6679 = vrot.lane.b32.xlu0 %v15242_v13, %s15083_s18  ;;  %v2453_v38 = vpop.f32.mrf.mxu0  ;;  %14527 = vmatpush3.bf16.msra.mxu0 %v5055_v27  ;;  %v5191_v46 = vpop.permute.xlu1 %5190 }
 0x1ed   : > { %v14429_v43 = vpop.f32.mrf.mxu1  ;;  %v2540_v45 = vadd.f32 %v2453_v38, %v2375_v34  ;;  %v5200_v20 = vsel %vm5198_vm8, %v5189_v19, %v5191_v46  ;;  %6681 = vrot.lane.b32.xlu1 %v16167_v12, %s15083_s18  ;;  %s15089_s18 = smov 108  }
 0x1ee   : > { %v5187_v28 = vpop.permute.xlu0 %5186  ;;  %13976 = vmatmul.mubr.msk.bf16.vlgmr.msra.gmra.mxu1 %vm426_vm3, %v13974_v36  ;;  %v2455_v52 = vpop.f32.mrf.mxu0  ;;  %v5211_v41 = vand.u32 %v5200_v20, %v15315_v18 }
 0x1ef   : > { %v5199_v26 = vsel %vm5198_vm8, %v5187_v28, %v5189_v19  ;;  %v2492_v56 = vpop.f32.mrf.mxu1  ;;  %5254 = vmatprep.mubr.bf16.mxu1 %v15041_v9 }
 0x1f0   : > { %v5208_v57 = vand.u32 %v5199_v26, %v15315_v18  ;;  %v2541_v59 = vadd.f32 %v2492_v56, %v2376_v54  ;;  %6838 = vrot.lane.b32.xlu0 %v15219_v7, %s15084_s13  ;;  %v2456_v55 = vpop.f32.mrf.mxu0  ;;  %5236 = vmatprep.subr.bf16.mxu1 %v5211_v41  ;;  %v5193_v4 = vpop.permute.xlu1 %5192 }
 0x1f1   : > { %v2494_v34 = vpop.f32.mrf.mxu1  ;;  %v5201_v61 = vsel %vm5198_vm8, %v5191_v46, %v5193_v4  ;;  %6840 = vrot.lane.b32.xlu1 %v15226_v10, %s15084_s13 }
 0x1f2   : > { %v2542_v1 = vadd.f32 %v2494_v34, %v2377_v58  ;;  %v5195_v54 = vpop.permute.xlu0 %5194  ;;  %14529 = vmatmul.mubr.msk.bf16.vlgmr.msra.gmra.mxu0 %vm426_vm3, %v13974_v36  ;;  %v2533_v0 = vpop.f32.mrf.mxu0  ;;  %5237 = vmatpush1.bf16.msra.mxu1 %v5208_v57  ;;  %v5214_v60 = vand.u32 %v5201_v61, %v15315_v18 }
 0x1f3   : > { %v2496_v5 = vpop.f32.mrf.mxu1  ;;  %v5202_v47 = vsel %vm5198_vm8, %v5193_v4, %v5195_v54  ;;  %v2543_v58 = vadd.f32 %v2533_v0, %v2378_v63  ;;  %14532 = vmatprep.subr.bf16.mxu1 %v15054_v30  ;;  %5295 = vmatprep.mubr.bf16.mxu0 %v15041_v9 }
 0x1f4   : > { %6836 = vrot.lane.b32.xlu0 %v16137_v50, %s15084_s13  ;;  %v5217_v36 = vand.u32 %v5202_v47, %v15315_v18  ;;  %v14434_v19 = vpop.f32.mrf.mxu0  ;;  %v5197_v50 = vpop.permute.xlu1 %5196 }
 0x1f5   : > { %v2497_v2 = vpop.f32.mrf.mxu1  ;;  %v5203_v63 = vsel %vm5198_vm8, %v5195_v54, %v5197_v50  ;;  %6842 = vrot.lane.b32.xlu1 %v15228_v11, %s15084_s13  ;;  %vm7160_vm8 = vcmask 1039360  }
 0x1f6   : > { %v5354_v14 = vpop.permute.xlu0 %5353  ;;  %13979 = vmatmul.mubr.msk.bf16.vlgmr.msra.gmra.mxu1 %vm426_vm3, %v13978_v8  ;;  %5277 = vmatprep.subr.bf16.mxu0 %v5217_v36  ;;  %v2536_v24 = vpop.f32.mrf.mxu0  ;;  %v5220_v27 = vand.u32 %v5203_v63, %v15315_v18  ;;  %v13982_v36 = vld [vmem:[%s18543_s3 + $0x78] sm:$0xf] }
 0x1f7   : > { %v2616_v17 = vpop.f32.mrf.mxu1  ;;  %5278 = vmatpush1.bf16.msra.mxu0 %v5214_v60  ;;  %14534 = vmatprep.mubr.msk.bf16.mxu1 %vm15055_vm4, %v15054_v30 }
 0x1f8   : > { %v2704_v6 = vadd.f32 %v2616_v17, %v2539_v22  ;;  %6844 = vrot.lane.b32.xlu0 %v15242_v13, %s15084_s13  ;;  %v14435_v22 = vpop.f32.mrf.mxu0  ;;  %14533 = vmatpush3.bf16.msra.mxu1 %v5220_v27  ;;  %v5356_v46 = vpop.permute.xlu1 %5355 }
 0x1f9   : > { %v2618_v43 = vpop.f32.mrf.mxu1  ;;  %v5365_v20 = vsel %vm5363_vm10, %v5354_v14, %v5356_v46  ;;  %6846 = vrot.lane.b32.xlu1 %v16167_v12, %s15084_s13  ;;  %s15088_s13 = smov 124  }
 0x1fa   : > { %v2705_v38 = vadd.f32 %v2618_v43, %v2540_v45  ;;  %v5352_v28 = vpop.permute.xlu0 %5351  ;;  %13980 = vmatmul.mubr.msk.bf16.vlgmr.msra.gmra.mxu0 %vm426_vm3, %v13978_v8  ;;  %v2657_v52 = vpop.f32.mrf.mxu0  ;;  %v5376_v41 = vand.u32 %v5365_v20, %v15315_v18 }
 0x1fb   : > { %v5364_v26 = vsel %vm5363_vm10, %v5352_v28, %v5354_v14  ;;  %v2620_v56 = vpop.f32.mrf.mxu1  ;;  %5419 = vmatprep.mubr.bf16.mxu0 %v15041_v9  ;;  %v2706_v45 = vadd.f32 %v2657_v52, %v2541_v59 }
 0x1fc   : > { %v5373_v57 = vand.u32 %v5364_v26, %v15315_v18  ;;  %7150 = vrot.lane.b32.xlu0 %v15226_v10, %s15085_s19  ;;  %v2659_v55 = vpop.f32.mrf.mxu0  ;;  %5401 = vmatprep.subr.bf16.mxu0 %v5376_v41  ;;  %v5358_v5 = vpop.permute.xlu1 %5357 }
 0x1fd   : > { %v2621_v34 = vpop.f32.mrf.mxu1  ;;  %v2707_v4 = vadd.f32 %v2659_v55, %v2542_v1  ;;  %v5366_v47 = vsel %vm5363_vm10, %v5356_v46, %v5358_v5  ;;  %7152 = vrot.lane.b32.xlu1 %v15228_v11, %s15085_s19  ;;  %v16441_v46 = vld.sshfl [vmem:[%s16430_s15] sm:$0xff pattern:$0x76325410] }
 0x1fe   : > { %v5360_v54 = vpop.permute.xlu0 %5359  ;;  %14535 = vmatmul.mubr.msk.bf16.vlgmr.msra.gmra.mxu1 %vm426_vm3, %v13978_v8  ;;  %v2661_v59 = vpop.f32.mrf.mxu0  ;;  %5402 = vmatpush1.bf16.msra.mxu0 %v5373_v57  ;;  %v5379_v60 = vand.u32 %v5366_v47, %v15315_v18 }
 0x1ff   : > { %v2698_v61 = vpop.f32.mrf.mxu1  ;;  %v5367_v0 = vsel %vm5363_vm10, %v5358_v5, %v5360_v54  ;;  %14538 = vmatprep.subr.bf16.mxu0 %v15054_v30  ;;  %5460 = vmatprep.mubr.bf16.mxu1 %v15041_v9 }
 0x200   : > { %v2708_v2 = vadd.f32 %v2698_v61, %v2543_v58  ;;  %7148 = vrot.lane.b32.xlu0 %v15219_v7, %s15085_s19  ;;  %v5382_v8 = vand.u32 %v5367_v0, %v15315_v18  ;;  %v2662_v58 = vpop.f32.mrf.mxu0  ;;  %v5362_v14 = vpop.permute.xlu1 %5361 }
 0x201   : > { %v14440_v1 = vpop.f32.mrf.mxu1  ;;  %v5368_v17 = vsel %vm5363_vm10, %v5360_v54, %v5362_v14  ;;  %7154 = vrot.lane.b32.xlu1 %v15242_v13, %s15085_s19  ;;  %vm7325_vm10 = vcmask 1031168  }
 0x202   : > { %v5519_v19 = vpop.permute.xlu0 %5518  ;;  %13983 = vmatmul.mubr.msk.bf16.vlgmr.msra.gmra.mxu0 %vm426_vm3, %v13982_v36  ;;  %5442 = vmatprep.subr.bf16.mxu1 %v5382_v8  ;;  %v2781_v63 = vpop.f32.mrf.mxu0  ;;  %v5385_v24 = vand.u32 %v5368_v17, %v15315_v18  ;;  %v13986_v8 = vld [vmem:[%s18543_s3 + $0x7c] sm:$0xf] }
 0x203   : > { %v2701_v50 = vpop.f32.mrf.mxu1  ;;  %5443 = vmatpush1.bf16.msra.mxu1 %v5379_v60  ;;  %v2869_v27 = vadd.f32 %v2781_v63, %v2704_v6  ;;  %14540 = vmatprep.mubr.msk.bf16.mxu0 %vm15055_vm4, %v15054_v30 }
 0x204   : > { %7156 = vrot.lane.b32.xlu0 %v16167_v12, %s15085_s19  ;;  %v2783_v22 = vpop.f32.mrf.mxu0  ;;  %14539 = vmatpush3.bf16.msra.mxu0 %v5385_v24  ;;  %v5521_v56 = vpop.permute.xlu1 %5520 }
 0x205   : > { %v14441_v43 = vpop.f32.mrf.mxu1  ;;  %v2870_v26 = vadd.f32 %v2783_v22, %v2705_v38  ;;  %v5530_v6 = vsel %vm5528_vm11, %v5519_v19, %v5521_v56  ;;  %7158 = vrot.lane.b32.xlu1 %v16441_v46, %s15085_s19  ;;  %s15092_s19 = smov 105  }
 0x206   : > { %v5517_v28 = vpop.permute.xlu0 %5516  ;;  %13984 = vmatmul.mubr.msk.bf16.vlgmr.msra.gmra.mxu1 %vm426_vm3, %v13982_v36  ;;  %v2785_v34 = vpop.f32.mrf.mxu0  ;;  %v5541_v55 = vand.u32 %v5530_v6, %v15315_v18 }
 0x207   : > { %v5529_v20 = vsel %vm5528_vm11, %v5517_v28, %v5519_v19  ;;  %v2822_v57 = vpop.f32.mrf.mxu1  ;;  %5584 = vmatprep.mubr.bf16.mxu1 %v15041_v9 }
 0x208   : > { %v5538_v52 = vand.u32 %v5529_v20, %v15315_v18  ;;  %v2871_v41 = vadd.f32 %v2822_v57, %v2706_v45  ;;  %7315 = vrot.lane.b32.xlu0 %v15226_v10, %s15086_s17  ;;  %v2786_v54 = vpop.f32.mrf.mxu0  ;;  %5566 = vmatprep.subr.bf16.mxu1 %v5541_v55  ;;  %v5523_v47 = vpop.permute.xlu1 %5522 }
 0x209   : > { %v2824_v38 = vpop.f32.mrf.mxu1  ;;  %v5531_v45 = vsel %vm5528_vm11, %v5521_v56, %v5523_v47  ;;  %7317 = vrot.lane.b32.xlu1 %v15228_v11, %s15086_s17 }
 0x20a   : > { %v2872_v5 = vadd.f32 %v2824_v38, %v2707_v4  ;;  %v5525_v61 = vpop.permute.xlu0 %5524  ;;  %14541 = vmatmul.mubr.msk.bf16.vlgmr.msra.gmra.mxu0 %vm426_vm3, %v13982_v36  ;;  %v2863_v1 = vpop.f32.mrf.mxu0  ;;  %5567 = vmatpush1.bf16.msra.mxu1 %v5538_v52  ;;  %v5544_v58 = vand.u32 %v5531_v45, %v15315_v18 }
 0x20b   : > { %v2826_v0 = vpop.f32.mrf.mxu1  ;;  %v5532_v59 = vsel %vm5528_vm11, %v5523_v47, %v5525_v61  ;;  %v2873_v4 = vadd.f32 %v2863_v1, %v2708_v2  ;;  %14544 = vmatprep.subr.bf16.mxu1 %v15054_v30  ;;  %5625 = vmatprep.mubr.bf16.mxu0 %v15041_v9 }
 0x20c   : > { %7313 = vrot.lane.b32.xlu0 %v15219_v7, %s15086_s17  ;;  %v5547_v36 = vand.u32 %v5532_v59, %v15315_v18  ;;  %v14446_v19 = vpop.f32.mrf.mxu0  ;;  %v5527_v50 = vpop.permute.xlu1 %5526 }
 0x20d   : > { %v2827_v60 = vpop.f32.mrf.mxu1  ;;  %v5533_v2 = vsel %vm5528_vm11, %v5525_v61, %v5527_v50  ;;  %7319 = vrot.lane.b32.xlu1 %v15242_v13, %s15086_s17  ;;  %vm7490_vm11 = vcmask 1022976  }
 0x20e   : > { %v5684_v14 = vpop.permute.xlu0 %5683  ;;  %13987 = vmatmul.mubr.msk.bf16.vlgmr.msra.gmra.mxu1 %vm426_vm3, %v13986_v8  ;;  %5607 = vmatprep.subr.bf16.mxu0 %v5547_v36  ;;  %v2866_v63 = vpop.f32.mrf.mxu0  ;;  %v5550_v43 = vand.u32 %v5533_v2, %v15315_v18 }
 0x20f   : > { %v2946_v17 = vpop.f32.mrf.mxu1  ;;  %5608 = vmatpush1.bf16.msra.mxu0 %v5544_v58  ;;  %14546 = vmatprep.mubr.msk.bf16.mxu1 %vm15055_vm4, %v15054_v30  ;;  %v13990_v58 = vld [vmem:[%s18543_s3 + $0x80] sm:$0xf] }
 0x210   : > { %v3034_v24 = vadd.f32 %v2946_v17, %v2869_v27  ;;  %7321 = vrot.lane.b32.xlu0 %v16167_v12, %s15086_s17  ;;  %v14447_v28 = vpop.f32.mrf.mxu0  ;;  %14545 = vmatpush3.bf16.msra.mxu1 %v5550_v43  ;;  %v5686_v57 = vpop.permute.xlu1 %5685 }
 0x211   : > { %v2948_v22 = vpop.f32.mrf.mxu1  ;;  %v5695_v52 = vsel %vm5693_vm12, %v5684_v14, %v5686_v57  ;;  %7323 = vrot.lane.b32.xlu1 %v16441_v46, %s15086_s17  ;;  %s15094_s17 = smov 103  }
 0x212   : > { %v3035_v56 = vadd.f32 %v2948_v22, %v2870_v26  ;;  %v5682_v20 = vpop.permute.xlu0 %5681  ;;  %13988 = vmatmul.mubr.msk.bf16.vlgmr.msra.gmra.mxu0 %vm426_vm3, %v13986_v8  ;;  %v2987_v38 = vpop.f32.mrf.mxu0  ;;  %v5706_v54 = vand.u32 %v5695_v52, %v15315_v18 }
 0x213   : > { %v5694_v27 = vsel %vm5693_vm12, %v5682_v20, %v5684_v14  ;;  %v2950_v6 = vpop.f32.mrf.mxu1  ;;  %5749 = vmatprep.mubr.bf16.mxu0 %v15041_v9  ;;  %v3036_v26 = vadd.f32 %v2987_v38, %v2871_v41 }
 0x214   : > { %v5703_v34 = vand.u32 %v5694_v27, %v15315_v18  ;;  %7480 = vrot.lane.b32.xlu0 %v15226_v10, %s15087_s10  ;;  %v2989_v61 = vpop.f32.mrf.mxu0  ;;  %5731 = vmatprep.subr.bf16.mxu0 %v5706_v54  ;;  %v5688_v45 = vpop.permute.xlu1 %5687 }
 0x215   : > { %v2951_v55 = vpop.f32.mrf.mxu1  ;;  %v3037_v0 = vadd.f32 %v2989_v61, %v2872_v5  ;;  %v5696_v1 = vsel %vm5693_vm12, %v5686_v57, %v5688_v45  ;;  %7482 = vrot.lane.b32.xlu1 %v15228_v11, %s15087_s10 }
 0x216   : > { %v5690_v47 = vpop.permute.xlu0 %5689  ;;  %14547 = vmatmul.mubr.msk.bf16.vlgmr.msra.gmra.mxu1 %vm426_vm3, %v13986_v8  ;;  %v2991_v36 = vpop.f32.mrf.mxu0  ;;  %5732 = vmatpush1.bf16.msra.mxu0 %v5703_v34  ;;  %v5709_v19 = vand.u32 %v5696_v1, %v15315_v18 }
 0x217   : > { %v3028_v59 = vpop.f32.mrf.mxu1  ;;  %v5697_v60 = vsel %vm5693_vm12, %v5688_v45, %v5690_v47  ;;  %14550 = vmatprep.subr.bf16.mxu0 %v15054_v30  ;;  %5790 = vmatprep.mubr.bf16.mxu1 %v15041_v9 }
 0x218   : > { %v3038_v41 = vadd.f32 %v3028_v59, %v2873_v4  ;;  %7478 = vrot.lane.b32.xlu0 %v15219_v7, %s15087_s10  ;;  %v5712_v8 = vand.u32 %v5697_v60, %v15315_v18  ;;  %v2992_v14 = vpop.f32.mrf.mxu0  ;;  %v5692_v50 = vpop.permute.xlu1 %5691 }
 0x219   : > { %v14452_v5 = vpop.f32.mrf.mxu1  ;;  %v5698_v2 = vsel %vm5693_vm12, %v5690_v47, %v5692_v50  ;;  %7484 = vrot.lane.b32.xlu1 %v15242_v13, %s15087_s10  ;;  %vm7655_vm12 = vcmask 1014784  }
 0x21a   : > { %v5849_v4 = vpop.permute.xlu0 %5848  ;;  %13991 = vmatmul.mubr.msk.bf16.vlgmr.msra.gmra.mxu0 %vm426_vm3, %v13990_v58  ;;  %5772 = vmatprep.subr.bf16.mxu1 %v5712_v8  ;;  %v3111_v63 = vpop.f32.mrf.mxu0  ;;  %v5715_v43 = vand.u32 %v5698_v2, %v15315_v18  ;;  %v13994_v5 = vld [vmem:[%s18543_s3 + $0x84] sm:$0xf] }
 0x21b   : > { %v3031_v17 = vpop.f32.mrf.mxu1  ;;  %5773 = vmatpush1.bf16.msra.mxu1 %v5709_v19  ;;  %v3199_v22 = vadd.f32 %v3111_v63, %v3034_v24  ;;  %14552 = vmatprep.mubr.msk.bf16.mxu0 %vm15055_vm4, %v15054_v30 }
 0x21c   : > { %7486 = vrot.lane.b32.xlu0 %v16167_v12, %s15087_s10  ;;  %v3113_v20 = vpop.f32.mrf.mxu0  ;;  %14551 = vmatpush3.bf16.msra.mxu0 %v5715_v43  ;;  %v5851_v6 = vpop.permute.xlu1 %5850  ;;  %v16536_v43 = vld.sshfl [vmem:[%s15216_s14 + $0x8] sm:$0x3 pattern:$0x76325410] }
 0x21d   : > { %v14453_v28 = vpop.f32.mrf.mxu1  ;;  %v3200_v27 = vadd.f32 %v3113_v20, %v3035_v56  ;;  %v5860_v12 = vsel %vm5858_vm14, %v5849_v4, %v5851_v6  ;;  %7488 = vrot.lane.b32.xlu1 %v16441_v46, %s15087_s10  ;;  %s15095_s10 = smov 102  }
 0x21e   : > { %v5847_v57 = vpop.permute.xlu0 %5846  ;;  %13992 = vmatmul.mubr.msk.bf16.vlgmr.msra.gmra.mxu1 %vm426_vm3, %v13990_v58  ;;  %v3115_v38 = vpop.f32.mrf.mxu0  ;;  %v5871_v54 = vand.u32 %v5860_v12, %v15315_v18 }
 0x21f   : > { %v5859_v52 = vsel %vm5858_vm14, %v5847_v57, %v5849_v4  ;;  %v3152_v34 = vpop.f32.mrf.mxu1  ;;  %5914 = vmatprep.mubr.bf16.mxu1 %v15041_v9 }
 0x220   : > { %v5868_v24 = vand.u32 %v5859_v52, %v15315_v18  ;;  %v3201_v55 = vadd.f32 %v3152_v34, %v3036_v26  ;;  %7645 = vrot.lane.b32.xlu0 %v15226_v10, %s15088_s13  ;;  %v3116_v61 = vpop.f32.mrf.mxu0  ;;  %5896 = vmatprep.subr.bf16.mxu1 %v5871_v54  ;;  %v5853_v59 = vpop.permute.xlu1 %5852 }
 0x221   : > { %v3154_v56 = vpop.f32.mrf.mxu1  ;;  %v5861_v26 = vsel %vm5858_vm14, %v5851_v6, %v5853_v59  ;;  %7647 = vrot.lane.b32.xlu1 %v15228_v11, %s15088_s13 }
 0x222   : > { %v3202_v47 = vadd.f32 %v3154_v56, %v3037_v0  ;;  %v5855_v45 = vpop.permute.xlu0 %5854  ;;  %14553 = vmatmul.mubr.msk.bf16.vlgmr.msra.gmra.mxu0 %vm426_vm3, %v13990_v58  ;;  %v3193_v36 = vpop.f32.mrf.mxu0  ;;  %5897 = vmatpush1.bf16.msra.mxu1 %v5868_v24  ;;  %v5874_v19 = vand.u32 %v5861_v26, %v15315_v18 }
 0x223   : > { %v3156_v1 = vpop.f32.mrf.mxu1  ;;  %v5862_v60 = vsel %vm5858_vm14, %v5853_v59, %v5855_v45  ;;  %v3203_v0 = vadd.f32 %v3193_v36, %v3038_v41  ;;  %14556 = vmatprep.subr.bf16.mxu1 %v15054_v30  ;;  %5955 = vmatprep.mubr.bf16.mxu0 %v15041_v9 }
 0x224   : > { %7643 = vrot.lane.b32.xlu0 %v15219_v7, %s15088_s13  ;;  %v5877_v58 = vand.u32 %v5862_v60, %v15315_v18  ;;  %v14458_v14 = vpop.f32.mrf.mxu0  ;;  %v5857_v50 = vpop.permute.xlu1 %5856 }
 0x225   : > { %v3157_v8 = vpop.f32.mrf.mxu1  ;;  %v5863_v41 = vsel %vm5858_vm14, %v5855_v45, %v5857_v50  ;;  %7649 = vrot.lane.b32.xlu1 %v15242_v13, %s15088_s13  ;;  %vm7820_vm14 = vcmask 883712  }
 0x226   : > { %v6014_v4 = vpop.permute.xlu0 %6013  ;;  %13995 = vmatmul.mubr.msk.bf16.vlgmr.msra.gmra.mxu1 %vm426_vm3, %v13994_v5  ;;  %5937 = vmatprep.subr.bf16.mxu0 %v5877_v58  ;;  %v3196_v2 = vpop.f32.mrf.mxu0  ;;  %v5880_v28 = vand.u32 %v5863_v41, %v15315_v18 }
 0x227   : > { %v3276_v17 = vpop.f32.mrf.mxu1  ;;  %5938 = vmatpush1.bf16.msra.mxu0 %v5874_v19  ;;  %14558 = vmatprep.mubr.msk.bf16.mxu1 %vm15055_vm4, %v15054_v30  ;;  %v13998_v19 = vld [vmem:[%s18543_s3 + $0x88] sm:$0xf] }
 0x228   : > { %v3364_v63 = vadd.f32 %v3276_v17, %v3199_v22  ;;  %7651 = vrot.lane.b32.xlu0 %v16536_v43, %s15088_s13  ;;  %v14459_v57 = vpop.f32.mrf.mxu0  ;;  %14557 = vmatpush3.bf16.msra.mxu1 %v5880_v28  ;;  %v6016_v22 = vpop.permute.xlu1 %6015 }
 0x229   : > { %v3278_v20 = vpop.f32.mrf.mxu1  ;;  %v6025_v24 = vsel %vm6023_vm15, %v6014_v4, %v6016_v22  ;;  %7653 = vrot.lane.b32.xlu1 %v16441_v46, %s15088_s13  ;;  %s15096_s13 = smov 101  }
 0x22a   : > { %v3365_v6 = vadd.f32 %v3278_v20, %v3200_v27  ;;  %v6012_v52 = vpop.permute.xlu0 %6011  ;;  %13996 = vmatmul.mubr.msk.bf16.vlgmr.msra.gmra.mxu0 %vm426_vm3, %v13994_v5  ;;  %v3317_v56 = vpop.f32.mrf.mxu0  ;;  %v6036_v61 = vand.u32 %v6025_v24, %v15315_v18 }
 0x22b   : > { %v6024_v34 = vsel %vm6023_vm15, %v6012_v52, %v6014_v4  ;;  %v3280_v12 = vpop.f32.mrf.mxu1  ;;  %6079 = vmatprep.mubr.bf16.mxu0 %v15041_v9  ;;  %v3366_v27 = vadd.f32 %v3317_v56, %v3201_v55 }
 0x22c   : > { %v6033_v38 = vand.u32 %v6024_v34, %v15315_v18  ;;  %7810 = vrot.lane.b32.xlu0 %v15226_v10, %s15089_s18  ;;  %v3319_v45 = vpop.f32.mrf.mxu0  ;;  %6061 = vmatprep.subr.bf16.mxu0 %v6036_v61  ;;  %v6018_v26 = vpop.permute.xlu1 %6017 }
 0x22d   : > { %v3281_v54 = vpop.f32.mrf.mxu1  ;;  %v3367_v1 = vadd.f32 %v3319_v45, %v3202_v47  ;;  %v6026_v36 = vsel %vm6023_vm15, %v6016_v22, %v6018_v26  ;;  %7812 = vrot.lane.b32.xlu1 %v15228_v11, %s15089_s18 }
 0x22e   : > { %v6020_v59 = vpop.permute.xlu0 %6019  ;;  %14559 = vmatmul.mubr.msk.bf16.vlgmr.msra.gmra.mxu1 %vm426_vm3, %v13994_v5  ;;  %v3321_v58 = vpop.f32.mrf.mxu0  ;;  %6062 = vmatpush1.bf16.msra.mxu0 %v6033_v38  ;;  %v6039_v14 = vand.u32 %v6026_v36, %v15315_v18 }
 0x22f   : > { %v3358_v60 = vpop.f32.mrf.mxu1  ;;  %v6027_v8 = vsel %vm6023_vm15, %v6018_v26, %v6020_v59  ;;  %14562 = vmatprep.subr.bf16.mxu0 %v15054_v30  ;;  %6120 = vmatprep.mubr.bf16.mxu1 %v15041_v9 }
 0x230   : > { %v3368_v55 = vadd.f32 %v3358_v60, %v3203_v0  ;;  %7808 = vrot.lane.b32.xlu0 %v15219_v7, %s15089_s18  ;;  %v6042_v5 = vand.u32 %v6027_v8, %v15315_v18  ;;  %v3322_v4 = vpop.f32.mrf.mxu0  ;;  %v6022_v50 = vpop.permute.xlu1 %6021 }
 0x231   : > { %v14464_v47 = vpop.f32.mrf.mxu1  ;;  %v6028_v41 = vsel %vm6023_vm15, %v6020_v59, %v6022_v50  ;;  %7814 = vrot.lane.b32.xlu1 %v15242_v13, %s15089_s18  ;;  %vm7985_vm15 = vcmask 875520  }
 0x232   : > { %v6179_v0 = vpop.permute.xlu0 %6178  ;;  %13999 = vmatmul.mubr.msk.bf16.vlgmr.msra.gmra.mxu0 %vm426_vm3, %v13998_v19  ;;  %6102 = vmatprep.subr.bf16.mxu1 %v6042_v5  ;;  %v3441_v2 = vpop.f32.mrf.mxu0  ;;  %v6045_v28 = vand.u32 %v6028_v41, %v15315_v18  ;;  %v14002_v5 = vld [vmem:[%s18543_s3 + $0x8c] sm:$0xf] }
 0x233   : > { %v3361_v17 = vpop.f32.mrf.mxu1  ;;  %6103 = vmatpush1.bf16.msra.mxu1 %v6039_v14  ;;  %v3529_v20 = vadd.f32 %v3441_v2, %v3364_v63  ;;  %14564 = vmatprep.mubr.msk.bf16.mxu0 %vm15055_vm4, %v15054_v30 }
 0x234   : > { %7816 = vrot.lane.b32.xlu0 %v16536_v43, %s15089_s18  ;;  %v3443_v52 = vpop.f32.mrf.mxu0  ;;  %14563 = vmatpush3.bf16.msra.mxu0 %v6045_v28  ;;  %v6181_v12 = vpop.permute.xlu1 %6180 }
 0x235   : > { %v14465_v57 = vpop.f32.mrf.mxu1  ;;  %v3530_v34 = vadd.f32 %v3443_v52, %v3365_v6  ;;  %v6190_v56 = vsel %vm6188_vm0, %v6179_v0, %v6181_v12  ;;  %7818 = vrot.lane.b32.xlu1 %v16441_v46, %s15089_s18  ;;  %s15110_s18 = smov 55  }
 0x236   : > { %v6177_v22 = vpop.permute.xlu0 %6176  ;;  %14000 = vmatmul.mubr.msk.bf16.vlgmr.msra.gmra.mxu1 %vm426_vm3, %v13998_v19  ;;  %v3445_v54 = vpop.f32.mrf.mxu0  ;;  %v6201_v45 = vand.u32 %v6190_v56, %v15315_v18 }
 0x237   : > { %v6189_v24 = vsel %vm6188_vm0, %v6177_v22, %v6179_v0  ;;  %v3482_v38 = vpop.f32.mrf.mxu1  ;;  %6244 = vmatprep.mubr.bf16.mxu1 %v15041_v9 }
 0x238   : > { %v6198_v63 = vand.u32 %v6189_v24, %v15315_v18  ;;  %v3531_v61 = vadd.f32 %v3482_v38, %v3366_v27  ;;  %7975 = vrot.lane.b32.xlu0 %v15226_v10, %s15090_s11  ;;  %v3446_v59 = vpop.f32.mrf.mxu0  ;;  %6226 = vmatprep.subr.bf16.mxu1 %v6201_v45  ;;  %v6183_v36 = vpop.permute.xlu1 %6182 }
 0x239   : > { %v3484_v6 = vpop.f32.mrf.mxu1  ;;  %v6191_v27 = vsel %vm6188_vm0, %v6181_v12, %v6183_v36  ;;  %7977 = vrot.lane.b32.xlu1 %v15228_v11, %s15090_s11 }
 0x23a   : > { %v3532_v26 = vadd.f32 %v3484_v6, %v3367_v1  ;;  %v6185_v60 = vpop.permute.xlu0 %6184  ;;  %14565 = vmatmul.mubr.msk.bf16.vlgmr.msra.gmra.mxu0 %vm426_vm3, %v13998_v19  ;;  %v3523_v47 = vpop.f32.mrf.mxu0  ;;  %6227 = vmatpush1.bf16.msra.mxu1 %v6198_v63  ;;  %v6204_v4 = vand.u32 %v6191_v27, %v15315_v18 }
 0x23b   : > { %v3486_v8 = vpop.f32.mrf.mxu1  ;;  %v6192_v58 = vsel %vm6188_vm0, %v6183_v36, %v6185_v60  ;;  %v3533_v1 = vadd.f32 %v3523_v47, %v3368_v55  ;;  %14568 = vmatprep.subr.bf16.mxu1 %v15054_v30  ;;  %6285 = vmatprep.mubr.bf16.mxu0 %v15041_v9 }
 0x23c   : > { %7973 = vrot.lane.b32.xlu0 %v15219_v7, %s15090_s11  ;;  %v6207_v19 = vand.u32 %v6192_v58, %v15315_v18  ;;  %v14470_v0 = vpop.f32.mrf.mxu0  ;;  %v6187_v17 = vpop.permute.xlu1 %6186 }
 0x23d   : > { %v3487_v14 = vpop.f32.mrf.mxu1  ;;  %v6193_v55 = vsel %vm6188_vm0, %v6185_v60, %v6187_v17  ;;  %7979 = vrot.lane.b32.xlu1 %v15242_v13, %s15090_s11  ;;  %vm8150_vm0 = vcmask 867328  }
 0x23e   : > { %v6344_v50 = vpop.permute.xlu0 %6343  ;;  %14003 = vmatmul.mubr.msk.bf16.vlgmr.msra.gmra.mxu1 %vm426_vm3, %v14002_v5  ;;  %6267 = vmatprep.subr.bf16.mxu0 %v6207_v19  ;;  %v3526_v2 = vpop.f32.mrf.mxu0  ;;  %v6210_v57 = vand.u32 %v6193_v55, %v15315_v18 }
 0x23f   : > { %v3606_v41 = vpop.f32.mrf.mxu1  ;;  %6268 = vmatpush1.bf16.msra.mxu0 %v6204_v4  ;;  %14570 = vmatprep.mubr.msk.bf16.mxu1 %vm15055_vm4, %v15054_v30  ;;  %v14006_v4 = vld [vmem:[%s18543_s3 + $0x90] sm:$0xf] }
 0x240   : > { %v3694_v28 = vadd.f32 %v3606_v41, %v3529_v20  ;;  %7981 = vrot.lane.b32.xlu0 %v16536_v43, %s15090_s11  ;;  %v14471_v22 = vpop.f32.mrf.mxu0  ;;  %14569 = vmatpush3.bf16.msra.mxu1 %v6210_v57  ;;  %v6346_v38 = vpop.permute.xlu1 %6345 }
 0x241   : > { %v3608_v52 = vpop.f32.mrf.mxu1  ;;  %v6355_v63 = vsel %vm6353_vm1, %v6344_v50, %v6346_v38  ;;  %7983 = vrot.lane.b32.xlu1 %v16441_v46, %s15090_s11  ;;  %s15111_s11 = smov 54  }
 0x242   : > { %v3695_v12 = vadd.f32 %v3608_v52, %v3530_v34  ;;  %v6342_v24 = vpop.permute.xlu0 %6341  ;;  %14004 = vmatmul.mubr.msk.bf16.vlgmr.msra.gmra.mxu0 %vm426_vm3, %v14002_v5  ;;  %v3647_v6 = vpop.f32.mrf.mxu0  ;;  %v6366_v59 = vand.u32 %v6355_v63, %v15315_v18 }
 0x243   : > { %v6354_v20 = vsel %vm6353_vm1, %v6342_v24, %v6344_v50  ;;  %v3610_v56 = vpop.f32.mrf.mxu1  ;;  %6409 = vmatprep.mubr.bf16.mxu0 %v15041_v9  ;;  %v3696_v34 = vadd.f32 %v3647_v6, %v3531_v61 }
 0x244   : > { %v6363_v54 = vand.u32 %v6354_v20, %v15315_v18  ;;  %8140 = vrot.lane.b32.xlu0 %v15226_v10, %s15091_s20  ;;  %v3649_v60 = vpop.f32.mrf.mxu0  ;;  %6391 = vmatprep.subr.bf16.mxu0 %v6366_v59  ;;  %v6348_v27 = vpop.permute.xlu1 %6347 }
 0x245   : > { %v3611_v45 = vpop.f32.mrf.mxu1  ;;  %v3697_v8 = vadd.f32 %v3649_v60, %v3532_v26  ;;  %v6356_v47 = vsel %vm6353_vm1, %v6346_v38, %v6348_v27  ;;  %8142 = vrot.lane.b32.xlu1 %v15228_v11, %s15091_s20 }
 0x246   : > { %v6350_v36 = vpop.permute.xlu0 %6349  ;;  %14571 = vmatmul.mubr.msk.bf16.vlgmr.msra.gmra.mxu1 %vm426_vm3, %v14002_v5  ;;  %v3651_v19 = vpop.f32.mrf.mxu0  ;;  %6392 = vmatpush1.bf16.msra.mxu0 %v6363_v54  ;;  %v6369_v0 = vand.u32 %v6356_v47, %v15315_v18 }
 0x247   : > { %v3688_v58 = vpop.f32.mrf.mxu1  ;;  %v6357_v14 = vsel %vm6353_vm1, %v6348_v27, %v6350_v36  ;;  %14574 = vmatprep.subr.bf16.mxu0 %v15054_v30  ;;  %6450 = vmatprep.mubr.bf16.mxu1 %v15041_v9 }
 0x248   : > { %v3698_v61 = vadd.f32 %v3688_v58, %v3533_v1  ;;  %8138 = vrot.lane.b32.xlu0 %v15219_v7, %s15091_s20  ;;  %v6372_v5 = vand.u32 %v6357_v14, %v15315_v18  ;;  %v3652_v50 = vpop.f32.mrf.mxu0  ;;  %v6352_v17 = vpop.permute.xlu1 %6351 }
 0x249   : > { %v14476_v26 = vpop.f32.mrf.mxu1  ;;  %v6358_v55 = vsel %vm6353_vm1, %v6350_v36, %v6352_v17  ;;  %8144 = vrot.lane.b32.xlu1 %v15242_v13, %s15091_s20  ;;  %vm8315_vm1 = vcmask 859136  }
 0x24a   : > { %v6509_v1 = vpop.permute.xlu0 %6508  ;;  %14007 = vmatmul.mubr.msk.bf16.vlgmr.msra.gmra.mxu0 %vm426_vm3, %v14006_v4  ;;  %6432 = vmatprep.subr.bf16.mxu1 %v6372_v5  ;;  %v3771_v2 = vpop.f32.mrf.mxu0  ;;  %v6375_v57 = vand.u32 %v6358_v55, %v15315_v18  ;;  %v14010_v5 = vld [vmem:[%s18543_s3 + $0x94] sm:$0xf] }
 0x24b   : > { %v3691_v41 = vpop.f32.mrf.mxu1  ;;  %6433 = vmatpush1.bf16.msra.mxu1 %v6369_v0  ;;  %v3859_v52 = vadd.f32 %v3771_v2, %v3694_v28  ;;  %14576 = vmatprep.mubr.msk.bf16.mxu0 %vm15055_vm4, %v15054_v30 }
 0x24c   : > { %8146 = vrot.lane.b32.xlu0 %v16536_v43, %s15091_s20  ;;  %v3773_v24 = vpop.f32.mrf.mxu0  ;;  %14575 = vmatpush3.bf16.msra.mxu0 %v6375_v57  ;;  %v6511_v56 = vpop.permute.xlu1 %6510 }
 0x24d   : > { %v14477_v22 = vpop.f32.mrf.mxu1  ;;  %v3860_v20 = vadd.f32 %v3773_v24, %v3695_v12  ;;  %v6520_v6 = vsel %vm426_vm3, %v6509_v1, %v6511_v56  ;;  %8148 = vrot.lane.b32.xlu1 %v16441_v46, %s15091_s20  ;;  %s15112_s20 = smov 53  }
 0x24e   : > { %v6507_v38 = vpop.permute.xlu0 %6506  ;;  %14008 = vmatmul.mubr.msk.bf16.vlgmr.msra.gmra.mxu1 %vm426_vm3, %v14006_v4  ;;  %v3775_v45 = vpop.f32.mrf.mxu0  ;;  %v6531_v60 = vand.u32 %v6520_v6, %v15315_v18 }
 0x24f   : > { %v6519_v63 = vsel %vm426_vm3, %v6507_v38, %v6509_v1  ;;  %v3812_v54 = vpop.f32.mrf.mxu1  ;;  %6574 = vmatprep.mubr.bf16.mxu1 %v15041_v9 }
 0x250   : > { %v6528_v28 = vand.u32 %v6519_v63, %v15315_v18  ;;  %v3861_v59 = vadd.f32 %v3812_v54, %v3696_v34  ;;  %8305 = vrot.lane.b32.xlu0 %v15226_v10, %s15092_s19  ;;  %v3776_v36 = vpop.f32.mrf.mxu0  ;;  %6556 = vmatprep.subr.bf16.mxu1 %v6531_v60  ;;  %v6513_v47 = vpop.permute.xlu1 %6512 }
 0x251   : > { %v3814_v12 = vpop.f32.mrf.mxu1  ;;  %v6521_v34 = vsel %vm426_vm3, %v6511_v56, %v6513_v47  ;;  %8307 = vrot.lane.b32.xlu1 %v15228_v11, %s15092_s19 }
 0x252   : > { %v3862_v27 = vadd.f32 %v3814_v12, %v3697_v8  ;;  %v6515_v58 = vpop.permute.xlu0 %6514  ;;  %14577 = vmatmul.mubr.msk.bf16.vlgmr.msra.gmra.mxu0 %vm426_vm3, %v14006_v4  ;;  %v3853_v26 = vpop.f32.mrf.mxu0  ;;  %6557 = vmatpush1.bf16.msra.mxu1 %v6528_v28  ;;  %v6534_v50 = vand.u32 %v6521_v34, %v15315_v18 }
 0x253   : > { %v3816_v14 = vpop.f32.mrf.mxu1  ;;  %v6522_v19 = vsel %vm426_vm3, %v6513_v47, %v6515_v58  ;;  %v3863_v8 = vadd.f32 %v3853_v26, %v3698_v61  ;;  %14580 = vmatprep.subr.bf16.mxu1 %v15054_v30  ;;  %6615 = vmatprep.mubr.bf16.mxu0 %v15041_v9 }
 0x254   : > { %8303 = vrot.lane.b32.xlu0 %v15219_v7, %s15092_s19  ;;  %v6537_v4 = vand.u32 %v6522_v19, %v15315_v18  ;;  %v14482_v1 = vpop.f32.mrf.mxu0  ;;  %v6517_v41 = vpop.permute.xlu1 %6516 }
 0x255   : > { %v3817_v0 = vpop.f32.mrf.mxu1  ;;  %v6523_v61 = vsel %vm426_vm3, %v6515_v58, %v6517_v41  ;;  %8309 = vrot.lane.b32.xlu1 %v15242_v13, %s15092_s19 }
 0x256   : > { %v6674_v17 = vpop.permute.xlu0 %6673  ;;  %14011 = vmatmul.mubr.msk.bf16.vlgmr.msra.gmra.mxu1 %vm426_vm3, %v14010_v5  ;;  %6597 = vmatprep.subr.bf16.mxu0 %v6537_v4  ;;  %v3856_v2 = vpop.f32.mrf.mxu0  ;;  %v6540_v22 = vand.u32 %v6523_v61, %v15315_v18 }
 0x257   : > { %v3936_v55 = vpop.f32.mrf.mxu1  ;;  %6598 = vmatpush1.bf16.msra.mxu0 %v6534_v50  ;;  %14582 = vmatprep.mubr.msk.bf16.mxu1 %vm15055_vm4, %v15054_v30  ;;  %v14014_v50 = vld [vmem:[%s18543_s3 + $0x98] sm:$0xf] }
 0x258   : > { %v4024_v57 = vadd.f32 %v3936_v55, %v3859_v52  ;;  %8311 = vrot.lane.b32.xlu0 %v16536_v43, %s15092_s19  ;;  %v14483_v38 = vpop.f32.mrf.mxu0  ;;  %14581 = vmatpush3.bf16.msra.mxu1 %v6540_v22  ;;  %v6676_v54 = vpop.permute.xlu1 %6675 }
 0x259   : > { %v3938_v24 = vpop.f32.mrf.mxu1  ;;  %v6685_v28 = vsel %vm6683_vm2, %v6674_v17, %v6676_v54  ;;  %8313 = vrot.lane.b32.xlu1 %v16441_v46, %s15092_s19  ;;  %s15107_s19 = smov 58  }
 0x25a   : > { %v4025_v56 = vadd.f32 %v3938_v24, %v3860_v20  ;;  %v6672_v63 = vpop.permute.xlu0 %6671  ;;  %14012 = vmatmul.mubr.msk.bf16.vlgmr.msra.gmra.mxu0 %vm426_vm3, %v14010_v5  ;;  %v3977_v12 = vpop.f32.mrf.mxu0  ;;  %v6696_v36 = vand.u32 %v6685_v28, %v15315_v18 }
 0x25b   : > { %v6684_v52 = vsel %vm6683_vm2, %v6672_v63, %v6674_v17  ;;  %v3940_v6 = vpop.f32.mrf.mxu1  ;;  %6739 = vmatprep.mubr.bf16.mxu0 %v15041_v9  ;;  %v4026_v20 = vadd.f32 %v3977_v12, %v3861_v59 }
 0x25c   : > { %v6693_v45 = vand.u32 %v6684_v52, %v15315_v18  ;;  %8470 = vrot.lane.b32.xlu0 %v15226_v10, %s15093_s12  ;;  %v3979_v58 = vpop.f32.mrf.mxu0  ;;  %6721 = vmatprep.subr.bf16.mxu0 %v6696_v36  ;;  %v6678_v34 = vpop.permute.xlu1 %6677 }
 0x25d   : > { %v3941_v60 = vpop.f32.mrf.mxu1  ;;  %v4027_v14 = vadd.f32 %v3979_v58, %v3862_v27  ;;  %v6686_v26 = vsel %vm6683_vm2, %v6676_v54, %v6678_v34  ;;  %8472 = vrot.lane.b32.xlu1 %v15228_v11, %s15093_s12 }
 0x25e   : > { %v6680_v47 = vpop.permute.xlu0 %6679  ;;  %14583 = vmatmul.mubr.msk.bf16.vlgmr.msra.gmra.mxu1 %vm426_vm3, %v14010_v5  ;;  %v3981_v4 = vpop.f32.mrf.mxu0  ;;  %6722 = vmatpush1.bf16.msra.mxu0 %v6693_v45  ;;  %v6699_v1 = vand.u32 %v6686_v26, %v15315_v18 }
 0x25f   : > { %v4018_v19 = vpop.f32.mrf.mxu1  ;;  %v6687_v0 = vsel %vm6683_vm2, %v6678_v34, %v6680_v47  ;;  %14586 = vmatprep.subr.bf16.mxu0 %v15054_v30  ;;  %6780 = vmatprep.mubr.bf16.mxu1 %v15041_v9 }
 0x260   : > { %v4028_v59 = vadd.f32 %v4018_v19, %v3863_v8  ;;  %8468 = vrot.lane.b32.xlu0 %v15219_v7, %s15093_s12  ;;  %v6702_v5 = vand.u32 %v6687_v0, %v15315_v18  ;;  %v3982_v17 = vpop.f32.mrf.mxu0  ;;  %v6682_v41 = vpop.permute.xlu1 %6681 }
 0x261   : > { %v14488_v27 = vpop.f32.mrf.mxu1  ;;  %v6688_v61 = vsel %vm6683_vm2, %v6680_v47, %v6682_v41  ;;  %8474 = vrot.lane.b32.xlu1 %v15242_v13, %s15093_s12  ;;  %vm8480_vm2 = vcmask 850944  }
 0x262   : > { %v6839_v8 = vpop.permute.xlu0 %6838  ;;  %14015 = vmatmul.mubr.msk.bf16.vlgmr.msra.gmra.mxu0 %vm426_vm3, %v14014_v50  ;;  %6762 = vmatprep.subr.bf16.mxu1 %v6702_v5  ;;  %v4101_v2 = vpop.f32.mrf.mxu0  ;;  %v6705_v22 = vand.u32 %v6688_v61, %v15315_v18  ;;  %v14018_v5 = vld [vmem:[%s18543_s3 + $0x9c] sm:$0xf] }
 0x263   : > { %v4021_v55 = vpop.f32.mrf.mxu1  ;;  %6763 = vmatpush1.bf16.msra.mxu1 %v6699_v1  ;;  %v4189_v24 = vadd.f32 %v4101_v2, %v4024_v57  ;;  %14588 = vmatprep.mubr.msk.bf16.mxu0 %vm15055_vm4, %v15054_v30 }
 0x264   : > { %8476 = vrot.lane.b32.xlu0 %v16536_v43, %s15093_s12  ;;  %v4103_v63 = vpop.f32.mrf.mxu0  ;;  %14587 = vmatpush3.bf16.msra.mxu0 %v6705_v22  ;;  %v6841_v6 = vpop.permute.xlu1 %6840  ;;  %v7008_v55 = vand.u32 %v15315_v18, %v15226_v10 }
 0x265   : > { %v14489_v38 = vpop.f32.mrf.mxu1  ;;  %v4190_v52 = vadd.f32 %v4103_v63, %v4025_v56  ;;  %v6850_v12 = vsel %vm6848_vm7, %v6839_v8, %v6841_v6  ;;  %8478 = vrot.lane.b32.xlu1 %v16441_v46, %s15093_s12  ;;  %v7005_v63 = vand.u32 %v15315_v18, %v15219_v7  ;;  %s15108_s12 = smov 57  }
 0x266   : > { %v6837_v54 = vpop.permute.xlu0 %6836  ;;  %14016 = vmatmul.mubr.msk.bf16.vlgmr.msra.gmra.mxu1 %vm426_vm3, %v14014_v50  ;;  %v4105_v60 = vpop.f32.mrf.mxu0  ;;  %v6861_v58 = vand.u32 %v6850_v12, %v15315_v18  ;;  %v7014_v12 = vand.u32 %v15315_v18, %v15242_v13 }
 0x267   : > { %v6849_v28 = vsel %vm6848_vm7, %v6837_v54, %v6839_v8  ;;  %v4142_v45 = vpop.f32.mrf.mxu1  ;;  %6904 = vmatprep.mubr.bf16.mxu1 %v15041_v9 }
 0x268   : > { %v6858_v57 = vand.u32 %v6849_v28, %v15315_v18  ;;  %v4191_v36 = vadd.f32 %v4142_v45, %v4026_v20  ;;  %8635 = vrot.lane.b32.xlu0 %v15226_v10, %s15094_s17  ;;  %v4106_v47 = vpop.f32.mrf.mxu0  ;;  %6886 = vmatprep.subr.bf16.mxu1 %v6861_v58  ;;  %v6843_v26 = vpop.permute.xlu1 %6842 }
 0x269   : > { %v4144_v56 = vpop.f32.mrf.mxu1  ;;  %v6851_v20 = vsel %vm6848_vm7, %v6841_v6, %v6843_v26  ;;  %8637 = vrot.lane.b32.xlu1 %v15228_v11, %s15094_s17 }
 0x26a   : > { %v4192_v34 = vadd.f32 %v4144_v56, %v4027_v14  ;;  %v6845_v19 = vpop.permute.xlu0 %6844  ;;  %14589 = vmatmul.mubr.msk.bf16.vlgmr.msra.gmra.mxu0 %vm426_vm3, %v14014_v50  ;;  %v4183_v27 = vpop.f32.mrf.mxu0  ;;  %6887 = vmatpush1.bf16.msra.mxu1 %v6858_v57  ;;  %v6864_v17 = vand.u32 %v6851_v20, %v15315_v18 }
 0x26b   : > { %v4146_v0 = vpop.f32.mrf.mxu1  ;;  %v6852_v4 = vsel %vm6848_vm7, %v6843_v26, %v6845_v19  ;;  %v4193_v14 = vadd.f32 %v4183_v27, %v4028_v59  ;;  %14592 = vmatprep.subr.bf16.mxu1 %v15054_v30  ;;  %6945 = vmatprep.mubr.bf16.mxu0 %v15041_v9 }
 0x26c   : > { %8633 = vrot.lane.b32.xlu0 %v15219_v7, %s15094_s17  ;;  %v6867_v50 = vand.u32 %v6852_v4, %v15315_v18  ;;  %v14494_v8 = vpop.f32.mrf.mxu0  ;;  %v6847_v61 = vpop.permute.xlu1 %6846 }
 0x26d   : > { %v4147_v1 = vpop.f32.mrf.mxu1  ;;  %v6853_v59 = vsel %vm6848_vm7, %v6845_v19, %v6847_v61  ;;  %8639 = vrot.lane.b32.xlu1 %v15242_v13, %s15094_s17  ;;  %v7017_v8 = vand.u32 %v16536_v43, %v15315_v18  ;;  %vm8645_vm7 = vcmask 842752  }
 0x26e   : > { %v7151_v41 = vpop.permute.xlu0 %7150  ;;  %14019 = vmatmul.mubr.msk.bf16.vlgmr.msra.gmra.mxu1 %vm426_vm3, %v14018_v5  ;;  %6927 = vmatprep.subr.bf16.mxu0 %v6867_v50  ;;  %v4186_v22 = vpop.f32.mrf.mxu0  ;;  %v6870_v54 = vand.u32 %v6853_v59, %v15315_v18 }
 0x26f   : > { %v4266_v2 = vpop.f32.mrf.mxu1  ;;  %6928 = vmatpush1.bf16.msra.mxu0 %v6864_v17  ;;  %14594 = vmatprep.mubr.msk.bf16.mxu1 %vm15055_vm4, %v15054_v30 }
 0x270   : > { %v4354_v38 = vadd.f32 %v4266_v2, %v4189_v24  ;;  %8641 = vrot.lane.b32.xlu0 %v16536_v43, %s15094_s17  ;;  %v14495_v28 = vpop.f32.mrf.mxu0  ;;  %7033 = vmatprep.subr.bf16.mxu0 %v7008_v55  ;;  %v7153_v57 = vpop.permute.xlu1 %7152 }
 0x271   : > { %v4268_v6 = vpop.f32.mrf.mxu1  ;;  %14593 = vmatpush3.bf16.msra.mxu1 %v6870_v54  ;;  %v7162_v56 = vsel %vm7160_vm8, %v7151_v41, %v7153_v57  ;;  %8643 = vrot.lane.b32.xlu1 %v16441_v46, %s15094_s17  ;;  %v14022_v46 = vld [vmem:[%s18543_s3 + $0xa0] sm:$0xf]  ;;  %s15109_s17 = smov 56  }
 0x272   : > { %v4355_v45 = vadd.f32 %v4268_v6, %v4190_v52  ;;  %v7149_v24 = vpop.permute.xlu0 %7148  ;;  %14020 = vmatmul.mubr.msk.bf16.vlgmr.msra.gmra.mxu0 %vm426_vm3, %v14018_v5  ;;  %v4307_v58 = vpop.f32.mrf.mxu0  ;;  %v7011_v52 = vand.u32 %v15315_v18, %v15228_v11  ;;  %7074 = vmatprep.subr.bf16.mxu1 %v7014_v12  ;;  %v7173_v20 = vand.u32 %v7162_v56, %v15315_v18 }
 0x273   : > { %v4270_v60 = vpop.f32.mrf.mxu1  ;;  %7034 = vmatpush1.bf16.msra.mxu0 %v7005_v63  ;;  %v4356_v47 = vadd.f32 %v4307_v58, %v4191_v36  ;;  %7051 = vmatprep.mubr.bf16.mxu0 %v15041_v9 }
 0x274   : > { %8800 = vrot.lane.b32.xlu0 %v15226_v10, %s15095_s10  ;;  %v4309_v26 = vpop.f32.mrf.mxu0  ;;  %14598 = vmatprep.subr.bf16.mxu0 %v15054_v30  ;;  %v7155_v27 = vpop.permute.xlu1 %7154 }
 0x275   : > { %v4271_v19 = vpop.f32.mrf.mxu1  ;;  %v4357_v4 = vadd.f32 %v4309_v26, %v4192_v34  ;;  %v7161_v34 = vsel %vm7160_vm8, %v7149_v24, %v7151_v41  ;;  %8802 = vrot.lane.b32.xlu1 %v15228_v11, %s15095_s10  ;;  %v7163_v41 = vsel %vm7160_vm8, %v7153_v57, %v7155_v27  ;;  %v16790_v26 = vld.sshfl [vmem:[%s16430_s15] sm:$0xff pattern:$0x76325410] }
 0x276   : > { %v7157_v0 = vpop.permute.xlu0 %7156  ;;  %14595 = vmatmul.mubr.msk.bf16.vlgmr.msra.gmra.mxu1 %vm426_vm3, %v14018_v5  ;;  %v4311_v50 = vpop.f32.mrf.mxu0  ;;  %v7170_v22 = vand.u32 %v7161_v34, %v15315_v18  ;;  %v7176_v57 = vand.u32 %v7163_v41, %v15315_v18 }
 0x277   : > { %v4348_v1 = vpop.f32.mrf.mxu1  ;;  %v7164_v36 = vsel %vm7160_vm8, %v7155_v27, %v7157_v0  ;;  %7075 = vmatpush1.bf16.msra.mxu1 %v7011_v52  ;;  %7092 = vmatprep.mubr.bf16.mxu1 %v15041_v9 }
 0x278   : > { %v4358_v17 = vadd.f32 %v4348_v1, %v4193_v14  ;;  %8798 = vrot.lane.b32.xlu0 %v15219_v7, %s15095_s10  ;;  %v4312_v14 = vpop.f32.mrf.mxu0  ;;  %7198 = vmatprep.subr.bf16.mxu1 %v7173_v20  ;;  %v7179_v61 = vand.u32 %v7164_v36, %v15315_v18  ;;  %v7159_v2 = vpop.permute.xlu1 %7158 }
 0x279   : > { %v14500_v5 = vpop.f32.mrf.mxu1  ;;  %8804 = vrot.lane.b32.xlu1 %v15242_v13, %s15095_s10  ;;  %v7165_v19 = vsel %vm7160_vm8, %v7157_v0, %v7159_v2  ;;  %vm8810_vm8 = vcmask 834560  }
 0x27a   : > { %v7316_v55 = vpop.permute.xlu0 %7315  ;;  %14023 = vmatmul.mubr.msk.bf16.vlgmr.msra.gmra.mxu0 %vm426_vm3, %v14022_v46  ;;  %v4431_v63 = vpop.f32.mrf.mxu0  ;;  %v7182_v0 = vand.u32 %v7165_v19, %v15315_v18 }
 0x27b   : > { %v4351_v59 = vpop.f32.mrf.mxu1  ;;  %14599 = vmatpush3.bf16.msra.mxu0 %v7017_v8  ;;  %v4519_v54 = vadd.f32 %v4431_v63, %v4354_v38  ;;  %14600 = vmatprep.mubr.msk.bf16.mxu0 %vm15055_vm4, %v15054_v30 }
 0x27c   : > { %8806 = vrot.lane.b32.xlu0 %v16536_v43, %s15095_s10  ;;  %v4433_v28 = vpop.f32.mrf.mxu0  ;;  %7239 = vmatprep.subr.bf16.mxu0 %v7179_v61  ;;  %v7318_v60 = vpop.permute.xlu1 %7317 }
 0x27d   : > { %v14501_v6 = vpop.f32.mrf.mxu1  ;;  %v4520_v12 = vadd.f32 %v4433_v28, %v4355_v45  ;;  %v7327_v38 = vsel %vm7325_vm10, %v7316_v55, %v7318_v60  ;;  %8808 = vrot.lane.b32.xlu1 %v16790_v26, %s15095_s10  ;;  %s15098_s10 = smov 83  }
 0x27e   : > { %v7314_v24 = vpop.permute.xlu0 %7313  ;;  %14024 = vmatmul.mubr.msk.bf16.vlgmr.msra.gmra.mxu1 %vm426_vm3, %v14022_v46  ;;  %v4435_v58 = vpop.f32.mrf.mxu0 }
 0x27f   : > { %v4472_v56 = vpop.f32.mrf.mxu1  ;;  %7199 = vmatpush1.bf16.msra.mxu1 %v7170_v22  ;;  %7216 = vmatprep.mubr.bf16.mxu1 %v15041_v9  ;;  %v7326_v5 = vsel %vm7325_vm10, %v7314_v24, %v7316_v55 }
 0x280   : > { %v4521_v52 = vadd.f32 %v4472_v56, %v4356_v47  ;;  %8965 = vrot.lane.b32.xlu0 %v15226_v10, %s15096_s13  ;;  %v4436_v20 = vpop.f32.mrf.mxu0  ;;  %14604 = vmatprep.subr.bf16.mxu1 %v15054_v30  ;;  %v7338_v47 = vand.u32 %v7327_v38, %v15315_v18  ;;  %v7320_v36 = vpop.permute.xlu1 %7319  ;;  %v7335_v41 = vand.u32 %v7326_v5, %v15315_v18 }
 0x281   : > { %v4474_v45 = vpop.f32.mrf.mxu1  ;;  %8967 = vrot.lane.b32.xlu1 %v15228_v11, %s15096_s13 }
 0x282   : > { %v4522_v27 = vadd.f32 %v4474_v45, %v4357_v4  ;;  %v7322_v1 = vpop.permute.xlu0 %7321  ;;  %14601 = vmatmul.mubr.msk.bf16.vlgmr.msra.gmra.mxu0 %vm426_vm3, %v14022_v46  ;;  %v4513_v34 = vpop.f32.mrf.mxu0  ;;  %v14026_v4 = vld [vmem:[%s18543_s3 + $0xa4] sm:$0xf] }
 0x283   : > { %v4476_v50 = vpop.f32.mrf.mxu1  ;;  %v7329_v8 = vsel %vm7325_vm10, %v7320_v36, %v7322_v1  ;;  %7240 = vmatpush1.bf16.msra.mxu0 %v7176_v57  ;;  %v4523_v14 = vadd.f32 %v4513_v34, %v4358_v17  ;;  %7257 = vmatprep.mubr.bf16.mxu0 %v15041_v9  ;;  %v7328_v17 = vsel %vm7325_vm10, %v7318_v60, %v7320_v36 }
 0x284   : > { %8963 = vrot.lane.b32.xlu0 %v15219_v7, %s15096_s13  ;;  %v14506_v61 = vpop.f32.mrf.mxu0  ;;  %7363 = vmatprep.subr.bf16.mxu0 %v7338_v47  ;;  %v7344_v59 = vand.u32 %v7329_v8, %v15315_v18  ;;  %v7324_v22 = vpop.permute.xlu1 %7323  ;;  %v7341_v58 = vand.u32 %v7328_v17, %v15315_v18 }
 0x285   : > { %v4477_v46 = vpop.f32.mrf.mxu1  ;;  %8969 = vrot.lane.b32.xlu1 %v15242_v13, %s15096_s13  ;;  %v7330_v45 = vsel %vm7325_vm10, %v7322_v1, %v7324_v22  ;;  %v14030_v61 = vld [vmem:[%s18543_s3 + $0xa8] sm:$0xf]  ;;  %vm8975_vm10 = vcmask 826368  }
 0x286   : > { %v7481_v2 = vpop.permute.xlu0 %7480  ;;  %14027 = vmatmul.mubr.msk.bf16.vlgmr.msra.gmra.mxu1 %vm426_vm3, %v14026_v4  ;;  %v4516_v6 = vpop.f32.mrf.mxu0  ;;  %v7347_v1 = vand.u32 %v7330_v45, %v15315_v18 }
 0x287   : > { %v4596_v63 = vpop.f32.mrf.mxu1  ;;  %14605 = vmatpush3.bf16.msra.mxu1 %v7182_v0  ;;  %14606 = vmatprep.mubr.msk.bf16.mxu1 %vm15055_vm4, %v15054_v30 }
 0x288   : > { %v4684_v55 = vadd.f32 %v4596_v63, %v4519_v54  ;;  %8971 = vrot.lane.b32.xlu0 %v16536_v43, %s15096_s13  ;;  %v14507_v24 = vpop.f32.mrf.mxu0  ;;  %7404 = vmatprep.subr.bf16.mxu1 %v7344_v59  ;;  %v7483_v38 = vpop.permute.xlu1 %7482 }
 0x289   : > { %v4598_v28 = vpop.f32.mrf.mxu1  ;;  %v7492_v60 = vsel %vm7490_vm11, %v7481_v2, %v7483_v38  ;;  %8973 = vrot.lane.b32.xlu1 %v16790_v26, %s15096_s13  ;;  %s15099_s13 = smov 82  }
 0x28a   : > { %v4685_v56 = vadd.f32 %v4598_v28, %v4520_v12  ;;  %v7479_v57 = vpop.permute.xlu0 %7478  ;;  %14028 = vmatmul.mubr.msk.bf16.vlgmr.msra.gmra.mxu0 %vm426_vm3, %v14026_v4  ;;  %v4637_v19 = vpop.f32.mrf.mxu0  ;;  %v7503_v50 = vand.u32 %v7492_v60, %v15315_v18 }
 0x28b   : > { %v4600_v54 = vpop.f32.mrf.mxu1  ;;  %7364 = vmatpush1.bf16.msra.mxu0 %v7335_v41  ;;  %v4686_v20 = vadd.f32 %v4637_v19, %v4521_v52  ;;  %7381 = vmatprep.mubr.bf16.mxu0 %v15041_v9 }
 0x28c   : > { %9128 = vrot.lane.b32.xlu0 %v16790_v26, %s15043_s26  ;;  %v4639_v47 = vpop.f32.mrf.mxu0  ;;  %14610 = vmatprep.subr.bf16.mxu0 %v15054_v30  ;;  %v7485_v8 = vpop.permute.xlu1 %7484  ;;  %s15097_s26 = smov 84  }
 0x28d   : > { %v4601_v12 = vpop.f32.mrf.mxu1  ;;  %v4687_v0 = vadd.f32 %v4639_v47, %v4522_v27  ;;  %v7491_v27 = vsel %vm7490_vm11, %v7479_v57, %v7481_v2  ;;  %9268 = vrot.lane.b32.xlu1 %v15226_v10, %s15097_s26  ;;  %v7493_v2 = vsel %vm7490_vm11, %v7483_v38, %v7485_v8 }
 0x28e   : > { %v7487_v36 = vpop.permute.xlu0 %7486  ;;  %14607 = vmatmul.mubr.msk.bf16.vlgmr.msra.gmra.mxu1 %vm426_vm3, %v14026_v4  ;;  %v4641_v5 = vpop.f32.mrf.mxu0  ;;  %v7500_v6 = vand.u32 %v7491_v27, %v15315_v18  ;;  %v7506_v45 = vand.u32 %v7493_v2, %v15315_v18 }
 0x28f   : > { %v4678_v34 = vpop.f32.mrf.mxu1  ;;  %v7494_v52 = vsel %vm7490_vm11, %v7485_v8, %v7487_v36  ;;  %7405 = vmatpush1.bf16.msra.mxu1 %v7341_v58  ;;  %7422 = vmatprep.mubr.bf16.mxu1 %v15041_v9 }
 0x290   : > { %v4688_v46 = vadd.f32 %v4678_v34, %v4523_v14  ;;  %9270 = vrot.lane.b32.xlu0 %v15228_v11, %s15097_s26  ;;  %v4642_v59 = vpop.f32.mrf.mxu0  ;;  %7528 = vmatprep.subr.bf16.mxu1 %v7503_v50  ;;  %v7509_v14 = vand.u32 %v7494_v52, %v15315_v18  ;;  %v7489_v63 = vpop.permute.xlu1 %7488 }
 0x291   : > { %v14512_v4 = vpop.f32.mrf.mxu1  ;;  %9266 = vrot.lane.b32.xlu1 %v15219_v7, %s15097_s26  ;;  %v7495_v47 = vsel %vm7490_vm11, %v7487_v36, %v7489_v63  ;;  %vm9278_vm11 = vcmask 687104  }
 0x292   : > { %v7646_v22 = vpop.permute.xlu0 %7645  ;;  %14031 = vmatmul.mubr.msk.bf16.vlgmr.msra.gmra.mxu0 %vm426_vm3, %v14030_v61  ;;  %v4761_v17 = vpop.f32.mrf.mxu0  ;;  %v7512_v5 = vand.u32 %v7495_v47, %v15315_v18 }
 0x293   : > { %v4681_v41 = vpop.f32.mrf.mxu1  ;;  %14611 = vmatpush3.bf16.msra.mxu0 %v7347_v1  ;;  %v4849_v28 = vadd.f32 %v4761_v17, %v4684_v55  ;;  %14612 = vmatprep.mubr.msk.bf16.mxu0 %vm15055_vm4, %v15054_v30 }
 0x294   : > { %9272 = vrot.lane.b32.xlu0 %v15242_v13, %s15097_s26  ;;  %v4763_v57 = vpop.f32.mrf.mxu0  ;;  %7569 = vmatprep.subr.bf16.mxu0 %v7509_v14  ;;  %v7648_v60 = vpop.permute.xlu1 %7647 }
 0x295   : > { %v14513_v24 = vpop.f32.mrf.mxu1  ;;  %v4850_v58 = vadd.f32 %v4763_v57, %v4685_v56  ;;  %v7657_v55 = vsel %vm7655_vm12, %v7646_v22, %v7648_v60  ;;  %9274 = vrot.lane.b32.xlu1 %v16536_v43, %s15097_s26  ;;  %v14034_v43 = vld [vmem:[%s18543_s3 + $0xac] sm:$0xf] }
 0x296   : > { %v7644_v54 = vpop.permute.xlu0 %7643  ;;  %14032 = vmatmul.mubr.msk.bf16.vlgmr.msra.gmra.mxu1 %vm426_vm3, %v14030_v61  ;;  %v4765_v38 = vpop.f32.mrf.mxu0  ;;  %v7668_v1 = vand.u32 %v7657_v55, %v15315_v18 }
 0x297   : > { %v4802_v19 = vpop.f32.mrf.mxu1  ;;  %7529 = vmatpush1.bf16.msra.mxu1 %v7500_v6  ;;  %7546 = vmatprep.mubr.bf16.mxu1 %v15041_v9 }
 0x298   : > { %v4851_v12 = vadd.f32 %v4802_v19, %v4686_v20  ;;  %9276 = vrot.lane.b32.xlu0 %v16790_v26, %s15097_s26  ;;  %v4766_v50 = vpop.f32.mrf.mxu0  ;;  %14616 = vmatprep.subr.bf16.mxu1 %v15054_v30  ;;  %v7650_v20 = vpop.permute.xlu1 %7649  ;;  %s15100_s26 = smov 81  }
 0x299   : > { %v4804_v56 = vpop.f32.mrf.mxu1  ;;  %9433 = vrot.lane.b32.xlu1 %v15226_v10, %s15098_s10  ;;  %v16892_v50 = vld.sshfl [vmem:[%s15216_s14 + $0x8] sm:$0x3 pattern:$0x76325410] }
 0x29a   : > { %v4852_v8 = vadd.f32 %v4804_v56, %v4687_v0  ;;  %v7652_v34 = vpop.permute.xlu0 %7651  ;;  %14613 = vmatmul.mubr.msk.bf16.vlgmr.msra.gmra.mxu0 %vm426_vm3, %v14030_v61  ;;  %v4843_v27 = vpop.f32.mrf.mxu0  ;;  %v7656_v0 = vsel %vm7655_vm12, %v7644_v54, %v7646_v22 }
 0x29b   : > { %v4806_v52 = vpop.f32.mrf.mxu1  ;;  %v7659_v36 = vsel %vm7655_vm12, %v7650_v20, %v7652_v34  ;;  %7570 = vmatpush1.bf16.msra.mxu0 %v7506_v45  ;;  %v4853_v4 = vadd.f32 %v4843_v27, %v4688_v46  ;;  %7587 = vmatprep.mubr.bf16.mxu0 %v15041_v9  ;;  %v7665_v17 = vand.u32 %v7656_v0, %v15315_v18 }
 0x29c   : > { %9435 = vrot.lane.b32.xlu0 %v15228_v11, %s15098_s10  ;;  %v14518_v59 = vpop.f32.mrf.mxu0  ;;  %7693 = vmatprep.subr.bf16.mxu0 %v7668_v1  ;;  %v7674_v63 = vand.u32 %v7659_v36, %v15315_v18  ;;  %v7654_v41 = vpop.permute.xlu1 %7653  ;;  %v7658_v46 = vsel %vm7655_vm12, %v7648_v60, %v7650_v20 }
 0x29d   : > { %v4807_v61 = vpop.f32.mrf.mxu1  ;;  %9431 = vrot.lane.b32.xlu1 %v15219_v7, %s15098_s10  ;;  %v7671_v55 = vand.u32 %v7658_v46, %v15315_v18  ;;  %v7660_v47 = vsel %vm7655_vm12, %v7652_v34, %v7654_v41  ;;  %v14038_v59 = vld [vmem:[%s18543_s3 + $0xb0] sm:$0xf]  ;;  %vm9608_vm12 = vcmask 670720  }
 0x29e   : > { %v7811_v14 = vpop.permute.xlu0 %7810  ;;  %14035 = vmatmul.mubr.msk.bf16.vlgmr.msra.gmra.mxu1 %vm426_vm3, %v14034_v43  ;;  %v4846_v2 = vpop.f32.mrf.mxu0 }
 0x29f   : > { %v4926_v6 = vpop.f32.mrf.mxu1  ;;  %14617 = vmatpush3.bf16.msra.mxu1 %v7512_v5  ;;  %14618 = vmatprep.mubr.msk.bf16.mxu1 %vm15055_vm4, %v15054_v30 }
 0x2a0   : > { %v5014_v22 = vadd.f32 %v4926_v6, %v4849_v28  ;;  %9437 = vrot.lane.b32.xlu0 %v15242_v13, %s15098_s10  ;;  %v14519_v57 = vpop.f32.mrf.mxu0  ;;  %7734 = vmatprep.subr.bf16.mxu1 %v7674_v63  ;;  %v7813_v28 = vpop.permute.xlu1 %7812 }
 0x2a1   : > { %v4928_v24 = vpop.f32.mrf.mxu1  ;;  %v7822_v60 = vsel %vm7820_vm14, %v7811_v14, %v7813_v28  ;;  %9439 = vrot.lane.b32.xlu1 %v16892_v50, %s15098_s10 }
 0x2a2   : > { %v5015_v54 = vadd.f32 %v4928_v24, %v4850_v58  ;;  %v7809_v19 = vpop.permute.xlu0 %7808  ;;  %14036 = vmatmul.mubr.msk.bf16.vlgmr.msra.gmra.mxu0 %vm426_vm3, %v14034_v43  ;;  %v4967_v38 = vpop.f32.mrf.mxu0  ;;  %v7833_v52 = vand.u32 %v7822_v60, %v15315_v18 }
 0x2a3   : > { %v4930_v45 = vpop.f32.mrf.mxu1  ;;  %7694 = vmatpush1.bf16.msra.mxu0 %v7665_v17  ;;  %v5016_v56 = vadd.f32 %v4967_v38, %v4851_v12  ;;  %7711 = vmatprep.mubr.bf16.mxu0 %v15041_v9  ;;  %v7677_v12 = vand.u32 %v7660_v47, %v15315_v18 }
 0x2a4   : > { %9441 = vrot.lane.b32.xlu0 %v16790_v26, %s15098_s10  ;;  %v4969_v1 = vpop.f32.mrf.mxu0  ;;  %14622 = vmatprep.subr.bf16.mxu0 %v15054_v30  ;;  %v7815_v36 = vpop.permute.xlu1 %7814  ;;  %s15101_s10 = smov 80  }
 0x2a5   : > { %v4931_v58 = vpop.f32.mrf.mxu1  ;;  %v5017_v5 = vadd.f32 %v4969_v1, %v4852_v8  ;;  %v7821_v8 = vsel %vm7820_vm14, %v7809_v19, %v7811_v14  ;;  %9598 = vrot.lane.b32.xlu1 %v15226_v10, %s15099_s13  ;;  %v7823_v14 = vsel %vm7820_vm14, %v7813_v28, %v7815_v36 }
 0x2a6   : > { %v7817_v20 = vpop.permute.xlu0 %7816  ;;  %14619 = vmatmul.mubr.msk.bf16.vlgmr.msra.gmra.mxu1 %vm426_vm3, %v14034_v43  ;;  %v4971_v0 = vpop.f32.mrf.mxu0  ;;  %v7830_v2 = vand.u32 %v7821_v8, %v15315_v18  ;;  %v7836_v47 = vand.u32 %v7823_v14, %v15315_v18 }
 0x2a7   : > { %v5008_v27 = vpop.f32.mrf.mxu1  ;;  %v7824_v34 = vsel %vm7820_vm14, %v7815_v36, %v7817_v20  ;;  %7735 = vmatpush1.bf16.msra.mxu1 %v7671_v55  ;;  %7752 = vmatprep.mubr.bf16.mxu1 %v15041_v9 }
 0x2a8   : > { %v5018_v61 = vadd.f32 %v5008_v27, %v4853_v4  ;;  %9600 = vrot.lane.b32.xlu0 %v15228_v11, %s15099_s13  ;;  %v4972_v63 = vpop.f32.mrf.mxu0  ;;  %7858 = vmatprep.subr.bf16.mxu1 %v7833_v52  ;;  %v7839_v4 = vand.u32 %v7824_v34, %v15315_v18  ;;  %v7819_v6 = vpop.permute.xlu1 %7818 }
 0x2a9   : > { %v14524_v43 = vpop.f32.mrf.mxu1  ;;  %9596 = vrot.lane.b32.xlu1 %v15219_v7, %s15099_s13  ;;  %v7825_v1 = vsel %vm7820_vm14, %v7817_v20, %v7819_v6  ;;  %vm9773_vm14 = vcmask 662528  }
 0x2aa   : > { %v7976_v41 = vpop.permute.xlu0 %7975  ;;  %14039 = vmatmul.mubr.msk.bf16.vlgmr.msra.gmra.mxu0 %vm426_vm3, %v14038_v59  ;;  %v5091_v46 = vpop.f32.mrf.mxu0  ;;  %v7842_v0 = vand.u32 %v7825_v1, %v15315_v18 }
 0x2ab   : > { %v5011_v17 = vpop.f32.mrf.mxu1  ;;  %14623 = vmatpush3.bf16.msra.mxu0 %v7677_v12  ;;  %v5179_v24 = vadd.f32 %v5091_v46, %v5014_v22  ;;  %14624 = vmatprep.mubr.msk.bf16.mxu0 %vm15055_vm4, %v15054_v30 }
 0x2ac   : > { %9602 = vrot.lane.b32.xlu0 %v15242_v13, %s15099_s13  ;;  %v5093_v19 = vpop.f32.mrf.mxu0  ;;  %7899 = vmatprep.subr.bf16.mxu0 %v7839_v4  ;;  %v7978_v60 = vpop.permute.xlu1 %7977 }
 0x2ad   : > { %v14525_v57 = vpop.f32.mrf.mxu1  ;;  %v5180_v55 = vadd.f32 %v5093_v19, %v5015_v54  ;;  %v7987_v22 = vsel %vm7985_vm15, %v7976_v41, %v7978_v60  ;;  %9604 = vrot.lane.b32.xlu1 %v16892_v50, %s15099_s13 }
 0x2ae   : > { %v7974_v45 = vpop.permute.xlu0 %7973  ;;  %14040 = vmatmul.mubr.msk.bf16.vlgmr.msra.gmra.mxu1 %vm426_vm3, %v14038_v59  ;;  %v5095_v28 = vpop.f32.mrf.mxu0  ;;  %v7998_v12 = vand.u32 %v7987_v22, %v15315_v18 }
 0x2af   : > { %v5132_v38 = vpop.f32.mrf.mxu1  ;;  %7859 = vmatpush1.bf16.msra.mxu1 %v7830_v2  ;;  %7876 = vmatprep.mubr.bf16.mxu1 %v15041_v9  ;;  %v7986_v43 = vsel %vm7985_vm15, %v7974_v45, %v7976_v41 }
 0x2b0   : > { %v5181_v58 = vadd.f32 %v5132_v38, %v5016_v56  ;;  %9606 = vrot.lane.b32.xlu0 %v16790_v26, %s15099_s13  ;;  %v5096_v52 = vpop.f32.mrf.mxu0  ;;  %14628 = vmatprep.subr.bf16.mxu1 %v15054_v30  ;;  %v7980_v56 = vpop.permute.xlu1 %7979  ;;  %v7995_v14 = vand.u32 %v7986_v43, %v15315_v18  ;;  %s15102_s13 = smov 79  }
 0x2b1   : > { %v5134_v54 = vpop.f32.mrf.mxu1  ;;  %9763 = vrot.lane.b32.xlu1 %v15226_v10, %s15100_s26 }
 0x2b2   : > { %v5182_v36 = vadd.f32 %v5134_v54, %v5017_v5  ;;  %v7982_v27 = vpop.permute.xlu0 %7981  ;;  %14625 = vmatmul.mubr.msk.bf16.vlgmr.msra.gmra.mxu0 %vm426_vm3, %v14038_v59  ;;  %v5173_v8 = vpop.f32.mrf.mxu0  ;;  %v14042_v5 = vld [vmem:[%s18543_s3 + $0xb4] sm:$0xf] }
 0x2b3   : > { %v5136_v34 = vpop.f32.mrf.mxu1  ;;  %v7989_v20 = vsel %vm7985_vm15, %v7980_v56, %v7982_v27  ;;  %7900 = vmatpush1.bf16.msra.mxu0 %v7836_v47  ;;  %v5183_v63 = vadd.f32 %v5173_v8, %v5018_v61  ;;  %7917 = vmatprep.mubr.bf16.mxu0 %v15041_v9  ;;  %v7988_v61 = vsel %vm7985_vm15, %v7978_v60, %v7980_v56 }
 0x2b4   : > { %9765 = vrot.lane.b32.xlu0 %v15228_v11, %s15100_s26  ;;  %v14530_v4 = vpop.f32.mrf.mxu0  ;;  %8023 = vmatprep.subr.bf16.mxu0 %v7998_v12  ;;  %v8004_v17 = vand.u32 %v7989_v20, %v15315_v18  ;;  %v7984_v2 = vpop.permute.xlu1 %7983  ;;  %v8001_v28 = vand.u32 %v7988_v61, %v15315_v18 }
 0x2b5   : > { %v5137_v59 = vpop.f32.mrf.mxu1  ;;  %9761 = vrot.lane.b32.xlu1 %v15219_v7, %s15100_s26  ;;  %v7990_v54 = vsel %vm7985_vm15, %v7982_v27, %v7984_v2  ;;  %v14046_v4 = vld [vmem:[%s18543_s3 + $0xb8] sm:$0xf]  ;;  %vm9938_vm15 = vcmask 654336  }
 0x2b6   : > { %v8141_v6 = vpop.permute.xlu0 %8140  ;;  %14043 = vmatmul.mubr.msk.bf16.vlgmr.msra.gmra.mxu1 %vm426_vm3, %v14042_v5  ;;  %v5176_v57 = vpop.f32.mrf.mxu0  ;;  %v8007_v27 = vand.u32 %v7990_v54, %v15315_v18 }
 0x2b7   : > { %v5256_v46 = vpop.f32.mrf.mxu1  ;;  %14629 = vmatpush3.bf16.msra.mxu1 %v7842_v0  ;;  %14630 = vmatprep.mubr.msk.bf16.mxu1 %vm15055_vm4, %v15054_v30 }
 0x2b8   : > { %v5344_v41 = vadd.f32 %v5256_v46, %v5179_v24  ;;  %9767 = vrot.lane.b32.xlu0 %v15242_v13, %s15100_s26  ;;  %v14531_v45 = vpop.f32.mrf.mxu0  ;;  %8064 = vmatprep.subr.bf16.mxu1 %v8004_v17  ;;  %v8143_v22 = vpop.permute.xlu1 %8142 }
 0x2b9   : > { %v5258_v19 = vpop.f32.mrf.mxu1  ;;  %v8152_v60 = vsel %vm8150_vm0, %v8141_v6, %v8143_v22  ;;  %9769 = vrot.lane.b32.xlu1 %v16892_v50, %s15100_s26 }
 0x2ba   : > { %v5345_v38 = vadd.f32 %v5258_v19, %v5180_v55  ;;  %v8139_v47 = vpop.permute.xlu0 %8138  ;;  %14044 = vmatmul.mubr.msk.bf16.vlgmr.msra.gmra.mxu0 %vm426_vm3, %v14042_v5  ;;  %v5297_v1 = vpop.f32.mrf.mxu0  ;;  %v8163_v34 = vand.u32 %v8152_v60, %v15315_v18 }
 0x2bb   : > { %v5260_v24 = vpop.f32.mrf.mxu1  ;;  %8024 = vmatpush1.bf16.msra.mxu0 %v7995_v14  ;;  %v5346_v52 = vadd.f32 %v5297_v1, %v5181_v58  ;;  %8041 = vmatprep.mubr.bf16.mxu0 %v15041_v9 }
 0x2bc   : > { %9771 = vrot.lane.b32.xlu0 %v16790_v26, %s15100_s26  ;;  %v5299_v12 = vpop.f32.mrf.mxu0  ;;  %14634 = vmatprep.subr.bf16.mxu0 %v15054_v30  ;;  %v8145_v20 = vpop.permute.xlu1 %8144  ;;  %s15103_s26 = smov 78  }
 0x2bd   : > { %v5261_v55 = vpop.f32.mrf.mxu1  ;;  %v5347_v0 = vadd.f32 %v5299_v12, %v5182_v36  ;;  %v8151_v36 = vsel %vm8150_vm0, %v8139_v47, %v8141_v6  ;;  %9928 = vrot.lane.b32.xlu1 %v15226_v10, %s15101_s10  ;;  %v8153_v6 = vsel %vm8150_vm0, %v8143_v22, %v8145_v20 }
 0x2be   : > { %v8147_v56 = vpop.permute.xlu0 %8146  ;;  %14631 = vmatmul.mubr.msk.bf16.vlgmr.msra.gmra.mxu1 %vm426_vm3, %v14042_v5  ;;  %v5301_v43 = vpop.f32.mrf.mxu0  ;;  %v8160_v57 = vand.u32 %v8151_v36, %v15315_v18  ;;  %v8166_v54 = vand.u32 %v8153_v6, %v15315_v18 }
 0x2bf   : > { %v5338_v8 = vpop.f32.mrf.mxu1  ;;  %v8154_v58 = vsel %vm8150_vm0, %v8145_v20, %v8147_v56  ;;  %8065 = vmatpush1.bf16.msra.mxu1 %v8001_v28  ;;  %8082 = vmatprep.mubr.bf16.mxu1 %v15041_v9 }
 0x2c0   : > { %v5348_v59 = vadd.f32 %v5338_v8, %v5183_v63  ;;  %9930 = vrot.lane.b32.xlu0 %v15228_v11, %s15101_s10  ;;  %v5302_v17 = vpop.f32.mrf.mxu0  ;;  %8188 = vmatprep.subr.bf16.mxu1 %v8163_v34  ;;  %v8169_v63 = vand.u32 %v8154_v58, %v15315_v18  ;;  %v8149_v46 = vpop.permute.xlu1 %8148 }
 0x2c1   : > { %v14536_v5 = vpop.f32.mrf.mxu1  ;;  %9926 = vrot.lane.b32.xlu1 %v15219_v7, %s15101_s10  ;;  %v8155_v12 = vsel %vm8150_vm0, %v8147_v56, %v8149_v46  ;;  %vm10103_vm0 = vcmask 646144  }
 0x2c2   : > { %v8306_v2 = vpop.permute.xlu0 %8305  ;;  %14047 = vmatmul.mubr.msk.bf16.vlgmr.msra.gmra.mxu0 %vm426_vm3, %v14046_v4  ;;  %v5421_v61 = vpop.f32.mrf.mxu0  ;;  %v8172_v43 = vand.u32 %v8155_v12, %v15315_v18 }
 0x2c3   : > { %v5341_v14 = vpop.f32.mrf.mxu1  ;;  %14635 = vmatpush3.bf16.msra.mxu0 %v8007_v27  ;;  %v5509_v19 = vadd.f32 %v5421_v61, %v5344_v41  ;;  %14636 = vmatprep.mubr.msk.bf16.mxu0 %vm15055_vm4, %v15054_v30 }
 0x2c4   : > { %9932 = vrot.lane.b32.xlu0 %v15242_v13, %s15101_s10  ;;  %v5423_v47 = vpop.f32.mrf.mxu0  ;;  %8229 = vmatprep.subr.bf16.mxu0 %v8169_v63  ;;  %v8308_v60 = vpop.permute.xlu1 %8307 }
 0x2c5   : > { %v14537_v45 = vpop.f32.mrf.mxu1  ;;  %v5510_v28 = vadd.f32 %v5423_v47, %v5345_v38  ;;  %v8317_v41 = vsel %vm8315_vm1, %v8306_v2, %v8308_v60  ;;  %9934 = vrot.lane.b32.xlu1 %v16892_v50, %s15101_s10 }
 0x2c6   : > { %v8304_v24 = vpop.permute.xlu0 %8303  ;;  %14048 = vmatmul.mubr.msk.bf16.vlgmr.msra.gmra.mxu1 %vm426_vm3, %v14046_v4  ;;  %v5425_v22 = vpop.f32.mrf.mxu0  ;;  %v8328_v27 = vand.u32 %v8317_v41, %v15315_v18 }
 0x2c7   : > { %v5462_v1 = vpop.f32.mrf.mxu1  ;;  %8189 = vmatpush1.bf16.msra.mxu1 %v8160_v57  ;;  %8206 = vmatprep.mubr.bf16.mxu1 %v15041_v9  ;;  %v8316_v5 = vsel %vm8315_vm1, %v8304_v24, %v8306_v2 }
 0x2c8   : > { %v5511_v55 = vadd.f32 %v5462_v1, %v5346_v52  ;;  %9936 = vrot.lane.b32.xlu0 %v16790_v26, %s15101_s10  ;;  %v5426_v34 = vpop.f32.mrf.mxu0  ;;  %14640 = vmatprep.subr.bf16.mxu1 %v15054_v30  ;;  %v8310_v52 = vpop.permute.xlu1 %8309  ;;  %v8325_v6 = vand.u32 %v8316_v5, %v15315_v18  ;;  %s15104_s10 = smov 77  }
 0x2c9   : > { %v5464_v38 = vpop.f32.mrf.mxu1  ;;  %10093 = vrot.lane.b32.xlu1 %v15226_v10, %s15102_s13 }
 0x2ca   : > { %v5512_v20 = vadd.f32 %v5464_v38, %v5347_v0  ;;  %v8312_v8 = vpop.permute.xlu0 %8311  ;;  %14637 = vmatmul.mubr.msk.bf16.vlgmr.msra.gmra.mxu0 %vm426_vm3, %v14046_v4  ;;  %v5503_v36 = vpop.f32.mrf.mxu0  ;;  %v14050_v0 = vld [vmem:[%s18543_s3 + $0xbc] sm:$0xf] }
 0x2cb   : > { %v5466_v58 = vpop.f32.mrf.mxu1  ;;  %v8319_v56 = vsel %vm8315_vm1, %v8310_v52, %v8312_v8  ;;  %8230 = vmatpush1.bf16.msra.mxu0 %v8166_v54  ;;  %v5513_v17 = vadd.f32 %v5503_v36, %v5348_v59  ;;  %8247 = vmatprep.mubr.bf16.mxu0 %v15041_v9  ;;  %v8318_v59 = vsel %vm8315_vm1, %v8308_v60, %v8310_v52 }
 0x2cc   : > { %10095 = vrot.lane.b32.xlu0 %v15228_v11, %s15102_s13  ;;  %v14542_v63 = vpop.f32.mrf.mxu0  ;;  %8353 = vmatprep.subr.bf16.mxu0 %v8328_v27  ;;  %v8334_v14 = vand.u32 %v8319_v56, %v15315_v18  ;;  %v8314_v57 = vpop.permute.xlu1 %8313  ;;  %v8331_v22 = vand.u32 %v8318_v59, %v15315_v18 }
 0x2cd   : > { %v5467_v4 = vpop.f32.mrf.mxu1  ;;  %10091 = vrot.lane.b32.xlu1 %v15219_v7, %s15102_s13  ;;  %v8320_v38 = vsel %vm8315_vm1, %v8312_v8, %v8314_v57  ;;  %v14054_v63 = vld [vmem:[%s18543_s3 + $0xc0] sm:$0xf]  ;;  %vm10268_vm1 = vcmask 637952  }
 0x2ce   : > { %v8471_v46 = vpop.permute.xlu0 %8470  ;;  %14051 = vmatmul.mubr.msk.bf16.vlgmr.msra.gmra.mxu1 %vm426_vm3, %v14050_v0  ;;  %v5506_v45 = vpop.f32.mrf.mxu0  ;;  %v8337_v8 = vand.u32 %v8320_v38, %v15315_v18 }
 0x2cf   : > { %v5586_v61 = vpop.f32.mrf.mxu1  ;;  %14641 = vmatpush3.bf16.msra.mxu1 %v8172_v43  ;;  %14642 = vmatprep.mubr.msk.bf16.mxu1 %vm15055_vm4, %v15054_v30 }
 0x2d0   : > { %v5674_v2 = vadd.f32 %v5586_v61, %v5509_v19  ;;  %10097 = vrot.lane.b32.xlu0 %v15242_v13, %s15102_s13  ;;  %v14543_v24 = vpop.f32.mrf.mxu0  ;;  %8394 = vmatprep.subr.bf16.mxu1 %v8334_v14  ;;  %v8473_v41 = vpop.permute.xlu1 %8472 }
 0x2d1   : > { %v5588_v47 = vpop.f32.mrf.mxu1  ;;  %v8482_v60 = vsel %vm8480_vm2, %v8471_v46, %v8473_v41  ;;  %10099 = vrot.lane.b32.xlu1 %v16892_v50, %s15102_s13 }
 0x2d2   : > { %v5675_v1 = vadd.f32 %v5588_v47, %v5510_v28  ;;  %v8469_v54 = vpop.permute.xlu0 %8468  ;;  %14052 = vmatmul.mubr.msk.bf16.vlgmr.msra.gmra.mxu0 %vm426_vm3, %v14050_v0  ;;  %v5627_v12 = vpop.f32.mrf.mxu0  ;;  %v8493_v58 = vand.u32 %v8482_v60, %v15315_v18 }
 0x2d3   : > { %v5590_v19 = vpop.f32.mrf.mxu1  ;;  %8354 = vmatpush1.bf16.msra.mxu0 %v8325_v6  ;;  %v5676_v34 = vadd.f32 %v5627_v12, %v5511_v55  ;;  %8371 = vmatprep.mubr.bf16.mxu0 %v15041_v9 }
 0x2d4   : > { %10101 = vrot.lane.b32.xlu0 %v16790_v26, %s15102_s13  ;;  %v5629_v27 = vpop.f32.mrf.mxu0  ;;  %14646 = vmatprep.subr.bf16.mxu0 %v15054_v30  ;;  %v8475_v56 = vpop.permute.xlu1 %8474  ;;  %s15105_s13 = smov 60  }
 0x2d5   : > { %v5591_v28 = vpop.f32.mrf.mxu1  ;;  %v5677_v43 = vadd.f32 %v5629_v27, %v5512_v20  ;;  %v8481_v20 = vsel %vm8480_vm2, %v8469_v54, %v8471_v46  ;;  %10258 = vrot.lane.b32.xlu1 %v15226_v10, %s15103_s26  ;;  %v8483_v46 = vsel %vm8480_vm2, %v8473_v41, %v8475_v56 }
 0x2d6   : > { %v8477_v52 = vpop.permute.xlu0 %8476  ;;  %14643 = vmatmul.mubr.msk.bf16.vlgmr.msra.gmra.mxu1 %vm426_vm3, %v14050_v0  ;;  %v5631_v5 = vpop.f32.mrf.mxu0  ;;  %v8490_v45 = vand.u32 %v8481_v20, %v15315_v18  ;;  %v8496_v38 = vand.u32 %v8483_v46, %v15315_v18 }
 0x2d7   : > { %v5668_v36 = vpop.f32.mrf.mxu1  ;;  %v8484_v55 = vsel %vm8480_vm2, %v8475_v56, %v8477_v52  ;;  %8395 = vmatpush1.bf16.msra.mxu1 %v8331_v22  ;;  %8412 = vmatprep.mubr.bf16.mxu1 %v15041_v9 }
 0x2d8   : > { %v5678_v4 = vadd.f32 %v5668_v36, %v5513_v17  ;;  %10260 = vrot.lane.b32.xlu0 %v15228_v11, %s15103_s26  ;;  %v5632_v14 = vpop.f32.mrf.mxu0  ;;  %8518 = vmatprep.subr.bf16.mxu1 %v8493_v58  ;;  %v8499_v17 = vand.u32 %v8484_v55, %v15315_v18  ;;  %v8479_v61 = vpop.permute.xlu1 %8478 }
 0x2d9   : > { %v14548_v0 = vpop.f32.mrf.mxu1  ;;  %10256 = vrot.lane.b32.xlu1 %v15219_v7, %s15103_s26  ;;  %v8485_v27 = vsel %vm8480_vm2, %v8477_v52, %v8479_v61  ;;  %vm10433_vm2 = vcmask 629760  }
 0x2da   : > { %v8636_v57 = vpop.permute.xlu0 %8635  ;;  %14055 = vmatmul.mubr.msk.bf16.vlgmr.msra.gmra.mxu0 %vm426_vm3, %v14054_v63  ;;  %v5751_v59 = vpop.f32.mrf.mxu0  ;;  %v8502_v5 = vand.u32 %v8485_v27, %v15315_v18 }
 0x2db   : > { %v5671_v6 = vpop.f32.mrf.mxu1  ;;  %14647 = vmatpush3.bf16.msra.mxu0 %v8337_v8  ;;  %v5839_v47 = vadd.f32 %v5751_v59, %v5674_v2  ;;  %14648 = vmatprep.mubr.msk.bf16.mxu0 %vm15055_vm4, %v15054_v30 }
 0x2dc   : > { %10262 = vrot.lane.b32.xlu0 %v15242_v13, %s15103_s26  ;;  %v5753_v54 = vpop.f32.mrf.mxu0  ;;  %8559 = vmatprep.subr.bf16.mxu0 %v8499_v17  ;;  %v8638_v60 = vpop.permute.xlu1 %8637 }
 0x2dd   : > { %v14549_v24 = vpop.f32.mrf.mxu1  ;;  %v5840_v22 = vadd.f32 %v5753_v54, %v5675_v1  ;;  %v8647_v2 = vsel %vm8645_vm7, %v8636_v57, %v8638_v60  ;;  %10264 = vrot.lane.b32.xlu1 %v16892_v50, %s15103_s26 }
 0x2de   : > { %v8634_v19 = vpop.permute.xlu0 %8633  ;;  %14056 = vmatmul.mubr.msk.bf16.vlgmr.msra.gmra.mxu1 %vm426_vm3, %v14054_v63  ;;  %v5755_v41 = vpop.f32.mrf.mxu0  ;;  %v8658_v8 = vand.u32 %v8647_v2, %v15315_v18 }
 0x2df   : > { %v5792_v12 = vpop.f32.mrf.mxu1  ;;  %8519 = vmatpush1.bf16.msra.mxu1 %v8490_v45  ;;  %8536 = vmatprep.mubr.bf16.mxu1 %v15041_v9  ;;  %v8646_v0 = vsel %vm8645_vm7, %v8634_v19, %v8636_v57 }
 0x2e0   : > { %v5841_v28 = vadd.f32 %v5792_v12, %v5676_v34  ;;  %10266 = vrot.lane.b32.xlu0 %v16790_v26, %s15103_s26  ;;  %v5756_v58 = vpop.f32.mrf.mxu0  ;;  %14652 = vmatprep.subr.bf16.mxu1 %v15054_v30  ;;  %v8640_v34 = vpop.permute.xlu1 %8639  ;;  %v8655_v46 = vand.u32 %v8646_v0, %v15315_v18  ;;  %s15116_s26 = smov 33  }
 0x2e1   : > { %v5794_v1 = vpop.f32.mrf.mxu1  ;;  %10423 = vrot.lane.b32.xlu1 %v15226_v10, %s15104_s10 }
 0x2e2   : > { %v5842_v56 = vadd.f32 %v5794_v1, %v5677_v43  ;;  %v8642_v36 = vpop.permute.xlu0 %8641  ;;  %14649 = vmatmul.mubr.msk.bf16.vlgmr.msra.gmra.mxu0 %vm426_vm3, %v14054_v63  ;;  %v5833_v20 = vpop.f32.mrf.mxu0  ;;  %v14058_v43 = vld [vmem:[%s18543_s3 + $0xc4] sm:$0xf] }
 0x2e3   : > { %v5796_v55 = vpop.f32.mrf.mxu1  ;;  %v8649_v52 = vsel %vm8645_vm7, %v8640_v34, %v8642_v36  ;;  %8560 = vmatpush1.bf16.msra.mxu0 %v8496_v38  ;;  %v5843_v14 = vadd.f32 %v5833_v20, %v5678_v4  ;;  %8577 = vmatprep.mubr.bf16.mxu0 %v15041_v9  ;;  %v8648_v4 = vsel %vm8645_vm7, %v8638_v60, %v8640_v34 }
 0x2e4   : > { %10425 = vrot.lane.b32.xlu0 %v15228_v11, %s15104_s10  ;;  %v14554_v17 = vpop.f32.mrf.mxu0  ;;  %8683 = vmatprep.subr.bf16.mxu0 %v8658_v8  ;;  %v8664_v6 = vand.u32 %v8649_v52, %v15315_v18  ;;  %v8644_v45 = vpop.permute.xlu1 %8643  ;;  %v8661_v41 = vand.u32 %v8648_v4, %v15315_v18 }
 0x2e5   : > { %v5797_v63 = vpop.f32.mrf.mxu1  ;;  %10421 = vrot.lane.b32.xlu1 %v15219_v7, %s15104_s10  ;;  %v8650_v1 = vsel %vm8645_vm7, %v8642_v36, %v8644_v45  ;;  %v14062_v17 = vld [vmem:[%s18543_s3 + $0xc8] sm:$0xf]  ;;  %vm10736_vm7 = vcmask 490496  }
 0x2e6   : > { %v8801_v61 = vpop.permute.xlu0 %8800  ;;  %14059 = vmatmul.mubr.msk.bf16.vlgmr.msra.gmra.mxu1 %vm426_vm3, %v14058_v43  ;;  %v5836_v24 = vpop.f32.mrf.mxu0  ;;  %v8667_v36 = vand.u32 %v8650_v1, %v15315_v18 }
 0x2e7   : > { %v5916_v59 = vpop.f32.mrf.mxu1  ;;  %14653 = vmatpush3.bf16.msra.mxu1 %v8502_v5  ;;  %14654 = vmatprep.mubr.msk.bf16.mxu1 %vm15055_vm4, %v15054_v30 }
 0x2e8   : > { %v6004_v57 = vadd.f32 %v5916_v59, %v5839_v47  ;;  %10427 = vrot.lane.b32.xlu0 %v15242_v13, %s15104_s10  ;;  %v14555_v19 = vpop.f32.mrf.mxu0  ;;  %8724 = vmatprep.subr.bf16.mxu1 %v8664_v6  ;;  %v8803_v2 = vpop.permute.xlu1 %8802 }
 0x2e9   : > { %v5918_v54 = vpop.f32.mrf.mxu1  ;;  %v8812_v60 = vsel %vm8810_vm8, %v8801_v61, %v8803_v2  ;;  %10429 = vrot.lane.b32.xlu1 %v16892_v50, %s15104_s10 }
 0x2ea   : > { %v6005_v12 = vadd.f32 %v5918_v54, %v5840_v22  ;;  %v8799_v38 = vpop.permute.xlu0 %8798  ;;  %14060 = vmatmul.mubr.msk.bf16.vlgmr.msra.gmra.mxu0 %vm426_vm3, %v14058_v43  ;;  %v5957_v27 = vpop.f32.mrf.mxu0  ;;  %v8823_v55 = vand.u32 %v8812_v60, %v15315_v18 }
 0x2eb   : > { %v5920_v47 = vpop.f32.mrf.mxu1  ;;  %8684 = vmatpush1.bf16.msra.mxu0 %v8655_v46  ;;  %v6006_v58 = vadd.f32 %v5957_v27, %v5841_v28  ;;  %8701 = vmatprep.mubr.bf16.mxu0 %v15041_v9 }
 0x2ec   : > { %10431 = vrot.lane.b32.xlu0 %v16790_v26, %s15104_s10  ;;  %v5959_v8 = vpop.f32.mrf.mxu0  ;;  %14658 = vmatprep.subr.bf16.mxu0 %v15054_v30  ;;  %v8805_v52 = vpop.permute.xlu1 %8804  ;;  %s355_s10 = scalar_lea.vmem %s18545_s5, %s18556_s9  ;;  %s319_s9 = sand.u32 1, %s15030_s22  }
 0x2ed   : > { %v5921_v22 = vpop.f32.mrf.mxu1  ;;  %v6007_v5 = vadd.f32 %v5959_v8, %v5842_v56  ;;  %v8811_v56 = vsel %vm8810_vm8, %v8799_v38, %v8801_v61  ;;  %10586 = vrot.lane.b32.xlu1 %v16790_v26, %s15051_s16  ;;  %v8813_v26 = vsel %vm8810_vm8, %v8803_v2, %v8805_v52  ;;  %s15106_s16 = smov 59  }
 0x2ee   : > { %v8807_v34 = vpop.permute.xlu0 %8806  ;;  %14655 = vmatmul.mubr.msk.bf16.vlgmr.msra.gmra.mxu1 %vm426_vm3, %v14058_v43  ;;  %v5961_v0 = vpop.f32.mrf.mxu0  ;;  %v8820_v24 = vand.u32 %v8811_v56, %v15315_v18  ;;  %v8826_v27 = vand.u32 %v8813_v26, %v15315_v18 }
 0x2ef   : > { %v5998_v20 = vpop.f32.mrf.mxu1  ;;  %v8814_v28 = vsel %vm8810_vm8, %v8805_v52, %v8807_v34  ;;  %8725 = vmatpush1.bf16.msra.mxu1 %v8661_v41  ;;  %8742 = vmatprep.mubr.bf16.mxu1 %v15041_v9 }
 0x2f0   : > { %v6008_v63 = vadd.f32 %v5998_v20, %v5843_v14  ;;  %10726 = vrot.lane.b32.xlu0 %v15226_v10, %s15105_s13  ;;  %v5962_v6 = vpop.f32.mrf.mxu0  ;;  %8848 = vmatprep.subr.bf16.mxu1 %v8823_v55  ;;  %v8829_v14 = vand.u32 %v8814_v28, %v15315_v18  ;;  %v8809_v59 = vpop.permute.xlu1 %8808 }
 0x2f1   : > { %v14560_v43 = vpop.f32.mrf.mxu1  ;;  %10728 = vrot.lane.b32.xlu1 %v15228_v11, %s15105_s13  ;;  %v8815_v22 = vsel %vm8810_vm8, %v8807_v34, %v8809_v59  ;;  %v17140_v6 = vld.sshfl [vmem:[%s16430_s15] sm:$0xff pattern:$0x76325410]  ;;  %vm11066_vm8 = vcmask 474112  }
 0x2f2   : > { %v8966_v45 = vpop.permute.xlu0 %8965  ;;  %14063 = vmatmul.mubr.msk.bf16.vlgmr.msra.gmra.mxu0 %vm426_vm3, %v14062_v17  ;;  %v6081_v4 = vpop.f32.mrf.mxu0  ;;  %v8832_v34 = vand.u32 %v8815_v22, %v15315_v18 }
 0x2f3   : > { %v6001_v46 = vpop.f32.mrf.mxu1  ;;  %14659 = vmatpush3.bf16.msra.mxu0 %v8667_v36  ;;  %v6169_v61 = vadd.f32 %v6081_v4, %v6004_v57  ;;  %14660 = vmatprep.mubr.msk.bf16.mxu0 %vm15055_vm4, %v15054_v30 }
 0x2f4   : > { %10724 = vrot.lane.b32.xlu0 %v15219_v7, %s15105_s13  ;;  %v6083_v19 = vpop.f32.mrf.mxu0  ;;  %8889 = vmatprep.subr.bf16.mxu0 %v8829_v14  ;;  %v8968_v41 = vpop.permute.xlu1 %8967 }
 0x2f5   : > { %v14561_v54 = vpop.f32.mrf.mxu1  ;;  %v6170_v47 = vadd.f32 %v6083_v19, %v6005_v12  ;;  %v8977_v57 = vsel %vm8975_vm10, %v8966_v45, %v8968_v41  ;;  %10730 = vrot.lane.b32.xlu1 %v15242_v13, %s15105_s13 }
 0x2f6   : > { %v8964_v38 = vpop.permute.xlu0 %8963  ;;  %14064 = vmatmul.mubr.msk.bf16.vlgmr.msra.gmra.mxu1 %vm426_vm3, %v14062_v17  ;;  %v6085_v2 = vpop.f32.mrf.mxu0 }
 0x2f7   : > { %v6122_v60 = vpop.f32.mrf.mxu1  ;;  %8849 = vmatpush1.bf16.msra.mxu1 %v8820_v24  ;;  %8866 = vmatprep.mubr.bf16.mxu1 %v15041_v9  ;;  %v8976_v56 = vsel %vm8975_vm10, %v8964_v38, %v8966_v45 }
 0x2f8   : > { %v6171_v1 = vadd.f32 %v6122_v60, %v6006_v58  ;;  %10732 = vrot.lane.b32.xlu0 %v16892_v50, %s15105_s13  ;;  %v6086_v8 = vpop.f32.mrf.mxu0  ;;  %14664 = vmatprep.subr.bf16.mxu1 %v15054_v30  ;;  %v8988_v58 = vand.u32 %v8977_v57, %v15315_v18  ;;  %v8970_v20 = vpop.permute.xlu1 %8969 }
 0x2f9   : > { %v6124_v12 = vpop.f32.mrf.mxu1  ;;  %10734 = vrot.lane.b32.xlu1 %v17140_v6, %s15105_s13  ;;  %v8978_v54 = vsel %vm8975_vm10, %v8968_v41, %v8970_v20  ;;  %s14195_s13 = smul.u32 320, %s15178_s25  ;;  %s15121_s25 = smov [#allocation2]  }
 0x2fa   : > { %v6172_v55 = vadd.f32 %v6124_v12, %v6007_v5  ;;  %v8972_v52 = vpop.permute.xlu0 %8971  ;;  %14661 = vmatmul.mubr.msk.bf16.vlgmr.msra.gmra.mxu0 %vm426_vm3, %v14062_v17  ;;  %v6163_v0 = vpop.f32.mrf.mxu0  ;;  %v14066_v5 = vld [vmem:[%s18543_s3 + $0xcc] sm:$0xf]  ;;  %v8991_v2 = vand.u32 %v8978_v54, %v15315_v18 }
 0x2fb   : > { %v6126_v36 = vpop.f32.mrf.mxu1  ;;  %v8979_v28 = vsel %vm8975_vm10, %v8970_v20, %v8972_v52  ;;  %8890 = vmatpush1.bf16.msra.mxu0 %v8826_v27  ;;  %v6173_v43 = vadd.f32 %v6163_v0, %v6008_v63  ;;  %8907 = vmatprep.mubr.bf16.mxu0 %v15041_v9  ;;  %v8985_v63 = vand.u32 %v8976_v56, %v15315_v18  ;;  %v14070_v0 = vld [vmem:[%s18543_s3 + $0xd0] sm:$0xf] }
 0x2fc   : > { %10891 = vrot.lane.b32.xlu0 %v15226_v10, %s15106_s16  ;;  %v14566_v14 = vpop.f32.mrf.mxu0  ;;  %9013 = vmatprep.subr.bf16.mxu0 %v8988_v58  ;;  %v8994_v46 = vand.u32 %v8979_v28, %v15315_v18  ;;  %v8974_v24 = vpop.permute.xlu1 %8973 }
 0x2fd   : > { %v6127_v17 = vpop.f32.mrf.mxu1  ;;  %10893 = vrot.lane.b32.xlu1 %v15228_v11, %s15106_s16  ;;  %v8980_v22 = vsel %vm8975_vm10, %v8972_v52, %v8974_v24  ;;  %vm11231_vm10 = vcmask 465920  }
 0x2fe   : > { %v17145_v59 = vpop.permute.xlu0 %9128  ;;  %14067 = vmatmul.mubr.msk.bf16.vlgmr.msra.gmra.mxu1 %vm426_vm3, %v14066_v5  ;;  %v6166_v45 = vpop.f32.mrf.mxu0  ;;  %v8997_v28 = vand.u32 %v8980_v22, %v15315_v18 }
 0x2ff   : > { %v6246_v4 = vpop.f32.mrf.mxu1  ;;  %14665 = vmatpush3.bf16.msra.mxu1 %v8832_v34  ;;  %14666 = vmatprep.mubr.msk.bf16.mxu1 %vm15055_vm4, %v15054_v30 }
 0x300   : > { %v6334_v26 = vadd.f32 %v6246_v4, %v6169_v61  ;;  %10889 = vrot.lane.b32.xlu0 %v15219_v7, %s15106_s16  ;;  %v14567_v38 = vpop.f32.mrf.mxu0  ;;  %9054 = vmatprep.subr.bf16.mxu1 %v8994_v46  ;;  %v17159_v57 = vpop.permute.xlu1 %9268 }
 0x301   : > { %v6248_v19 = vpop.f32.mrf.mxu1  ;;  %10895 = vrot.lane.b32.xlu1 %v15242_v13, %s15106_s16 }
 0x302   : > { %v6335_v60 = vadd.f32 %v6248_v19, %v6170_v47  ;;  %v17157_v27 = vpop.permute.xlu0 %9270  ;;  %14068 = vmatmul.mubr.msk.bf16.vlgmr.msra.gmra.mxu0 %vm426_vm3, %v14066_v5  ;;  %v6287_v41 = vpop.f32.mrf.mxu0 }
 0x303   : > { %v6250_v61 = vpop.f32.mrf.mxu1  ;;  %9014 = vmatpush1.bf16.msra.mxu0 %v8985_v63  ;;  %v6336_v12 = vadd.f32 %v6287_v41, %v6171_v1  ;;  %9031 = vmatprep.mubr.bf16.mxu0 %v15041_v9  ;;  %v9280_v63 = vsel %vm9278_vm11, %v17159_v57, %v17157_v27 }
 0x304   : > { %10897 = vrot.lane.b32.xlu0 %v16892_v50, %s15106_s16  ;;  %v6289_v8 = vpop.f32.mrf.mxu0  ;;  %14670 = vmatprep.subr.bf16.mxu0 %v15054_v30  ;;  %v9267_v36 = vpop.permute.xlu1 %9266  ;;  %v9291_v41 = vand.u32 %v9280_v63, %v15315_v18 }
 0x305   : > { %v6251_v47 = vpop.f32.mrf.mxu1  ;;  %v6337_v20 = vadd.f32 %v6289_v8, %v6172_v55  ;;  %10899 = vrot.lane.b32.xlu1 %v17140_v6, %s15106_s16  ;;  %s15120_s16 = smov 29  }
 0x306   : > { %v17169_v58 = vpop.permute.xlu0 %9272  ;;  %14667 = vmatmul.mubr.msk.bf16.vlgmr.msra.gmra.mxu1 %vm426_vm3, %v14066_v5  ;;  %v6291_v52 = vpop.f32.mrf.mxu0 }
 0x307   : > { %v6328_v34 = vpop.f32.mrf.mxu1  ;;  %9055 = vmatpush1.bf16.msra.mxu1 %v8991_v2  ;;  %9072 = vmatprep.mubr.bf16.mxu1 %v15041_v9 }
 0x308   : > { %v6338_v1 = vadd.f32 %v6328_v34, %v6173_v43  ;;  %11056 = vrot.lane.b32.xlu0 %v15226_v10, %s15107_s19  ;;  %9151 = vmatprep.subr.bf16.mxu1 %v15375_v49  ;;  %v6292_v5 = vpop.f32.mrf.mxu0  ;;  %v17185_v43 = vpop.permute.xlu1 %9274 }
 0x309   : > { %v14572_v55 = vpop.f32.mrf.mxu1  ;;  %11058 = vrot.lane.b32.xlu1 %v15228_v11, %s15107_s19  ;;  %v9281_v5 = vsel %vm9278_vm11, %v17157_v27, %v17169_v58 }
 0x30a   : > { %v17182_v56 = vpop.permute.xlu0 %9276  ;;  %14071 = vmatmul.mubr.msk.bf16.vlgmr.msra.gmra.mxu0 %vm426_vm3, %v14070_v0  ;;  %v6411_v14 = vpop.f32.mrf.mxu0  ;;  %v9294_v27 = vand.u32 %v9281_v5, %v15315_v18 }
 0x30b   : > { %v6331_v17 = vpop.f32.mrf.mxu1  ;;  %14671 = vmatpush3.bf16.msra.mxu0 %v8997_v28  ;;  %v6499_v46 = vadd.f32 %v6411_v14, %v6334_v26  ;;  %14672 = vmatprep.mubr.msk.bf16.mxu0 %vm15055_vm4, %v15054_v30 }
 0x30c   : > { %11054 = vrot.lane.b32.xlu0 %v15219_v7, %s15107_s19  ;;  %9192 = vmatprep.subr.bf16.mxu0 %v15387_v53  ;;  %v6413_v24 = vpop.f32.mrf.mxu0  ;;  %v17200_v54 = vpop.permute.xlu1 %9433 }
 0x30d   : > { %v14573_v49 = vpop.f32.mrf.mxu1  ;;  %v6500_v45 = vadd.f32 %v6413_v24, %v6335_v60  ;;  %11060 = vrot.lane.b32.xlu1 %v15242_v13, %s15107_s19 }
 0x30e   : > { %v17193_v4 = vpop.permute.xlu0 %9435  ;;  %14072 = vmatmul.mubr.msk.bf16.vlgmr.msra.gmra.mxu1 %vm426_vm3, %v14070_v0  ;;  %v6415_v19 = vpop.f32.mrf.mxu0 }
 0x30f   : > { %v6452_v26 = vpop.f32.mrf.mxu1  ;;  %9152 = vmatpush1.bf16.msra.mxu1 %v15356_v42  ;;  %9169 = vmatprep.mubr.bf16.mxu1 %v15041_v9  ;;  %v9130_v42 = vsel %vm583_vm5, %v15377_v51, %v17145_v59  ;;  %v14074_v51 = vld [vmem:[%s18543_s3 + $0xd4] sm:$0xf]  ;;  %v9279_v59 = vsel %vm9278_vm11, %v9267_v36, %v17159_v57  ;;  %vm9443_vm5 = vcmask 678912  }
 0x310   : > { %v6501_v38 = vadd.f32 %v6452_v26, %v6336_v12  ;;  %11062 = vrot.lane.b32.xlu0 %v16892_v50, %s15107_s19  ;;  %v6416_v61 = vpop.f32.mrf.mxu0  ;;  %14676 = vmatprep.subr.bf16.mxu1 %v15054_v30  ;;  %v9282_v50 = vsel %vm9278_vm11, %v17169_v58, %v17185_v43  ;;  %v17219_v22 = vpop.permute.xlu1 %9431  ;;  %v9288_v57 = vand.u32 %v9279_v59, %v15315_v18  ;;  %v17260_v19 = vld.sshfl [vmem:[%s15216_s14 + $0x8] sm:$0x3 pattern:$0x76325410] }
 0x311   : > { %v6454_v53 = vpop.f32.mrf.mxu1  ;;  %11064 = vrot.lane.b32.xlu1 %v17140_v6, %s15107_s19  ;;  %v9297_v52 = vand.u32 %v9282_v50, %v15315_v18 }
 0x312   : > { %v6502_v60 = vadd.f32 %v6454_v53, %v6337_v20  ;;  %v17209_v2 = vpop.permute.xlu0 %9437  ;;  %14673 = vmatmul.mubr.msk.bf16.vlgmr.msra.gmra.mxu0 %vm426_vm3, %v14070_v0  ;;  %v6493_v47 = vpop.f32.mrf.mxu0 }
 0x313   : > { %v6456_v12 = vpop.f32.mrf.mxu1  ;;  %9193 = vmatpush1.bf16.msra.mxu0 %v15371_v48  ;;  %v6503_v8 = vadd.f32 %v6493_v47, %v6338_v1  ;;  %9210 = vmatprep.mubr.bf16.mxu0 %v15041_v9  ;;  %v9135_v48 = vand.u32 %v9130_v42, %v15315_v18 }
 0x314   : > { %11221 = vrot.lane.b32.xlu0 %v15226_v10, %s15108_s12  ;;  %v14578_v34 = vpop.f32.mrf.mxu0  ;;  %9316 = vmatprep.subr.bf16.mxu0 %v9291_v41  ;;  %v17237_v0 = vpop.permute.xlu1 %9439 }
 0x315   : > { %v6457_v20 = vpop.f32.mrf.mxu1  ;;  %11223 = vrot.lane.b32.xlu1 %v15228_v11, %s15108_s12  ;;  %v9447_v12 = vsel %vm9443_vm5, %v17209_v2, %v17237_v0 }
 0x316   : > { %v17234_v28 = vpop.permute.xlu0 %9441  ;;  %14075 = vmatmul.mubr.msk.bf16.vlgmr.msra.gmra.mxu1 %vm426_vm3, %v14074_v51  ;;  %v6496_v36 = vpop.f32.mrf.mxu0 }
 0x317   : > { %v6576_v55 = vpop.f32.mrf.mxu1  ;;  %14677 = vmatpush3.bf16.msra.mxu1 %v9135_v48  ;;  %14678 = vmatprep.mubr.msk.bf16.mxu1 %vm15055_vm4, %v15054_v30  ;;  %v14078_v48 = vld [vmem:[%s18543_s3 + $0xd8] sm:$0xf] }
 0x318   : > { %v6664_v1 = vadd.f32 %v6576_v55, %v6499_v46  ;;  %11219 = vrot.lane.b32.xlu0 %v15219_v7, %s15108_s12  ;;  %v14579_v14 = vpop.f32.mrf.mxu0  ;;  %9357 = vmatprep.subr.bf16.mxu1 %v9297_v52  ;;  %v9445_v46 = vsel %vm9443_vm5, %v17200_v54, %v17193_v4  ;;  %v17255_v63 = vpop.permute.xlu1 %9598  ;;  %v9462_v52 = vand.u32 %v9447_v12, %v15315_v18 }
 0x319   : > { %v6578_v17 = vpop.f32.mrf.mxu1  ;;  %11225 = vrot.lane.b32.xlu1 %v15242_v13, %s15108_s12  ;;  %v9456_v50 = vand.u32 %v9445_v46, %v15315_v18 }
 0x31a   : > { %v6665_v49 = vadd.f32 %v6578_v17, %v6500_v45  ;;  %v17250_v24 = vpop.permute.xlu0 %9600  ;;  %14076 = vmatmul.mubr.msk.bf16.vlgmr.msra.gmra.mxu0 %vm426_vm3, %v14074_v51  ;;  %v6617_v58 = vpop.f32.mrf.mxu0  ;;  %v9283_v45 = vsel %vm9278_vm11, %v17185_v43, %v17182_v56  ;;  %vm11396_vm11 = vcmask 457728  }
 0x31b   : > { %v6580_v26 = vpop.f32.mrf.mxu1  ;;  %9317 = vmatpush1.bf16.msra.mxu0 %v9288_v57  ;;  %v6666_v53 = vadd.f32 %v6617_v58, %v6501_v38  ;;  %9334 = vmatprep.mubr.bf16.mxu0 %v15041_v9  ;;  %v9300_v38 = vand.u32 %v9283_v45, %v15315_v18 }
 0x31c   : > { %11227 = vrot.lane.b32.xlu0 %v17260_v19, %s15108_s12  ;;  %v6619_v41 = vpop.f32.mrf.mxu0  ;;  %14682 = vmatprep.subr.bf16.mxu0 %v15054_v30  ;;  %v17277_v56 = vpop.permute.xlu1 %9596  ;;  %v9610_v26 = vsel %vm9608_vm12, %v17255_v63, %v17250_v24 }
 0x31d   : > { %v6581_v61 = vpop.f32.mrf.mxu1  ;;  %v6667_v47 = vadd.f32 %v6619_v41, %v6502_v60  ;;  %v9444_v60 = vsel %vm9443_vm5, %v17219_v22, %v17200_v54  ;;  %11229 = vrot.lane.b32.xlu1 %v17140_v6, %s15108_s12  ;;  %v9446_v22 = vsel %vm9443_vm5, %v17193_v4, %v17209_v2 }
 0x31e   : > { %v17270_v42 = vpop.permute.xlu0 %9602  ;;  %14679 = vmatmul.mubr.msk.bf16.vlgmr.msra.gmra.mxu1 %vm426_vm3, %v14074_v51  ;;  %v6621_v59 = vpop.f32.mrf.mxu0  ;;  %v9453_v36 = vand.u32 %v9444_v60, %v15315_v18  ;;  %v9459_v2 = vand.u32 %v9446_v22, %v15315_v18  ;;  %v9448_v61 = vsel %vm9443_vm5, %v17237_v0, %v17234_v28  ;;  %v9609_v60 = vsel %vm9608_vm12, %v17277_v56, %v17255_v63 }
 0x31f   : > { %v6658_v43 = vpop.f32.mrf.mxu1  ;;  %9358 = vmatpush1.bf16.msra.mxu1 %v9294_v27  ;;  %9375 = vmatprep.mubr.bf16.mxu1 %v15041_v9  ;;  %v9465_v0 = vand.u32 %v9448_v61, %v15315_v18  ;;  %v9618_v63 = vand.u32 %v9609_v60, %v15315_v18  ;;  %v9611_v22 = vsel %vm9608_vm12, %v17250_v24, %v17270_v42  ;;  %vm11561_vm5 = vcmask 449536  }
 0x320   : > { %v6668_v20 = vadd.f32 %v6658_v43, %v6503_v8  ;;  %11386 = vrot.lane.b32.xlu0 %v15226_v10, %s15109_s17  ;;  %v6622_v8 = vpop.f32.mrf.mxu0  ;;  %9481 = vmatprep.subr.bf16.mxu1 %v9456_v50  ;;  %v17295_v55 = vpop.permute.xlu1 %9604  ;;  %v9624_v24 = vand.u32 %v9611_v22, %v15315_v18 }
 0x321   : > { %v14584_v51 = vpop.f32.mrf.mxu1  ;;  %11388 = vrot.lane.b32.xlu1 %v15228_v11, %s15109_s17  ;;  %v9612_v43 = vsel %vm9608_vm12, %v17270_v42, %v17295_v55 }
 0x322   : > { %v17292_v34 = vpop.permute.xlu0 %9606  ;;  %14079 = vmatmul.mubr.msk.bf16.vlgmr.msra.gmra.mxu0 %vm426_vm3, %v14078_v48  ;;  %v6741_v54 = vpop.f32.mrf.mxu0 }
 0x323   : > { %v6661_v57 = vpop.f32.mrf.mxu1  ;;  %14683 = vmatpush3.bf16.msra.mxu0 %v9300_v38  ;;  %v6829_v5 = vadd.f32 %v6741_v54, %v6664_v1  ;;  %14684 = vmatprep.mubr.msk.bf16.mxu0 %vm15055_vm4, %v15054_v30 }
 0x324   : > { %11384 = vrot.lane.b32.xlu0 %v15219_v7, %s15109_s17  ;;  %v6743_v14 = vpop.f32.mrf.mxu0  ;;  %9522 = vmatprep.subr.bf16.mxu0 %v9462_v52  ;;  %v17313_v58 = vpop.permute.xlu1 %9763  ;;  %v9627_v57 = vand.u32 %v9612_v43, %v15315_v18 }
 0x325   : > { %v14585_v17 = vpop.f32.mrf.mxu1  ;;  %v6830_v27 = vadd.f32 %v6743_v14, %v6665_v49  ;;  %11390 = vrot.lane.b32.xlu1 %v15242_v13, %s15109_s17 }
 0x326   : > { %v17308_v46 = vpop.permute.xlu0 %9765  ;;  %14080 = vmatmul.mubr.msk.bf16.vlgmr.msra.gmra.mxu1 %vm426_vm3, %v14078_v48  ;;  %v6745_v1 = vpop.f32.mrf.mxu0 }
 0x327   : > { %v6782_v4 = vpop.f32.mrf.mxu1  ;;  %9482 = vmatpush1.bf16.msra.mxu1 %v9453_v36  ;;  %9499 = vmatprep.mubr.bf16.mxu1 %v15041_v9 }
 0x328   : > { %v6831_v45 = vadd.f32 %v6782_v4, %v6666_v53  ;;  %11392 = vrot.lane.b32.xlu0 %v17260_v19, %s15109_s17  ;;  %v6746_v41 = vpop.f32.mrf.mxu0  ;;  %14688 = vmatprep.subr.bf16.mxu1 %v15054_v30  ;;  %v9621_v53 = vand.u32 %v9610_v26, %v15315_v18  ;;  %v17332_v38 = vpop.permute.xlu1 %9761 }
 0x329   : > { %v6784_v49 = vpop.f32.mrf.mxu1  ;;  %11394 = vrot.lane.b32.xlu1 %v17140_v6, %s15109_s17 }
 0x32a   : > { %v6832_v50 = vadd.f32 %v6784_v49, %v6667_v47  ;;  %v17325_v12 = vpop.permute.xlu0 %9767  ;;  %14685 = vmatmul.mubr.msk.bf16.vlgmr.msra.gmra.mxu0 %vm426_vm3, %v14078_v48  ;;  %v6823_v59 = vpop.f32.mrf.mxu0  ;;  %v14082_v47 = vld [vmem:[%s18543_s3 + $0xdc] sm:$0xf] }
 0x32b   : > { %v6786_v28 = vpop.f32.mrf.mxu1  ;;  %9523 = vmatpush1.bf16.msra.mxu0 %v9459_v2  ;;  %v6833_v51 = vadd.f32 %v6823_v59, %v6668_v20  ;;  %9540 = vmatprep.mubr.bf16.mxu0 %v15041_v9 }
 0x32c   : > { %11551 = vrot.lane.b32.xlu0 %v15226_v10, %s15110_s18  ;;  %v14590_v8 = vpop.f32.mrf.mxu0  ;;  %9646 = vmatprep.subr.bf16.mxu0 %v9621_v53  ;;  %v17350_v36 = vpop.permute.xlu1 %9769 }
 0x32d   : > { %v6787_v48 = vpop.f32.mrf.mxu1  ;;  %11553 = vrot.lane.b32.xlu1 %v15228_v11, %s15110_s18  ;;  %v9777_v28 = vsel %vm9773_vm14, %v17325_v12, %v17350_v36 }
 0x32e   : > { %v17347_v52 = vpop.permute.xlu0 %9771  ;;  %14083 = vmatmul.mubr.msk.bf16.vlgmr.msra.gmra.mxu1 %vm426_vm3, %v14082_v47  ;;  %v6826_v56 = vpop.f32.mrf.mxu0  ;;  %v14086_v48 = vld [vmem:[%s18543_s3 + $0xe0] sm:$0xf] }
 0x32f   : > { %v6906_v54 = vpop.f32.mrf.mxu1  ;;  %14689 = vmatpush3.bf16.msra.mxu1 %v9465_v0  ;;  %14690 = vmatprep.mubr.msk.bf16.mxu1 %vm15055_vm4, %v15054_v30 }
 0x330   : > { %v6994_v20 = vadd.f32 %v6906_v54, %v6829_v5  ;;  %11549 = vrot.lane.b32.xlu0 %v15219_v7, %s15110_s18  ;;  %v14591_v14 = vpop.f32.mrf.mxu0  ;;  %9687 = vmatprep.subr.bf16.mxu1 %v9627_v57  ;;  %v9775_v5 = vsel %vm9773_vm14, %v17313_v58, %v17308_v46  ;;  %v17368_v2 = vpop.permute.xlu1 %9928  ;;  %v9792_v57 = vand.u32 %v9777_v28, %v15315_v18 }
 0x331   : > { %v6908_v17 = vpop.f32.mrf.mxu1  ;;  %11555 = vrot.lane.b32.xlu1 %v15242_v13, %s15110_s18  ;;  %v9786_v43 = vand.u32 %v9775_v5, %v15315_v18 }
 0x332   : > { %v6995_v26 = vadd.f32 %v6908_v17, %v6830_v27  ;;  %v17363_v4 = vpop.permute.xlu0 %9930  ;;  %14084 = vmatmul.mubr.msk.bf16.vlgmr.msra.gmra.mxu0 %vm426_vm3, %v14082_v47  ;;  %v6947_v42 = vpop.f32.mrf.mxu0  ;;  %v9613_v27 = vsel %vm9608_vm12, %v17295_v55, %v17292_v34  ;;  %vm11726_vm12 = vcmask 441344  }
 0x333   : > { %v6910_v1 = vpop.f32.mrf.mxu1  ;;  %9647 = vmatpush1.bf16.msra.mxu0 %v9618_v63  ;;  %v6996_v61 = vadd.f32 %v6947_v42, %v6831_v45  ;;  %9664 = vmatprep.mubr.bf16.mxu0 %v15041_v9  ;;  %v9630_v45 = vand.u32 %v9613_v27, %v15315_v18 }
 0x334   : > { %11557 = vrot.lane.b32.xlu0 %v17260_v19, %s15110_s18  ;;  %v6949_v41 = vpop.f32.mrf.mxu0  ;;  %14694 = vmatprep.subr.bf16.mxu0 %v15054_v30  ;;  %v17387_v34 = vpop.permute.xlu1 %9926  ;;  %v9940_v1 = vsel %vm9938_vm15, %v17368_v2, %v17363_v4 }
 0x335   : > { %v6911_v49 = vpop.f32.mrf.mxu1  ;;  %v6997_v0 = vadd.f32 %v6949_v41, %v6832_v50  ;;  %v9774_v50 = vsel %vm9773_vm14, %v17332_v38, %v17313_v58  ;;  %11559 = vrot.lane.b32.xlu1 %v17140_v6, %s15110_s18  ;;  %v9776_v38 = vsel %vm9773_vm14, %v17308_v46, %v17325_v12 }
 0x336   : > { %v17380_v53 = vpop.permute.xlu0 %9932  ;;  %14691 = vmatmul.mubr.msk.bf16.vlgmr.msra.gmra.mxu1 %vm426_vm3, %v14082_v47  ;;  %v6951_v59 = vpop.f32.mrf.mxu0  ;;  %v9783_v56 = vand.u32 %v9774_v50, %v15315_v18  ;;  %v9789_v12 = vand.u32 %v9776_v38, %v15315_v18  ;;  %v9778_v49 = vsel %vm9773_vm14, %v17350_v36, %v17347_v52  ;;  %v9939_v50 = vsel %vm9938_vm15, %v17387_v34, %v17368_v2 }
 0x337   : > { %v6988_v55 = vpop.f32.mrf.mxu1  ;;  %9688 = vmatpush1.bf16.msra.mxu1 %v9624_v24  ;;  %9705 = vmatprep.mubr.bf16.mxu1 %v15041_v9  ;;  %v9795_v36 = vand.u32 %v9778_v49, %v15315_v18  ;;  %v9948_v2 = vand.u32 %v9939_v50, %v15315_v18  ;;  %v9941_v38 = vsel %vm9938_vm15, %v17363_v4, %v17380_v53  ;;  %vm11891_vm14 = vcmask 433152  }
 0x338   : > { %v6998_v60 = vadd.f32 %v6988_v55, %v6833_v51  ;;  %11716 = vrot.lane.b32.xlu0 %v15226_v10, %s15111_s11  ;;  %v6952_v51 = vpop.f32.mrf.mxu0  ;;  %9811 = vmatprep.subr.bf16.mxu1 %v9786_v43  ;;  %v17405_v54 = vpop.permute.xlu1 %9934  ;;  %v9954_v4 = vand.u32 %v9941_v38, %v15315_v18 }
 0x339   : > { %v14596_v47 = vpop.f32.mrf.mxu1  ;;  %11718 = vrot.lane.b32.xlu1 %v15228_v11, %s15111_s11  ;;  %v9942_v55 = vsel %vm9938_vm15, %v17380_v53, %v17405_v54 }
 0x33a   : > { %v17402_v8 = vpop.permute.xlu0 %9936  ;;  %14087 = vmatmul.mubr.msk.bf16.vlgmr.msra.gmra.mxu0 %vm426_vm3, %v14086_v48  ;;  %v7053_v58 = vpop.f32.mrf.mxu0 }
 0x33b   : > { %v6991_v63 = vpop.f32.mrf.mxu1  ;;  %14695 = vmatpush3.bf16.msra.mxu0 %v9630_v45  ;;  %v7141_v22 = vadd.f32 %v7053_v58, %v6994_v20  ;;  %14696 = vmatprep.mubr.msk.bf16.mxu0 %vm15055_vm4, %v15054_v30 }
 0x33c   : > { %11714 = vrot.lane.b32.xlu0 %v15219_v7, %s15111_s11  ;;  %v7055_v14 = vpop.f32.mrf.mxu0  ;;  %9852 = vmatprep.subr.bf16.mxu0 %v9792_v57  ;;  %v17423_v42 = vpop.permute.xlu1 %10093  ;;  %v9957_v63 = vand.u32 %v9942_v55, %v15315_v18 }
 0x33d   : > { %v14597_v17 = vpop.f32.mrf.mxu1  ;;  %v7142_v24 = vadd.f32 %v7055_v14, %v6995_v26  ;;  %11720 = vrot.lane.b32.xlu1 %v15242_v13, %s15111_s11 }
 0x33e   : > { %v17418_v5 = vpop.permute.xlu0 %10095  ;;  %14088 = vmatmul.mubr.msk.bf16.vlgmr.msra.gmra.mxu1 %vm426_vm3, %v14086_v48  ;;  %v7057_v20 = vpop.f32.mrf.mxu0 }
 0x33f   : > { %v7094_v46 = vpop.f32.mrf.mxu1  ;;  %9812 = vmatpush1.bf16.msra.mxu1 %v9783_v56  ;;  %9829 = vmatprep.mubr.bf16.mxu1 %v15041_v9 }
 0x340   : > { %v7143_v27 = vadd.f32 %v7094_v46, %v6996_v61  ;;  %11722 = vrot.lane.b32.xlu0 %v17260_v19, %s15111_s11  ;;  %v7058_v41 = vpop.f32.mrf.mxu0  ;;  %14700 = vmatprep.subr.bf16.mxu1 %v15054_v30  ;;  %v9951_v61 = vand.u32 %v9940_v1, %v15315_v18  ;;  %v17442_v45 = vpop.permute.xlu1 %10091 }
 0x341   : > { %v7096_v26 = vpop.f32.mrf.mxu1  ;;  %11724 = vrot.lane.b32.xlu1 %v17140_v6, %s15111_s11  ;;  %s15114_s11 = smov 35  }
 0x342   : > { %v7144_v43 = vadd.f32 %v7096_v26, %v6997_v0  ;;  %v17435_v28 = vpop.permute.xlu0 %10097  ;;  %14697 = vmatmul.mubr.msk.bf16.vlgmr.msra.gmra.mxu0 %vm426_vm3, %v14086_v48  ;;  %v7135_v59 = vpop.f32.mrf.mxu0  ;;  %v14090_v0 = vld [vmem:[%s18543_s3 + $0xe4] sm:$0xf] }
 0x343   : > { %v7098_v52 = vpop.f32.mrf.mxu1  ;;  %9853 = vmatpush1.bf16.msra.mxu0 %v9789_v12  ;;  %v7145_v47 = vadd.f32 %v7135_v59, %v6998_v60  ;;  %9870 = vmatprep.mubr.bf16.mxu0 %v15041_v9 }
 0x344   : > { %11881 = vrot.lane.b32.xlu0 %v15226_v10, %s15112_s20  ;;  %v14602_v51 = vpop.f32.mrf.mxu0  ;;  %9976 = vmatprep.subr.bf16.mxu0 %v9951_v61  ;;  %v17460_v56 = vpop.permute.xlu1 %10099 }
 0x345   : > { %v7099_v48 = vpop.f32.mrf.mxu1  ;;  %11883 = vrot.lane.b32.xlu1 %v15228_v11, %s15112_s20  ;;  %v10107_v41 = vsel %vm10103_vm0, %v17435_v28, %v17460_v56 }
 0x346   : > { %v17457_v57 = vpop.permute.xlu0 %10101  ;;  %14091 = vmatmul.mubr.msk.bf16.vlgmr.msra.gmra.mxu1 %vm426_vm3, %v14090_v0  ;;  %v7138_v34 = vpop.f32.mrf.mxu0  ;;  %v14094_v48 = vld [vmem:[%s18543_s3 + $0xe8] sm:$0xf] }
 0x347   : > { %v7218_v58 = vpop.f32.mrf.mxu1  ;;  %14701 = vmatpush3.bf16.msra.mxu1 %v9795_v36  ;;  %14702 = vmatprep.mubr.msk.bf16.mxu1 %vm15055_vm4, %v15054_v30  ;;  %v10106_v34 = vsel %vm10103_vm0, %v17418_v5, %v17435_v28 }
 0x348   : > { %v7306_v60 = vadd.f32 %v7218_v58, %v7141_v22  ;;  %11879 = vrot.lane.b32.xlu0 %v15219_v7, %s15112_s20  ;;  %v14603_v14 = vpop.f32.mrf.mxu0  ;;  %10017 = vmatprep.subr.bf16.mxu1 %v9957_v63  ;;  %v10105_v22 = vsel %vm10103_vm0, %v17423_v42, %v17418_v5  ;;  %v17478_v12 = vpop.permute.xlu1 %10258  ;;  %v10119_v28 = vand.u32 %v10106_v34, %v15315_v18 }
 0x349   : > { %v7220_v17 = vpop.f32.mrf.mxu1  ;;  %11885 = vrot.lane.b32.xlu1 %v15242_v13, %s15112_s20  ;;  %v10116_v52 = vand.u32 %v10105_v22, %v15315_v18 }
 0x34a   : > { %v7307_v1 = vadd.f32 %v7220_v17, %v7142_v24  ;;  %v17473_v46 = vpop.permute.xlu0 %10260  ;;  %14092 = vmatmul.mubr.msk.bf16.vlgmr.msra.gmra.mxu0 %vm426_vm3, %v14090_v0  ;;  %v7259_v53 = vpop.f32.mrf.mxu0  ;;  %v9943_v24 = vsel %vm9938_vm15, %v17405_v54, %v17402_v8  ;;  %vm12194_vm15 = vcmask 293888  }
 0x34b   : > { %v7222_v20 = vpop.f32.mrf.mxu1  ;;  %9977 = vmatpush1.bf16.msra.mxu0 %v9948_v2  ;;  %v7308_v49 = vadd.f32 %v7259_v53, %v7143_v27  ;;  %9994 = vmatprep.mubr.bf16.mxu0 %v15041_v9  ;;  %v9960_v27 = vand.u32 %v9943_v24, %v15315_v18  ;;  %v10270_v14 = vsel %vm10268_vm1, %v17478_v12, %v17473_v46 }
 0x34c   : > { %11887 = vrot.lane.b32.xlu0 %v17260_v19, %s15112_s20  ;;  %v7261_v61 = vpop.f32.mrf.mxu0  ;;  %14706 = vmatprep.subr.bf16.mxu0 %v15054_v30  ;;  %v17497_v8 = vpop.permute.xlu1 %10256 }
 0x34d   : > { %v7223_v26 = vpop.f32.mrf.mxu1  ;;  %v7309_v36 = vadd.f32 %v7261_v61, %v7144_v43  ;;  %v10104_v43 = vsel %vm10103_vm0, %v17442_v45, %v17423_v42  ;;  %11889 = vrot.lane.b32.xlu1 %v17140_v6, %s15112_s20  ;;  %s15115_s20 = smov 34  }
 0x34e   : > { %v17493_v55 = vpop.permute.xlu0 %10262  ;;  %14703 = vmatmul.mubr.msk.bf16.vlgmr.msra.gmra.mxu1 %vm426_vm3, %v14090_v0  ;;  %v7263_v59 = vpop.f32.mrf.mxu0  ;;  %v10113_v42 = vand.u32 %v10104_v43, %v15315_v18  ;;  %v10108_v26 = vsel %vm10103_vm0, %v17460_v56, %v17457_v57  ;;  %v14098_v43 = vld [vmem:[%s18543_s3 + $0xec] sm:$0xf]  ;;  %vm12524_vm0 = vcmask 277504  }
 0x34f   : > { %v7300_v54 = vpop.f32.mrf.mxu1  ;;  %10018 = vmatpush1.bf16.msra.mxu1 %v9954_v4  ;;  %10035 = vmatprep.mubr.bf16.mxu1 %v15041_v9  ;;  %v10271_v34 = vsel %vm10268_vm1, %v17473_v46, %v17493_v55 }
 0x350   : > { %v7310_v50 = vadd.f32 %v7300_v54, %v7145_v47  ;;  %12044 = vrot.lane.b32.xlu0 %v17140_v6, %s15063_s29  ;;  %v10122_v47 = vand.u32 %v10107_v41, %v15315_v18  ;;  %v7264_v51 = vpop.f32.mrf.mxu0  ;;  %10141 = vmatprep.subr.bf16.mxu1 %v10116_v52  ;;  %v17515_v58 = vpop.permute.xlu1 %10264  ;;  %s15113_s29 = smov 36   ;;  %v10281_v41 = vand.u32 %v10270_v14, %v15315_v18 }
 0x351   : > { %v14608_v0 = vpop.f32.mrf.mxu1  ;;  %12184 = vrot.lane.b32.xlu1 %v15226_v10, %s15113_s29  ;;  %v10272_v61 = vsel %vm10268_vm1, %v17493_v55, %v17515_v58  ;;  %v10284_v55 = vand.u32 %v10271_v34, %v15315_v18 }
 0x352   : > { %v17513_v63 = vpop.permute.xlu0 %10266  ;;  %14095 = vmatmul.mubr.msk.bf16.vlgmr.msra.gmra.mxu0 %vm426_vm3, %v14094_v48  ;;  %v7383_v45 = vpop.f32.mrf.mxu0 }
 0x353   : > { %v7303_v2 = vpop.f32.mrf.mxu1  ;;  %14707 = vmatpush3.bf16.msra.mxu0 %v9960_v27  ;;  %14708 = vmatprep.mubr.msk.bf16.mxu0 %vm15055_vm4, %v15054_v30  ;;  %v7471_v38 = vadd.f32 %v7383_v45, %v7306_v60  ;;  %v10125_v27 = vand.u32 %v10108_v26, %v15315_v18 }
 0x354   : > { %10182 = vmatprep.subr.bf16.mxu0 %v10122_v47  ;;  %v7385_v22 = vpop.f32.mrf.mxu0  ;;  %12186 = vrot.lane.b32.xlu0 %v15228_v11, %s15113_s29  ;;  %v17533_v53 = vpop.permute.xlu1 %10423 }
 0x355   : > { %v14609_v17 = vpop.f32.mrf.mxu1  ;;  %v7472_v4 = vadd.f32 %v7385_v22, %v7307_v1  ;;  %12182 = vrot.lane.b32.xlu1 %v15219_v7, %s15113_s29 }
 0x356   : > { %v17529_v20 = vpop.permute.xlu0 %10425  ;;  %14096 = vmatmul.mubr.msk.bf16.vlgmr.msra.gmra.mxu1 %vm426_vm3, %v14094_v48  ;;  %v7387_v60 = vpop.f32.mrf.mxu0 }
 0x357   : > { %v7424_v5 = vpop.f32.mrf.mxu1  ;;  %10142 = vmatpush1.bf16.msra.mxu1 %v10113_v42  ;;  %10159 = vmatprep.mubr.bf16.mxu1 %v15041_v9  ;;  %v10435_v14 = vsel %vm10433_vm2, %v17533_v53, %v17529_v20 }
 0x358   : > { %v7473_v24 = vadd.f32 %v7424_v5, %v7308_v49  ;;  %14712 = vmatprep.subr.bf16.mxu1 %v15054_v30  ;;  %v7388_v49 = vpop.f32.mrf.mxu0  ;;  %12188 = vrot.lane.b32.xlu0 %v15242_v13, %s15113_s29  ;;  %v17552_v57 = vpop.permute.xlu1 %10421 }
 0x359   : > { %v7426_v1 = vpop.f32.mrf.mxu1  ;;  %12190 = vrot.lane.b32.xlu1 %v17260_v19, %s15113_s29 }
 0x35a   : > { %v7474_v52 = vadd.f32 %v7426_v1, %v7309_v36  ;;  %v17548_v54 = vpop.permute.xlu0 %10427  ;;  %14709 = vmatmul.mubr.msk.bf16.vlgmr.msra.gmra.mxu0 %vm426_vm3, %v14094_v48  ;;  %v7465_v59 = vpop.f32.mrf.mxu0  ;;  %v10269_v36 = vsel %vm10268_vm1, %v17497_v8, %v17478_v12  ;;  %v10287_v48 = vand.u32 %v10272_v61, %v15315_v18 }
 0x35b   : > { %v7428_v56 = vpop.f32.mrf.mxu1  ;;  %10183 = vmatpush1.bf16.msra.mxu0 %v10119_v28  ;;  %10200 = vmatprep.mubr.bf16.mxu0 %v15041_v9  ;;  %v7475_v0 = vadd.f32 %v7465_v59, %v7310_v50  ;;  %v10278_v12 = vand.u32 %v10269_v36, %v15315_v18 }
 0x35c   : > { %10306 = vmatprep.subr.bf16.mxu0 %v10281_v41  ;;  %v14614_v51 = vpop.f32.mrf.mxu0  ;;  %12192 = vrot.lane.b32.xlu0 %v17140_v6, %s15113_s29  ;;  %v17570_v42 = vpop.permute.xlu1 %10429  ;;  %v10446_v41 = vand.u32 %v10435_v14, %v15315_v18  ;;  %s15117_s29 = smov 32  }
 0x35d   : > { %v7429_v47 = vpop.f32.mrf.mxu1  ;;  %12349 = vrot.lane.b32.xlu1 %v15226_v10, %s15114_s11  ;;  %v10437_v61 = vsel %vm10433_vm2, %v17548_v54, %v17570_v42 }
 0x35e   : > { %v17566_v2 = vpop.permute.xlu0 %10431  ;;  %14099 = vmatmul.mubr.msk.bf16.vlgmr.msra.gmra.mxu1 %vm426_vm3, %v14098_v43  ;;  %v7468_v8 = vpop.f32.mrf.mxu0  ;;  %v14102_v47 = vld [vmem:[%s18543_s3 + $0xf0] sm:$0xf] }
 0x35f   : > { %v7548_v45 = vpop.f32.mrf.mxu1  ;;  %14713 = vmatpush3.bf16.msra.mxu1 %v10125_v27  ;;  %14714 = vmatprep.mubr.msk.bf16.mxu1 %vm15055_vm4, %v15054_v30  ;;  %v10436_v8 = vsel %vm10433_vm2, %v17529_v20, %v17548_v54 }
 0x360   : > { %v7636_v50 = vadd.f32 %v7548_v45, %v7471_v38  ;;  %10347 = vmatprep.subr.bf16.mxu1 %v10287_v48  ;;  %v14615_v22 = vpop.f32.mrf.mxu0  ;;  %12351 = vrot.lane.b32.xlu0 %v15228_v11, %s15114_s11  ;;  %v17588_v28 = vpop.permute.xlu1 %10586  ;;  %v10449_v20 = vand.u32 %v10436_v8, %v15315_v18 }
 0x361   : > { %v7550_v17 = vpop.f32.mrf.mxu1  ;;  %12347 = vrot.lane.b32.xlu1 %v15219_v7, %s15114_s11 }
 0x362   : > { %v7637_v38 = vadd.f32 %v7550_v17, %v7472_v4  ;;  %v17584_v5 = vpop.permute.xlu0 %10726  ;;  %14100 = vmatmul.mubr.msk.bf16.vlgmr.msra.gmra.mxu0 %vm426_vm3, %v14098_v43  ;;  %v7589_v60 = vpop.f32.mrf.mxu0  ;;  %v10273_v4 = vsel %vm10268_vm1, %v17515_v58, %v17513_v63  ;;  %vm12689_vm1 = vcmask 269312  }
 0x363   : > { %v7552_v46 = vpop.f32.mrf.mxu1  ;;  %10307 = vmatpush1.bf16.msra.mxu0 %v10278_v12  ;;  %10324 = vmatprep.mubr.bf16.mxu0 %v15041_v9  ;;  %v7638_v26 = vadd.f32 %v7589_v60, %v7473_v24  ;;  %v10290_v27 = vand.u32 %v10273_v4, %v15315_v18  ;;  %v10438_v60 = vsel %vm10433_vm2, %v17570_v42, %v17566_v2 }
 0x364   : > { %14718 = vmatprep.subr.bf16.mxu0 %v15054_v30  ;;  %v7591_v49 = vpop.f32.mrf.mxu0  ;;  %12353 = vrot.lane.b32.xlu0 %v15242_v13, %s15114_s11  ;;  %v17607_v58 = vpop.permute.xlu1 %10728  ;;  %v10455_v2 = vand.u32 %v10438_v60, %v15315_v18 }
 0x365   : > { %v7553_v1 = vpop.f32.mrf.mxu1  ;;  %v7639_v63 = vadd.f32 %v7591_v49, %v7474_v52  ;;  %v10434_v52 = vsel %vm10433_vm2, %v17552_v57, %v17533_v53  ;;  %12355 = vrot.lane.b32.xlu1 %v17260_v19, %s15114_s11  ;;  %v14106_v49 = vld [vmem:[%s18543_s3 + $0xf4] sm:$0xf]  ;;  %vm12854_vm2 = vcmask 261120  }
 0x366   : > { %v17603_v56 = vpop.permute.xlu0 %10724  ;;  %14715 = vmatmul.mubr.msk.bf16.vlgmr.msra.gmra.mxu1 %vm426_vm3, %v14098_v43  ;;  %v7593_v59 = vpop.f32.mrf.mxu0  ;;  %v10452_v43 = vand.u32 %v10437_v61, %v15315_v18  ;;  %v10443_v53 = vand.u32 %v10434_v52, %v15315_v18 }
 0x367   : > { %v7630_v24 = vpop.f32.mrf.mxu1  ;;  %10348 = vmatpush1.bf16.msra.mxu1 %v10284_v55  ;;  %10365 = vmatprep.mubr.bf16.mxu1 %v15041_v9 }
 0x368   : > { %v7640_v36 = vadd.f32 %v7630_v24, %v7475_v0  ;;  %10471 = vmatprep.subr.bf16.mxu1 %v10446_v41  ;;  %v7594_v51 = vpop.f32.mrf.mxu0  ;;  %12357 = vrot.lane.b32.xlu0 %v17140_v6, %s15114_s11  ;;  %v17625_v45 = vpop.permute.xlu1 %10730  ;;  %s15118_s11 = smov 31  }
 0x369   : > { %v14620_v48 = vpop.f32.mrf.mxu1  ;;  %12514 = vrot.lane.b32.xlu1 %v15226_v10, %s15115_s20  ;;  %v10738_v51 = vsel %vm10736_vm7, %v17584_v5, %v17607_v58 }
 0x36a   : > { %v17621_v0 = vpop.permute.xlu0 %10732  ;;  %14103 = vmatmul.mubr.msk.bf16.vlgmr.msra.gmra.mxu0 %vm426_vm3, %v14102_v47  ;;  %v7713_v57 = vpop.f32.mrf.mxu0 }
 0x36b   : > { %v7633_v12 = vpop.f32.mrf.mxu1  ;;  %14719 = vmatpush3.bf16.msra.mxu0 %v10290_v27  ;;  %14720 = vmatprep.mubr.msk.bf16.mxu0 %vm15055_vm4, %v15054_v30  ;;  %v7801_v34 = vadd.f32 %v7713_v57, %v7636_v50 }
 0x36c   : > { %10512 = vmatprep.subr.bf16.mxu0 %v10452_v43  ;;  %v7715_v17 = vpop.f32.mrf.mxu0  ;;  %12516 = vrot.lane.b32.xlu0 %v15228_v11, %s15115_s20  ;;  %v17640_v46 = vpop.permute.xlu1 %10734 }
 0x36d   : > { %v14621_v6 = vpop.f32.mrf.mxu1  ;;  %v7802_v22 = vadd.f32 %v7715_v17, %v7637_v38  ;;  %12512 = vrot.lane.b32.xlu1 %v15219_v7, %s15115_s20 }
 0x36e   : > { %v17636_v14 = vpop.permute.xlu0 %10891  ;;  %14104 = vmatmul.mubr.msk.bf16.vlgmr.msra.gmra.mxu1 %vm426_vm3, %v14102_v47  ;;  %v7717_v54 = vpop.f32.mrf.mxu0 }
 0x36f   : > { %v7754_v55 = vpop.f32.mrf.mxu1  ;;  %10472 = vmatpush1.bf16.msra.mxu1 %v10443_v53  ;;  %10489 = vmatprep.mubr.bf16.mxu1 %v15041_v9 }
 0x370   : > { %v7803_v50 = vadd.f32 %v7754_v55, %v7638_v26  ;;  %14724 = vmatprep.subr.bf16.mxu1 %v15054_v30  ;;  %v7718_v4 = vpop.f32.mrf.mxu0  ;;  %12518 = vrot.lane.b32.xlu0 %v15242_v13, %s15115_s20  ;;  %v17655_v26 = vpop.permute.xlu1 %10893  ;;  %v10740_v55 = vsel %vm10736_vm7, %v17625_v45, %v17621_v0 }
 0x371   : > { %v7756_v38 = vpop.f32.mrf.mxu1  ;;  %12520 = vrot.lane.b32.xlu1 %v17260_v19, %s15115_s20 }
 0x372   : > { %v7804_v1 = vadd.f32 %v7756_v38, %v7639_v63  ;;  %v17651_v41 = vpop.permute.xlu0 %10889  ;;  %14721 = vmatmul.mubr.msk.bf16.vlgmr.msra.gmra.mxu0 %vm426_vm3, %v14102_v47  ;;  %v7795_v42 = vpop.f32.mrf.mxu0  ;;  %v17669_v47 = vld.sshfl [vmem:[%s16430_s15] sm:$0xff pattern:$0x76325410] }
 0x373   : > { %v7758_v61 = vpop.f32.mrf.mxu1  ;;  %10513 = vmatpush1.bf16.msra.mxu0 %v10449_v20  ;;  %10530 = vmatprep.mubr.bf16.mxu0 %v15041_v9  ;;  %v7805_v63 = vadd.f32 %v7795_v42, %v7640_v36 }
 0x374   : > { %10609 = vmatprep.subr.bf16.mxu0 %v15653_v33  ;;  %v14626_v27 = vpop.f32.mrf.mxu0  ;;  %12522 = vrot.lane.b32.xlu0 %v17669_v47, %s15115_s20  ;;  %v17673_v52 = vpop.permute.xlu1 %10895 }
 0x375   : > { %v7759_v24 = vpop.f32.mrf.mxu1  ;;  %12679 = vrot.lane.b32.xlu1 %v15226_v10, %s15116_s26  ;;  %v10739_v27 = vsel %vm10736_vm7, %v17607_v58, %v17625_v45 }
 0x376   : > { %v17666_v59 = vpop.permute.xlu0 %10897  ;;  %14107 = vmatmul.mubr.msk.bf16.vlgmr.msra.gmra.mxu1 %vm426_vm3, %v14106_v49  ;;  %v7798_v36 = vpop.f32.mrf.mxu0  ;;  %v10752_v45 = vand.u32 %v10739_v27, %v15315_v18 }
 0x377   : > { %v7878_v48 = vpop.f32.mrf.mxu1  ;;  %14725 = vmatpush3.bf16.msra.mxu1 %v10455_v2  ;;  %14726 = vmatprep.mubr.msk.bf16.mxu1 %vm15055_vm4, %v15054_v30  ;;  %v14110_v2 = vld [vmem:[%s18543_s3 + $0xf8] sm:$0xf] }
 0x378   : > { %v7966_v43 = vadd.f32 %v7878_v48, %v7801_v34  ;;  %10650 = vmatprep.subr.bf16.mxu1 %v15666_v37  ;;  %v14627_v12 = vpop.f32.mrf.mxu0  ;;  %12681 = vrot.lane.b32.xlu0 %v15228_v11, %s15116_s26  ;;  %v17688_v8 = vpop.permute.xlu1 %10899  ;;  %v10749_v37 = vand.u32 %v10738_v51, %v15315_v18 }
 0x379   : > { %v7880_v33 = vpop.f32.mrf.mxu1  ;;  %12677 = vrot.lane.b32.xlu1 %v15219_v7, %s15116_s26 }
 0x37a   : > { %v7967_v53 = vadd.f32 %v7880_v33, %v7802_v22  ;;  %v17684_v57 = vpop.permute.xlu0 %11056  ;;  %14108 = vmatmul.mubr.msk.bf16.vlgmr.msra.gmra.mxu0 %vm426_vm3, %v14106_v49  ;;  %v7919_v6 = vpop.f32.mrf.mxu0 }
 0x37b   : > { %v7882_v34 = vpop.f32.mrf.mxu1  ;;  %10610 = vmatpush1.bf16.msra.mxu0 %v15635_v25  ;;  %10627 = vmatprep.mubr.bf16.mxu0 %v15041_v9  ;;  %v7968_v17 = vadd.f32 %v7919_v6, %v7803_v50  ;;  %v10588_v25 = vsel %vm1898_vm13, %v15656_v35, %v17588_v28  ;;  %v10737_v35 = vsel %vm10736_vm7, %v17603_v56, %v17584_v5  ;;  %vm10901_vm13 = vcmask 482304  }
 0x37c   : > { %14730 = vmatprep.subr.bf16.mxu0 %v15054_v30  ;;  %v7921_v20 = vpop.f32.mrf.mxu0  ;;  %12683 = vrot.lane.b32.xlu0 %v15242_v13, %s15116_s26  ;;  %v17707_v60 = vpop.permute.xlu1 %11058  ;;  %v10755_v28 = vand.u32 %v10740_v55, %v15315_v18  ;;  %v10593_v42 = vand.u32 %v10588_v25, %v15315_v18  ;;  %v10746_v5 = vand.u32 %v10737_v35, %v15315_v18 }
 0x37d   : > { %v7883_v22 = vpop.f32.mrf.mxu1  ;;  %v7969_v50 = vadd.f32 %v7921_v20, %v7804_v1  ;;  %12685 = vrot.lane.b32.xlu1 %v17260_v19, %s15116_s26  ;;  %v10903_v33 = vsel %vm10901_vm13, %v17636_v14, %v17655_v26  ;;  %v10905_v20 = vsel %vm10901_vm13, %v17673_v52, %v17666_v59 }
 0x37e   : > { %v17700_v54 = vpop.permute.xlu0 %11054  ;;  %14727 = vmatmul.mubr.msk.bf16.vlgmr.msra.gmra.mxu1 %vm426_vm3, %v14106_v49  ;;  %v7923_v4 = vpop.f32.mrf.mxu0  ;;  %v10741_v22 = vsel %vm10736_vm7, %v17621_v0, %v17640_v46  ;;  %v10914_v55 = vand.u32 %v10903_v33, %v15315_v18  ;;  %vm13019_vm7 = vcmask 252928  }
 0x37f   : > { %v7960_v38 = vpop.f32.mrf.mxu1  ;;  %10651 = vmatpush1.bf16.msra.mxu1 %v15649_v32  ;;  %10668 = vmatprep.mubr.bf16.mxu1 %v15041_v9  ;;  %v10758_v4 = vand.u32 %v10741_v22, %v15315_v18 }
 0x380   : > { %v7970_v61 = vadd.f32 %v7960_v38, %v7805_v63  ;;  %10774 = vmatprep.subr.bf16.mxu1 %v10749_v37  ;;  %v7924_v32 = vpop.f32.mrf.mxu0  ;;  %12687 = vrot.lane.b32.xlu0 %v17669_v47, %s15116_s26  ;;  %v17726_v63 = vpop.permute.xlu1 %11060  ;;  %s13744_s26 = scalar_lea.sflag [#allocation3], %s319_s9 }
 0x381   : > { %v14632_v1 = vpop.f32.mrf.mxu1  ;;  %12844 = vrot.lane.b32.xlu1 %v15226_v10, %s15117_s29 }
 0x382   : > { %v17722_v49 = vpop.permute.xlu0 %11062  ;;  %14111 = vmatmul.mubr.msk.bf16.vlgmr.msra.gmra.mxu0 %vm426_vm3, %v14110_v2  ;;  %v8043_v56 = vpop.f32.mrf.mxu0  ;;  %v10920_v1 = vand.u32 %v10905_v20, %v15315_v18 }
 0x383   : > { %v7963_v24 = vpop.f32.mrf.mxu1  ;;  %14731 = vmatpush3.bf16.msra.mxu0 %v10593_v42  ;;  %14732 = vmatprep.mubr.msk.bf16.mxu0 %vm15055_vm4, %v15054_v30  ;;  %v8131_v48 = vadd.f32 %v8043_v56, %v7966_v43 }
 0x384   : > { %10815 = vmatprep.subr.bf16.mxu0 %v10755_v28  ;;  %v8045_v51 = vpop.f32.mrf.mxu0  ;;  %12846 = vrot.lane.b32.xlu0 %v15228_v11, %s15117_s29  ;;  %v17744_v6 = vpop.permute.xlu1 %11064  ;;  %v14114_v28 = vld [vmem:[%s18543_s3 + $0xfc] sm:$0xf] }
 0x385   : > { %v14633_v36 = vpop.f32.mrf.mxu1  ;;  %v8132_v34 = vadd.f32 %v8045_v51, %v7967_v53  ;;  %12842 = vrot.lane.b32.xlu1 %v15219_v7, %s15117_s29 }
 0x386   : > { %v17740_v12 = vpop.permute.xlu0 %11221  ;;  %14112 = vmatmul.mubr.msk.bf16.vlgmr.msra.gmra.mxu1 %vm426_vm3, %v14110_v2  ;;  %v8047_v43 = vpop.f32.mrf.mxu0  ;;  %v11068_v36 = vsel %vm11066_vm8, %v17684_v57, %v17707_v60 }
 0x387   : > { %v8084_v58 = vpop.f32.mrf.mxu1  ;;  %10775 = vmatpush1.bf16.msra.mxu1 %v10746_v5  ;;  %10792 = vmatprep.mubr.bf16.mxu1 %v15041_v9  ;;  %v11079_v43 = vand.u32 %v11068_v36, %v15315_v18 }
 0x388   : > { %v8133_v37 = vadd.f32 %v8084_v58, %v7968_v17  ;;  %14736 = vmatprep.subr.bf16.mxu1 %v15054_v30  ;;  %v8048_v17 = vpop.f32.mrf.mxu0  ;;  %12848 = vrot.lane.b32.xlu0 %v15242_v13, %s15117_s29  ;;  %v17763_v0 = vpop.permute.xlu1 %11223 }
 0x389   : > { %v8086_v53 = vpop.f32.mrf.mxu1  ;;  %12850 = vrot.lane.b32.xlu1 %v17260_v19, %s15117_s29  ;;  %v10904_v19 = vsel %vm10901_vm13, %v17655_v26, %v17673_v52  ;;  %v11233_v36 = vsel %vm11231_vm10, %v17740_v12, %v17763_v0 }
 0x38a   : > { %v8134_v25 = vadd.f32 %v8086_v53, %v7969_v50  ;;  %v17759_v38 = vpop.permute.xlu0 %11219  ;;  %14733 = vmatmul.mubr.msk.bf16.vlgmr.msra.gmra.mxu0 %vm426_vm3, %v14110_v2  ;;  %v8125_v35 = vpop.f32.mrf.mxu0  ;;  %v10902_v50 = vsel %vm10901_vm13, %v17651_v41, %v17636_v14  ;;  %v10917_v52 = vand.u32 %v10904_v19, %v15315_v18  ;;  %v11070_v53 = vsel %vm11066_vm8, %v17726_v63, %v17722_v49 }
 0x38b   : > { %v8088_v46 = vpop.f32.mrf.mxu1  ;;  %10816 = vmatpush1.bf16.msra.mxu0 %v10752_v45  ;;  %10833 = vmatprep.mubr.bf16.mxu0 %v15041_v9  ;;  %v8135_v42 = vadd.f32 %v8125_v35, %v7970_v61  ;;  %v10911_v14 = vand.u32 %v10902_v50, %v15315_v18  ;;  %v14118_v50 = vld [vmem:[%s18543_s3 + $0x100] sm:$0xf] }
 0x38c   : > { %10939 = vmatprep.subr.bf16.mxu0 %v10914_v55  ;;  %v14638_v32 = vpop.f32.mrf.mxu0  ;;  %12852 = vrot.lane.b32.xlu0 %v17669_v47, %s15117_s29  ;;  %v17781_v5 = vpop.permute.xlu1 %11225 }
 0x38d   : > { %v8089_v2 = vpop.f32.mrf.mxu1  ;;  %13009 = vrot.lane.b32.xlu1 %v15226_v10, %s15118_s11 }
 0x38e   : > { %v17777_v24 = vpop.permute.xlu0 %11227  ;;  %14115 = vmatmul.mubr.msk.bf16.vlgmr.msra.gmra.mxu1 %vm426_vm3, %v14114_v28  ;;  %v8128_v41 = vpop.f32.mrf.mxu0  ;;  %v17831_v2 = vld.sshfl [vmem:[%s15216_s14 + $0x8] sm:$0x3 pattern:$0x76325410]  ;;  %s15119_s14 = smov 30  }
 0x38f   : > { %v8208_v56 = vpop.f32.mrf.mxu1  ;;  %14737 = vmatpush3.bf16.msra.mxu1 %v10758_v4  ;;  %14738 = vmatprep.mubr.msk.bf16.mxu1 %vm15055_vm4, %v15054_v30  ;;  %v11069_v41 = vsel %vm11066_vm8, %v17707_v60, %v17726_v63 }
 0x390   : > { %v8296_v61 = vadd.f32 %v8208_v56, %v8131_v48  ;;  %10980 = vmatprep.subr.bf16.mxu1 %v10920_v1  ;;  %v14639_v33 = vpop.f32.mrf.mxu0  ;;  %13011 = vrot.lane.b32.xlu0 %v15228_v11, %s15118_s11  ;;  %v17799_v58 = vpop.permute.xlu1 %11229  ;;  %v11085_v1 = vand.u32 %v11070_v53, %v15315_v18  ;;  %v11082_v63 = vand.u32 %v11069_v41, %v15315_v18 }
 0x391   : > { %v8210_v27 = vpop.f32.mrf.mxu1  ;;  %13007 = vrot.lane.b32.xlu1 %v15219_v7, %s15118_s11  ;;  %v11235_v53 = vsel %vm11231_vm10, %v17781_v5, %v17777_v24  ;;  %v11234_v41 = vsel %vm11231_vm10, %v17763_v0, %v17781_v5 }
 0x392   : > { %v8297_v48 = vadd.f32 %v8210_v27, %v8132_v34  ;;  %v17795_v51 = vpop.permute.xlu0 %11386  ;;  %14116 = vmatmul.mubr.msk.bf16.vlgmr.msra.gmra.mxu0 %vm426_vm3, %v14114_v28  ;;  %v8249_v45 = vpop.f32.mrf.mxu0  ;;  %v10906_v34 = vsel %vm10901_vm13, %v17666_v59, %v17688_v8  ;;  %vm13184_vm13 = vcmask 244736  }
 0x393   : > { %v8212_v26 = vpop.f32.mrf.mxu1  ;;  %10940 = vmatpush1.bf16.msra.mxu0 %v10911_v14  ;;  %10957 = vmatprep.mubr.bf16.mxu0 %v15041_v9  ;;  %v8298_v22 = vadd.f32 %v8249_v45, %v8133_v37  ;;  %v10923_v46 = vand.u32 %v10906_v34, %v15315_v18 }
 0x394   : > { %14742 = vmatprep.subr.bf16.mxu0 %v15054_v30  ;;  %v8251_v20 = vpop.f32.mrf.mxu0  ;;  %13013 = vrot.lane.b32.xlu0 %v15242_v13, %s15118_s11  ;;  %v17818_v8 = vpop.permute.xlu1 %11388 }
 0x395   : > { %v8213_v55 = vpop.f32.mrf.mxu1  ;;  %v8299_v59 = vadd.f32 %v8251_v20, %v8134_v25  ;;  %v11067_v25 = vsel %vm11066_vm8, %v17700_v54, %v17684_v57  ;;  %13015 = vrot.lane.b32.xlu1 %v17831_v2, %s15118_s11 }
 0x396   : > { %v17814_v17 = vpop.permute.xlu0 %11384  ;;  %14739 = vmatmul.mubr.msk.bf16.vlgmr.msra.gmra.mxu1 %vm426_vm3, %v14114_v28  ;;  %v8253_v4 = vpop.f32.mrf.mxu0  ;;  %v11076_v57 = vand.u32 %v11067_v25, %v15315_v18  ;;  %v11244_v55 = vand.u32 %v11233_v36, %v15315_v18  ;;  %v14122_v25 = vld [vmem:[%s18543_s3 + $0x104] sm:$0xf]  ;;  %v11398_v36 = vsel %vm11396_vm11, %v17795_v51, %v17818_v8 }
 0x397   : > { %v8290_v37 = vpop.f32.mrf.mxu1  ;;  %10981 = vmatpush1.bf16.msra.mxu1 %v10917_v52  ;;  %10998 = vmatprep.mubr.bf16.mxu1 %v15041_v9 }
 0x398   : > { %v8300_v35 = vadd.f32 %v8290_v37, %v8135_v42  ;;  %11104 = vmatprep.subr.bf16.mxu1 %v11079_v43  ;;  %v8254_v42 = vpop.f32.mrf.mxu0  ;;  %13017 = vrot.lane.b32.xlu0 %v17669_v47, %s15118_s11  ;;  %v17839_v56 = vpop.permute.xlu1 %11390  ;;  %v11071_v43 = vsel %vm11066_vm8, %v17722_v49, %v17744_v6  ;;  %vm13349_vm8 = vcmask 236544   ;;  %s14844_s11 = smul.u32 20, %s319_s9 }
 0x399   : > { %v14644_v28 = vpop.f32.mrf.mxu1  ;;  %13174 = vrot.lane.b32.xlu1 %v15226_v10, %s15119_s14 }
 0x39a   : > { %v17835_v32 = vpop.permute.xlu0 %11392  ;;  %14119 = vmatmul.mubr.msk.bf16.vlgmr.msra.gmra.mxu0 %vm426_vm3, %v14118_v50  ;;  %v8373_v54 = vpop.f32.mrf.mxu0  ;;  %s321_s12 = scalar_lea.vmem [#allocation2], %s14844_s11 }
 0x39b   : > { %v8293_v14 = vpop.f32.mrf.mxu1  ;;  %14743 = vmatpush3.bf16.msra.mxu0 %v10923_v46  ;;  %14744 = vmatprep.mubr.msk.bf16.mxu0 %vm15055_vm4, %v15054_v30  ;;  %v8461_v19 = vadd.f32 %v8373_v54, %v8296_v61  ;;  %v11088_v46 = vand.u32 %v11071_v43, %v15315_v18 }
 0x39c   : > { %11145 = vmatprep.subr.bf16.mxu0 %v11085_v1  ;;  %v8375_v33 = vpop.f32.mrf.mxu0  ;;  %13176 = vrot.lane.b32.xlu0 %v15228_v11, %s15119_s14  ;;  %v17857_v45 = vpop.permute.xlu1 %11394  ;;  %v11250_v1 = vand.u32 %v11235_v53, %v15315_v18 }
 0x39d   : > { %v14645_v27 = vpop.f32.mrf.mxu1  ;;  %v8462_v52 = vadd.f32 %v8375_v33, %v8297_v48  ;;  %13172 = vrot.lane.b32.xlu1 %v15219_v7, %s15119_s14 }
 0x39e   : > { %v17853_v26 = vpop.permute.xlu0 %11551  ;;  %14120 = vmatmul.mubr.msk.bf16.vlgmr.msra.gmra.mxu1 %vm426_vm3, %v14118_v50  ;;  %v8377_v61 = vpop.f32.mrf.mxu0 }
 0x39f   : > { %v8414_v60 = vpop.f32.mrf.mxu1  ;;  %11105 = vmatpush1.bf16.msra.mxu1 %v11076_v57  ;;  %11122 = vmatprep.mubr.bf16.mxu1 %v15041_v9  ;;  %v11409_v61 = vand.u32 %v11398_v36, %v15315_v18 }
 0x3a0   : > { %v8463_v34 = vadd.f32 %v8414_v60, %v8298_v22  ;;  %14748 = vmatprep.subr.bf16.mxu1 %v15054_v30  ;;  %v8378_v22 = vpop.f32.mrf.mxu0  ;;  %13178 = vrot.lane.b32.xlu0 %v15242_v13, %s15119_s14  ;;  %v17876_v49 = vpop.permute.xlu1 %11553 }
 0x3a1   : > { %v8416_v48 = vpop.f32.mrf.mxu1  ;;  %13180 = vrot.lane.b32.xlu1 %v17831_v2, %s15119_s14 }
 0x3a2   : > { %v8464_v20 = vadd.f32 %v8416_v48, %v8299_v59  ;;  %v17872_v37 = vpop.permute.xlu0 %11549  ;;  %14745 = vmatmul.mubr.msk.bf16.vlgmr.msra.gmra.mxu0 %vm426_vm3, %v14118_v50  ;;  %v8455_v4 = vpop.f32.mrf.mxu0  ;;  %v11232_v59 = vsel %vm11231_vm10, %v17759_v38, %v17740_v12 }
 0x3a3   : > { %v8418_v6 = vpop.f32.mrf.mxu1  ;;  %11146 = vmatpush1.bf16.msra.mxu0 %v11082_v63  ;;  %11163 = vmatprep.mubr.bf16.mxu0 %v15041_v9  ;;  %v8465_v28 = vadd.f32 %v8455_v4, %v8300_v35  ;;  %v11241_v12 = vand.u32 %v11232_v59, %v15315_v18 }
 0x3a4   : > { %11269 = vmatprep.subr.bf16.mxu0 %v11244_v55  ;;  %v14650_v42 = vpop.f32.mrf.mxu0  ;;  %13182 = vrot.lane.b32.xlu0 %v17669_v47, %s15119_s14  ;;  %v17894_v57 = vpop.permute.xlu1 %11555  ;;  %v11400_v55 = vsel %vm11396_vm11, %v17839_v56, %v17835_v32  ;;  %s13758_s14 = sshll.u32 %s321_s12, 4  ;;  %s13759_s14 = int_to_ptr.vmem [resolvable:$true] %s13758_s14 }
 0x3a5   : > { %v8419_v50 = vpop.f32.mrf.mxu1  ;;  %13339 = vrot.lane.b32.xlu1 %v15226_v10, %s15120_s16  ;;  %v11247_v10 = vand.u32 %v11234_v41, %v15315_v18  ;;  %s14978_s15 = scalar_lea.vmem %s13759_s14, 320 }
 0x3a6   : > { %v17890_v14 = vpop.permute.xlu0 %11557  ;;  %14123 = vmatmul.mubr.msk.bf16.vlgmr.msra.gmra.mxu1 %vm426_vm3, %v14122_v25  ;;  %v8458_v38 = vpop.f32.mrf.mxu0  ;;  %p14979_p1 = scmp.ne.s32.totalorder %s13759_s14, %s14978_s15 }
 0x3a7   : > { %v8538_v54 = vpop.f32.mrf.mxu1  ;;  %14749 = vmatpush3.bf16.msra.mxu1 %v11088_v46  ;;  %14750 = vmatprep.mubr.msk.bf16.mxu1 %vm15055_vm4, %v15054_v30  ;;  %v14126_v46 = vld [vmem:[%s18543_s3 + $0x108] sm:$0xf] }
 0x3a8   : > { %v8626_v35 = vadd.f32 %v8538_v54, %v8461_v19  ;;  %11310 = vmatprep.subr.bf16.mxu1 %v11250_v1  ;;  %v14651_v33 = vpop.f32.mrf.mxu0  ;;  %13341 = vrot.lane.b32.xlu0 %v15228_v11, %s15120_s16  ;;  %v17912_v63 = vpop.permute.xlu1 %11559  ;;  %v11563_v54 = vsel %vm11561_vm5, %v17853_v26, %v17876_v49  ;;  %p14980_p2 = pnand %p14979_p1, %p15195_p5 }
 0x3a9   : > { %v8540_v27 = vpop.f32.mrf.mxu1  ;;  %13337 = vrot.lane.b32.xlu1 %v15219_v7, %s15120_s16  ;;  %v11574_v33 = vand.u32 %v11563_v54, %v15315_v18 }
 0x3aa   : > { %v8627_v19 = vadd.f32 %v8540_v27, %v8462_v52  ;;  %v17908_v60 = vpop.permute.xlu0 %11716  ;;  %14124 = vmatmul.mubr.msk.bf16.vlgmr.msra.gmra.mxu0 %vm426_vm3, %v14122_v25  ;;  %v8579_v5 = vpop.f32.mrf.mxu0  ;;  %v11236_v52 = vsel %vm11231_vm10, %v17777_v24, %v17799_v58  ;;  %p14981_p3 = pneg %p14980_p2 }
 0x3ab   : > { %v8542_v0 = vpop.f32.mrf.mxu1  ;;  %11270 = vmatpush1.bf16.msra.mxu0 %v11241_v12  ;;  %11287 = vmatprep.mubr.bf16.mxu0 %v15041_v9  ;;  %v8628_v43 = vadd.f32 %v8579_v5, %v8463_v34  ;;  %v11253_v7 = vand.u32 %v11236_v52, %v15315_v18 }
 0x3ac   : > { %14754 = vmatprep.subr.bf16.mxu0 %v15054_v30  ;;  %v8581_v48 = vpop.f32.mrf.mxu0  ;;  %13343 = vrot.lane.b32.xlu0 %v15242_v13, %s15120_s16  ;;  %v17931_v58 = vpop.permute.xlu1 %11718  ;;  %v11397_v13 = vsel %vm11396_vm11, %v17814_v17, %v17795_v51 }
 0x3ad   : > { %v8543_v11 = vpop.f32.mrf.mxu1  ;;  %v8629_v24 = vadd.f32 %v8581_v48, %v8464_v20  ;;  %v11415_v20 = vand.u32 %v11400_v55, %v15315_v18  ;;  %13345 = vrot.lane.b32.xlu1 %v17831_v2, %s15120_s16  ;;  %v11406_v51 = vand.u32 %v11397_v13, %v15315_v18  ;;  %v11399_v2 = vsel %vm11396_vm11, %v17818_v8, %v17839_v56 }
 0x3ae   : > { %v17927_v53 = vpop.permute.xlu0 %11714  ;;  %14751 = vmatmul.mubr.msk.bf16.vlgmr.msra.gmra.mxu1 %vm426_vm3, %v14122_v25  ;;  %v8583_v22 = vpop.f32.mrf.mxu0  ;;  %v11412_v8 = vand.u32 %v11399_v2, %v15315_v18  ;;  %v14130_v11 = vld [vmem:[%s18543_s3 + $0x10c] sm:$0xf]  ;;  %v11562_v55 = vsel %vm11561_vm5, %v17872_v37, %v17853_v26  ;;  %v11564_v26 = vsel %vm11561_vm5, %v17876_v49, %v17894_v57  ;;  %v11566_v49 = vsel %vm11561_vm5, %v17890_v14, %v17912_v63 }
 0x3af   : > { %v8620_v34 = vpop.f32.mrf.mxu1  ;;  %11311 = vmatpush1.bf16.msra.mxu1 %v11247_v10  ;;  %11328 = vmatprep.mubr.bf16.mxu1 %v15041_v9 }
 0x3b0   : > { %v8630_v6 = vadd.f32 %v8620_v34, %v8465_v28  ;;  %11434 = vmatprep.subr.bf16.mxu1 %v11409_v61  ;;  %v8584_v25 = vpop.f32.mrf.mxu0  ;;  %13347 = vrot.lane.b32.xlu0 %v17669_v47, %s15120_s16  ;;  %v17949_v1 = vpop.permute.xlu1 %11720  ;;  %s13756_s16 = scalar_lea.hbm %s18546_s6, %s14195_s13 }
 0x3b1   : > { %v14656_v4 = vpop.f32.mrf.mxu1  ;;  %13502 = vrot.lane.b32.xlu1 %v17669_v47, %s15072_s28  ;;  %v11401_v47 = vsel %vm11396_vm11, %v17835_v32, %v17857_v45  ;;  %s14982_s28 = sshll.u32 %s15121_s25, 4  ;;  %s14983_s28 = int_to_ptr.vmem [resolvable:$false] %s14982_s28 }
 0x3b2   : > { %v17945_v59 = vpop.permute.xlu0 %11722  ;;  %14127 = vmatmul.mubr.msk.bf16.vlgmr.msra.gmra.mxu0 %vm426_vm3, %v14126_v46  ;;  %v8703_v17 = vpop.f32.mrf.mxu0  ;;  %v11418_v32 = vand.u32 %v11401_v47, %v15315_v18  ;;  %s14984_s18 = scalar_lea.vmem %s14983_s28, 640  ;;  %p14985_p4 = scmp.lt.s32.totalorder %s13759_s14, %s14983_s28 }
 0x3b3   : > { %v8623_v28 = vpop.f32.mrf.mxu1  ;;  %14755 = vmatpush3.bf16.msra.mxu0 %v11253_v7  ;;  %14756 = vmatprep.mubr.msk.bf16.mxu0 %vm15055_vm4, %v15054_v30  ;;  %v8791_v50 = vadd.f32 %v8703_v17, %v8626_v35  ;;  %p14986_p7 = scmp.lt.s32.totalorder %s14984_s18, %s14978_s15 }
 0x3b4   : > { %11475 = vmatprep.subr.bf16.mxu0 %v11415_v20  ;;  %v8705_v12 = vpop.f32.mrf.mxu0  ;;  %v17965_v27 = vpop.permute.xlu1 %11724  ;;  %v11571_v20 = vand.u32 %v11562_v55, %v15315_v18 }
 0x3b5   : > { %v14657_v42 = vpop.f32.mrf.mxu1  ;;  %v8792_v41 = vadd.f32 %v8705_v12, %v8627_v19  ;;  %v11565_v19 = vsel %vm11561_vm5, %v17894_v57, %v17890_v14  ;;  %p14987_p8 = por %p14986_p7, %p14985_p4 }
 0x3b6   : > { %v17963_v38 = vpop.permute.xlu0 %11881  ;;  %14128 = vmatmul.mubr.msk.bf16.vlgmr.msra.gmra.mxu1 %vm426_vm3, %v14126_v46  ;;  %v8707_v56 = vpop.f32.mrf.mxu0  ;;  %v11580_v48 = vand.u32 %v11565_v19, %v15315_v18 }
 0x3b7   : > { %v8744_v36 = vpop.f32.mrf.mxu1  ;;  %11435 = vmatpush1.bf16.msra.mxu1 %v11406_v51  ;;  %11452 = vmatprep.mubr.bf16.mxu1 %v15041_v9  ;;  %p14988_p9 = pnand %p14987_p8, %p14981_p3 }
 0x3b8   : > { %v8793_v35 = vadd.f32 %v8744_v36, %v8628_v43  ;;  %14760 = vmatprep.subr.bf16.mxu1 %v15054_v30  ;;  %v8708_v10 = vpop.f32.mrf.mxu0  ;;  %v17980_v61 = vpop.permute.xlu1 %11883  ;;  %v11730_v36 = vsel %vm11726_vm12, %v17949_v1, %v17945_v59 }
 0x3b9   : > { %v8746_v0 = vpop.f32.mrf.mxu1  ;;  %v11727_v10 = vsel %vm11726_vm12, %v17927_v53, %v17908_v60 }
 0x3ba   : > { %v8794_v5 = vadd.f32 %v8746_v0, %v8629_v24  ;;  %v17978_v52 = vpop.permute.xlu0 %11879  ;;  %14757 = vmatmul.mubr.msk.bf16.vlgmr.msra.gmra.mxu0 %vm426_vm3, %v14126_v46  ;;  %v8785_v45 = vpop.f32.mrf.mxu0  ;;  %v11583_v0 = vand.u32 %v11566_v49, %v15315_v18  ;;  %v11736_v55 = vand.u32 %v11727_v10, %v15315_v18 }
 0x3bb   : > { %v8748_v43 = vpop.f32.mrf.mxu1  ;;  %11476 = vmatpush1.bf16.msra.mxu0 %v11412_v8  ;;  %11493 = vmatprep.mubr.bf16.mxu0 %v15041_v9  ;;  %v8795_v24 = vadd.f32 %v8785_v45, %v8630_v6  ;;  %v11728_v6 = vsel %vm11726_vm12, %v17908_v60, %v17931_v58  ;;  %v11729_v60 = vsel %vm11726_vm12, %v17931_v58, %v17949_v1 }
 0x3bc   : > { %11599 = vmatprep.subr.bf16.mxu0 %v11574_v33  ;;  %v14662_v7 = vpop.f32.mrf.mxu0  ;;  %v17994_v46 = vpop.permute.xlu1 %11885  ;;  %v11739_v57 = vand.u32 %v11728_v6, %v15315_v18  ;;  %v11731_v1 = vsel %vm11726_vm12, %v17945_v59, %v17965_v27  ;;  %v14138_v59 = vld [vmem:[%s18543_s3 + $0x114] sm:$0xf] }
 0x3bd   : > { %v8749_v34 = vpop.f32.mrf.mxu1  ;;  %v11893_v7 = vsel %vm11891_vm14, %v17963_v38, %v17980_v61 }
 0x3be   : > { %v17992_v22 = vpop.permute.xlu0 %11887  ;;  %14131 = vmatmul.mubr.msk.bf16.vlgmr.msra.gmra.mxu1 %vm426_vm3, %v14130_v11  ;;  %v8788_v4 = vpop.f32.mrf.mxu0 }
 0x3bf   : > { %v8868_v13 = vpop.f32.mrf.mxu1  ;;  %14761 = vmatpush3.bf16.msra.mxu1 %v11418_v32  ;;  %14762 = vmatprep.mubr.msk.bf16.mxu1 %vm15055_vm4, %v15054_v30 }
 0x3c0   : > { %v8956_v25 = vadd.f32 %v8868_v13, %v8791_v50  ;;  %11640 = vmatprep.subr.bf16.mxu1 %v11580_v48  ;;  %v14663_v28 = vpop.f32.mrf.mxu0  ;;  %v18006_v17 = vpop.permute.xlu1 %11889  ;;  %v11577_v50 = vand.u32 %v11564_v26, %v15315_v18 }
 0x3c1   : > { %v8870_v37 = vpop.f32.mrf.mxu1 }
 0x3c2   : > { %v8957_v51 = vadd.f32 %v8870_v37, %v8792_v41  ;;  %14132 = vmatmul.mubr.msk.bf16.vlgmr.msra.gmra.mxu0 %vm426_vm3, %v14130_v11  ;;  %v18010_v42 = vpop.permute.xlu0 %12044  ;;  %v8909_v54 = vpop.f32.mrf.mxu0  ;;  %v11742_v37 = vand.u32 %v11729_v60, %v15315_v18 }
 0x3c3   : > { %v8872_v2 = vpop.f32.mrf.mxu1  ;;  %11600 = vmatpush1.bf16.msra.mxu0 %v11571_v20  ;;  %11617 = vmatprep.mubr.bf16.mxu0 %v15041_v9  ;;  %v8958_v12 = vadd.f32 %v8909_v54, %v8793_v35  ;;  %v14134_v35 = vld [vmem:[%s18543_s3 + $0x110] sm:$0xf] }
 0x3c4   : > { %14766 = vmatprep.subr.bf16.mxu0 %v15054_v30  ;;  %v8911_v8 = vpop.f32.mrf.mxu0  ;;  %v18021_v47 = vpop.permute.xlu1 %12184  ;;  %v11895_v2 = vsel %vm11891_vm14, %v17994_v46, %v17992_v22 }
 0x3c5   : > { %v8873_v41 = vpop.f32.mrf.mxu1  ;;  %v8959_v56 = vadd.f32 %v8911_v8, %v8794_v5  ;;  %v11745_v5 = vand.u32 %v11730_v36, %v15315_v18  ;;  %v11892_v36 = vsel %vm11891_vm14, %v17978_v52, %v17963_v38  ;;  %v11910_v8 = vand.u32 %v11895_v2, %v15315_v18 }
 0x3c6   : > { %14763 = vmatmul.mubr.msk.bf16.vlgmr.msra.gmra.mxu1 %vm426_vm3, %v14130_v11  ;;  %v8913_v14 = vpop.f32.mrf.mxu0  ;;  %v18029_v19 = vpop.permute.xlu0 %12186  ;;  %v11901_v10 = vand.u32 %v11892_v36, %v15315_v18  ;;  %v11894_v52 = vsel %vm11891_vm14, %v17980_v61, %v17994_v46  ;;  %v11896_v61 = vsel %vm11891_vm14, %v17992_v22, %v18006_v17  ;;  %v14142_v22 = vld [vmem:[%s18543_s3 + $0x118] sm:$0xf] }
 0x3c7   : > { %v8950_v33 = vpop.f32.mrf.mxu1  ;;  %11641 = vmatpush1.bf16.msra.mxu1 %v11577_v50  ;;  %11658 = vmatprep.mubr.bf16.mxu1 %v15041_v9  ;;  %v11907_v60 = vand.u32 %v11894_v52, %v15315_v18 }
 0x3c8   : > { %v8960_v63 = vadd.f32 %v8950_v33, %v8795_v24  ;;  %11764 = vmatprep.subr.bf16.mxu1 %v11739_v57  ;;  %v8914_v32 = vpop.f32.mrf.mxu0  ;;  %v18035_v45 = vpop.permute.xlu1 %12182 }
 0x3c9   : > { %v14668_v43 = vpop.f32.mrf.mxu1 }
 0x3ca   : > { %14135 = vmatmul.mubr.msk.bf16.vlgmr.msra.gmra.mxu0 %vm426_vm3, %v14134_v35  ;;  %v9033_v48 = vpop.f32.mrf.mxu0  ;;  %v18041_v24 = vpop.permute.xlu0 %12188 }
 0x3cb   : > { %v8953_v11 = vpop.f32.mrf.mxu1  ;;  %14767 = vmatpush3.bf16.msra.mxu0 %v11583_v0  ;;  %14768 = vmatprep.mubr.msk.bf16.mxu0 %vm15055_vm4, %v15054_v30  ;;  %v9121_v53 = vadd.f32 %v9033_v48, %v8956_v25  ;;  %v11904_v25 = vand.u32 %v11893_v7, %v15315_v18 }
 0x3cc   : > { %11805 = vmatprep.subr.bf16.mxu0 %v11745_v5  ;;  %v9035_v13 = vpop.f32.mrf.mxu0  ;;  %v18049_v4 = vpop.permute.xlu1 %12190 }
 0x3cd   : > { %v14669_v34 = vpop.f32.mrf.mxu1  ;;  %v9122_v20 = vadd.f32 %v9035_v13, %v8957_v51  ;;  %v12198_v52 = vsel %vm12194_vm15, %v18041_v24, %v18049_v4 }
 0x3ce   : > { %14136 = vmatmul.mubr.msk.bf16.vlgmr.msra.gmra.mxu1 %vm426_vm3, %v14134_v35  ;;  %v9037_v6 = vpop.f32.mrf.mxu0  ;;  %v18054_v58 = vpop.permute.xlu0 %12192 }
 0x3cf   : > { %v9074_v26 = vpop.f32.mrf.mxu1  ;;  %11765 = vmatpush1.bf16.msra.mxu1 %v11736_v55  ;;  %11782 = vmatprep.mubr.bf16.mxu1 %v15041_v9  ;;  %v11913_v6 = vand.u32 %v11896_v61, %v15315_v18 }
 0x3d0   : > { %v9123_v28 = vadd.f32 %v9074_v26, %v8958_v12  ;;  %14772 = vmatprep.subr.bf16.mxu1 %v15054_v30  ;;  %v9038_v50 = vpop.f32.mrf.mxu0  ;;  %v18064_v49 = vpop.permute.xlu1 %12349  ;;  %v11748_v12 = vand.u32 %v11731_v1, %v15315_v18 }
 0x3d1   : > { %v9076_v51 = vpop.f32.mrf.mxu1 }
 0x3d2   : > { %v9124_v54 = vadd.f32 %v9076_v51, %v8959_v56  ;;  %14769 = vmatmul.mubr.msk.bf16.vlgmr.msra.gmra.mxu0 %vm426_vm3, %v14134_v35  ;;  %v9115_v41 = vpop.f32.mrf.mxu0  ;;  %v18072_v27 = vpop.permute.xlu0 %12351 }
 0x3d3   : > { %v9078_v57 = vpop.f32.mrf.mxu1  ;;  %11806 = vmatpush1.bf16.msra.mxu0 %v11742_v37  ;;  %11823 = vmatprep.mubr.bf16.mxu0 %v15041_v9  ;;  %v9125_v56 = vadd.f32 %v9115_v41, %v8960_v63 }
 0x3d4   : > { %11929 = vmatprep.subr.bf16.mxu0 %v11904_v25  ;;  %v14674_v0 = vpop.f32.mrf.mxu0  ;;  %v18078_v14 = vpop.permute.xlu1 %12347 }
 0x3d5   : > { %v9079_v33 = vpop.f32.mrf.mxu1 }
 0x3d6   : > { %14139 = vmatmul.mubr.msk.bf16.vlgmr.msra.gmra.mxu1 %vm426_vm3, %v14138_v59  ;;  %v9118_v5 = vpop.f32.mrf.mxu0  ;;  %v18084_v38 = vpop.permute.xlu0 %12353 }
 0x3d7   : > { %v9171_v35 = vpop.f32.mrf.mxu1  ;;  %14773 = vmatpush3.bf16.msra.mxu1 %v11748_v12  ;;  %14774 = vmatprep.mubr.msk.bf16.mxu1 %vm15055_vm4, %v15054_v30 }
 0x3d8   : > { %v9259_v43 = vadd.f32 %v9171_v35, %v9121_v53  ;;  %11970 = vmatprep.subr.bf16.mxu1 %v11910_v8  ;;  %v14675_v32 = vpop.f32.mrf.mxu0  ;;  %v18089_v55 = vpop.permute.xlu1 %12355 }
 0x3d9   : > { %v9173_v63 = vpop.f32.mrf.mxu1 }
 0x3da   : > { %v9260_v11 = vadd.f32 %v9173_v63, %v9122_v20  ;;  %14140 = vmatmul.mubr.msk.bf16.vlgmr.msra.gmra.mxu0 %vm426_vm3, %v14138_v59  ;;  %v9212_v53 = vpop.f32.mrf.mxu0  ;;  %v18094_v34 = vpop.permute.xlu0 %12357  ;;  %v12046_v63 = vsel %vm3383_vm9, %v15974_v39, %v18010_v42  ;;  %v12213_v42 = vand.u32 %v12198_v52, %v15315_v18  ;;  %vm12359_vm9 = vcmask 285696  }
 0x3db   : > { %v9175_v48 = vpop.f32.mrf.mxu1  ;;  %11930 = vmatpush1.bf16.msra.mxu0 %v11901_v10  ;;  %11947 = vmatprep.mubr.bf16.mxu0 %v15041_v9  ;;  %v9261_v46 = vadd.f32 %v9212_v53, %v9123_v28 }
 0x3dc   : > { %14778 = vmatprep.subr.bf16.mxu0 %v15054_v30  ;;  %v9214_v13 = vpop.f32.mrf.mxu0  ;;  %v18100_v26 = vpop.permute.xlu1 %12514  ;;  %v14146_v48 = vld [vmem:[%s18543_s3 + $0x11c] sm:$0xf] }
 0x3dd   : > { %v9176_v7 = vpop.f32.mrf.mxu1  ;;  %v9262_v20 = vadd.f32 %v9214_v13, %v9124_v54 }
 0x3de   : > { %14775 = vmatmul.mubr.msk.bf16.vlgmr.msra.gmra.mxu1 %vm426_vm3, %v14138_v59  ;;  %v9216_v1 = vpop.f32.mrf.mxu0  ;;  %v18108_v17 = vpop.permute.xlu0 %12516  ;;  %v12196_v59 = vsel %vm12194_vm15, %v18021_v47, %v18029_v19 }
 0x3df   : > { %v9253_v37 = vpop.f32.mrf.mxu1  ;;  %11971 = vmatpush1.bf16.msra.mxu1 %v11907_v60  ;;  %11988 = vmatprep.mubr.bf16.mxu1 %v15041_v9  ;;  %v12207_v10 = vand.u32 %v12196_v59, %v15315_v18  ;;  %v12195_v60 = vsel %vm12194_vm15, %v18035_v45, %v18021_v47 }
 0x3e0   : > { %v9263_v25 = vadd.f32 %v9253_v37, %v9125_v56  ;;  %12067 = vmatprep.subr.bf16.mxu1 %v15971_v31  ;;  %v9217_v51 = vpop.f32.mrf.mxu0  ;;  %v18111_v2 = vpop.permute.xlu1 %12512 }
 0x3e1   : > { %v14680_v28 = vpop.f32.mrf.mxu1 }
 0x3e2   : > { %14143 = vmatmul.mubr.msk.bf16.vlgmr.msra.gmra.mxu0 %vm426_vm3, %v14142_v22  ;;  %v9336_v54 = vpop.f32.mrf.mxu0  ;;  %v18116_v57 = vpop.permute.xlu0 %12518 }
 0x3e3   : > { %v9256_v50 = vpop.f32.mrf.mxu1  ;;  %14779 = vmatpush3.bf16.msra.mxu0 %v11913_v6  ;;  %14780 = vmatprep.mubr.msk.bf16.mxu0 %vm15055_vm4, %v15054_v30  ;;  %v9424_v12 = vadd.f32 %v9336_v54, %v9259_v43  ;;  %v12197_v6 = vsel %vm12194_vm15, %v18029_v19, %v18041_v24 }
 0x3e4   : > { %12108 = vmatprep.subr.bf16.mxu0 %v15984_v44  ;;  %v9338_v31 = vpop.f32.mrf.mxu0  ;;  %v18122_v8 = vpop.permute.xlu1 %12520  ;;  %v12210_v50 = vand.u32 %v12197_v6, %v15315_v18 }
 0x3e5   : > { %v14681_v41 = vpop.f32.mrf.mxu1  ;;  %v9425_v36 = vadd.f32 %v9338_v31, %v9260_v11 }
 0x3e6   : > { %14144 = vmatmul.mubr.msk.bf16.vlgmr.msra.gmra.mxu1 %vm426_vm3, %v14142_v22  ;;  %v9340_v33 = vpop.f32.mrf.mxu0  ;;  %v18127_v35 = vpop.permute.xlu0 %12522  ;;  %v12199_v41 = vsel %vm12194_vm15, %v18049_v4, %v18054_v58  ;;  %v14150_v4 = vld [vmem:[%s18543_s3 + $0x120] sm:$0xf]  ;;  %v12360_v58 = vsel %vm12359_vm9, %v18078_v14, %v18064_v49 }
 0x3e7   : > { %v9377_v56 = vpop.f32.mrf.mxu1  ;;  %12068 = vmatpush1.bf16.msra.mxu1 %v15953_v15  ;;  %12085 = vmatprep.mubr.bf16.mxu1 %v15041_v9 }
 0x3e8   : > { %v9426_v0 = vadd.f32 %v9377_v56, %v9261_v46  ;;  %14784 = vmatprep.subr.bf16.mxu1 %v15054_v30  ;;  %v9341_v5 = vpop.f32.mrf.mxu0  ;;  %v18137_v15 = vpop.permute.xlu1 %12679  ;;  %v12051_v46 = vand.u32 %v12046_v63, %v15315_v18 }
 0x3e9   : > { %v9379_v44 = vpop.f32.mrf.mxu1 }
 0x3ea   : > { %v9427_v43 = vadd.f32 %v9379_v44, %v9262_v20  ;;  %14781 = vmatmul.mubr.msk.bf16.vlgmr.msra.gmra.mxu0 %vm426_vm3, %v14142_v22  ;;  %v9418_v11 = vpop.f32.mrf.mxu0  ;;  %v18149_v61 = vpop.permute.xlu0 %12681  ;;  %v12204_v20 = vand.u32 %v12195_v60, %v15315_v18  ;;  %v12361_v22 = vsel %vm12359_vm9, %v18064_v49, %v18072_v27 }
 0x3eb   : > { %v9381_v32 = vpop.f32.mrf.mxu1  ;;  %12109 = vmatpush1.bf16.msra.mxu0 %v15967_v29  ;;  %12126 = vmatprep.mubr.bf16.mxu0 %v15041_v9  ;;  %v9428_v53 = vadd.f32 %v9418_v11, %v9263_v25  ;;  %v12372_v31 = vand.u32 %v12361_v22, %v15315_v18  ;;  %v12528_v22 = vsel %vm12524_vm0, %v18116_v57, %v18122_v8 }
 0x3ec   : > { %12232 = vmatprep.subr.bf16.mxu0 %v12207_v10  ;;  %v14686_v29 = vpop.f32.mrf.mxu0  ;;  %v18152_v7 = vpop.permute.xlu1 %12677 }
 0x3ed   : > { %v9382_v39 = vpop.f32.mrf.mxu1 }
 0x3ee   : > { %14147 = vmatmul.mubr.msk.bf16.vlgmr.msra.gmra.mxu1 %vm426_vm3, %v14146_v48  ;;  %v9421_v37 = vpop.f32.mrf.mxu0  ;;  %v18165_v51 = vpop.permute.xlu0 %12683 }
 0x3ef   : > { %v9501_v13 = vpop.f32.mrf.mxu1  ;;  %14785 = vmatpush3.bf16.msra.mxu1 %v12051_v46  ;;  %14786 = vmatprep.mubr.msk.bf16.mxu1 %vm15055_vm4, %v15054_v30 }
 0x3f0   : > { %v9589_v47 = vadd.f32 %v9501_v13, %v9424_v12  ;;  %12273 = vmatprep.subr.bf16.mxu1 %v12213_v42  ;;  %v14687_v1 = vpop.f32.mrf.mxu0  ;;  %v18169_v12 = vpop.permute.xlu1 %12685  ;;  %v12526_v42 = vsel %vm12524_vm0, %v18100_v26, %v18108_v17 }
 0x3f1   : > { %v9503_v45 = vpop.f32.mrf.mxu1  ;;  %v12537_v6 = vand.u32 %v12526_v42, %v15315_v18 }
 0x3f2   : > { %v9590_v25 = vadd.f32 %v9503_v45, %v9425_v36  ;;  %14148 = vmatmul.mubr.msk.bf16.vlgmr.msra.gmra.mxu0 %vm426_vm3, %v14146_v48  ;;  %v9542_v54 = vpop.f32.mrf.mxu0  ;;  %v12363_v36 = vsel %vm12359_vm9, %v18084_v38, %v18089_v55  ;;  %v18189_v52 = vpop.permute.xlu0 %12687  ;;  %v12364_v45 = vsel %vm12359_vm9, %v18089_v55, %v18094_v34  ;;  %v14154_v55 = vld [vmem:[%s18543_s3 + $0x124] sm:$0xf]  ;;  %v12525_v34 = vsel %vm12524_vm0, %v18111_v2, %v18100_v26 }
 0x3f3   : > { %v9505_v28 = vpop.f32.mrf.mxu1  ;;  %12233 = vmatpush1.bf16.msra.mxu0 %v12204_v20  ;;  %12250 = vmatprep.mubr.bf16.mxu0 %v15041_v9  ;;  %v9591_v19 = vadd.f32 %v9542_v54, %v9426_v0  ;;  %v12216_v0 = vand.u32 %v12199_v41, %v15315_v18  ;;  %v12543_v41 = vand.u32 %v12528_v22, %v15315_v18 }
 0x3f4   : > { %14790 = vmatprep.subr.bf16.mxu0 %v15054_v30  ;;  %v9544_v59 = vpop.f32.mrf.mxu0  ;;  %v18191_v32 = vpop.permute.xlu1 %12844  ;;  %v12527_v2 = vsel %vm12524_vm0, %v18108_v17, %v18116_v57 }
 0x3f5   : > { %v9506_v24 = vpop.f32.mrf.mxu1  ;;  %v9592_v56 = vadd.f32 %v9544_v59, %v9427_v43  ;;  %v12378_v43 = vand.u32 %v12363_v36, %v15315_v18 }
 0x3f6   : > { %14787 = vmatmul.mubr.msk.bf16.vlgmr.msra.gmra.mxu1 %vm426_vm3, %v14146_v48  ;;  %v9546_v44 = vpop.f32.mrf.mxu0  ;;  %v12369_v48 = vand.u32 %v12360_v58, %v15315_v18  ;;  %v18204_v13 = vpop.permute.xlu0 %12846  ;;  %v12691_v58 = vsel %vm12689_vm1, %v18137_v15, %v18149_v61 }
 0x3f7   : > { %v9583_v33 = vpop.f32.mrf.mxu1  ;;  %12274 = vmatpush1.bf16.msra.mxu1 %v12210_v50  ;;  %12291 = vmatprep.mubr.bf16.mxu1 %v15041_v9  ;;  %v12381_v50 = vand.u32 %v12364_v45, %v15315_v18 }
 0x3f8   : > { %v9593_v10 = vadd.f32 %v9583_v33, %v9428_v53  ;;  %12397 = vmatprep.subr.bf16.mxu1 %v12372_v31  ;;  %v9547_v63 = vpop.f32.mrf.mxu0  ;;  %v12362_v53 = vsel %vm12359_vm9, %v18072_v27, %v18084_v38  ;;  %v18208_v27 = vpop.permute.xlu1 %12842  ;;  %v12534_v33 = vand.u32 %v12525_v34, %v15315_v18 }
 0x3f9   : > { %v14692_v5 = vpop.f32.mrf.mxu1  ;;  %v12375_v20 = vand.u32 %v12362_v53, %v15315_v18  ;;  %v12540_v63 = vand.u32 %v12527_v2, %v15315_v18  ;;  %v12693_v53 = vsel %vm12689_vm1, %v18165_v51, %v18169_v12 }
 0x3fa   : > { %14151 = vmatmul.mubr.msk.bf16.vlgmr.msra.gmra.mxu0 %vm426_vm3, %v14150_v4  ;;  %v9666_v60 = vpop.f32.mrf.mxu0  ;;  %v18228_v31 = vpop.permute.xlu0 %12848 }
 0x3fb   : > { %v9586_v11 = vpop.f32.mrf.mxu1  ;;  %14791 = vmatpush3.bf16.msra.mxu0 %v12216_v0  ;;  %14792 = vmatprep.mubr.msk.bf16.mxu0 %vm15055_vm4, %v15054_v30  ;;  %v9754_v49 = vadd.f32 %v9666_v60, %v9589_v47  ;;  %v12529_v60 = vsel %vm12524_vm0, %v18122_v8, %v18127_v35  ;;  %v14158_v8 = vld [vmem:[%s18543_s3 + $0x128] sm:$0xf]  ;;  %v12690_v35 = vsel %vm12689_vm1, %v18152_v7, %v18137_v15 }
 0x3fc   : > { %12438 = vmatprep.subr.bf16.mxu0 %v12378_v43  ;;  %v9668_v39 = vpop.f32.mrf.mxu0  ;;  %v18230_v36 = vpop.permute.xlu1 %12850 }
 0x3fd   : > { %v14693_v14 = vpop.f32.mrf.mxu1  ;;  %v9755_v46 = vadd.f32 %v9668_v39, %v9590_v25 }
 0x3fe   : > { %14152 = vmatmul.mubr.msk.bf16.vlgmr.msra.gmra.mxu1 %vm426_vm3, %v14150_v4  ;;  %v9670_v37 = vpop.f32.mrf.mxu0  ;;  %v18243_v43 = vpop.permute.xlu0 %12852 }
 0x3ff   : > { %v9707_v29 = vpop.f32.mrf.mxu1  ;;  %12398 = vmatpush1.bf16.msra.mxu1 %v12369_v48  ;;  %12415 = vmatprep.mubr.bf16.mxu1 %v15041_v9 }
 0x400   : > { %v9756_v47 = vadd.f32 %v9707_v29, %v9591_v19  ;;  %14796 = vmatprep.subr.bf16.mxu1 %v15054_v30  ;;  %v9671_v1 = vpop.f32.mrf.mxu0  ;;  %v18247_v48 = vpop.permute.xlu1 %13009 }
 0x401   : > { %v9709_v38 = vpop.f32.mrf.mxu1 }
 0x402   : > { %v9757_v25 = vadd.f32 %v9709_v38, %v9592_v56  ;;  %14793 = vmatmul.mubr.msk.bf16.vlgmr.msra.gmra.mxu0 %vm426_vm3, %v14150_v4  ;;  %v9748_v54 = vpop.f32.mrf.mxu0  ;;  %v18267_v38 = vpop.permute.xlu0 %13011 }
 0x403   : > { %v9711_v28 = vpop.f32.mrf.mxu1  ;;  %12439 = vmatpush1.bf16.msra.mxu0 %v12375_v20  ;;  %12456 = vmatprep.mubr.bf16.mxu0 %v15041_v9  ;;  %v9758_v19 = vadd.f32 %v9748_v54, %v9593_v10  ;;  %v12856_v54 = vsel %vm12854_vm2, %v18191_v32, %v18204_v13 }
 0x404   : > { %12562 = vmatprep.subr.bf16.mxu0 %v12537_v6  ;;  %v14698_v59 = vpop.f32.mrf.mxu0  ;;  %v18269_v6 = vpop.permute.xlu1 %13007  ;;  %v12692_v28 = vsel %vm12689_vm1, %v18149_v61, %v18165_v51 }
 0x405   : > { %v9712_v24 = vpop.f32.mrf.mxu1 }
 0x406   : > { %14155 = vmatmul.mubr.msk.bf16.vlgmr.msra.gmra.mxu1 %vm426_vm3, %v14154_v55  ;;  %v9751_v0 = vpop.f32.mrf.mxu0  ;;  %v12705_v24 = vand.u32 %v12692_v28, %v15315_v18 }
 0x407   : > { %v9831_v56 = vpop.f32.mrf.mxu1  ;;  %14797 = vmatpush3.bf16.msra.mxu1 %v12381_v50  ;;  %14798 = vmatprep.mubr.msk.bf16.mxu1 %vm15055_vm4, %v15054_v30 }
 0x408   : > { %v9919_v44 = vadd.f32 %v9831_v56, %v9754_v49  ;;  %12603 = vmatprep.subr.bf16.mxu1 %v12543_v41  ;;  %v14699_v10 = vpop.f32.mrf.mxu0  ;;  %v12702_v49 = vand.u32 %v12691_v58, %v15315_v18  ;;  %v18286_v61 = vpop.permute.xlu1 %13015  ;;  %v12694_v56 = vsel %vm12689_vm1, %v18169_v12, %v18189_v52  ;;  %v14162_v12 = vld [vmem:[%s18543_s3 + $0x12c] sm:$0xf]  ;;  %v12855_v52 = vsel %vm12854_vm2, %v18208_v27, %v18191_v32 }
 0x409   : > { %v9833_v26 = vpop.f32.mrf.mxu1  ;;  %v12711_v10 = vand.u32 %v12694_v56, %v15315_v18  ;;  %v12857_v27 = vsel %vm12854_vm2, %v18204_v13, %v18228_v31 }
 0x40a   : > { %v9920_v4 = vadd.f32 %v9833_v26, %v9755_v46  ;;  %14156 = vmatmul.mubr.msk.bf16.vlgmr.msra.gmra.mxu0 %vm426_vm3, %v14154_v55  ;;  %v9872_v11 = vpop.f32.mrf.mxu0  ;;  %v12546_v46 = vand.u32 %v12529_v60, %v15315_v18  ;;  %v12858_v26 = vsel %vm12854_vm2, %v18228_v31, %v18230_v36 }
 0x40b   : > { %v9835_v5 = vpop.f32.mrf.mxu1  ;;  %12563 = vmatpush1.bf16.msra.mxu0 %v12534_v33  ;;  %12580 = vmatprep.mubr.bf16.mxu0 %v15041_v9  ;;  %v9921_v17 = vadd.f32 %v9872_v11, %v9756_v47  ;;  %v12708_v47 = vand.u32 %v12693_v53, %v15315_v18  ;;  %v12867_v33 = vand.u32 %v12856_v54, %v15315_v18 }
 0x40c   : > { %14802 = vmatprep.subr.bf16.mxu0 %v15054_v30  ;;  %v9874_v14 = vpop.f32.mrf.mxu0 }
 0x40d   : > { %v9836_v57 = vpop.f32.mrf.mxu1  ;;  %v9922_v39 = vadd.f32 %v9874_v14, %v9757_v25  ;;  %v12699_v25 = vand.u32 %v12690_v35, %v15315_v18  ;;  %v12870_v35 = vand.u32 %v12857_v27, %v15315_v18 }
 0x40e   : > { %14799 = vmatmul.mubr.msk.bf16.vlgmr.msra.gmra.mxu1 %vm426_vm3, %v14154_v55  ;;  %v9876_v29 = vpop.f32.mrf.mxu0  ;;  %v18308_v57 = vpop.permute.xlu1 %13174 }
 0x40f   : > { %v9913_v42 = vpop.f32.mrf.mxu1  ;;  %12604 = vmatpush1.bf16.msra.mxu1 %v12540_v63  ;;  %12621 = vmatprep.mubr.bf16.mxu1 %v15041_v9  ;;  %v12873_v63 = vand.u32 %v12858_v26, %v15315_v18  ;;  %v13638_v29 = vld [vmem:[%s18544_s4] sm:$0xff] }
 0x410   : > { %v9923_v20 = vadd.f32 %v9913_v42, %v9758_v19  ;;  %12727 = vmatprep.subr.bf16.mxu1 %v12702_v49  ;;  %v9877_v45 = vpop.f32.mrf.mxu0  ;;  %v18282_v19 = vpop.permute.xlu0 %13013  ;;  %v12864_v49 = vand.u32 %v12855_v52, %v15315_v18  ;;  %13641 = vperm.xlu0 %14965, %v13638_v29  }
 0x411   : > { %v14704_v37 = vpop.f32.mrf.mxu1  ;;  %v12859_v45 = vsel %vm12854_vm2, %v18230_v36, %v18243_v43  ;;  %v14166_v36 = vld [vmem:[%s18543_s3 + $0x130] sm:$0xf]  ;;  %v13020_v43 = vsel %vm13019_vm7, %v18269_v6, %v18247_v48 }
 0x412   : > { %14159 = vmatmul.mubr.msk.bf16.vlgmr.msra.gmra.mxu0 %vm426_vm3, %v14158_v8  ;;  %v9996_v22 = vpop.f32.mrf.mxu0  ;;  %v13173_v31 = vpop.permute.xlu1 %13172  ;;  %v12876_v28 = vand.u32 %v12859_v45, %v15315_v18  ;;  %v13029_v56 = vand.u32 %v13020_v43, %v15315_v18 }
 0x413   : > { %v9916_v1 = vpop.f32.mrf.mxu1  ;;  %14803 = vmatpush3.bf16.msra.mxu0 %v12546_v46  ;;  %14804 = vmatprep.mubr.msk.bf16.mxu0 %vm15055_vm4, %v15054_v30  ;;  %v10084_v15 = vadd.f32 %v9996_v22, %v9919_v44  ;;  %v13021_v46 = vsel %vm13019_vm7, %v18247_v48, %v18267_v38  ;;  %v13023_v22 = vsel %vm13019_vm7, %v18282_v19, %v18286_v61 }
 0x414   : > { %12768 = vmatprep.subr.bf16.mxu0 %v12708_v47  ;;  %v9998_v50 = vpop.f32.mrf.mxu0  ;;  %v18306_v11 = vpop.permute.xlu0 %13017  ;;  %v13032_v1 = vand.u32 %v13021_v46, %v15315_v18 }
 0x415   : > { %v14705_v7 = vpop.f32.mrf.mxu1  ;;  %v10085_v55 = vadd.f32 %v9998_v50, %v9920_v4 }
 0x416   : > { %14160 = vmatmul.mubr.msk.bf16.vlgmr.msra.gmra.mxu1 %vm426_vm3, %v14158_v8  ;;  %v10000_v41 = vpop.f32.mrf.mxu0 }
 0x417   : > { %v10037_v34 = vpop.f32.mrf.mxu1  ;;  %12728 = vmatpush1.bf16.msra.mxu1 %v12699_v25  ;;  %12745 = vmatprep.mubr.bf16.mxu1 %v15041_v9 }
 0x418   : > { %v10086_v59 = vadd.f32 %v10037_v34, %v9921_v17  ;;  %14808 = vmatprep.subr.bf16.mxu1 %v15054_v30  ;;  %v10001_v0 = vpop.f32.mrf.mxu0  ;;  %v13038_v34 = vand.u32 %v13023_v22, %v15315_v18 }
 0x419   : > { %v10039_v51 = vpop.f32.mrf.mxu1  ;;  %v13022_v0 = vsel %vm13019_vm7, %v18267_v38, %v18282_v19  ;;  %v13024_v19 = vsel %vm13019_vm7, %v18286_v61, %v18306_v11  ;;  %v14170_v61 = vld [vmem:[%s18543_s3 + $0x134] sm:$0xf]  ;;  %v13185_v11 = vsel %vm13184_vm13, %v13173_v31, %v18308_v57 }
 0x41a   : > { %v10087_v44 = vadd.f32 %v10039_v51, %v9922_v39  ;;  %14805 = vmatmul.mubr.msk.bf16.vlgmr.msra.gmra.mxu0 %vm426_vm3, %v14158_v8  ;;  %v10078_v4 = vpop.f32.mrf.mxu0  ;;  %v18324_v8 = vpop.permute.xlu0 %13176 }
 0x41b   : > { %v10041_v2 = vpop.f32.mrf.mxu1  ;;  %12769 = vmatpush1.bf16.msra.mxu0 %v12705_v24  ;;  %12786 = vmatprep.mubr.bf16.mxu0 %v15041_v9  ;;  %v10088_v58 = vadd.f32 %v10078_v4, %v9923_v20  ;;  %v13186_v26 = vsel %vm13184_vm13, %v18308_v57, %v18324_v8 }
 0x41c   : > { %12892 = vmatprep.subr.bf16.mxu0 %v12867_v33  ;;  %v14710_v17 = vpop.f32.mrf.mxu0 }
 0x41d   : > { %v10042_v5 = vpop.f32.mrf.mxu1 }
 0x41e   : > { %14163 = vmatmul.mubr.msk.bf16.vlgmr.msra.gmra.mxu1 %vm426_vm3, %v14162_v12  ;;  %v10081_v14 = vpop.f32.mrf.mxu0  ;;  %v13179_v24 = vpop.permute.xlu0 %13178 }
 0x41f   : > { %v10161_v60 = vpop.f32.mrf.mxu1  ;;  %14809 = vmatpush3.bf16.msra.mxu1 %v12711_v10  ;;  %14810 = vmatprep.mubr.msk.bf16.mxu1 %vm15055_vm4, %v15054_v30  ;;  %v13187_v31 = vsel %vm13184_vm13, %v18324_v8, %v13179_v24 }
 0x420   : > { %v10249_v53 = vadd.f32 %v10161_v60, %v10084_v15  ;;  %12933 = vmatprep.subr.bf16.mxu1 %v12873_v63  ;;  %v14711_v39 = vpop.f32.mrf.mxu0  ;;  %v13197_v63 = vand.u32 %v13186_v26, %v15315_v18 }
 0x421   : > { %v10163_v32 = vpop.f32.mrf.mxu1 }
 0x422   : > { %v10250_v42 = vadd.f32 %v10163_v32, %v10085_v55  ;;  %14164 = vmatmul.mubr.msk.bf16.vlgmr.msra.gmra.mxu0 %vm426_vm3, %v14162_v12  ;;  %v10202_v13 = vpop.f32.mrf.mxu0  ;;  %v13183_v4 = vpop.permute.xlu0 %13182 }
 0x423   : > { %v10165_v20 = vpop.f32.mrf.mxu1  ;;  %12893 = vmatpush1.bf16.msra.mxu0 %v12864_v49  ;;  %12910 = vmatprep.mubr.bf16.mxu0 %v15041_v9  ;;  %v10251_v37 = vadd.f32 %v10202_v13, %v10086_v59  ;;  %v18346_v59 = vpop.permute.xlu1 %13180  ;;  %v13194_v13 = vand.u32 %v13185_v11, %v15315_v18 }
 0x424   : > { %14814 = vmatprep.subr.bf16.mxu0 %v15054_v30  ;;  %v10204_v25 = vpop.f32.mrf.mxu0  ;;  %v13188_v49 = vsel %vm13184_vm13, %v13179_v24, %v18346_v59  ;;  %v13189_v8 = vsel %vm13184_vm13, %v18346_v59, %v13183_v4  ;;  %v14174_v59 = vld [vmem:[%s18543_s3 + $0x138] sm:$0xf] }
 0x425   : > { %v10166_v47 = vpop.f32.mrf.mxu1  ;;  %v10252_v15 = vadd.f32 %v10204_v25, %v10087_v44 }
 0x426   : > { %14811 = vmatmul.mubr.msk.bf16.vlgmr.msra.gmra.mxu1 %vm426_vm3, %v14162_v12  ;;  %v10206_v50 = vpop.f32.mrf.mxu0  ;;  %v13035_v12 = vand.u32 %v13022_v0, %v15315_v18  ;;  %v13342_v46 = vpop.permute.xlu0 %13341 }
 0x427   : > { %v10243_v7 = vpop.f32.mrf.mxu1  ;;  %12934 = vmatpush1.bf16.msra.mxu1 %v12870_v35  ;;  %12951 = vmatprep.mubr.bf16.mxu1 %v15041_v9  ;;  %v13340_v5 = vpop.permute.xlu1 %13339 }
 0x428   : > { %v10253_v54 = vadd.f32 %v10243_v7, %v10088_v58  ;;  %13057 = vmatprep.subr.bf16.mxu1 %v13032_v1  ;;  %v10207_v41 = vpop.f32.mrf.mxu0  ;;  %v13351_v25 = vsel %vm13349_vm8, %v13340_v5, %v13342_v46  ;;  %v13200_v7 = vand.u32 %v13187_v31, %v15315_v18 }
 0x429   : > { %v14716_v55 = vpop.f32.mrf.mxu1  ;;  %v13362_v43 = vand.u32 %v13351_v25, %v15315_v18 }
 0x42a   : > { %14167 = vmatmul.mubr.msk.bf16.vlgmr.msra.gmra.mxu0 %vm426_vm3, %v14166_v36  ;;  %v10326_v33 = vpop.f32.mrf.mxu0 }
 0x42b   : > { %v10246_v51 = vpop.f32.mrf.mxu1  ;;  %14815 = vmatpush3.bf16.msra.mxu0 %v12876_v28  ;;  %14816 = vmatprep.mubr.msk.bf16.mxu0 %vm15055_vm4, %v15054_v30  ;;  %v10414_v48 = vadd.f32 %v10326_v33, %v10249_v53  ;;  %v13041_v53 = vand.u32 %v13024_v19, %v15315_v18  ;;  %v13338_v20 = vpop.permute.xlu1 %13337 }
 0x42c   : > { %13098 = vmatprep.subr.bf16.mxu0 %v13038_v34  ;;  %v10328_v44 = vpop.f32.mrf.mxu0  ;;  %v13206_v51 = vand.u32 %v13189_v8, %v15315_v18 }
 0x42d   : > { %v14717_v6 = vpop.f32.mrf.mxu1  ;;  %v10415_v2 = vadd.f32 %v10328_v44, %v10250_v42  ;;  %v13203_v42 = vand.u32 %v13188_v49, %v15315_v18 }
 0x42e   : > { %14168 = vmatmul.mubr.msk.bf16.vlgmr.msra.gmra.mxu1 %vm426_vm3, %v14166_v36  ;;  %v10330_v52 = vpop.f32.mrf.mxu0 }
 0x42f   : > { %v10367_v10 = vpop.f32.mrf.mxu1  ;;  %13058 = vmatpush1.bf16.msra.mxu1 %v13029_v56  ;;  %13075 = vmatprep.mubr.bf16.mxu1 %v15041_v9  ;;  %v13346_v50 = vpop.permute.xlu1 %13345 }
 0x430   : > { %v10416_v58 = vadd.f32 %v10367_v10, %v10251_v37  ;;  %14820 = vmatprep.subr.bf16.mxu1 %v15054_v30  ;;  %v10331_v17 = vpop.f32.mrf.mxu0 }
 0x431   : > { %v10369_v38 = vpop.f32.mrf.mxu1 }
 0x432   : > { %v10417_v60 = vadd.f32 %v10369_v38, %v10252_v15  ;;  %14817 = vmatmul.mubr.msk.bf16.vlgmr.msra.gmra.mxu0 %vm426_vm3, %v14166_v36  ;;  %v10408_v32 = vpop.f32.mrf.mxu0  ;;  %v13344_v15 = vpop.permute.xlu0 %13343 }
 0x433   : > { %v10371_v14 = vpop.f32.mrf.mxu1  ;;  %13099 = vmatpush1.bf16.msra.mxu0 %v13035_v12  ;;  %13116 = vmatprep.mubr.bf16.mxu0 %v15041_v9  ;;  %v10418_v27 = vadd.f32 %v10408_v32, %v10253_v54  ;;  %v13353_v34 = vsel %vm13349_vm8, %v13344_v15, %v13346_v50  ;;  %v13352_v52 = vsel %vm13349_vm8, %v13342_v46, %v13344_v15 }
 0x434   : > { %13222 = vmatprep.subr.bf16.mxu0 %v13197_v63  ;;  %v14722_v29 = vpop.f32.mrf.mxu0  ;;  %v13368_v0 = vand.u32 %v13353_v34, %v15315_v18  ;;  %v13365_v63 = vand.u32 %v13352_v52, %v15315_v18 }
 0x435   : > { %v10372_v39 = vpop.f32.mrf.mxu1 }
 0x436   : > { %14171 = vmatmul.mubr.msk.bf16.vlgmr.msra.gmra.mxu1 %vm426_vm3, %v14170_v61  ;;  %v10411_v37 = vpop.f32.mrf.mxu0  ;;  %v14178_v39 = vld [vmem:[%s18543_s3 + $0x13c] sm:$0xf] }
 0x437   : > { %v10491_v35 = vpop.f32.mrf.mxu1  ;;  %14821 = vmatpush3.bf16.msra.mxu1 %v13041_v53  ;;  %14822 = vmatprep.mubr.msk.bf16.mxu1 %vm15055_vm4, %v15054_v30 }
 0x438   : > { %v10579_v47 = vadd.f32 %v10491_v35, %v10414_v48  ;;  %13263 = vmatprep.subr.bf16.mxu1 %v13203_v42  ;;  %v14723_v45 = vpop.f32.mrf.mxu0  ;;  %v13350_v48 = vsel %vm13349_vm8, %v13338_v20, %v13340_v5  ;;  %v13348_v5 = vpop.permute.xlu0 %13347 }
 0x439   : > { %v10493_v57 = vpop.f32.mrf.mxu1  ;;  %v13354_v14 = vsel %vm13349_vm8, %v13346_v50, %v13348_v5 }
 0x43a   : > { %v10580_v1 = vadd.f32 %v10493_v57, %v10415_v2  ;;  %14172 = vmatmul.mubr.msk.bf16.vlgmr.msra.gmra.mxu0 %vm426_vm3, %v14170_v61  ;;  %v10532_v28 = vpop.f32.mrf.mxu0  ;;  %v13359_v2 = vand.u32 %v13350_v48, %v15315_v18  ;;  %v13371_v11 = vand.u32 %v13354_v14, %v15315_v18 }
 0x43b   : > { %v10495_v22 = vpop.f32.mrf.mxu1  ;;  %13223 = vmatpush1.bf16.msra.mxu0 %v13194_v13  ;;  %13240 = vmatprep.mubr.bf16.mxu0 %v15041_v9  ;;  %v10581_v54 = vadd.f32 %v10532_v28, %v10416_v58 }
 0x43c   : > { %14826 = vmatprep.subr.bf16.mxu0 %v15054_v30  ;;  %v10534_v55 = vpop.f32.mrf.mxu0 }
 0x43d   : > { %v10496_v36 = vpop.f32.mrf.mxu1  ;;  %v10582_v24 = vadd.f32 %v10534_v55, %v10417_v60 }
 0x43e   : > { %14823 = vmatmul.mubr.msk.bf16.vlgmr.msra.gmra.mxu1 %vm426_vm3, %v14170_v61  ;;  %v10536_v56 = vpop.f32.mrf.mxu0 }
 0x43f   : > { %v10573_v41 = vpop.f32.mrf.mxu1  ;;  %13264 = vmatpush1.bf16.msra.mxu1 %v13200_v7  ;;  %13281 = vmatprep.mubr.bf16.mxu1 %v15041_v9 }
 0x440   : > { %v10583_v33 = vadd.f32 %v10573_v41, %v10418_v27  ;;  %13387 = vmatprep.subr.bf16.mxu1 %v13362_v43  ;;  %v10537_v44 = vpop.f32.mrf.mxu0 }
 0x441   : > { %v14728_v6 = vpop.f32.mrf.mxu1 }
 0x442   : > { %14175 = vmatmul.mubr.msk.bf16.vlgmr.msra.gmra.mxu0 %vm426_vm3, %v14174_v59  ;;  %v10629_v10 = vpop.f32.mrf.mxu0 }
 0x443   : > { %v10576_v26 = vpop.f32.mrf.mxu1  ;;  %14827 = vmatpush3.bf16.msra.mxu0 %v13206_v51  ;;  %14828 = vmatprep.mubr.msk.bf16.mxu0 %vm15055_vm4, %v15054_v30  ;;  %v10717_v4 = vadd.f32 %v10629_v10, %v10579_v47 }
 0x444   : > { %13428 = vmatprep.subr.bf16.mxu0 %v13368_v0  ;;  %v10631_v58 = vpop.f32.mrf.mxu0 }
 0x445   : > { %v14729_v12 = vpop.f32.mrf.mxu1  ;;  %v10718_v38 = vadd.f32 %v10631_v58, %v10580_v1 }
 0x446   : > { %14176 = vmatmul.mubr.msk.bf16.vlgmr.msra.gmra.mxu1 %vm426_vm3, %v14174_v59  ;;  %v10633_v17 = vpop.f32.mrf.mxu0 }
 0x447   : > { %v10670_v19 = vpop.f32.mrf.mxu1  ;;  %13388 = vmatpush1.bf16.msra.mxu1 %v13359_v2  ;;  %13405 = vmatprep.mubr.bf16.mxu1 %v15041_v9 }
 0x448   : > { %v10719_v60 = vadd.f32 %v10670_v19, %v10581_v54  ;;  %14832 = vmatprep.subr.bf16.mxu1 %v15054_v30  ;;  %v10634_v53 = vpop.f32.mrf.mxu0 }
 0x449   : > { %v10672_v49 = vpop.f32.mrf.mxu1 }
 0x44a   : > { %v10720_v32 = vadd.f32 %v10672_v49, %v10582_v24  ;;  %14829 = vmatmul.mubr.msk.bf16.vlgmr.msra.gmra.mxu0 %vm426_vm3, %v14174_v59  ;;  %v10711_v27 = vpop.f32.mrf.mxu0 }
 0x44b   : > { %v10674_v61 = vpop.f32.mrf.mxu1  ;;  %13429 = vmatpush1.bf16.msra.mxu0 %v13365_v63  ;;  %13446 = vmatprep.mubr.bf16.mxu0 %v15041_v9  ;;  %v10721_v42 = vadd.f32 %v10711_v27, %v10583_v33 }
 0x44c   : > { %13525 = vmatprep.subr.bf16.mxu0 %v16289_v16  ;;  %v14734_v29 = vpop.f32.mrf.mxu0  ;;  %v13503_v16 = vpop.permute.xlu1 %13502 }
 0x44d   : > { %v10675_v46 = vpop.f32.mrf.mxu1 }
 0x44e   : > { %14179 = vmatmul.mubr.msk.bf16.vlgmr.msra.gmra.mxu1 %vm426_vm3, %v14178_v39  ;;  %v10714_v35 = vpop.f32.mrf.mxu0 }
 0x44f   : > { %v10794_v20 = vpop.f32.mrf.mxu1  ;;  %14833 = vmatpush3.bf16.msra.mxu1 %v13371_v11  ;;  %14834 = vmatprep.mubr.msk.bf16.mxu1 %vm15055_vm4, %v15054_v30 }
 0x450   : > { %v10882_v13 = vadd.f32 %v10794_v20, %v10717_v4  ;;  %13566 = vmatprep.subr.bf16.mxu1 %v16302_v40  ;;  %v14735_v47 = vpop.f32.mrf.mxu0  ;;  %v13504_v40 = vsel %vm4868_vm6, %v16292_v23, %v13503_v16 }
 0x451   : > { %v10796_v37 = vpop.f32.mrf.mxu1  ;;  %v13509_v36 = vand.u32 %v13504_v40, %v15315_v18 }
 0x452   : > { %v10883_v57 = vadd.f32 %v10796_v37, %v10718_v38  ;;  %14180 = vmatmul.mubr.msk.bf16.vlgmr.msra.gmra.mxu0 %vm426_vm3, %v14178_v39  ;;  %v10835_v45 = vpop.f32.mrf.mxu0 }
 0x453   : > { %v10798_v31 = vpop.f32.mrf.mxu1  ;;  %13526 = vmatpush1.bf16.msra.mxu0 %v16271_v62  ;;  %13543 = vmatprep.mubr.bf16.mxu0 %v15041_v9  ;;  %v10884_v1 = vadd.f32 %v10835_v45, %v10719_v60  ;;  %v14182_v62 = vld [vmem:[%s18543_s3 + $0x140] sm:$0xf] }
 0x454   : > { %14838 = vmatprep.subr.bf16.mxu0 %v15054_v30  ;;  %v10837_v22 = vpop.f32.mrf.mxu0 }
 0x455   : > { %v10799_v25 = vpop.f32.mrf.mxu1  ;;  %v10885_v15 = vadd.f32 %v10837_v22, %v10720_v32 }
 0x456   : > { %14835 = vmatmul.mubr.msk.bf16.vlgmr.msra.gmra.mxu1 %vm426_vm3, %v14178_v39  ;;  %v10839_v28 = vpop.f32.mrf.mxu0 }
 0x457   : > { %v10876_v7 = vpop.f32.mrf.mxu1  ;;  %13567 = vmatpush1.bf16.msra.mxu1 %v16285_v21  ;;  %13584 = vmatprep.mubr.bf16.mxu1 %v15041_v9 }
 0x458   : > { %v10886_v50 = vadd.f32 %v10876_v7, %v10721_v42  ;;  %v10840_v8 = vpop.f32.mrf.mxu0 }
 0x459   : > { %v14740_v54 = vpop.f32.mrf.mxu1 }
 0x45a   : > { %14183 = vmatmul.mubr.msk.bf16.vlgmr.msra.gmra.mxu0 %vm426_vm3, %v14182_v62  ;;  %v10959_v23 = vpop.f32.mrf.mxu0 }
 0x45b   : > { %v10879_v43 = vpop.f32.mrf.mxu1  ;;  %14839 = vmatpush3.bf16.msra.mxu0 %v13509_v36  ;;  %14840 = vmatprep.mubr.msk.bf16.mxu0 %vm15055_vm4, %v15054_v30  ;;  %v11047_v55 = vadd.f32 %v10959_v23, %v10882_v13 }
 0x45c   : > { %v10961_v34 = vpop.f32.mrf.mxu0 }
 0x45d   : > { %v14741_v21 = vpop.f32.mrf.mxu1  ;;  %v11048_v24 = vadd.f32 %v10961_v34, %v10883_v57 }
 0x45e   : > { %14184 = vmatmul.mubr.msk.bf16.vlgmr.msra.gmra.mxu1 %vm426_vm3, %v14182_v62  ;;  %v10963_v9 = vpop.f32.mrf.mxu0 }
 0x45f   : > { %v11000_v41 = vpop.f32.mrf.mxu1 }
 0x460   : > { %v11049_v51 = vadd.f32 %v11000_v41, %v10884_v1  ;;  %v10964_v18 = vpop.f32.mrf.mxu0 }
 0x461   : > { %v11002_v56 = vpop.f32.mrf.mxu1 }
 0x462   : > { %v11050_v33 = vadd.f32 %v11002_v56, %v10885_v15  ;;  %14841 = vmatmul.mubr.msk.bf16.vlgmr.msra.gmra.mxu0 %vm426_vm3, %v14182_v62  ;;  %v11041_v48 = vpop.f32.mrf.mxu0 }
 0x463   : > { %v11004_v59 = vpop.f32.mrf.mxu1  ;;  %v11051_v6 = vadd.f32 %v11041_v48, %v10886_v50 }
 0x464   : > { %v14746_v44 = vpop.f32.mrf.mxu0 }
 0x465   : > { %v11005_v0 = vpop.f32.mrf.mxu1 }
 0x466   : > { %v11044_v26 = vpop.f32.mrf.mxu0 }
 0x467   : > { %v11124_v30 = vpop.f32.mrf.mxu1 }
 0x468   : > { %v11212_v2 = vadd.f32 %v11124_v30, %v11047_v55  ;;  %v14747_v4 = vpop.f32.mrf.mxu0 }
 0x469   : > { %v11126_v10 = vpop.f32.mrf.mxu1 }
 0x46a   : > { %v11213_v12 = vadd.f32 %v11126_v10, %v11048_v24  ;;  %v11165_v58 = vpop.f32.mrf.mxu0 }
 0x46b   : > { %v11128_v52 = vpop.f32.mrf.mxu1  ;;  %v11214_v5 = vadd.f32 %v11165_v58, %v11049_v51 }
 0x46c   : > { %v11167_v19 = vpop.f32.mrf.mxu0 }
 0x46d   : > { %v11129_v38 = vpop.f32.mrf.mxu1  ;;  %v11215_v63 = vadd.f32 %v11167_v19, %v11050_v33 }
 0x46e   : > { %v11169_v60 = vpop.f32.mrf.mxu0 }
 0x46f   : > { %v11206_v17 = vpop.f32.mrf.mxu1 }
 0x470   : > { %v11216_v49 = vadd.f32 %v11206_v17, %v11051_v6  ;;  %v11170_v53 = vpop.f32.mrf.mxu0 }
 0x471   : > { %v14752_v14 = vpop.f32.mrf.mxu1 }
 0x472   : > { %v11289_v61 = vpop.f32.mrf.mxu0 }
 0x473   : > { %v11209_v32 = vpop.f32.mrf.mxu1  ;;  %v11377_v11 = vadd.f32 %v11289_v61, %v11212_v2 }
 0x474   : > { %v11291_v39 = vpop.f32.mrf.mxu0 }
 0x475   : > { %v14753_v27 = vpop.f32.mrf.mxu1  ;;  %v11378_v42 = vadd.f32 %v11291_v39, %v11213_v12 }
 0x476   : > { %v11293_v29 = vpop.f32.mrf.mxu0 }
 0x477   : > { %v11330_v46 = vpop.f32.mrf.mxu1 }
 0x478   : > { %v11379_v20 = vadd.f32 %v11330_v46, %v11214_v5  ;;  %v11294_v13 = vpop.f32.mrf.mxu0 }
 0x479   : > { %v11332_v35 = vpop.f32.mrf.mxu1 }
 0x47a   : > { %v11380_v37 = vadd.f32 %v11332_v35, %v11215_v63  ;;  %v11371_v57 = vpop.f32.mrf.mxu0 }
 0x47b   : > { %v11334_v47 = vpop.f32.mrf.mxu1  ;;  %v11381_v31 = vadd.f32 %v11371_v57, %v11216_v49 }
 0x47c   : > { %v14758_v45 = vpop.f32.mrf.mxu0 }
 0x47d   : > { %v11335_v16 = vpop.f32.mrf.mxu1 }
 0x47e   : > { %v11374_v25 = vpop.f32.mrf.mxu0 }
 0x47f   : > { %v11454_v1 = vpop.f32.mrf.mxu1 }
 0x480   : > { %v11542_v22 = vadd.f32 %v11454_v1, %v11377_v11  ;;  %v14759_v15 = vpop.f32.mrf.mxu0 }
 0x481   : > { %v11456_v40 = vpop.f32.mrf.mxu1 }
 0x482   : > { %v11543_v7 = vadd.f32 %v11456_v40, %v11378_v42  ;;  %v11495_v50 = vpop.f32.mrf.mxu0 }
 0x483   : > { %v11458_v28 = vpop.f32.mrf.mxu1  ;;  %v11544_v62 = vadd.f32 %v11495_v50, %v11379_v20 }
 0x484   : > { %v11497_v36 = vpop.f32.mrf.mxu0 }
 0x485   : > { %v11459_v54 = vpop.f32.mrf.mxu1  ;;  %v11545_v8 = vadd.f32 %v11497_v36, %v11380_v37 }
 0x486   : > { %v11499_v23 = vpop.f32.mrf.mxu0 }
 0x487   : > { %v11536_v43 = vpop.f32.mrf.mxu1 }
 0x488   : > { %v11546_v55 = vadd.f32 %v11536_v43, %v11381_v31  ;;  %v11500_v34 = vpop.f32.mrf.mxu0 }
 0x489   : > { %v14764_v21 = vpop.f32.mrf.mxu1 }
 0x48a   : > { %v11619_v41 = vpop.f32.mrf.mxu0 }
 0x48b   : > { %v11539_v24 = vpop.f32.mrf.mxu1  ;;  %v11707_v9 = vadd.f32 %v11619_v41, %v11542_v22 }
 0x48c   : > { %v11621_v56 = vpop.f32.mrf.mxu0 }
 0x48d   : > { %v14765_v51 = vpop.f32.mrf.mxu1  ;;  %v11708_v18 = vadd.f32 %v11621_v56, %v11543_v7 }
 0x48e   : > { %v11623_v59 = vpop.f32.mrf.mxu0 }
 0x48f   : > { %v11660_v33 = vpop.f32.mrf.mxu1 }
 0x490   : > { %v11709_v48 = vadd.f32 %v11660_v33, %v11544_v62  ;;  %v11624_v0 = vpop.f32.mrf.mxu0 }
 0x491   : > { %v11662_v6 = vpop.f32.mrf.mxu1 }
 0x492   : > { %v11710_v44 = vadd.f32 %v11662_v6, %v11545_v8  ;;  %v11701_v26 = vpop.f32.mrf.mxu0 }
 0x493   : > { %v11664_v30 = vpop.f32.mrf.mxu1  ;;  %v11711_v2 = vadd.f32 %v11701_v26, %v11546_v55 }
 0x494   : > { %v14770_v4 = vpop.f32.mrf.mxu0 }
 0x495   : > { %v11665_v10 = vpop.f32.mrf.mxu1 }
 0x496   : > { %v11704_v52 = vpop.f32.mrf.mxu0 }
 0x497   : > { %v11784_v12 = vpop.f32.mrf.mxu1 }
 0x498   : > { %v11872_v58 = vadd.f32 %v11784_v12, %v11707_v9  ;;  %v14771_v38 = vpop.f32.mrf.mxu0 }
 0x499   : > { %v11786_v5 = vpop.f32.mrf.mxu1 }
 0x49a   : > { %v11873_v19 = vadd.f32 %v11786_v5, %v11708_v18  ;;  %v11825_v17 = vpop.f32.mrf.mxu0 }
 0x49b   : > { %v11788_v63 = vpop.f32.mrf.mxu1  ;;  %v11874_v60 = vadd.f32 %v11825_v17, %v11709_v48 }
 0x49c   : > { %v11827_v14 = vpop.f32.mrf.mxu0 }
 0x49d   : > { %v11789_v49 = vpop.f32.mrf.mxu1  ;;  %v11875_v53 = vadd.f32 %v11827_v14, %v11710_v44 }
 0x49e   : > { %v11829_v61 = vpop.f32.mrf.mxu0 }
 0x49f   : > { %v11866_v32 = vpop.f32.mrf.mxu1 }
 0x4a0   : > { %v11876_v11 = vadd.f32 %v11866_v32, %v11711_v2  ;;  %v11830_v39 = vpop.f32.mrf.mxu0 }
 0x4a1   : > { %v14776_v27 = vpop.f32.mrf.mxu1 }
 0x4a2   : > { %v11949_v46 = vpop.f32.mrf.mxu0 }
 0x4a3   : > { %v11869_v42 = vpop.f32.mrf.mxu1  ;;  %v12037_v29 = vadd.f32 %v11949_v46, %v11872_v58 }
 0x4a4   : > { %v11951_v35 = vpop.f32.mrf.mxu0 }
 0x4a5   : > { %v14777_v20 = vpop.f32.mrf.mxu1  ;;  %v12038_v13 = vadd.f32 %v11951_v35, %v11873_v19 }
 0x4a6   : > { %v11953_v47 = vpop.f32.mrf.mxu0 }
 0x4a7   : > { %v11990_v37 = vpop.f32.mrf.mxu1 }
 0x4a8   : > { %v12039_v57 = vadd.f32 %v11990_v37, %v11874_v60  ;;  %v11954_v16 = vpop.f32.mrf.mxu0 }
 0x4a9   : > { %v11992_v31 = vpop.f32.mrf.mxu1 }
 0x4aa   : > { %v12040_v45 = vadd.f32 %v11992_v31, %v11875_v53  ;;  %v12031_v25 = vpop.f32.mrf.mxu0 }
 0x4ab   : > { %v11994_v1 = vpop.f32.mrf.mxu1  ;;  %v12041_v22 = vadd.f32 %v12031_v25, %v11876_v11 }
 0x4ac   : > { %v14782_v15 = vpop.f32.mrf.mxu0 }
 0x4ad   : > { %v11995_v40 = vpop.f32.mrf.mxu1 }
 0x4ae   : > { %v12034_v28 = vpop.f32.mrf.mxu0 }
 0x4af   : > { %v12087_v7 = vpop.f32.mrf.mxu1 }
 0x4b0   : > { %v12175_v50 = vadd.f32 %v12087_v7, %v12037_v29  ;;  %v14783_v54 = vpop.f32.mrf.mxu0 }
 0x4b1   : > { %v12089_v62 = vpop.f32.mrf.mxu1 }
 0x4b2   : > { %v12176_v36 = vadd.f32 %v12089_v62, %v12038_v13  ;;  %v12128_v43 = vpop.f32.mrf.mxu0 }
 0x4b3   : > { %v12091_v8 = vpop.f32.mrf.mxu1  ;;  %v12177_v23 = vadd.f32 %v12128_v43, %v12039_v57 }
 0x4b4   : > { %v12130_v21 = vpop.f32.mrf.mxu0 }
 0x4b5   : > { %v12092_v55 = vpop.f32.mrf.mxu1  ;;  %v12178_v34 = vadd.f32 %v12130_v21, %v12040_v45 }
 0x4b6   : > { %v12132_v41 = vpop.f32.mrf.mxu0 }
 0x4b7   : > { %v12169_v24 = vpop.f32.mrf.mxu1 }
 0x4b8   : > { %v12179_v9 = vadd.f32 %v12169_v24, %v12041_v22  ;;  %v12133_v56 = vpop.f32.mrf.mxu0 }
 0x4b9   : > { %v14788_v51 = vpop.f32.mrf.mxu1 }
 0x4ba   : > { %v12252_v33 = vpop.f32.mrf.mxu0 }
 0x4bb   : > { %v12172_v18 = vpop.f32.mrf.mxu1  ;;  %v12340_v59 = vadd.f32 %v12252_v33, %v12175_v50 }
 0x4bc   : > { %v12254_v6 = vpop.f32.mrf.mxu0 }
 0x4bd   : > { %v14789_v48 = vpop.f32.mrf.mxu1  ;;  %v12341_v0 = vadd.f32 %v12254_v6, %v12176_v36 }
 0x4be   : > { %v12256_v30 = vpop.f32.mrf.mxu0 }
 0x4bf   : > { %v12293_v44 = vpop.f32.mrf.mxu1 }
 0x4c0   : > { %v12342_v26 = vadd.f32 %v12293_v44, %v12177_v23  ;;  %v12257_v10 = vpop.f32.mrf.mxu0 }
 0x4c1   : > { %v12295_v2 = vpop.f32.mrf.mxu1 }
 0x4c2   : > { %v12343_v4 = vadd.f32 %v12295_v2, %v12178_v34  ;;  %v12334_v52 = vpop.f32.mrf.mxu0 }
 0x4c3   : > { %v12297_v12 = vpop.f32.mrf.mxu1  ;;  %v12344_v58 = vadd.f32 %v12334_v52, %v12179_v9 }
 0x4c4   : > { %v14794_v38 = vpop.f32.mrf.mxu0 }
 0x4c5   : > { %v12298_v5 = vpop.f32.mrf.mxu1 }
 0x4c6   : > { %v12337_v63 = vpop.f32.mrf.mxu0 }
 0x4c7   : > { %v12417_v19 = vpop.f32.mrf.mxu1 }
 0x4c8   : > { %v18439_v17 = vadd.f32 %v12417_v19, %v12340_v59  ;;  %v14795_v49 = vpop.f32.mrf.mxu0 }
 0x4c9   : > { %v12419_v60 = vpop.f32.mrf.mxu1 }
 0x4ca   : > { %v18441_v14 = vadd.f32 %v12419_v60, %v12341_v0  ;;  %v12458_v32 = vpop.f32.mrf.mxu0 }
 0x4cb   : > { %v12421_v53 = vpop.f32.mrf.mxu1  ;;  %v18443_v61 = vadd.f32 %v12458_v32, %v12342_v26 }
 0x4cc   : > { %v12460_v27 = vpop.f32.mrf.mxu0 }
 0x4cd   : > { %v12422_v11 = vpop.f32.mrf.mxu1  ;;  %v18445_v39 = vadd.f32 %v12460_v27, %v12343_v4 }
 0x4ce   : > { %v12462_v46 = vpop.f32.mrf.mxu0 }
 0x4cf   : > { %v12499_v42 = vpop.f32.mrf.mxu1 }
 0x4d0   : > { %v18447_v29 = vadd.f32 %v12499_v42, %v12344_v58  ;;  %v12463_v35 = vpop.f32.mrf.mxu0 }
 0x4d1   : > { %v14800_v20 = vpop.f32.mrf.mxu1 }
 0x4d2   : > { %v12582_v37 = vpop.f32.mrf.mxu0 }
 0x4d3   : > { %v12502_v13 = vpop.f32.mrf.mxu1 }
 0x4d4   : > { %v18449_v57 = vpop.f32.mrf.mxu0 }
 0x4d5   : > { %v14801_v47 = vpop.f32.mrf.mxu1 }
 0x4d6   : > { %v12586_v16 = vpop.f32.mrf.mxu0 }
 0x4d7   : > { %v18451_v31 = vpop.f32.mrf.mxu1 }
 0x4d8   : > { %v12587_v1 = vpop.f32.mrf.mxu0 }
 0x4d9   : > { %v18453_v45 = vpop.f32.mrf.mxu1 }
 0x4da   : > { %v18455_v22 = vpop.f32.mrf.mxu0 }
 0x4db   : > { %v12627_v25 = vpop.f32.mrf.mxu1 }
 0x4dc   : > { %v14806_v15 = vpop.f32.mrf.mxu0  ;;  %v12670_v25 = vadd.f32 %v12582_v37, %v18439_v17  ;;  %v12673_v37 = vadd.f32 %v18453_v45, %v18445_v39 }
 0x4dd   : > { %v12628_v40 = vpop.f32.mrf.mxu1 }
 0x4de   : > { %v12667_v28 = vpop.f32.mrf.mxu0 }
 0x4df   : > { %v12747_v7 = vpop.f32.mrf.mxu1  ;;  %v12671_v28 = vadd.f32 %v18449_v57, %v18441_v14  ;;  %v18482_v57 = vsub.s32 0, %v15207_v3 }
 0x4e0   : > { %v14807_v62 = vpop.f32.mrf.mxu0 }
 0x4e1   : > { %v12749_v50 = vpop.f32.mrf.mxu1  ;;  %v12835_v62 = vadd.f32 %v12747_v7, %v12670_v25 }
 0x4e2   : > { %v12788_v36 = vpop.f32.mrf.mxu0 }
 0x4e3   : > { %v12751_v54 = vpop.f32.mrf.mxu1 }
 0x4e4   : > { %v18457_v43 = vpop.f32.mrf.mxu0 }
 0x4e5   : > { %v12752_v8 = vpop.f32.mrf.mxu1 }
 0x4e6   : > { %v12792_v55 = vpop.f32.mrf.mxu0  ;;  %v12672_v8 = vadd.f32 %v18451_v31, %v18443_v61  ;;  %v12838_v61 = vadd.f32 %v18457_v43, %v12673_v37 }
 0x4e7   : > { %v18459_v23 = vpop.f32.mrf.mxu1 }
 0x4e8   : > { %v12793_v34 = vpop.f32.mrf.mxu0 }
 0x4e9   : > { %v14812_v21 = vpop.f32.mrf.mxu1  ;;  %v12836_v34 = vadd.f32 %v12749_v50, %v12671_v28  ;;  %v12674_v50 = vadd.f32 %v18455_v22, %v18447_v29  ;;  %v13642_v22 = vpop.permute.xlu0 %13641 }
 0x4ea   : > { %v12912_v41 = vpop.f32.mrf.mxu0  ;;  %v18476_v21 = vld [vmem:[%s355_s10] sm:$0x1f] }
 0x4eb   : > { %v12832_v24 = vpop.f32.mrf.mxu1  ;;  %v13665_v14 = vunpack.c.l.bf16 %v18476_v21 }
 0x4ec   : > { %v12914_v51 = vpop.f32.mrf.mxu0  ;;  %v13000_v24 = vadd.f32 %v12912_v41, %v12835_v62 }
 0x4ed   : > { %v14813_v9 = vpop.f32.mrf.mxu1 }
 0x4ee   : > { %v12916_v18 = vpop.f32.mrf.mxu0  ;;  %v12837_v9 = vadd.f32 %v12788_v36, %v12672_v8 }
 0x4ef   : > { %v12953_v56 = vpop.f32.mrf.mxu1 }
 0x4f0   : > { %v12917_v59 = vpop.f32.mrf.mxu0  ;;  %v13002_v31 = vadd.f32 %v12953_v56, %v12837_v9  ;;  %v13672_v56 = vrot.slane %v13665_v14, %v18482_v57 }
 0x4f1   : > { %v12955_v33 = vpop.f32.mrf.mxu1  ;;  %v13001_v59 = vadd.f32 %v12914_v51, %v12836_v34 }
 0x4f2   : > { %v18461_v6 = vpop.f32.mrf.mxu0  ;;  %v13003_v45 = vadd.f32 %v12955_v33, %v12838_v61 }
 0x4f3   : > { %v12957_v48 = vpop.f32.mrf.mxu1 }
 0x4f4   : > { %v14818_v44 = vpop.f32.mrf.mxu0 }
 0x4f5   : > { %v12958_v0 = vpop.f32.mrf.mxu1 }
 0x4f6   : > { %v12997_v26 = vpop.f32.mrf.mxu0 }
 0x4f7   : > { %v13077_v30 = vpop.f32.mrf.mxu1  ;;  %v13679_v26 = vsub.s32 4, %v15207_v3 }
 0x4f8   : > { %v14819_v10 = vpop.f32.mrf.mxu0  ;;  %v13165_v48 = vadd.f32 %v13077_v30, %v13000_v24  ;;  %v13675_v30 = vsub.s32 2, %v15207_v3 }
 0x4f9   : > { %v13079_v2 = vpop.f32.mrf.mxu1  ;;  %v12839_v10 = vadd.f32 %v18459_v23, %v12674_v50 }
 0x4fa   : > { %v13118_v12 = vpop.f32.mrf.mxu0  ;;  %v13166_v41 = vadd.f32 %v13079_v2, %v13001_v59  ;;  %v13683_v2 = vsub.s32 6, %v15207_v3 }
 0x4fb   : > { %v13081_v4 = vpop.f32.mrf.mxu1  ;;  %v13167_v36 = vadd.f32 %v13118_v12, %v13002_v31  ;;  %v13004_v33 = vadd.f32 %v18461_v6, %v12839_v10 }
 0x4fc   : > { %v13120_v58 = vpop.f32.mrf.mxu0  ;;  %v13684_v6 = vrot.slane %v13665_v14, %v13683_v2 }
 0x4fd   : > { %v13082_v52 = vpop.f32.mrf.mxu1 }
 0x4fe   : > { %v13122_v38 = vpop.f32.mrf.mxu0 }
 0x4ff   : > { %v18463_v5 = vpop.f32.mrf.mxu1  ;;  %v13168_v38 = vadd.f32 %v13120_v58, %v13003_v45  ;;  %v13697_v58 = vrot.slane %v13672_v56, %v18482_v57 }
 0x500   : > { %v13123_v63 = vpop.f32.mrf.mxu0 }
 0x501   : > { %v14824_v19 = vpop.f32.mrf.mxu1 }
 0x502   : > { %v13242_v49 = vpop.f32.mrf.mxu0 }
 0x503   : > { %v13162_v60 = vpop.f32.mrf.mxu1  ;;  %v13330_v44 = vadd.f32 %v13242_v49, %v13165_v48  ;;  %v13709_v48 = vrot.slane %v13684_v6, %v18482_v57 }
 0x504   : > { %v13244_v32 = vpop.f32.mrf.mxu0 }
 0x505   : > { %v14825_v53 = vpop.f32.mrf.mxu1  ;;  %v13331_v4 = vadd.f32 %v13244_v32, %v13166_v41  ;;  %v13676_v32 = vrot.slane %v13665_v14, %v13675_v30 }
 0x506   : > { %v13246_v27 = vpop.f32.mrf.mxu0 }
 0x507   : > { %v13283_v11 = vpop.f32.mrf.mxu1  ;;  %v13680_v27 = vrot.slane %v13665_v14, %v13679_v26 }
 0x508   : > { %v13247_v46 = vpop.f32.mrf.mxu0  ;;  %v13332_v19 = vadd.f32 %v13283_v11, %v13167_v36 }
 0x509   : > { %v13285_v42 = vpop.f32.mrf.mxu1  ;;  %v13169_v46 = vadd.f32 %v18463_v5, %v13004_v33  ;;  %v13701_v5 = vrot.slane %v13676_v32, %v18482_v57  ;;  %v13705_v62 = vrot.slane %v13680_v27, %v18482_v57 }
 0x50a   : > { %v18465_v35 = vpop.f32.mrf.mxu0  ;;  %v13333_v49 = vadd.f32 %v13285_v42, %v13168_v38 }
 0x50b   : > { %v13287_v20 = vpop.f32.mrf.mxu1  ;;  %v13334_v42 = vadd.f32 %v18465_v35, %v13169_v46 }
 0x50c   : > { %v14830_v47 = vpop.f32.mrf.mxu0 }
 0x50d   : > { %v13288_v13 = vpop.f32.mrf.mxu1 }
 0x50e   : > { %v13327_v1 = vpop.f32.mrf.mxu0 }
 0x50f   : > { %v13407_v16 = vpop.f32.mrf.mxu1  ;;  %v13666_v1 = vunpack.c.h.bf16 %v18476_v21 }
 0x510   : > { %v14831_v15 = vpop.f32.mrf.mxu0  ;;  %v13495_v52 = vadd.f32 %v13407_v16, %v13330_v44 }
 0x511   : > { %v13409_v40 = vpop.f32.mrf.mxu1  ;;  %v13688_v9 = vrot.slane %v13666_v1, %v18482_v57 }
 0x512   : > { %v13448_v55 = vpop.f32.mrf.mxu0  ;;  %v13496_v12 = vadd.f32 %v13409_v40, %v13331_v4 }
 0x513   : > { %v13411_v54 = vpop.f32.mrf.mxu1  ;;  %v13497_v53 = vadd.f32 %v13448_v55, %v13332_v19  ;;  %v13713_v45 = vrot.slane %v13688_v9, %v18482_v57 }
 0x514   : > { %v13450_v18 = vpop.f32.mrf.mxu0 }
 0x515   : > { %v13412_v17 = vpop.f32.mrf.mxu1  ;;  %v13498_v47 = vadd.f32 %v13450_v18, %v13333_v49 }
 0x516   : > { %v13452_v7 = vpop.f32.mrf.mxu0 }
 0x517   : > { %v13489_v0 = vpop.f32.mrf.mxu1 }
 0x518   : > { %v13453_v51 = vpop.f32.mrf.mxu0  ;;  %v13499_v55 = vadd.f32 %v13489_v0, %v13334_v42 }
 0x519   : > { %v14836_v39 = vpop.f32.mrf.mxu1 }
 0x51a   : > { %v13545_v29 = vpop.f32.mrf.mxu0 }
 0x51b   : > { %v13492_v43 = vpop.f32.mrf.mxu1  ;;  %v13633_v63 = vadd.f32 %v13545_v29, %v13495_v52 }
 0x51c   : > { %v13547_v23 = vpop.f32.mrf.mxu0 }
 0x51d   : > { %v14837_v60 = vpop.f32.mrf.mxu1  ;;  %v13644_v11 = vadd.f32 %v13642_v22, %v13633_v63  ;;  %v13634_v20 = vadd.f32 %v13547_v23, %v13496_v12 }
 0x51e   : > { %v13549_v3 = vpop.f32.mrf.mxu0 }
 0x51f   : > { %v13586_v13 = vpop.f32.mrf.mxu1  ;;  %vm13649_vm3 = vcmp.ge.f32.partialorder %v13644_v11, 0.0  ;;  %v13654_v25 = vmul.f32 0.25, %v13644_v11  ;;  %v13645_v40 = vadd.f32 %v13642_v22, %v13634_v20 }
 0x520   : > { %v13635_v16 = vadd.f32 %v13586_v13, %v13497_v53  ;;  %v13550_v54 = vpop.f32.mrf.mxu0 }
 0x521   : > { %v13588_v15 = vpop.f32.mrf.mxu1  ;;  %v13659_v34 = vsel %vm13649_vm3, %v13644_v11, %v13654_v25  ;;  %vm13650_vm4 = vcmp.ge.f32.partialorder %v13645_v40, 0.0  ;;  %v13655_v24 = vmul.f32 0.25, %v13645_v40 }
 0x522   : > { %v13646_v28 = vadd.f32 %v13642_v22, %v13635_v16  ;;  %v13636_v8 = vadd.f32 %v13588_v15, %v13498_v47  ;;  %v13627_v37 = vpop.f32.mrf.mxu0  ;;  %v13714_v18 = vmul.f32 %v13697_v58, %v13659_v34 }
 0x523   : > { %v13590_v21 = vpop.f32.mrf.mxu1  ;;  %v13660_v59 = vsel %vm13650_vm4, %v13645_v40, %v13655_v24  ;;  %v13637_v14 = vadd.f32 %v13627_v37, %v13499_v55 }
 0x524   : > { %vm13651_vm6 = vcmp.ge.f32.partialorder %v13646_v28, 0.0  ;;  %v13656_v35 = vmul.f32 0.25, %v13646_v28  ;;  %v13647_v17 = vadd.f32 %v13642_v22, %v13636_v8  ;;  %v13715_v31 = vmul.f32 %v13701_v5, %v13660_v59  ;;  %v14842_v50 = vpop.f32.mrf.mxu0 }
 0x525   : > { %v13591_v61 = vpop.f32.mrf.mxu1  ;;  %v13648_v41 = vadd.f32 %v13642_v22, %v13637_v14 }
 0x526   : > { %v13661_v0 = vsel %vm13651_vm6, %v13646_v28, %v13656_v35  ;;  %vm13652_vm10 = vcmp.ge.f32.partialorder %v13647_v17, 0.0  ;;  %v13657_v7 = vmul.f32 0.25, %v13647_v17  ;;  %v14192_v44 = vpack.c.bf16 %v13715_v31, %v13714_v18  ;;  %v13630_v36 = vpop.f32.mrf.mxu0 }
 0x527   : > { %v13716_v51 = vmul.f32 %v13705_v62, %v13661_v0  ;;  %vm13653_vm11 = vcmp.ge.f32.partialorder %v13648_v41, 0.0  ;;  %v13658_v26 = vmul.f32 0.25, %v13648_v41 }
 0x528   : > { %v13662_v39 = vsel %vm13652_vm10, %v13647_v17, %v13657_v7  ;;  %v14843_v10 = vpop.f32.mrf.mxu0  ;;  %13740 = vst [vmem:[%s321_s12] sm:$0xff] %v14192_v44 }
 0x529   : > { %v13717_v30 = vmul.f32 %v13709_v48, %v13662_v39  ;;  %v13663_v52 = vsel %vm13653_vm11, %v13648_v41, %v13658_v26 }
 0x52a   : > { %v13718_v43 = vmul.f32 %v13713_v45, %v13663_v52 }
 0x52b   : > { %v14193_v4 = vpack.c.bf16 %v13717_v30, %v13716_v51 }
 0x52c   : > { %v14194_v56 = vpack.c.bf16 %v13718_v43, %v13718_v43 }
 0x52d   : > { %13741 = vst [vmem:[%s321_s12 + $0x8] sm:$0xff] %v14193_v4 }
 0x52e   : > { %13742 = vst [vmem:[%s321_s12 + $0x10] sm:$0xf] %v14194_v56 }
 0x52f   : > { %14991 = shalt.err (!%p14988_p9)
}
 0x530   : > { %s14992_s29 = scalar_lea.hbm %s13756_s16, 320  ;;  %s14996_s9 = scalar_lea.hbm %s18546_s6, 1280 }
 0x531   : > { %p14993_p10 = scmp.ne.s32.totalorder %s13756_s16, %s14992_s29  ;;  %p14997_p13 = scmp.lt.s32.totalorder %s13756_s16, %s18546_s6 }
 0x532   : > { %p14998_p0 = scmp.lt.s32.totalorder %s14996_s9, %s14992_s29 }
 0x533   : > { %p14994_p11 = pnand %p14993_p10, %p15195_p5 }
 0x534   : > { %p14999_p1 = por %p14998_p0, %p14997_p13 }
 0x535   : > { %p14995_p12 = pneg %p14994_p11 }
 0x537   : > { %p15000_p2 = pnand %p14999_p1, %p14995_p12 }
 0x539   : > { %15003 = shalt.err (!%p15000_p2)
}
 0x53a   : > { %14845 = dma.vmem_to_hbm [thread:$0]  (%p15195_p5), %s13759_s14, 320, %s13756_s16, %s13744_s26  }
 0x53b PF: > { %p14851_p3 = scmp.ge.s32.totalorder %s15038_s24, 2  ;;  %s13770_s13 = sand.u32 1, %s15026_s21  }
 0x53c   : > { %s13771_s20 = scalar_lea.sflag [#allocation3], %s13770_s13 }
 0x53d   : > { %p14848_p4 = pnand %p14851_p3, %p15199_p6 }
 0x53f   : > { %p14849_p7 = pneg %p14848_p4 }
 0x541   : > { %15021 = dma.done.wait (%p14849_p7), %s13771_s20, 320  }
 0x542   : > { %15023 = vsyncadd (%p14849_p7), %s13771_s20, 4294966976  ;;  %p16_p8 = scmp.ge.s32.totalorder %s15182_s27, 6   ;;  %s18551_s21 = smov %s15030_s22 }
 0x543   : > { %s18552_s22 = smov %s15034_s23  ;;  %s18553_s23 = smov %s15193_s30 }
 0x544   : > { %s18554_s24 = smov %s15182_s27  ;;  %18 = sbr.rel (!%p16_p8) target bundleno = 3 (0x3), region = 168 }
 0x549   :  { %13776 = vsyncpa [#allocation3], 1 }
 0x54a   :  { %13778 = vsyncpa [#allocation3 + $0x1], 1 }

</bundles_post_ra>
